<compile_context>
chip_gen: v5e
topology: v5e:2x2
jax: 0.10.0
libtpu: 0.0.40
codegen_flags: <defaults>
</compile_context>

<pallas_src>
import jax
import jax.numpy as jnp
from jax import lax
from jax.experimental import pallas as pl
from jax.experimental.pallas import tpu as pltpu

LRELU_SLOPE = 0.01   # InPlaceABNSync default activation: leaky_relu, slope=0.01
BN_EPS = 1e-5


# ----------------------------- Pallas kernels -----------------------------

def _bilinear_resize_kernel(ah_ref, aw_ref, x_ref, o_ref):
    """Separable bilinear resize for one batch / one output-row block (NCHW layout).

    ah_ref: (th_r, H1) f32     rows of the H-interp matrix for this block
    aw_ref: (w,  W1)  f32      full W-interp matrix
    x_ref : (1, C1, H1, W1) f32
    o_ref : (1, C1, th_r, w)   bf16
    """
    c1 = x_ref.shape[1]
    th_r, h1 = ah_ref.shape
    w_out, w1 = aw_ref.shape
    x = x_ref[0]                                                   # (C1, H1, W1)
    aw_b = jnp.broadcast_to(aw_ref[...][None], (c1, w_out, w1))     # (C1, w, W1)
    ah_b = jnp.broadcast_to(ah_ref[...][None], (c1, th_r, h1))      # (C1, th_r, H1)
    # s1[c, H, j] = sum_W x[c, H, W] * a_w[j, W]
    s1 = lax.dot_general(x, aw_b, (((2,), (2,)), ((0,), (0,))),
                         preferred_element_type=jnp.float32)        # (C1, H1, w)
    # out[c, t, j] = sum_H a_h[t, H] * s1[c, H, j]
    out = lax.dot_general(ah_b, s1, (((2,), (1,)), ((0,), (0,))),
                          preferred_element_type=jnp.float32)       # (C1, th_r, w)
    o_ref[0] = out.astype(o_ref.dtype)


def _accum_conv3x3_taps(x_main, x_halo, w9_ref, acc_ref):
    """Accumulate the 9 taps of a 3x3 conv for one row block into a f32 VMEM scratch.

    x_main: (th, w+2, C) bf16   main rows of the zero-padded input
    x_halo: (2,  w+2, C) bf16   2 halo rows below the block
    w9_ref: (9, C, Cout) bf16 ref (tap-major, dy*3+dx)
    acc_ref: (th*w, Cout) f32 VMEM scratch
    """
    th = x_main.shape[0]
    w_out = x_main.shape[1] - 2
    cin = x_main.shape[2]
    x_full = jnp.concatenate([x_main, x_halo], axis=0)              # (th+2, w+2, C)
    for dx in range(3):                                             # 3 sublane shifts only
        xs = x_full[:, dx:dx + w_out, :]                            # (th+2, w, C)
        xs = xs.reshape((th + 2) * w_out, cin)                      # lane dim preserved
        for dy in range(3):                                         # free row slices
            patch = xs[dy * w_out:(dy + th) * w_out, :]             # (th*w, C)
            acc_ref[...] += jnp.dot(patch, w9_ref[dy * 3 + dx],
                                    preferred_element_type=jnp.float32)


def _epilogue(acc, scale_ref, shift_ref, o_ref):
    # folded BN(+bias) scale/shift and leaky ReLU, in f32.
    y = acc * scale_ref[...] + shift_ref[...]
    y = jnp.where(y >= 0, y, LRELU_SLOPE * y)
    _, th, w_out, cout = o_ref.shape
    o_ref[0] = y.reshape(th, w_out, cout).astype(o_ref.dtype)


def _conv3x3_bn_lrelu_kernel(xa_ref, xh_ref, w9_ref, scale_ref, shift_ref,
                             o_ref, acc_ref):
    acc_ref[...] = jnp.zeros_like(acc_ref)
    _accum_conv3x3_taps(xa_ref[0], xh_ref[0], w9_ref, acc_ref)
    _epilogue(acc_ref[...], scale_ref, shift_ref, o_ref)


def _conv3x3_bn_lrelu_two_input_kernel(xa_ref, xh_ref, ya_ref, yh_ref,
                                       wx_ref, wy_ref, scale_ref, shift_ref,
                                       o_ref, acc_ref):
    # conv of cat([x, y], channel) with the concat fused via weight split.
    acc_ref[...] = jnp.zeros_like(acc_ref)
    _accum_conv3x3_taps(xa_ref[0], xh_ref[0], wx_ref, acc_ref)
    _accum_conv3x3_taps(ya_ref[0], yh_ref[0], wy_ref, acc_ref)
    _epilogue(acc_ref[...], scale_ref, shift_ref, o_ref)


# ------------------------------- JAX glue ---------------------------------

def _bilinear_matrix(out_size, in_size):
    """1-D bilinear interpolation matrix with align_corners=True."""
    if out_size == 1:
        src = jnp.zeros((1,), jnp.float32)
    else:
        src = jnp.arange(out_size, dtype=jnp.float32) * (
            float(in_size - 1) / float(out_size - 1))
    i0 = jnp.clip(jnp.floor(src).astype(jnp.int32), 0, in_size - 1)
    i1 = jnp.clip(i0 + 1, 0, in_size - 1)
    f = src - i0.astype(jnp.float32)
    rows = jnp.arange(out_size)
    m = jnp.zeros((out_size, in_size), jnp.float32)
    m = m.at[rows, i0].add(1.0 - f)
    m = m.at[rows, i1].add(f)
    return m


def _pick_conv_row_tile(h):
    # Even divisor of h (needed so the 2-row halo block is block-aligned), <= ~16 rows,
    # preferring >1 row blocks so the grid has several parallel steps.
    assert h % 2 == 0, "TODO(synk): odd output heights need a different halo scheme"
    cap = max(2, min(16, h // 2))
    th = 2
    for d in range(2, cap + 1, 2):
        if h % d == 0:
            th = d
    return th


def _pick_resize_row_tile(h):
    # Second-to-last dim of the NCHW resize output block: multiple of 8 or the full h.
    cap = min(32, h // 2) if h >= 16 else h
    th = None
    for d in range(8, cap + 1, 8):
        if h % d == 0:
            th = d
    return th if th is not None else h


def init_params(key, in_ch, out_ch):
    ks = jax.random.split(key, 12)
    p = {}
    # conv1: 3x3, in_ch -> out_ch, bias=True, stored HWIO
    p['w1'] = 0.1 * jax.random.normal(ks[0], (3, 3, in_ch, out_ch), jnp.float32)
    p['b1'] = 0.1 * jax.random.normal(ks[1], (out_ch,), jnp.float32)
    p['bn1_gamma'] = 1.0 + 0.1 * jax.random.normal(ks[2], (out_ch,), jnp.float32)
    p['bn1_beta'] = 0.1 * jax.random.normal(ks[3], (out_ch,), jnp.float32)
    p['bn1_mean'] = 0.1 * jax.random.normal(ks[4], (out_ch,), jnp.float32)
    p['bn1_var'] = jnp.abs(1.0 + 0.1 * jax.random.normal(ks[5], (out_ch,), jnp.float32))
    # conv2: 3x3, out_ch -> out_ch, bias=True, stored HWIO
    p['w2'] = 0.1 * jax.random.normal(ks[6], (3, 3, out_ch, out_ch), jnp.float32)
    p['b2'] = 0.1 * jax.random.normal(ks[7], (out_ch,), jnp.float32)
    p['bn2_gamma'] = 1.0 + 0.1 * jax.random.normal(ks[8], (out_ch,), jnp.float32)
    p['bn2_beta'] = 0.1 * jax.random.normal(ks[9], (out_ch,), jnp.float32)
    p['bn2_mean'] = 0.1 * jax.random.normal(ks[10], (out_ch,), jnp.float32)
    p['bn2_var'] = jnp.abs(1.0 + 0.1 * jax.random.normal(ks[11], (out_ch,), jnp.float32))
    return p


def _fold_bn(gamma, beta, mean, var, bias, cout):
    inv = 1.0 / jnp.sqrt(var + BN_EPS)
    scale = (gamma * inv).reshape(1, cout).astype(jnp.float32)
    shift = (beta + (bias - mean) * gamma * inv).reshape(1, cout).astype(jnp.float32)
    return scale, shift


def up_forward(x1_nchw, x2_nchw, params):
    N, C1, H1, W1 = x1_nchw.shape
    _, C2, h, w = x2_nchw.shape
    Cin, Cout = params['w1'].shape[2], params['w1'].shape[3]
    assert Cin == C1 + C2, (Cin, C1, C2)

    cdt = jnp.bfloat16          # matmul input dtype (f32 accumulation everywhere)
    parallel2 = pltpu.CompilerParams(dimension_semantics=("parallel", "parallel"))

    scale1, shift1 = _fold_bn(params['bn1_gamma'], params['bn1_beta'],
                              params['bn1_mean'], params['bn1_var'], params['b1'], Cout)
    scale2, shift2 = _fold_bn(params['bn2_gamma'], params['bn2_beta'],
                              params['bn2_mean'], params['bn2_var'], params['b2'], Cout)

    # ---- stage 1: separable bilinear upsample of x1 (align_corners=True) ----
    a_h = _bilinear_matrix(h, H1)                 # (h, H1)
    a_w = _bilinear_matrix(w, W1)                 # (w, W1)
    th_r = _pick_resize_row_tile(h)
    nb_r = h // th_r
    x1_up_nchw = pl.pallas_call(
        _bilinear_resize_kernel,
        out_shape=jax.ShapeDtypeStruct((N, C1, h, w), cdt),
        grid=(N, nb_r),
        in_specs=[pl.BlockSpec((th_r, H1), lambda n, r: (r, 0)),
                  pl.BlockSpec((w, W1), lambda n, r: (0, 0)),
                  pl.BlockSpec((1, C1, H1, W1), lambda n, r: (n, 0, 0, 0))],
        out_specs=pl.BlockSpec((1, C1, th_r, w), lambda n, r: (n, 0, r, 0)),
        compiler_params=parallel2,
    )(a_h, a_w, x1_nchw.astype(jnp.float32))

    # NCHW -> NHWC + 1-pixel zero pad (layout glue; XLA fuses transpose+pad).
    x1_up_p = jnp.pad(jnp.transpose(x1_up_nchw, (0, 2, 3, 1)),
                      ((0, 0), (1, 1), (1, 1), (0, 0)))
    x2_p = jnp.pad(jnp.transpose(x2_nchw, (0, 2, 3, 1)).astype(cdt),
                   ((0, 0), (1, 1), (1, 1), (0, 0)))

    th = _pick_conv_row_tile(h)
    nb = h // th

    def idx_main(n, r):
        return (n, r, 0, 0)

    def idx_halo(n, r):
        # 2-row halo below the block: element offset (r+1)*th  (block height 2).
        return (n, (r + 1) * (th // 2), 0, 0)

    idx_w3 = lambda n, r: (0, 0, 0)
    idx_vec = lambda n, r: (0, 0)

    # ---- stage 2: conv1 on cat([x2, x1_up]) with the concat fused (weight split) ----
    w1_9 = params['w1'].reshape(9, Cin, Cout).astype(cdt)
    w1a = w1_9[:, :C2, :]        # multiplies x2 channels (concat puts x2 first)
    w1b = w1_9[:, C2:, :]        # multiplies upsampled x1 channels
    y1 = pl.pallas_call(
        _conv3x3_bn_lrelu_two_input_kernel,
        out_shape=jax.ShapeDtypeStruct((N, h, w, Cout), cdt),
        grid=(N, nb),
        in_specs=[pl.BlockSpec((1, th, w + 2, C2), idx_main),
                  pl.BlockSpec((1, 2, w + 2, C2), idx_halo),
                  pl.BlockSpec((1, th, w + 2, C1), idx_main),
                  pl.BlockSpec((1, 2, w + 2, C1), idx_halo),
                  pl.BlockSpec((9, C2, Cout), idx_w3),
                  pl.BlockSpec((9, C1, Cout), idx_w3),
                  pl.BlockSpec((1, Cout), idx_vec),
                  pl.BlockSpec((1, Cout), idx_vec)],
        out_specs=pl.BlockSpec((1, th, w, Cout), idx_main),
        scratch_shapes=[pltpu.VMEM((th * w, Cout), jnp.float32)],
        compiler_params=parallel2,
    )(x2_p, x2_p, x1_up_p, x1_up_p, w1a, w1b, scale1, shift1)

    # ---- stage 3: conv2 (out_ch -> out_ch) ----
    y1_p = jnp.pad(y1, ((0, 0), (1, 1), (1, 1), (0, 0)))
    w2_9 = params['w2'].reshape(9, Cout, Cout).astype(cdt)
    y2 = pl.pallas_call(
        _conv3x3_bn_lrelu_kernel,
        out_shape=jax.ShapeDtypeStruct((N, h, w, Cout), jnp.float32),
        grid=(N, nb),
        in_specs=[pl.BlockSpec((1, th, w + 2, Cout), idx_main),
                  pl.BlockSpec((1, 2, w + 2, Cout), idx_halo),
                  pl.BlockSpec((9, Cout, Cout), idx_w3),
                  pl.BlockSpec((1, Cout), idx_vec),
                  pl.BlockSpec((1, Cout), idx_vec)],
        out_specs=pl.BlockSpec((1, th, w, Cout), idx_main),
        scratch_shapes=[pltpu.VMEM((th * w, Cout), jnp.float32)],
        compiler_params=parallel2,
    )(y1_p, y1_p, w2_9, scale2, shift2)

    # back to NCHW (PyTorch convention).
    # TODO(synk): drop this transpose if the downstream consumer accepts NHWC.
    return jnp.transpose(y2, (0, 3, 1, 2))


# ------------------------- pure-JAX reference (check) ----------------------

def _reference_forward(x1_nchw, x2_nchw, params):
    _, _, H1, W1 = x1_nchw.shape
    _, _, h, w = x2_nchw.shape
    a_h = _bilinear_matrix(h, H1)
    a_w = _bilinear_matrix(w, W1)
    x1_up = jnp.einsum('hH,ncHW,wW->nchw', a_h, x1_nchw, a_w)
    x = jnp.concatenate([x2_nchw, x1_up], axis=1)

    def block(x, wk, b, g, beta, mean, var):
        y = lax.conv_general_dilated(x, wk, (1, 1), ((1, 1), (1, 1)),
                                     dimension_numbers=('NCHW', 'HWIO', 'NCHW'))
        y = y + b[None, :, None, None]
        y = (y - mean[None, :, None, None]) / jnp.sqrt(var[None, :, None, None] + BN_EPS)
        y = y * g[None, :, None, None] + beta[None, :, None, None]
        return jnp.where(y >= 0, y, LRELU_SLOPE * y)

    y = block(x, params['w1'], params['b1'], params['bn1_gamma'], params['bn1_beta'],
              params['bn1_mean'], params['bn1_var'])
    y = block(y, params['w2'], params['b2'], params['bn2_gamma'], params['bn2_beta'],
              params['bn2_mean'], params['bn2_var'])
    return y


if __name__ == "__main__":
    key = jax.random.PRNGKey(0)
    k1, k2, kp = jax.random.split(key, 3)

    N = 2
    C1, H1, W1 = 6, 8, 8        # x1: low-res branch to be upsampled
    C2, h, w = 10, 16, 16       # x2: skip connection, target spatial size
    in_ch, out_ch = C1 + C2, 8

    x1 = jax.random.normal(k1, (N, C1, H1, W1), jnp.float32)
    x2 = jax.random.normal(k2, (N, C2, h, w), jnp.float32)
    params = init_params(kp, in_ch, out_ch)

    out = jax.block_until_ready(jax.jit(up_forward)(x1, x2, params))
    assert out.shape == (N, out_ch, h, w), out.shape
    assert bool(jnp.all(jnp.isfinite(out)))

    # loose tolerance: kernels use bf16 matmul inputs with f32 accumulation.
    ref = _reference_forward(x1, x2, params)
    rel = float(jnp.linalg.norm(out - ref) / (jnp.linalg.norm(ref) + 1e-12))
    assert rel < 0.05, f"relative error vs f32 reference too large: {rel}"

    print("KERNEL_OK")
</pallas_src>

<mosaic_0001>
module attributes {stable_mosaic.version = 11 : i64} {
  func.func @_bilinear_resize_kernel(%arg0: i32, %arg1: i32, %arg2: memref<8x8xf32, #tpu.memory_space<vmem>>, %arg3: memref<16x8xf32, #tpu.memory_space<vmem>>, %arg4: memref<1x6x8x8xf32, #tpu.memory_space<vmem>>, %arg5: memref<1x6x8x16xbf16, #tpu.memory_space<vmem>>) attributes {dimension_semantics = [#tpu.dimension_semantics<parallel>, #tpu.dimension_semantics<parallel>], iteration_bounds = array<i64: 2, 2>, scalar_prefetch = 0 : i64, scratch_operands = 0 : i64, tpu.core_type = #tpu.core_type<tc>, window_params = [{transform_indices = @transform_0, window_bounds = array<i64: 8, 8>}, {pipeline_mode = #tpu.pipeline_mode<synchronous>, transform_indices = @transform_1, window_bounds = array<i64: 16, 8>}, {transform_indices = @transform_2, window_bounds = array<i64: 1, 6, 8, 8>}, {transform_indices = @transform_3, window_bounds = array<i64: 1, 6, 8, 16>}]} {
    %c0 = arith.constant 0 : index
    %c0_0 = arith.constant 0 : index
    %c0_1 = arith.constant 0 : index
    %c0_2 = arith.constant 0 : index
    %0 = vector.load %arg4[%c0, %c0_0, %c0_1, %c0_2] : memref<1x6x8x8xf32, #tpu.memory_space<vmem>>, vector<1x6x8x8xf32>
    %1 = vector.shape_cast %0 : vector<1x6x8x8xf32> to vector<6x8x8xf32>
    %c0_3 = arith.constant 0 : index
    %c0_4 = arith.constant 0 : index
    %2 = vector.load %arg3[%c0_3, %c0_4] : memref<16x8xf32, #tpu.memory_space<vmem>>, vector<16x8xf32>
    %3 = vector.shape_cast %2 : vector<16x8xf32> to vector<1x16x8xf32>
    %4 = vector.shape_cast %3 : vector<1x16x8xf32> to vector<1x16x8xf32>
    %5 = vector.broadcast %4 : vector<1x16x8xf32> to vector<6x16x8xf32>
    %c0_5 = arith.constant 0 : index
    %c0_6 = arith.constant 0 : index
    %6 = vector.load %arg2[%c0_5, %c0_6] : memref<8x8xf32, #tpu.memory_space<vmem>>, vector<8x8xf32>
    %7 = vector.shape_cast %6 : vector<8x8xf32> to vector<1x8x8xf32>
    %8 = vector.shape_cast %7 : vector<1x8x8xf32> to vector<1x8x8xf32>
    %9 = vector.broadcast %8 : vector<1x8x8xf32> to vector<6x8x8xf32>
    %cst = arith.constant dense<0.000000e+00> : vector<6x8x16xf32>
    %10 = tpu.matmul %1, %5, %cst {dimension_numbers = #tpu.dot_dimension_numbers<[2], [2], [1], [1], [0, 0, 0, 1, 1, 1], [0], [0]>} : vector<6x8x8xf32>, vector<6x16x8xf32>, vector<6x8x16xf32> -> vector<6x8x16xf32>
    %cst_7 = arith.constant dense<0.000000e+00> : vector<6x8x16xf32>
    %11 = tpu.matmul %9, %10, %cst_7 {dimension_numbers = #tpu.dot_dimension_numbers<[2], [1], [1], [2], [0, 0, 0, 1, 1, 2], [0], [0]>} : vector<6x8x8xf32>, vector<6x8x16xf32>, vector<6x8x16xf32> -> vector<6x8x16xf32>
    %12 = arith.truncf %11 : vector<6x8x16xf32> to vector<6x8x16xbf16>
    %c0_8 = arith.constant 0 : index
    %c0_9 = arith.constant 0 : index
    %c0_10 = arith.constant 0 : index
    %c0_11 = arith.constant 0 : index
    %13 = vector.load %arg5[%c0_8, %c0_9, %c0_10, %c0_11] : memref<1x6x8x16xbf16, #tpu.memory_space<vmem>>, vector<1x6x8x16xbf16>
    %14 = vector.shape_cast %13 : vector<1x6x8x16xbf16> to vector<6x8x16xbf16>
    %15 = vector.shape_cast %12 : vector<6x8x16xbf16> to vector<1x6x8x16xbf16>
    tpu.vector_store %arg5[%c0_8, %c0_9, %c0_10, %c0_11], %15 {strides = array<i32>} : memref<1x6x8x16xbf16, #tpu.memory_space<vmem>>, vector<1x6x8x16xbf16>,
    return
  }
  func.func @transform_0(%arg0: i32, %arg1: i32) -> (i32, i32) {
    %c0_i32 = arith.constant 0 : i32
    %c0_i32_0 = arith.constant 0 : i32
    return %arg1, %c0_i32 : i32, i32
  }
  func.func @transform_1(%arg0: i32, %arg1: i32) -> (i32, i32) {
    %c0_i32 = arith.constant 0 : i32
    %c0_i32_0 = arith.constant 0 : i32
    %c0_i32_1 = arith.constant 0 : i32
    return %c0_i32, %c0_i32_0 : i32, i32
  }
  func.func @transform_2(%arg0: i32, %arg1: i32) -> (i32, i32, i32, i32) {
    %c0_i32 = arith.constant 0 : i32
    %c0_i32_0 = arith.constant 0 : i32
    %c0_i32_1 = arith.constant 0 : i32
    %c0_i32_2 = arith.constant 0 : i32
    return %arg0, %c0_i32, %c0_i32_0, %c0_i32_1 : i32, i32, i32, i32
  }
  func.func @transform_3(%arg0: i32, %arg1: i32) -> (i32, i32, i32, i32) {
    %c0_i32 = arith.constant 0 : i32
    %c0_i32_0 = arith.constant 0 : i32
    %c0_i32_1 = arith.constant 0 : i32
    return %arg0, %c0_i32, %arg1, %c0_i32_0 : i32, i32, i32, i32
  }
}

module attributes {stable_mosaic.version = 11 : i64} {
  func.func @_conv3x3_bn_lrelu_two_input_kernel(%arg0: i32, %arg1: i32, %arg2: memref<1x8x18x10xbf16, #tpu.memory_space<vmem>>, %arg3: memref<1x2x18x10xbf16, #tpu.memory_space<vmem>>, %arg4: memref<1x8x18x6xbf16, #tpu.memory_space<vmem>>, %arg5: memref<1x2x18x6xbf16, #tpu.memory_space<vmem>>, %arg6: memref<9x10x8xbf16, #tpu.memory_space<vmem>>, %arg7: memref<9x6x8xbf16, #tpu.memory_space<vmem>>, %arg8: memref<1x8xf32, #tpu.memory_space<vmem>>, %arg9: memref<1x8xf32, #tpu.memory_space<vmem>>, %arg10: memref<1x8x16x8xbf16, #tpu.memory_space<vmem>>, %arg11: memref<128x8xf32, #tpu.memory_space<vmem>>) attributes {dimension_semantics = [#tpu.dimension_semantics<parallel>, #tpu.dimension_semantics<parallel>], iteration_bounds = array<i64: 2, 2>, scalar_prefetch = 0 : i64, scratch_operands = 1 : i64, tpu.core_type = #tpu.core_type<tc>, window_params = [{transform_indices = @transform_0, window_bounds = array<i64: 1, 8, 18, 10>}, {transform_indices = @transform_1, window_bounds = array<i64: 1, 2, 18, 10>}, {transform_indices = @transform_2, window_bounds = array<i64: 1, 8, 18, 6>}, {transform_indices = @transform_3, window_bounds = array<i64: 1, 2, 18, 6>}, {pipeline_mode = #tpu.pipeline_mode<synchronous>, transform_indices = @transform_4, window_bounds = array<i64: 9, 10, 8>}, {pipeline_mode = #tpu.pipeline_mode<synchronous>, transform_indices = @transform_5, window_bounds = array<i64: 9, 6, 8>}, {pipeline_mode = #tpu.pipeline_mode<synchronous>, transform_indices = @transform_6, window_bounds = array<i64: 1, 8>}, {pipeline_mode = #tpu.pipeline_mode<synchronous>, transform_indices = @transform_7, window_bounds = array<i64: 1, 8>}, {transform_indices = @transform_8, window_bounds = array<i64: 1, 8, 16, 8>}]} {
    %cst = arith.constant 0.000000e+00 : f32
    %0 = vector.broadcast %cst : f32 to vector<128x8xf32>
    %c0 = arith.constant 0 : index
    %c0_0 = arith.constant 0 : index
    %1 = vector.load %arg11[%c0, %c0_0] : memref<128x8xf32, #tpu.memory_space<vmem>>, vector<128x8xf32>
    tpu.vector_store %arg11[%c0, %c0_0], %0 {strides = array<i32>} : memref<128x8xf32, #tpu.memory_space<vmem>>, vector<128x8xf32>,
    %c0_1 = arith.constant 0 : index
    %c0_2 = arith.constant 0 : index
    %c0_3 = arith.constant 0 : index
    %c0_4 = arith.constant 0 : index
    %2 = vector.load %arg2[%c0_1, %c0_2, %c0_3, %c0_4] : memref<1x8x18x10xbf16, #tpu.memory_space<vmem>>, vector<1x8x18x10xbf16>
    %3 = vector.shape_cast %2 : vector<1x8x18x10xbf16> to vector<8x18x10xbf16>
    %c0_5 = arith.constant 0 : index
    %c0_6 = arith.constant 0 : index
    %c0_7 = arith.constant 0 : index
    %c0_8 = arith.constant 0 : index
    %4 = vector.load %arg3[%c0_5, %c0_6, %c0_7, %c0_8] : memref<1x2x18x10xbf16, #tpu.memory_space<vmem>>, vector<1x2x18x10xbf16>
    %5 = vector.shape_cast %4 : vector<1x2x18x10xbf16> to vector<2x18x10xbf16>
    %6 = tpu.concatenate %3, %5 in 0 : vector<8x18x10xbf16>, vector<2x18x10xbf16> -> vector<10x18x10xbf16>
    %7 = vector.extract_strided_slice %6 {offsets = [0, 0, 0], sizes = [10, 16, 10], strides = [1, 1, 1]} : vector<10x18x10xbf16> to vector<10x16x10xbf16>
    %8 = vector.shape_cast %7 : vector<10x16x10xbf16> to vector<160x10xbf16>
    %9 = vector.extract_strided_slice %8 {offsets = [0, 0], sizes = [128, 10], strides = [1, 1]} : vector<160x10xbf16> to vector<128x10xbf16>
    %c0_9 = arith.constant 0 : index
    %c0_10 = arith.constant 0 : index
    %10 = vector.load %arg11[%c0_9, %c0_10] : memref<128x8xf32, #tpu.memory_space<vmem>>, vector<128x8xf32>
    %c0_11 = arith.constant 0 : index
    %c0_12 = arith.constant 0 : index
    %c0_13 = arith.constant 0 : index
    %11 = vector.load %arg6[%c0_11, %c0_12, %c0_13] : memref<9x10x8xbf16, #tpu.memory_space<vmem>>, vector<1x10x8xbf16>
    %12 = vector.shape_cast %11 : vector<1x10x8xbf16> to vector<10x8xbf16>
    %cst_14 = arith.constant dense<0.000000e+00> : vector<128x8xf32>
    %13 = tpu.matmul %9, %12, %cst_14 {dimension_numbers = #tpu.dot_dimension_numbers<[1], [0], [0], [1], [0, 0, 1, 1], [], []>} : vector<128x10xbf16>, vector<10x8xbf16>, vector<128x8xf32> -> vector<128x8xf32>
    %14 = arith.addf %10, %13 : vector<128x8xf32>
    %c0_15 = arith.constant 0 : index
    %c0_16 = arith.constant 0 : index
    %15 = vector.load %arg11[%c0_15, %c0_16] : memref<128x8xf32, #tpu.memory_space<vmem>>, vector<128x8xf32>
    tpu.vector_store %arg11[%c0_15, %c0_16], %14 {strides = array<i32>} : memref<128x8xf32, #tpu.memory_space<vmem>>, vector<128x8xf32>,
    %16 = vector.extract_strided_slice %8 {offsets = [16, 0], sizes = [128, 10], strides = [1, 1]} : vector<160x10xbf16> to vector<128x10xbf16>
    %c0_17 = arith.constant 0 : index
    %c0_18 = arith.constant 0 : index
    %17 = vector.load %arg11[%c0_17, %c0_18] : memref<128x8xf32, #tpu.memory_space<vmem>>, vector<128x8xf32>
    %c3 = arith.constant 3 : index
    %c0_19 = arith.constant 0 : index
    %c0_20 = arith.constant 0 : index
    %18 = vector.load %arg6[%c3, %c0_19, %c0_20] : memref<9x10x8xbf16, #tpu.memory_space<vmem>>, vector<1x10x8xbf16>
    %19 = vector.shape_cast %18 : vector<1x10x8xbf16> to vector<10x8xbf16>
    %cst_21 = arith.constant dense<0.000000e+00> : vector<128x8xf32>
    %20 = tpu.matmul %16, %19, %cst_21 {dimension_numbers = #tpu.dot_dimension_numbers<[1], [0], [0], [1], [0, 0, 1, 1], [], []>} : vector<128x10xbf16>, vector<10x8xbf16>, vector<128x8xf32> -> vector<128x8xf32>
    %21 = arith.addf %17, %20 : vector<128x8xf32>
    %c0_22 = arith.constant 0 : index
    %c0_23 = arith.constant 0 : index
    %22 = vector.load %arg11[%c0_22, %c0_23] : memref<128x8xf32, #tpu.memory_space<vmem>>, vector<128x8xf32>
    tpu.vector_store %arg11[%c0_22, %c0_23], %21 {strides = array<i32>} : memref<128x8xf32, #tpu.memory_space<vmem>>, vector<128x8xf32>,
    %23 = vector.extract_strided_slice %8 {offsets = [32, 0], sizes = [128, 10], strides = [1, 1]} : vector<160x10xbf16> to vector<128x10xbf16>
    %c0_24 = arith.constant 0 : index
    %c0_25 = arith.constant 0 : index
    %24 = vector.load %arg11[%c0_24, %c0_25] : memref<128x8xf32, #tpu.memory_space<vmem>>, vector<128x8xf32>
    %c6 = arith.constant 6 : index
    %c0_26 = arith.constant 0 : index
    %c0_27 = arith.constant 0 : index
    %25 = vector.load %arg6[%c6, %c0_26, %c0_27] : memref<9x10x8xbf16, #tpu.memory_space<vmem>>, vector<1x10x8xbf16>
    %26 = vector.shape_cast %25 : vector<1x10x8xbf16> to vector<10x8xbf16>
    %cst_28 = arith.constant dense<0.000000e+00> : vector<128x8xf32>
    %27 = tpu.matmul %23, %26, %cst_28 {dimension_numbers = #tpu.dot_dimension_numbers<[1], [0], [0], [1], [0, 0, 1, 1], [], []>} : vector<128x10xbf16>, vector<10x8xbf16>, vector<128x8xf32> -> vector<128x8xf32>
    %28 = arith.addf %24, %27 : vector<128x8xf32>
    %c0_29 = arith.constant 0 : index
    %c0_30 = arith.constant 0 : index
    %29 = vector.load %arg11[%c0_29, %c0_30] : memref<128x8xf32, #tpu.memory_space<vmem>>, vector<128x8xf32>
    tpu.vector_store %arg11[%c0_29, %c0_30], %28 {strides = array<i32>} : memref<128x8xf32, #tpu.memory_space<vmem>>, vector<128x8xf32>,
    %30 = vector.extract_strided_slice %6 {offsets = [0, 1, 0], sizes = [10, 16, 10], strides = [1, 1, 1]} : vector<10x18x10xbf16> to vector<10x16x10xbf16>
    %31 = vector.shape_cast %30 : vector<10x16x10xbf16> to vector<160x10xbf16>
    %32 = vector.extract_strided_slice %31 {offsets = [0, 0], sizes = [128, 10], strides = [1, 1]} : vector<160x10xbf16> to vector<128x10xbf16>
    %c0_31 = arith.constant 0 : index
    %c0_32 = arith.constant 0 : index
    %33 = vector.load %arg11[%c0_31, %c0_32] : memref<128x8xf32, #tpu.memory_space<vmem>>, vector<128x8xf32>
    %c1 = arith.constant 1 : index
    %c0_33 = arith.constant 0 : index
    %c0_34 = arith.constant 0 : index
    %34 = vector.load %arg6[%c1, %c0_33, %c0_34] : memref<9x10x8xbf16, #tpu.memory_space<vmem>>, vector<1x10x8xbf16>
    %35 = vector.shape_cast %34 : vector<1x10x8xbf16> to vector<10x8xbf16>
    %cst_35 = arith.constant dense<0.000000e+00> : vector<128x8xf32>
    %36 = tpu.matmul %32, %35, %cst_35 {dimension_numbers = #tpu.dot_dimension_numbers<[1], [0], [0], [1], [0, 0, 1, 1], [], []>} : vector<128x10xbf16>, vector<10x8xbf16>, vector<128x8xf32> -> vector<128x8xf32>
    %37 = arith.addf %33, %36 : vector<128x8xf32>
    %c0_36 = arith.constant 0 : index
    %c0_37 = arith.constant 0 : index
    %38 = vector.load %arg11[%c0_36, %c0_37] : memref<128x8xf32, #tpu.memory_space<vmem>>, vector<128x8xf32>
    tpu.vector_store %arg11[%c0_36, %c0_37], %37 {strides = array<i32>} : memref<128x8xf32, #tpu.memory_space<vmem>>, vector<128x8xf32>,
    %39 = vector.extract_strided_slice %31 {offsets = [16, 0], sizes = [128, 10], strides = [1, 1]} : vector<160x10xbf16> to vector<128x10xbf16>
    %c0_38 = arith.constant 0 : index
    %c0_39 = arith.constant 0 : index
    %40 = vector.load %arg11[%c0_38, %c0_39] : memref<128x8xf32, #tpu.memory_space<vmem>>, vector<128x8xf32>
    %c4 = arith.constant 4 : index
    %c0_40 = arith.constant 0 : index
    %c0_41 = arith.constant 0 : index
    %41 = vector.load %arg6[%c4, %c0_40, %c0_41] : memref<9x10x8xbf16, #tpu.memory_space<vmem>>, vector<1x10x8xbf16>
    %42 = vector.shape_cast %41 : vector<1x10x8xbf16> to vector<10x8xbf16>
    %cst_42 = arith.constant dense<0.000000e+00> : vector<128x8xf32>
    %43 = tpu.matmul %39, %42, %cst_42 {dimension_numbers = #tpu.dot_dimension_numbers<[1], [0], [0], [1], [0, 0, 1, 1], [], []>} : vector<128x10xbf16>, vector<10x8xbf16>, vector<128x8xf32> -> vector<128x8xf32>
    %44 = arith.addf %40, %43 : vector<128x8xf32>
    %c0_43 = arith.constant 0 : index
    %c0_44 = arith.constant 0 : index
    %45 = vector.load %arg11[%c0_43, %c0_44] : memref<128x8xf32, #tpu.memory_space<vmem>>, vector<128x8xf32>
    tpu.vector_store %arg11[%c0_43, %c0_44], %44 {strides = array<i32>} : memref<128x8xf32, #tpu.memory_space<vmem>>, vector<128x8xf32>,
    %46 = vector.extract_strided_slice %31 {offsets = [32, 0], sizes = [128, 10], strides = [1, 1]} : vector<160x10xbf16> to vector<128x10xbf16>
    %c0_45 = arith.constant 0 : index
    %c0_46 = arith.constant 0 : index
    %47 = vector.load %arg11[%c0_45, %c0_46] : memref<128x8xf32, #tpu.memory_space<vmem>>, vector<128x8xf32>
    %c7 = arith.constant 7 : index
    %c0_47 = arith.constant 0 : index
    %c0_48 = arith.constant 0 : index
    %48 = vector.load %arg6[%c7, %c0_47, %c0_48] : memref<9x10x8xbf16, #tpu.memory_space<vmem>>, vector<1x10x8xbf16>
    %49 = vector.shape_cast %48 : vector<1x10x8xbf16> to vector<10x8xbf16>
    %cst_49 = arith.constant dense<0.000000e+00> : vector<128x8xf32>
    %50 = tpu.matmul %46, %49, %cst_49 {dimension_numbers = #tpu.dot_dimension_numbers<[1], [0], [0], [1], [0, 0, 1, 1], [], []>} : vector<128x10xbf16>, vector<10x8xbf16>, vector<128x8xf32> -> vector<128x8xf32>
    %51 = arith.addf %47, %50 : vector<128x8xf32>
    %c0_50 = arith.constant 0 : index
    %c0_51 = arith.constant 0 : index
    %52 = vector.load %arg11[%c0_50, %c0_51] : memref<128x8xf32, #tpu.memory_space<vmem>>, vector<128x8xf32>
    tpu.vector_store %arg11[%c0_50, %c0_51], %51 {strides = array<i32>} : memref<128x8xf32, #tpu.memory_space<vmem>>, vector<128x8xf32>,
    %53 = vector.extract_strided_slice %6 {offsets = [0, 2, 0], sizes = [10, 16, 10], strides = [1, 1, 1]} : vector<10x18x10xbf16> to vector<10x16x10xbf16>
    %54 = vector.shape_cast %53 : vector<10x16x10xbf16> to vector<160x10xbf16>
    %55 = vector.extract_strided_slice %54 {offsets = [0, 0], sizes = [128, 10], strides = [1, 1]} : vector<160x10xbf16> to vector<128x10xbf16>
    %c0_52 = arith.constant 0 : index
    %c0_53 = arith.constant 0 : index
    %56 = vector.load %arg11[%c0_52, %c0_53] : memref<128x8xf32, #tpu.memory_space<vmem>>, vector<128x8xf32>
    %c2 = arith.constant 2 : index
    %c0_54 = arith.constant 0 : index
    %c0_55 = arith.constant 0 : index
    %57 = vector.load %arg6[%c2, %c0_54, %c0_55] : memref<9x10x8xbf16, #tpu.memory_space<vmem>>, vector<1x10x8xbf16>
    %58 = vector.shape_cast %57 : vector<1x10x8xbf16> to vector<10x8xbf16>
    %cst_56 = arith.constant dense<0.000000e+00> : vector<128x8xf32>
    %59 = tpu.matmul %55, %58, %cst_56 {dimension_numbers = #tpu.dot_dimension_numbers<[1], [0], [0], [1], [0, 0, 1, 1], [], []>} : vector<128x10xbf16>, vector<10x8xbf16>, vector<128x8xf32> -> vector<128x8xf32>
    %60 = arith.addf %56, %59 : vector<128x8xf32>
    %c0_57 = arith.constant 0 : index
    %c0_58 = arith.constant 0 : index
    %61 = vector.load %arg11[%c0_57, %c0_58] : memref<128x8xf32, #tpu.memory_space<vmem>>, vector<128x8xf32>
    tpu.vector_store %arg11[%c0_57, %c0_58], %60 {strides = array<i32>} : memref<128x8xf32, #tpu.memory_space<vmem>>, vector<128x8xf32>,
    %62 = vector.extract_strided_slice %54 {offsets = [16, 0], sizes = [128, 10], strides = [1, 1]} : vector<160x10xbf16> to vector<128x10xbf16>
    %c0_59 = arith.constant 0 : index
    %c0_60 = arith.constant 0 : index
    %63 = vector.load %arg11[%c0_59, %c0_60] : memref<128x8xf32, #tpu.memory_space<vmem>>, vector<128x8xf32>
    %c5 = arith.constant 5 : index
    %c0_61 = arith.constant 0 : index
    %c0_62 = arith.constant 0 : index
    %64 = vector.load %arg6[%c5, %c0_61, %c0_62] : memref<9x10x8xbf16, #tpu.memory_space<vmem>>, vector<1x10x8xbf16>
    %65 = vector.shape_cast %64 : vector<1x10x8xbf16> to vector<10x8xbf16>
    %cst_63 = arith.constant dense<0.000000e+00> : vector<128x8xf32>
    %66 = tpu.matmul %62, %65, %cst_63 {dimension_numbers = #tpu.dot_dimension_numbers<[1], [0], [0], [1], [0, 0, 1, 1], [], []>} : vector<128x10xbf16>, vector<10x8xbf16>, vector<128x8xf32> -> vector<128x8xf32>
    %67 = arith.addf %63, %66 : vector<128x8xf32>
    %c0_64 = arith.constant 0 : index
    %c0_65 = arith.constant 0 : index
    %68 = vector.load %arg11[%c0_64, %c0_65] : memref<128x8xf32, #tpu.memory_space<vmem>>, vector<128x8xf32>
    tpu.vector_store %arg11[%c0_64, %c0_65], %67 {strides = array<i32>} : memref<128x8xf32, #tpu.memory_space<vmem>>, vector<128x8xf32>,
    %69 = vector.extract_strided_slice %54 {offsets = [32, 0], sizes = [128, 10], strides = [1, 1]} : vector<160x10xbf16> to vector<128x10xbf16>
    %c0_66 = arith.constant 0 : index
    %c0_67 = arith.constant 0 : index
    %70 = vector.load %arg11[%c0_66, %c0_67] : memref<128x8xf32, #tpu.memory_space<vmem>>, vector<128x8xf32>
    %c8 = arith.constant 8 : index
    %c0_68 = arith.constant 0 : index
    %c0_69 = arith.constant 0 : index
    %71 = vector.load %arg6[%c8, %c0_68, %c0_69] : memref<9x10x8xbf16, #tpu.memory_space<vmem>>, vector<1x10x8xbf16>
    %72 = vector.shape_cast %71 : vector<1x10x8xbf16> to vector<10x8xbf16>
    %cst_70 = arith.constant dense<0.000000e+00> : vector<128x8xf32>
    %73 = tpu.matmul %69, %72, %cst_70 {dimension_numbers = #tpu.dot_dimension_numbers<[1], [0], [0], [1], [0, 0, 1, 1], [], []>} : vector<128x10xbf16>, vector<10x8xbf16>, vector<128x8xf32> -> vector<128x8xf32>
    %74 = arith.addf %70, %73 : vector<128x8xf32>
    %c0_71 = arith.constant 0 : index
    %c0_72 = arith.constant 0 : index
    %75 = vector.load %arg11[%c0_71, %c0_72] : memref<128x8xf32, #tpu.memory_space<vmem>>, vector<128x8xf32>
    tpu.vector_store %arg11[%c0_71, %c0_72], %74 {strides = array<i32>} : memref<128x8xf32, #tpu.memory_space<vmem>>, vector<128x8xf32>,
    %c0_73 = arith.constant 0 : index
    %c0_74 = arith.constant 0 : index
    %c0_75 = arith.constant 0 : index
    %c0_76 = arith.constant 0 : index
    %76 = vector.load %arg4[%c0_73, %c0_74, %c0_75, %c0_76] : memref<1x8x18x6xbf16, #tpu.memory_space<vmem>>, vector<1x8x18x6xbf16>
    %77 = vector.shape_cast %76 : vector<1x8x18x6xbf16> to vector<8x18x6xbf16>
    %c0_77 = arith.constant 0 : index
    %c0_78 = arith.constant 0 : index
    %c0_79 = arith.constant 0 : index
    %c0_80 = arith.constant 0 : index
    %78 = vector.load %arg5[%c0_77, %c0_78, %c0_79, %c0_80] : memref<1x2x18x6xbf16, #tpu.memory_space<vmem>>, vector<1x2x18x6xbf16>
    %79 = vector.shape_cast %78 : vector<1x2x18x6xbf16> to vector<2x18x6xbf16>
    %80 = tpu.concatenate %77, %79 in 0 : vector<8x18x6xbf16>, vector<2x18x6xbf16> -> vector<10x18x6xbf16>
    %81 = vector.extract_strided_slice %80 {offsets = [0, 0, 0], sizes = [10, 16, 6], strides = [1, 1, 1]} : vector<10x18x6xbf16> to vector<10x16x6xbf16>
    %82 = vector.shape_cast %81 : vector<10x16x6xbf16> to vector<160x6xbf16>
    %83 = vector.extract_strided_slice %82 {offsets = [0, 0], sizes = [128, 6], strides = [1, 1]} : vector<160x6xbf16> to vector<128x6xbf16>
    %c0_81 = arith.constant 0 : index
    %c0_82 = arith.constant 0 : index
    %84 = vector.load %arg11[%c0_81, %c0_82] : memref<128x8xf32, #tpu.memory_space<vmem>>, vector<128x8xf32>
    %c0_83 = arith.constant 0 : index
    %c0_84 = arith.constant 0 : index
    %c0_85 = arith.constant 0 : index
    %85 = vector.load %arg7[%c0_83, %c0_84, %c0_85] : memref<9x6x8xbf16, #tpu.memory_space<vmem>>, vector<1x6x8xbf16>
    %86 = vector.shape_cast %85 : vector<1x6x8xbf16> to vector<6x8xbf16>
    %cst_86 = arith.constant dense<0.000000e+00> : vector<128x8xf32>
    %87 = tpu.matmul %83, %86, %cst_86 {dimension_numbers = #tpu.dot_dimension_numbers<[1], [0], [0], [1], [0, 0, 1, 1], [], []>} : vector<128x6xbf16>, vector<6x8xbf16>, vector<128x8xf32> -> vector<128x8xf32>
    %88 = arith.addf %84, %87 : vector<128x8xf32>
    %c0_87 = arith.constant 0 : index
    %c0_88 = arith.constant 0 : index
    %89 = vector.load %arg11[%c0_87, %c0_88] : memref<128x8xf32, #tpu.memory_space<vmem>>, vector<128x8xf32>
    tpu.vector_store %arg11[%c0_87, %c0_88], %88 {strides = array<i32>} : memref<128x8xf32, #tpu.memory_space<vmem>>, vector<128x8xf32>,
    %90 = vector.extract_strided_slice %82 {offsets = [16, 0], sizes = [128, 6], strides = [1, 1]} : vector<160x6xbf16> to vector<128x6xbf16>
    %c0_89 = arith.constant 0 : index
    %c0_90 = arith.constant 0 : index
    %91 = vector.load %arg11[%c0_89, %c0_90] : memref<128x8xf32, #tpu.memory_space<vmem>>, vector<128x8xf32>
    %c3_91 = arith.constant 3 : index
    %c0_92 = arith.constant 0 : index
    %c0_93 = arith.constant 0 : index
    %92 = vector.load %arg7[%c3_91, %c0_92, %c0_93] : memref<9x6x8xbf16, #tpu.memory_space<vmem>>, vector<1x6x8xbf16>
    %93 = vector.shape_cast %92 : vector<1x6x8xbf16> to vector<6x8xbf16>
    %cst_94 = arith.constant dense<0.000000e+00> : vector<128x8xf32>
    %94 = tpu.matmul %90, %93, %cst_94 {dimension_numbers = #tpu.dot_dimension_numbers<[1], [0], [0], [1], [0, 0, 1, 1], [], []>} : vector<128x6xbf16>, vector<6x8xbf16>, vector<128x8xf32> -> vector<128x8xf32>
    %95 = arith.addf %91, %94 : vector<128x8xf32>
    %c0_95 = arith.constant 0 : index
    %c0_96 = arith.constant 0 : index
    %96 = vector.load %arg11[%c0_95, %c0_96] : memref<128x8xf32, #tpu.memory_space<vmem>>, vector<128x8xf32>
    tpu.vector_store %arg11[%c0_95, %c0_96], %95 {strides = array<i32>} : memref<128x8xf32, #tpu.memory_space<vmem>>, vector<128x8xf32>,
    %97 = vector.extract_strided_slice %82 {offsets = [32, 0], sizes = [128, 6], strides = [1, 1]} : vector<160x6xbf16> to vector<128x6xbf16>
    %c0_97 = arith.constant 0 : index
    %c0_98 = arith.constant 0 : index
    %98 = vector.load %arg11[%c0_97, %c0_98] : memref<128x8xf32, #tpu.memory_space<vmem>>, vector<128x8xf32>
    %c6_99 = arith.constant 6 : index
    %c0_100 = arith.constant 0 : index
    %c0_101 = arith.constant 0 : index
    %99 = vector.load %arg7[%c6_99, %c0_100, %c0_101] : memref<9x6x8xbf16, #tpu.memory_space<vmem>>, vector<1x6x8xbf16>
    %100 = vector.shape_cast %99 : vector<1x6x8xbf16> to vector<6x8xbf16>
    %cst_102 = arith.constant dense<0.000000e+00> : vector<128x8xf32>
    %101 = tpu.matmul %97, %100, %cst_102 {dimension_numbers = #tpu.dot_dimension_numbers<[1], [0], [0], [1], [0, 0, 1, 1], [], []>} : vector<128x6xbf16>, vector<6x8xbf16>, vector<128x8xf32> -> vector<128x8xf32>
    %102 = arith.addf %98, %101 : vector<128x8xf32>
    %c0_103 = arith.constant 0 : index
    %c0_104 = arith.constant 0 : index
    %103 = vector.load %arg11[%c0_103, %c0_104] : memref<128x8xf32, #tpu.memory_space<vmem>>, vector<128x8xf32>
    tpu.vector_store %arg11[%c0_103, %c0_104], %102 {strides = array<i32>} : memref<128x8xf32, #tpu.memory_space<vmem>>, vector<128x8xf32>,
    %104 = vector.extract_strided_slice %80 {offsets = [0, 1, 0], sizes = [10, 16, 6], strides = [1, 1, 1]} : vector<10x18x6xbf16> to vector<10x16x6xbf16>
    %105 = vector.shape_cast %104 : vector<10x16x6xbf16> to vector<160x6xbf16>
    %106 = vector.extract_strided_slice %105 {offsets = [0, 0], sizes = [128, 6], strides = [1, 1]} : vector<160x6xbf16> to vector<128x6xbf16>
    %c0_105 = arith.constant 0 : index
    %c0_106 = arith.constant 0 : index
    %107 = vector.load %arg11[%c0_105, %c0_106] : memref<128x8xf32, #tpu.memory_space<vmem>>, vector<128x8xf32>
    %c1_107 = arith.constant 1 : index
    %c0_108 = arith.constant 0 : index
    %c0_109 = arith.constant 0 : index
    %108 = vector.load %arg7[%c1_107, %c0_108, %c0_109] : memref<9x6x8xbf16, #tpu.memory_space<vmem>>, vector<1x6x8xbf16>
    %109 = vector.shape_cast %108 : vector<1x6x8xbf16> to vector<6x8xbf16>
    %cst_110 = arith.constant dense<0.000000e+00> : vector<128x8xf32>
    %110 = tpu.matmul %106, %109, %cst_110 {dimension_numbers = #tpu.dot_dimension_numbers<[1], [0], [0], [1], [0, 0, 1, 1], [], []>} : vector<128x6xbf16>, vector<6x8xbf16>, vector<128x8xf32> -> vector<128x8xf32>
    %111 = arith.addf %107, %110 : vector<128x8xf32>
    %c0_111 = arith.constant 0 : index
    %c0_112 = arith.constant 0 : index
    %112 = vector.load %arg11[%c0_111, %c0_112] : memref<128x8xf32, #tpu.memory_space<vmem>>, vector<128x8xf32>
    tpu.vector_store %arg11[%c0_111, %c0_112], %111 {strides = array<i32>} : memref<128x8xf32, #tpu.memory_space<vmem>>, vector<128x8xf32>,
    %113 = vector.extract_strided_slice %105 {offsets = [16, 0], sizes = [128, 6], strides = [1, 1]} : vector<160x6xbf16> to vector<128x6xbf16>
    %c0_113 = arith.constant 0 : index
    %c0_114 = arith.constant 0 : index
    %114 = vector.load %arg11[%c0_113, %c0_114] : memref<128x8xf32, #tpu.memory_space<vmem>>, vector<128x8xf32>
    %c4_115 = arith.constant 4 : index
    %c0_116 = arith.constant 0 : index
    %c0_117 = arith.constant 0 : index
    %115 = vector.load %arg7[%c4_115, %c0_116, %c0_117] : memref<9x6x8xbf16, #tpu.memory_space<vmem>>, vector<1x6x8xbf16>
    %116 = vector.shape_cast %115 : vector<1x6x8xbf16> to vector<6x8xbf16>
    %cst_118 = arith.constant dense<0.000000e+00> : vector<128x8xf32>
    %117 = tpu.matmul %113, %116, %cst_118 {dimension_numbers = #tpu.dot_dimension_numbers<[1], [0], [0], [1], [0, 0, 1, 1], [], []>} : vector<128x6xbf16>, vector<6x8xbf16>, vector<128x8xf32> -> vector<128x8xf32>
    %118 = arith.addf %114, %117 : vector<128x8xf32>
    %c0_119 = arith.constant 0 : index
    %c0_120 = arith.constant 0 : index
    %119 = vector.load %arg11[%c0_119, %c0_120] : memref<128x8xf32, #tpu.memory_space<vmem>>, vector<128x8xf32>
    tpu.vector_store %arg11[%c0_119, %c0_120], %118 {strides = array<i32>} : memref<128x8xf32, #tpu.memory_space<vmem>>, vector<128x8xf32>,
    %120 = vector.extract_strided_slice %105 {offsets = [32, 0], sizes = [128, 6], strides = [1, 1]} : vector<160x6xbf16> to vector<128x6xbf16>
    %c0_121 = arith.constant 0 : index
    %c0_122 = arith.constant 0 : index
    %121 = vector.load %arg11[%c0_121, %c0_122] : memref<128x8xf32, #tpu.memory_space<vmem>>, vector<128x8xf32>
    %c7_123 = arith.constant 7 : index
    %c0_124 = arith.constant 0 : index
    %c0_125 = arith.constant 0 : index
    %122 = vector.load %arg7[%c7_123, %c0_124, %c0_125] : memref<9x6x8xbf16, #tpu.memory_space<vmem>>, vector<1x6x8xbf16>
    %123 = vector.shape_cast %122 : vector<1x6x8xbf16> to vector<6x8xbf16>
    %cst_126 = arith.constant dense<0.000000e+00> : vector<128x8xf32>
    %124 = tpu.matmul %120, %123, %cst_126 {dimension_numbers = #tpu.dot_dimension_numbers<[1], [0], [0], [1], [0, 0, 1, 1], [], []>} : vector<128x6xbf16>, vector<6x8xbf16>, vector<128x8xf32> -> vector<128x8xf32>
    %125 = arith.addf %121, %124 : vector<128x8xf32>
    %c0_127 = arith.constant 0 : index
    %c0_128 = arith.constant 0 : index
    %126 = vector.load %arg11[%c0_127, %c0_128] : memref<128x8xf32, #tpu.memory_space<vmem>>, vector<128x8xf32>
    tpu.vector_store %arg11[%c0_127, %c0_128], %125 {strides = array<i32>} : memref<128x8xf32, #tpu.memory_space<vmem>>, vector<128x8xf32>,
    %127 = vector.extract_strided_slice %80 {offsets = [0, 2, 0], sizes = [10, 16, 6], strides = [1, 1, 1]} : vector<10x18x6xbf16> to vector<10x16x6xbf16>
    %128 = vector.shape_cast %127 : vector<10x16x6xbf16> to vector<160x6xbf16>
    %129 = vector.extract_strided_slice %128 {offsets = [0, 0], sizes = [128, 6], strides = [1, 1]} : vector<160x6xbf16> to vector<128x6xbf16>
    %c0_129 = arith.constant 0 : index
    %c0_130 = arith.constant 0 : index
    %130 = vector.load %arg11[%c0_129, %c0_130] : memref<128x8xf32, #tpu.memory_space<vmem>>, vector<128x8xf32>
    %c2_131 = arith.constant 2 : index
    %c0_132 = arith.constant 0 : index
    %c0_133 = arith.constant 0 : index
    %131 = vector.load %arg7[%c2_131, %c0_132, %c0_133] : memref<9x6x8xbf16, #tpu.memory_space<vmem>>, vector<1x6x8xbf16>
    %132 = vector.shape_cast %131 : vector<1x6x8xbf16> to vector<6x8xbf16>
    %cst_134 = arith.constant dense<0.000000e+00> : vector<128x8xf32>
    %133 = tpu.matmul %129, %132, %cst_134 {dimension_numbers = #tpu.dot_dimension_numbers<[1], [0], [0], [1], [0, 0, 1, 1], [], []>} : vector<128x6xbf16>, vector<6x8xbf16>, vector<128x8xf32> -> vector<128x8xf32>
    %134 = arith.addf %130, %133 : vector<128x8xf32>
    %c0_135 = arith.constant 0 : index
    %c0_136 = arith.constant 0 : index
    %135 = vector.load %arg11[%c0_135, %c0_136] : memref<128x8xf32, #tpu.memory_space<vmem>>, vector<128x8xf32>
    tpu.vector_store %arg11[%c0_135, %c0_136], %134 {strides = array<i32>} : memref<128x8xf32, #tpu.memory_space<vmem>>, vector<128x8xf32>,
    %136 = vector.extract_strided_slice %128 {offsets = [16, 0], sizes = [128, 6], strides = [1, 1]} : vector<160x6xbf16> to vector<128x6xbf16>
    %c0_137 = arith.constant 0 : index
    %c0_138 = arith.constant 0 : index
    %137 = vector.load %arg11[%c0_137, %c0_138] : memref<128x8xf32, #tpu.memory_space<vmem>>, vector<128x8xf32>
    %c5_139 = arith.constant 5 : index
    %c0_140 = arith.constant 0 : index
    %c0_141 = arith.constant 0 : index
    %138 = vector.load %arg7[%c5_139, %c0_140, %c0_141] : memref<9x6x8xbf16, #tpu.memory_space<vmem>>, vector<1x6x8xbf16>
    %139 = vector.shape_cast %138 : vector<1x6x8xbf16> to vector<6x8xbf16>
    %cst_142 = arith.constant dense<0.000000e+00> : vector<128x8xf32>
    %140 = tpu.matmul %136, %139, %cst_142 {dimension_numbers = #tpu.dot_dimension_numbers<[1], [0], [0], [1], [0, 0, 1, 1], [], []>} : vector<128x6xbf16>, vector<6x8xbf16>, vector<128x8xf32> -> vector<128x8xf32>
    %141 = arith.addf %137, %140 : vector<128x8xf32>
    %c0_143 = arith.constant 0 : index
    %c0_144 = arith.constant 0 : index
    %142 = vector.load %arg11[%c0_143, %c0_144] : memref<128x8xf32, #tpu.memory_space<vmem>>, vector<128x8xf32>
    tpu.vector_store %arg11[%c0_143, %c0_144], %141 {strides = array<i32>} : memref<128x8xf32, #tpu.memory_space<vmem>>, vector<128x8xf32>,
    %143 = vector.extract_strided_slice %128 {offsets = [32, 0], sizes = [128, 6], strides = [1, 1]} : vector<160x6xbf16> to vector<128x6xbf16>
    %c0_145 = arith.constant 0 : index
    %c0_146 = arith.constant 0 : index
    %144 = vector.load %arg11[%c0_145, %c0_146] : memref<128x8xf32, #tpu.memory_space<vmem>>, vector<128x8xf32>
    %c8_147 = arith.constant 8 : index
    %c0_148 = arith.constant 0 : index
    %c0_149 = arith.constant 0 : index
    %145 = vector.load %arg7[%c8_147, %c0_148, %c0_149] : memref<9x6x8xbf16, #tpu.memory_space<vmem>>, vector<1x6x8xbf16>
    %146 = vector.shape_cast %145 : vector<1x6x8xbf16> to vector<6x8xbf16>
    %cst_150 = arith.constant dense<0.000000e+00> : vector<128x8xf32>
    %147 = tpu.matmul %143, %146, %cst_150 {dimension_numbers = #tpu.dot_dimension_numbers<[1], [0], [0], [1], [0, 0, 1, 1], [], []>} : vector<128x6xbf16>, vector<6x8xbf16>, vector<128x8xf32> -> vector<128x8xf32>
    %148 = arith.addf %144, %147 : vector<128x8xf32>
    %c0_151 = arith.constant 0 : index
    %c0_152 = arith.constant 0 : index
    %149 = vector.load %arg11[%c0_151, %c0_152] : memref<128x8xf32, #tpu.memory_space<vmem>>, vector<128x8xf32>
    tpu.vector_store %arg11[%c0_151, %c0_152], %148 {strides = array<i32>} : memref<128x8xf32, #tpu.memory_space<vmem>>, vector<128x8xf32>,
    %c0_153 = arith.constant 0 : index
    %c0_154 = arith.constant 0 : index
    %150 = vector.load %arg11[%c0_153, %c0_154] : memref<128x8xf32, #tpu.memory_space<vmem>>, vector<128x8xf32>
    %c0_155 = arith.constant 0 : index
    %c0_156 = arith.constant 0 : index
    %151 = vector.load %arg8[%c0_155, %c0_156] : memref<1x8xf32, #tpu.memory_space<vmem>>, vector<1x8xf32>
    %152 = vector.broadcast %151 : vector<1x8xf32> to vector<128x8xf32>
    %153 = arith.mulf %150, %152 : vector<128x8xf32>
    %c0_157 = arith.constant 0 : index
    %c0_158 = arith.constant 0 : index
    %154 = vector.load %arg9[%c0_157, %c0_158] : memref<1x8xf32, #tpu.memory_space<vmem>>, vector<1x8xf32>
    %155 = vector.broadcast %154 : vector<1x8xf32> to vector<128x8xf32>
    %156 = arith.addf %153, %155 : vector<128x8xf32>
    %cst_159 = arith.constant 0.000000e+00 : f32
    %157 = vector.broadcast %cst_159 : f32 to vector<128x8xf32>
    %158 = arith.cmpf oge, %156, %157 : vector<128x8xf32>
    %cst_160 = arith.constant 0.00999999977 : f32
    %159 = vector.broadcast %cst_160 : f32 to vector<128x8xf32>
    %160 = arith.mulf %159, %156 : vector<128x8xf32>
    %161 = arith.select %158, %156, %160 : vector<128x8xi1>, vector<128x8xf32>
    %162 = vector.shape_cast %161 : vector<128x8xf32> to vector<8x16x8xf32>
    %163 = arith.truncf %162 : vector<8x16x8xf32> to vector<8x16x8xbf16>
    %c0_161 = arith.constant 0 : index
    %c0_162 = arith.constant 0 : index
    %c0_163 = arith.constant 0 : index
    %c0_164 = arith.constant 0 : index
    %164 = vector.load %arg10[%c0_161, %c0_162, %c0_163, %c0_164] : memref<1x8x16x8xbf16, #tpu.memory_space<vmem>>, vector<1x8x16x8xbf16>
    %165 = vector.shape_cast %164 : vector<1x8x16x8xbf16> to vector<8x16x8xbf16>
    %166 = vector.shape_cast %163 : vector<8x16x8xbf16> to vector<1x8x16x8xbf16>
    tpu.vector_store %arg10[%c0_161, %c0_162, %c0_163, %c0_164], %166 {strides = array<i32>} : memref<1x8x16x8xbf16, #tpu.memory_space<vmem>>, vector<1x8x16x8xbf16>,
    return
  }
  func.func @transform_0(%arg0: i32, %arg1: i32) -> (i32, i32, i32, i32) {
    %c0_i32 = arith.constant 0 : i32
    %c0_i32_0 = arith.constant 0 : i32
    %c0_i32_1 = arith.constant 0 : i32
    return %arg0, %arg1, %c0_i32, %c0_i32_0 : i32, i32, i32, i32
  }
  func.func @transform_1(%arg0: i32, %arg1: i32) -> (i32, i32, i32, i32) {
    %c1_i32 = arith.constant 1 : i32
    %0 = arith.addi %arg1, %c1_i32 : i32
    %c4_i32 = arith.constant 4 : i32
    %1 = arith.muli %0, %c4_i32 : i32
    %c0_i32 = arith.constant 0 : i32
    %c0_i32_0 = arith.constant 0 : i32
    %c0_i32_1 = arith.constant 0 : i32
    return %arg0, %1, %c0_i32, %c0_i32_0 : i32, i32, i32, i32
  }
  func.func @transform_2(%arg0: i32, %arg1: i32) -> (i32, i32, i32, i32) {
    %c0_i32 = arith.constant 0 : i32
    %c0_i32_0 = arith.constant 0 : i32
    %c0_i32_1 = arith.constant 0 : i32
    return %arg0, %arg1, %c0_i32, %c0_i32_0 : i32, i32, i32, i32
  }
  func.func @transform_3(%arg0: i32, %arg1: i32) -> (i32, i32, i32, i32) {
    %c1_i32 = arith.constant 1 : i32
    %0 = arith.addi %arg1, %c1_i32 : i32
    %c4_i32 = arith.constant 4 : i32
    %1 = arith.muli %0, %c4_i32 : i32
    %c0_i32 = arith.constant 0 : i32
    %c0_i32_0 = arith.constant 0 : i32
    %c0_i32_1 = arith.constant 0 : i32
    return %arg0, %1, %c0_i32, %c0_i32_0 : i32, i32, i32, i32
  }
  func.func @transform_4(%arg0: i32, %arg1: i32) -> (i32, i32, i32) {
    %c0_i32 = arith.constant 0 : i32
    %c0_i32_0 = arith.constant 0 : i32
    %c0_i32_1 = arith.constant 0 : i32
    %c0_i32_2 = arith.constant 0 : i32
    return %c0_i32, %c0_i32_0, %c0_i32_1 : i32, i32, i32
  }
  func.func @transform_5(%arg0: i32, %arg1: i32) -> (i32, i32, i32) {
    %c0_i32 = arith.constant 0 : i32
    %c0_i32_0 = arith.constant 0 : i32
    %c0_i32_1 = arith.constant 0 : i32
    %c0_i32_2 = arith.constant 0 : i32
    return %c0_i32, %c0_i32_0, %c0_i32_1 : i32, i32, i32
  }
  func.func @transform_6(%arg0: i32, %arg1: i32) -> (i32, i32) {
    %c0_i32 = arith.constant 0 : i32
    %c0_i32_0 = arith.constant 0 : i32
    %c0_i32_1 = arith.constant 0 : i32
    return %c0_i32, %c0_i32_0 : i32, i32
  }
  func.func @transform_7(%arg0: i32, %arg1: i32) -> (i32, i32) {
    %c0_i32 = arith.constant 0 : i32
    %c0_i32_0 = arith.constant 0 : i32
    %c0_i32_1 = arith.constant 0 : i32
    return %c0_i32, %c0_i32_0 : i32, i32
  }
  func.func @transform_8(%arg0: i32, %arg1: i32) -> (i32, i32, i32, i32) {
    %c0_i32 = arith.constant 0 : i32
    %c0_i32_0 = arith.constant 0 : i32
    %c0_i32_1 = arith.constant 0 : i32
    return %arg0, %arg1, %c0_i32, %c0_i32_0 : i32, i32, i32, i32
  }
}

module attributes {stable_mosaic.version = 11 : i64} {
  func.func @_conv3x3_bn_lrelu_kernel(%arg0: i32, %arg1: i32, %arg2: memref<1x8x18x8xbf16, #tpu.memory_space<vmem>>, %arg3: memref<1x2x18x8xbf16, #tpu.memory_space<vmem>>, %arg4: memref<9x8x8xbf16, #tpu.memory_space<vmem>>, %arg5: memref<1x8xf32, #tpu.memory_space<vmem>>, %arg6: memref<1x8xf32, #tpu.memory_space<vmem>>, %arg7: memref<1x8x16x8xf32, #tpu.memory_space<vmem>>, %arg8: memref<128x8xf32, #tpu.memory_space<vmem>>) attributes {dimension_semantics = [#tpu.dimension_semantics<parallel>, #tpu.dimension_semantics<parallel>], iteration_bounds = array<i64: 2, 2>, scalar_prefetch = 0 : i64, scratch_operands = 1 : i64, tpu.core_type = #tpu.core_type<tc>, window_params = [{transform_indices = @transform_0, window_bounds = array<i64: 1, 8, 18, 8>}, {transform_indices = @transform_1, window_bounds = array<i64: 1, 2, 18, 8>}, {pipeline_mode = #tpu.pipeline_mode<synchronous>, transform_indices = @transform_2, window_bounds = array<i64: 9, 8, 8>}, {pipeline_mode = #tpu.pipeline_mode<synchronous>, transform_indices = @transform_3, window_bounds = array<i64: 1, 8>}, {pipeline_mode = #tpu.pipeline_mode<synchronous>, transform_indices = @transform_4, window_bounds = array<i64: 1, 8>}, {transform_indices = @transform_5, window_bounds = array<i64: 1, 8, 16, 8>}]} {
    %cst = arith.constant 0.000000e+00 : f32
    %0 = vector.broadcast %cst : f32 to vector<128x8xf32>
    %c0 = arith.constant 0 : index
    %c0_0 = arith.constant 0 : index
    %1 = vector.load %arg8[%c0, %c0_0] : memref<128x8xf32, #tpu.memory_space<vmem>>, vector<128x8xf32>
    tpu.vector_store %arg8[%c0, %c0_0], %0 {strides = array<i32>} : memref<128x8xf32, #tpu.memory_space<vmem>>, vector<128x8xf32>,
    %c0_1 = arith.constant 0 : index
    %c0_2 = arith.constant 0 : index
    %c0_3 = arith.constant 0 : index
    %c0_4 = arith.constant 0 : index
    %2 = vector.load %arg2[%c0_1, %c0_2, %c0_3, %c0_4] : memref<1x8x18x8xbf16, #tpu.memory_space<vmem>>, vector<1x8x18x8xbf16>
    %3 = vector.shape_cast %2 : vector<1x8x18x8xbf16> to vector<8x18x8xbf16>
    %c0_5 = arith.constant 0 : index
    %c0_6 = arith.constant 0 : index
    %c0_7 = arith.constant 0 : index
    %c0_8 = arith.constant 0 : index
    %4 = vector.load %arg3[%c0_5, %c0_6, %c0_7, %c0_8] : memref<1x2x18x8xbf16, #tpu.memory_space<vmem>>, vector<1x2x18x8xbf16>
    %5 = vector.shape_cast %4 : vector<1x2x18x8xbf16> to vector<2x18x8xbf16>
    %6 = tpu.concatenate %3, %5 in 0 : vector<8x18x8xbf16>, vector<2x18x8xbf16> -> vector<10x18x8xbf16>
    %7 = vector.extract_strided_slice %6 {offsets = [0, 0, 0], sizes = [10, 16, 8], strides = [1, 1, 1]} : vector<10x18x8xbf16> to vector<10x16x8xbf16>
    %8 = vector.shape_cast %7 : vector<10x16x8xbf16> to vector<160x8xbf16>
    %9 = vector.extract_strided_slice %8 {offsets = [0, 0], sizes = [128, 8], strides = [1, 1]} : vector<160x8xbf16> to vector<128x8xbf16>
    %c0_9 = arith.constant 0 : index
    %c0_10 = arith.constant 0 : index
    %10 = vector.load %arg8[%c0_9, %c0_10] : memref<128x8xf32, #tpu.memory_space<vmem>>, vector<128x8xf32>
    %c0_11 = arith.constant 0 : index
    %c0_12 = arith.constant 0 : index
    %c0_13 = arith.constant 0 : index
    %11 = vector.load %arg4[%c0_11, %c0_12, %c0_13] : memref<9x8x8xbf16, #tpu.memory_space<vmem>>, vector<1x8x8xbf16>
    %12 = vector.shape_cast %11 : vector<1x8x8xbf16> to vector<8x8xbf16>
    %cst_14 = arith.constant dense<0.000000e+00> : vector<128x8xf32>
    %13 = tpu.matmul %9, %12, %cst_14 {dimension_numbers = #tpu.dot_dimension_numbers<[1], [0], [0], [1], [0, 0, 1, 1], [], []>} : vector<128x8xbf16>, vector<8x8xbf16>, vector<128x8xf32> -> vector<128x8xf32>
    %14 = arith.addf %10, %13 : vector<128x8xf32>
    %c0_15 = arith.constant 0 : index
    %c0_16 = arith.constant 0 : index
    %15 = vector.load %arg8[%c0_15, %c0_16] : memref<128x8xf32, #tpu.memory_space<vmem>>, vector<128x8xf32>
    tpu.vector_store %arg8[%c0_15, %c0_16], %14 {strides = array<i32>} : memref<128x8xf32, #tpu.memory_space<vmem>>, vector<128x8xf32>,
    %16 = vector.extract_strided_slice %8 {offsets = [16, 0], sizes = [128, 8], strides = [1, 1]} : vector<160x8xbf16> to vector<128x8xbf16>
    %c0_17 = arith.constant 0 : index
    %c0_18 = arith.constant 0 : index
    %17 = vector.load %arg8[%c0_17, %c0_18] : memref<128x8xf32, #tpu.memory_space<vmem>>, vector<128x8xf32>
    %c3 = arith.constant 3 : index
    %c0_19 = arith.constant 0 : index
    %c0_20 = arith.constant 0 : index
    %18 = vector.load %arg4[%c3, %c0_19, %c0_20] : memref<9x8x8xbf16, #tpu.memory_space<vmem>>, vector<1x8x8xbf16>
    %19 = vector.shape_cast %18 : vector<1x8x8xbf16> to vector<8x8xbf16>
    %cst_21 = arith.constant dense<0.000000e+00> : vector<128x8xf32>
    %20 = tpu.matmul %16, %19, %cst_21 {dimension_numbers = #tpu.dot_dimension_numbers<[1], [0], [0], [1], [0, 0, 1, 1], [], []>} : vector<128x8xbf16>, vector<8x8xbf16>, vector<128x8xf32> -> vector<128x8xf32>
    %21 = arith.addf %17, %20 : vector<128x8xf32>
    %c0_22 = arith.constant 0 : index
    %c0_23 = arith.constant 0 : index
    %22 = vector.load %arg8[%c0_22, %c0_23] : memref<128x8xf32, #tpu.memory_space<vmem>>, vector<128x8xf32>
    tpu.vector_store %arg8[%c0_22, %c0_23], %21 {strides = array<i32>} : memref<128x8xf32, #tpu.memory_space<vmem>>, vector<128x8xf32>,
    %23 = vector.extract_strided_slice %8 {offsets = [32, 0], sizes = [128, 8], strides = [1, 1]} : vector<160x8xbf16> to vector<128x8xbf16>
    %c0_24 = arith.constant 0 : index
    %c0_25 = arith.constant 0 : index
    %24 = vector.load %arg8[%c0_24, %c0_25] : memref<128x8xf32, #tpu.memory_space<vmem>>, vector<128x8xf32>
    %c6 = arith.constant 6 : index
    %c0_26 = arith.constant 0 : index
    %c0_27 = arith.constant 0 : index
    %25 = vector.load %arg4[%c6, %c0_26, %c0_27] : memref<9x8x8xbf16, #tpu.memory_space<vmem>>, vector<1x8x8xbf16>
    %26 = vector.shape_cast %25 : vector<1x8x8xbf16> to vector<8x8xbf16>
    %cst_28 = arith.constant dense<0.000000e+00> : vector<128x8xf32>
    %27 = tpu.matmul %23, %26, %cst_28 {dimension_numbers = #tpu.dot_dimension_numbers<[1], [0], [0], [1], [0, 0, 1, 1], [], []>} : vector<128x8xbf16>, vector<8x8xbf16>, vector<128x8xf32> -> vector<128x8xf32>
    %28 = arith.addf %24, %27 : vector<128x8xf32>
    %c0_29 = arith.constant 0 : index
    %c0_30 = arith.constant 0 : index
    %29 = vector.load %arg8[%c0_29, %c0_30] : memref<128x8xf32, #tpu.memory_space<vmem>>, vector<128x8xf32>
    tpu.vector_store %arg8[%c0_29, %c0_30], %28 {strides = array<i32>} : memref<128x8xf32, #tpu.memory_space<vmem>>, vector<128x8xf32>,
    %30 = vector.extract_strided_slice %6 {offsets = [0, 1, 0], sizes = [10, 16, 8], strides = [1, 1, 1]} : vector<10x18x8xbf16> to vector<10x16x8xbf16>
    %31 = vector.shape_cast %30 : vector<10x16x8xbf16> to vector<160x8xbf16>
    %32 = vector.extract_strided_slice %31 {offsets = [0, 0], sizes = [128, 8], strides = [1, 1]} : vector<160x8xbf16> to vector<128x8xbf16>
    %c0_31 = arith.constant 0 : index
    %c0_32 = arith.constant 0 : index
    %33 = vector.load %arg8[%c0_31, %c0_32] : memref<128x8xf32, #tpu.memory_space<vmem>>, vector<128x8xf32>
    %c1 = arith.constant 1 : index
    %c0_33 = arith.constant 0 : index
    %c0_34 = arith.constant 0 : index
    %34 = vector.load %arg4[%c1, %c0_33, %c0_34] : memref<9x8x8xbf16, #tpu.memory_space<vmem>>, vector<1x8x8xbf16>
    %35 = vector.shape_cast %34 : vector<1x8x8xbf16> to vector<8x8xbf16>
    %cst_35 = arith.constant dense<0.000000e+00> : vector<128x8xf32>
    %36 = tpu.matmul %32, %35, %cst_35 {dimension_numbers = #tpu.dot_dimension_numbers<[1], [0], [0], [1], [0, 0, 1, 1], [], []>} : vector<128x8xbf16>, vector<8x8xbf16>, vector<128x8xf32> -> vector<128x8xf32>
    %37 = arith.addf %33, %36 : vector<128x8xf32>
    %c0_36 = arith.constant 0 : index
    %c0_37 = arith.constant 0 : index
    %38 = vector.load %arg8[%c0_36, %c0_37] : memref<128x8xf32, #tpu.memory_space<vmem>>, vector<128x8xf32>
    tpu.vector_store %arg8[%c0_36, %c0_37], %37 {strides = array<i32>} : memref<128x8xf32, #tpu.memory_space<vmem>>, vector<128x8xf32>,
    %39 = vector.extract_strided_slice %31 {offsets = [16, 0], sizes = [128, 8], strides = [1, 1]} : vector<160x8xbf16> to vector<128x8xbf16>
    %c0_38 = arith.constant 0 : index
    %c0_39 = arith.constant 0 : index
    %40 = vector.load %arg8[%c0_38, %c0_39] : memref<128x8xf32, #tpu.memory_space<vmem>>, vector<128x8xf32>
    %c4 = arith.constant 4 : index
    %c0_40 = arith.constant 0 : index
    %c0_41 = arith.constant 0 : index
    %41 = vector.load %arg4[%c4, %c0_40, %c0_41] : memref<9x8x8xbf16, #tpu.memory_space<vmem>>, vector<1x8x8xbf16>
    %42 = vector.shape_cast %41 : vector<1x8x8xbf16> to vector<8x8xbf16>
    %cst_42 = arith.constant dense<0.000000e+00> : vector<128x8xf32>
    %43 = tpu.matmul %39, %42, %cst_42 {dimension_numbers = #tpu.dot_dimension_numbers<[1], [0], [0], [1], [0, 0, 1, 1], [], []>} : vector<128x8xbf16>, vector<8x8xbf16>, vector<128x8xf32> -> vector<128x8xf32>
    %44 = arith.addf %40, %43 : vector<128x8xf32>
    %c0_43 = arith.constant 0 : index
    %c0_44 = arith.constant 0 : index
    %45 = vector.load %arg8[%c0_43, %c0_44] : memref<128x8xf32, #tpu.memory_space<vmem>>, vector<128x8xf32>
    tpu.vector_store %arg8[%c0_43, %c0_44], %44 {strides = array<i32>} : memref<128x8xf32, #tpu.memory_space<vmem>>, vector<128x8xf32>,
    %46 = vector.extract_strided_slice %31 {offsets = [32, 0], sizes = [128, 8], strides = [1, 1]} : vector<160x8xbf16> to vector<128x8xbf16>
    %c0_45 = arith.constant 0 : index
    %c0_46 = arith.constant 0 : index
    %47 = vector.load %arg8[%c0_45, %c0_46] : memref<128x8xf32, #tpu.memory_space<vmem>>, vector<128x8xf32>
    %c7 = arith.constant 7 : index
    %c0_47 = arith.constant 0 : index
    %c0_48 = arith.constant 0 : index
    %48 = vector.load %arg4[%c7, %c0_47, %c0_48] : memref<9x8x8xbf16, #tpu.memory_space<vmem>>, vector<1x8x8xbf16>
    %49 = vector.shape_cast %48 : vector<1x8x8xbf16> to vector<8x8xbf16>
    %cst_49 = arith.constant dense<0.000000e+00> : vector<128x8xf32>
    %50 = tpu.matmul %46, %49, %cst_49 {dimension_numbers = #tpu.dot_dimension_numbers<[1], [0], [0], [1], [0, 0, 1, 1], [], []>} : vector<128x8xbf16>, vector<8x8xbf16>, vector<128x8xf32> -> vector<128x8xf32>
    %51 = arith.addf %47, %50 : vector<128x8xf32>
    %c0_50 = arith.constant 0 : index
    %c0_51 = arith.constant 0 : index
    %52 = vector.load %arg8[%c0_50, %c0_51] : memref<128x8xf32, #tpu.memory_space<vmem>>, vector<128x8xf32>
    tpu.vector_store %arg8[%c0_50, %c0_51], %51 {strides = array<i32>} : memref<128x8xf32, #tpu.memory_space<vmem>>, vector<128x8xf32>,
    %53 = vector.extract_strided_slice %6 {offsets = [0, 2, 0], sizes = [10, 16, 8], strides = [1, 1, 1]} : vector<10x18x8xbf16> to vector<10x16x8xbf16>
    %54 = vector.shape_cast %53 : vector<10x16x8xbf16> to vector<160x8xbf16>
    %55 = vector.extract_strided_slice %54 {offsets = [0, 0], sizes = [128, 8], strides = [1, 1]} : vector<160x8xbf16> to vector<128x8xbf16>
    %c0_52 = arith.constant 0 : index
    %c0_53 = arith.constant 0 : index
    %56 = vector.load %arg8[%c0_52, %c0_53] : memref<128x8xf32, #tpu.memory_space<vmem>>, vector<128x8xf32>
    %c2 = arith.constant 2 : index
    %c0_54 = arith.constant 0 : index
    %c0_55 = arith.constant 0 : index
    %57 = vector.load %arg4[%c2, %c0_54, %c0_55] : memref<9x8x8xbf16, #tpu.memory_space<vmem>>, vector<1x8x8xbf16>
    %58 = vector.shape_cast %57 : vector<1x8x8xbf16> to vector<8x8xbf16>
    %cst_56 = arith.constant dense<0.000000e+00> : vector<128x8xf32>
    %59 = tpu.matmul %55, %58, %cst_56 {dimension_numbers = #tpu.dot_dimension_numbers<[1], [0], [0], [1], [0, 0, 1, 1], [], []>} : vector<128x8xbf16>, vector<8x8xbf16>, vector<128x8xf32> -> vector<128x8xf32>
    %60 = arith.addf %56, %59 : vector<128x8xf32>
    %c0_57 = arith.constant 0 : index
    %c0_58 = arith.constant 0 : index
    %61 = vector.load %arg8[%c0_57, %c0_58] : memref<128x8xf32, #tpu.memory_space<vmem>>, vector<128x8xf32>
    tpu.vector_store %arg8[%c0_57, %c0_58], %60 {strides = array<i32>} : memref<128x8xf32, #tpu.memory_space<vmem>>, vector<128x8xf32>,
    %62 = vector.extract_strided_slice %54 {offsets = [16, 0], sizes = [128, 8], strides = [1, 1]} : vector<160x8xbf16> to vector<128x8xbf16>
    %c0_59 = arith.constant 0 : index
    %c0_60 = arith.constant 0 : index
    %63 = vector.load %arg8[%c0_59, %c0_60] : memref<128x8xf32, #tpu.memory_space<vmem>>, vector<128x8xf32>
    %c5 = arith.constant 5 : index
    %c0_61 = arith.constant 0 : index
    %c0_62 = arith.constant 0 : index
    %64 = vector.load %arg4[%c5, %c0_61, %c0_62] : memref<9x8x8xbf16, #tpu.memory_space<vmem>>, vector<1x8x8xbf16>
    %65 = vector.shape_cast %64 : vector<1x8x8xbf16> to vector<8x8xbf16>
    %cst_63 = arith.constant dense<0.000000e+00> : vector<128x8xf32>
    %66 = tpu.matmul %62, %65, %cst_63 {dimension_numbers = #tpu.dot_dimension_numbers<[1], [0], [0], [1], [0, 0, 1, 1], [], []>} : vector<128x8xbf16>, vector<8x8xbf16>, vector<128x8xf32> -> vector<128x8xf32>
    %67 = arith.addf %63, %66 : vector<128x8xf32>
    %c0_64 = arith.constant 0 : index
    %c0_65 = arith.constant 0 : index
    %68 = vector.load %arg8[%c0_64, %c0_65] : memref<128x8xf32, #tpu.memory_space<vmem>>, vector<128x8xf32>
    tpu.vector_store %arg8[%c0_64, %c0_65], %67 {strides = array<i32>} : memref<128x8xf32, #tpu.memory_space<vmem>>, vector<128x8xf32>,
    %69 = vector.extract_strided_slice %54 {offsets = [32, 0], sizes = [128, 8], strides = [1, 1]} : vector<160x8xbf16> to vector<128x8xbf16>
    %c0_66 = arith.constant 0 : index
    %c0_67 = arith.constant 0 : index
    %70 = vector.load %arg8[%c0_66, %c0_67] : memref<128x8xf32, #tpu.memory_space<vmem>>, vector<128x8xf32>
    %c8 = arith.constant 8 : index
    %c0_68 = arith.constant 0 : index
    %c0_69 = arith.constant 0 : index
    %71 = vector.load %arg4[%c8, %c0_68, %c0_69] : memref<9x8x8xbf16, #tpu.memory_space<vmem>>, vector<1x8x8xbf16>
    %72 = vector.shape_cast %71 : vector<1x8x8xbf16> to vector<8x8xbf16>
    %cst_70 = arith.constant dense<0.000000e+00> : vector<128x8xf32>
    %73 = tpu.matmul %69, %72, %cst_70 {dimension_numbers = #tpu.dot_dimension_numbers<[1], [0], [0], [1], [0, 0, 1, 1], [], []>} : vector<128x8xbf16>, vector<8x8xbf16>, vector<128x8xf32> -> vector<128x8xf32>
    %74 = arith.addf %70, %73 : vector<128x8xf32>
    %c0_71 = arith.constant 0 : index
    %c0_72 = arith.constant 0 : index
    %75 = vector.load %arg8[%c0_71, %c0_72] : memref<128x8xf32, #tpu.memory_space<vmem>>, vector<128x8xf32>
    tpu.vector_store %arg8[%c0_71, %c0_72], %74 {strides = array<i32>} : memref<128x8xf32, #tpu.memory_space<vmem>>, vector<128x8xf32>,
    %c0_73 = arith.constant 0 : index
    %c0_74 = arith.constant 0 : index
    %76 = vector.load %arg8[%c0_73, %c0_74] : memref<128x8xf32, #tpu.memory_space<vmem>>, vector<128x8xf32>
    %c0_75 = arith.constant 0 : index
    %c0_76 = arith.constant 0 : index
    %77 = vector.load %arg5[%c0_75, %c0_76] : memref<1x8xf32, #tpu.memory_space<vmem>>, vector<1x8xf32>
    %78 = vector.broadcast %77 : vector<1x8xf32> to vector<128x8xf32>
    %79 = arith.mulf %76, %78 : vector<128x8xf32>
    %c0_77 = arith.constant 0 : index
    %c0_78 = arith.constant 0 : index
    %80 = vector.load %arg6[%c0_77, %c0_78] : memref<1x8xf32, #tpu.memory_space<vmem>>, vector<1x8xf32>
    %81 = vector.broadcast %80 : vector<1x8xf32> to vector<128x8xf32>
    %82 = arith.addf %79, %81 : vector<128x8xf32>
    %cst_79 = arith.constant 0.000000e+00 : f32
    %83 = vector.broadcast %cst_79 : f32 to vector<128x8xf32>
    %84 = arith.cmpf oge, %82, %83 : vector<128x8xf32>
    %cst_80 = arith.constant 0.00999999977 : f32
    %85 = vector.broadcast %cst_80 : f32 to vector<128x8xf32>
    %86 = arith.mulf %85, %82 : vector<128x8xf32>
    %87 = arith.select %84, %82, %86 : vector<128x8xi1>, vector<128x8xf32>
    %88 = vector.shape_cast %87 : vector<128x8xf32> to vector<8x16x8xf32>
    %c0_81 = arith.constant 0 : index
    %c0_82 = arith.constant 0 : index
    %c0_83 = arith.constant 0 : index
    %c0_84 = arith.constant 0 : index
    %89 = vector.load %arg7[%c0_81, %c0_82, %c0_83, %c0_84] : memref<1x8x16x8xf32, #tpu.memory_space<vmem>>, vector<1x8x16x8xf32>
    %90 = vector.shape_cast %89 : vector<1x8x16x8xf32> to vector<8x16x8xf32>
    %91 = vector.shape_cast %88 : vector<8x16x8xf32> to vector<1x8x16x8xf32>
    tpu.vector_store %arg7[%c0_81, %c0_82, %c0_83, %c0_84], %91 {strides = array<i32>} : memref<1x8x16x8xf32, #tpu.memory_space<vmem>>, vector<1x8x16x8xf32>,
    return
  }
  func.func @transform_0(%arg0: i32, %arg1: i32) -> (i32, i32, i32, i32) {
    %c0_i32 = arith.constant 0 : i32
    %c0_i32_0 = arith.constant 0 : i32
    %c0_i32_1 = arith.constant 0 : i32
    return %arg0, %arg1, %c0_i32, %c0_i32_0 : i32, i32, i32, i32
  }
  func.func @transform_1(%arg0: i32, %arg1: i32) -> (i32, i32, i32, i32) {
    %c1_i32 = arith.constant 1 : i32
    %0 = arith.addi %arg1, %c1_i32 : i32
    %c4_i32 = arith.constant 4 : i32
    %1 = arith.muli %0, %c4_i32 : i32
    %c0_i32 = arith.constant 0 : i32
    %c0_i32_0 = arith.constant 0 : i32
    %c0_i32_1 = arith.constant 0 : i32
    return %arg0, %1, %c0_i32, %c0_i32_0 : i32, i32, i32, i32
  }
  func.func @transform_2(%arg0: i32, %arg1: i32) -> (i32, i32, i32) {
    %c0_i32 = arith.constant 0 : i32
    %c0_i32_0 = arith.constant 0 : i32
    %c0_i32_1 = arith.constant 0 : i32
    %c0_i32_2 = arith.constant 0 : i32
    return %c0_i32, %c0_i32_0, %c0_i32_1 : i32, i32, i32
  }
  func.func @transform_3(%arg0: i32, %arg1: i32) -> (i32, i32) {
    %c0_i32 = arith.constant 0 : i32
    %c0_i32_0 = arith.constant 0 : i32
    %c0_i32_1 = arith.constant 0 : i32
    return %c0_i32, %c0_i32_0 : i32, i32
  }
  func.func @transform_4(%arg0: i32, %arg1: i32) -> (i32, i32) {
    %c0_i32 = arith.constant 0 : i32
    %c0_i32_0 = arith.constant 0 : i32
    %c0_i32_1 = arith.constant 0 : i32
    return %c0_i32, %c0_i32_0 : i32, i32
  }
  func.func @transform_5(%arg0: i32, %arg1: i32) -> (i32, i32, i32, i32) {
    %c0_i32 = arith.constant 0 : i32
    %c0_i32_0 = arith.constant 0 : i32
    %c0_i32_1 = arith.constant 0 : i32
    return %arg0, %arg1, %c0_i32, %c0_i32_0 : i32, i32, i32, i32
  }
}

</mosaic_0001>

<bundles_post_ra>
// kernel: up_forward.3
= control target key start
LH: loop header
LB: loop body
LE: loop exit
PB: predicated region body
PF: predicated region fallthrough
CT: control target
= control target key end

     0   :  { %s803_s12 = smov 0   ;;  %s805_s13 = smov 0   ;;  %s937_s0 = inlined_call_operand.vmem [shape: f32[16,8], index: 0, kind: input, shape index: {}, may-alias: {0,1}]   ;;  %s938_s1 = inlined_call_operand.vmem [shape: f32[16,8], index: 1, kind: input, shape index: {}, may-alias: {0,1}]   ;;  %s939_s2 = inlined_call_operand.vmem [shape: f32[2,6,8,8], index: 2, kind: input, shape index: {}]   ;;  %s940_s3 = inlined_call_operand.vmem [shape: bf16[2,6,16,16], index: 3, kind: output, shape index: {}]  }
   0x1   :  { %s807_s14 = smov 0   ;;  %s809_s15 = smov 0  }
   0x2   :  { %s811_s16 = smov 0   ;;  %s813_s17 = smov 0  }
   0x3   :  { %s815_s18 = smov 0  }
   0x4 LB: > { %s22_s19 = sadd.s32 1, %s773_s16  ;;  %s25_s20 = sadd.s32 1, %s777_s17  ;;  %s781_s18 = sphi %s815_s18, %s13_s18   ;;  %s777_s17 = sphi %s813_s17, %s947_s17   ;;  %s773_s16 = sphi %s811_s16, %s946_s16   ;;  %s769_s15 = sphi %s809_s15, %s945_s15   ;;  %s765_s14 = sphi %s807_s14, %s944_s14   ;;  %s761_s13 = sphi %s805_s13, %s943_s13   ;;  %s757_s12 = sphi %s803_s12, %s942_s12  }
   0x5   : > { %p23_p0 = scmp.ge.s32.totalorder %s22_s19, 2  ;;  %s634_s21 = sadd.s32 4294967295, %s781_s18  }
   0x6   : > { %p117_p1 = scmp.ne.s32.totalorder %s761_s13, %s757_s12  ;;  %p118_p2 = scmp.eq.s32.totalorder %s634_s21, 3 }
   0x7   : > { %s949_s19 = smov (%p23_p0, %s22_s19), 0  ;;  %s951_s20 = smov (!%p23_p0, %s25_s20), %s777_s17 }
   0x8   : > { %s103_s22 = ssub.s32 %s773_s16, %s949_s19  ;;  %p27_p3 = scmp.ge.s32.totalorder %s951_s20, 2 }
   0x9   : > { %p638_p4 = scmp.ge.s32.totalorder %s781_s18, 1  ;;  %p849_p5 = por %p118_p2, %p117_p1 }
   0xa   : > { %p160_p6 = scmp.lt.s32.totalorder %s781_s18, 5  ;;  %s953_s20 = smov (%p27_p3, %s951_s20), 0 }
   0xb   : > { %s102_s24 = ssub.s32 %s777_s17, %s953_s20  ;;  %s107_s26 = sadd.s32 1, %s761_s13 }
   0xc   : > { %p161_p7 = pnand %p638_p4, %p160_p6  ;;  %s104_s25 = sor.u32 %s103_s22, %s102_s24 }
   0xd   : > { %p105_p8 = scmp.eq.s32.totalorder %s104_s25, 0  ;;  %p191_p9 = scmp.lt.s32.totalorder (!%p161_p7), %s769_s15, 1 }
   0xe   : > { %164 = sbr.rel (%p161_p7) target bundleno = 307 (0x133), region = 32  ;;  %p187_p10 = scmp.lt.s32.totalorder (!%p161_p7), %s765_s14, 1 }
   0xf   : > { %s860_s27 = scalar_select %p105_p8, %s761_s13, %s107_s26  }
  0x10   : > { %s184_s25 = sand.u32 (!%p161_p7), 1, %s757_s12  }
  0x11   : > { %s668_s26 = smul.u32 (!%p161_p7), 24, %s184_s25 }
  0x13   : > { %v203_v0 = vld [vmem:[%s938_s1 + $0x8] sm:$0xff]  ;;  %vm205_vm0 = vcmask 64512   ;;  %v202_v1 = vld [vmem:[%s938_s1] sm:$0xff]  ;;  %s192_s5 = scalar_select %p191_p9, %s769_s15, 1  ;;  %vm479_vm1 = vcmask 125952  }
  0x14   : > { %641 = vmatpush.xpose.msk.msra.mxu0 %vm205_vm0, %v203_v0  ;;  %644 = vmatpush.xpose.msk.msra.mxu1 %vm205_vm0, %v203_v0  ;;  %s188_s10 = scalar_select %p187_p10, %s765_s14, 1 }
  0x15   : > { %647 = vmatpush.xpose.msk.msra.mxu2 %vm205_vm0, %v203_v0  ;;  %650 = vmatpush.xpose.msk.msra.mxu3 %vm205_vm0, %v203_v0  ;;  %s669_s6 = smul.u32 48, %s192_s5  ;;  %s186_s28 = scalar_lea.vmem [#allocation2], %s668_s26 }
  0x16   : > { %s639_s11 = sshll.u32 %s188_s10, 3  ;;  %s670_s12 = smul.u32 (%p849_p5), 12, %s769_s15 }
  0x17   : > { %s195_s9 = scalar_lea.vmem %s939_s2, %s669_s6  ;;  %s190_s24 = scalar_lea.vmem %s937_s0, %s639_s11 }
  0x18   : > { %642 = vmatpush.xpose.msk.msra.mxu0 %vm205_vm0, %v202_v1  ;;  %645 = vmatpush.xpose.msk.msra.mxu1 %vm205_vm0, %v202_v1  ;;  %v196_v2 = vld [vmem:[%s195_s9] sm:$0xff]  ;;  %v197_v3 = vld [vmem:[%s195_s9 + $0x8] sm:$0xff]  ;;  %v198_v4 = vld [vmem:[%s195_s9 + $0x10] sm:$0xff]  ;;  %s494_s29 = sadd.s32 (%p849_p5), %s765_s14, %s670_s12 }
  0x19   : > { %648 = vmatpush.xpose.msk.msra.mxu2 %vm205_vm0, %v202_v1  ;;  %651 = vmatpush.xpose.msk.msra.mxu3 %vm205_vm0, %v202_v1  ;;  %v199_v5 = vld [vmem:[%s195_s9 + $0x18] sm:$0xff]  ;;  %v200_v6 = vld [vmem:[%s195_s9 + $0x20] sm:$0xff]  ;;  %v201_v7 = vld [vmem:[%s195_s9 + $0x28] sm:$0xff]  ;;  %s665_s30 = sshll.u32 (%p849_p5), %s494_s29, 2 }
  0x1a   : > { %v204_v8 = vld [vmem:[%s190_s24] sm:$0xff]  ;;  %s496_s6 = scalar_lea.vmem (%p849_p5), %s940_s3, %s665_s30 }
  0x1b   : > { %643 = vmatmul.msk.f32.vlgmr.msra.gmra.mxu0 %vm205_vm0, %v196_v2  ;;  %646 = vmatmul.msk.f32.vlgmr.msra.gmra.mxu1 %vm205_vm0, %v197_v3 }
  0x1c   : > { %653 = vmatpush.xpose.msk.msrb.mxu0 %vm205_vm0, %v203_v0  ;;  %656 = vmatpush.xpose.msk.msrb.mxu1 %vm205_vm0, %v203_v0 }
  0x1d   : > { %649 = vmatmul.msk.f32.vlgmr.msra.gmra.mxu2 %vm205_vm0, %v198_v4  ;;  %652 = vmatmul.msk.f32.vlgmr.msra.gmra.mxu3 %vm205_vm0, %v199_v5 }
  0x20   : > { %654 = vmatpush.xpose.msk.msrb.mxu0 %vm205_vm0, %v202_v1  ;;  %657 = vmatpush.xpose.msk.msrb.mxu1 %vm205_vm0, %v202_v1 }
  0x23   : > { %655 = vmatmul.msk.f32.vlgmr.msrb.gmra.mxu0 %vm205_vm0, %v200_v6  ;;  %658 = vmatmul.msk.f32.vlgmr.msrb.gmra.mxu1 %vm205_vm0, %v201_v7 }
  0x98   : > { %v232_v9 = vpop.f32.mrf.mxu0  ;;  %v255_v10 = vpop.f32.mrf.mxu1 }
  0x99   : > { %368 = vmatpush.msrb.mxu2 %v232_v9  ;;  %388 = vmatpush.msrb.mxu3 %v255_v10 }
  0x9a   : > { %659 = vmatmul.msk.f32.vlgmr.msrb.gmra.mxu2 %vm205_vm0, %v204_v8  ;;  %660 = vmatmul.msk.f32.vlgmr.msrb.gmra.mxu3 %vm205_vm0, %v204_v8 }
  0xa0   : > { %v324_v11 = vpop.f32.mrf.mxu0  ;;  %v347_v12 = vpop.f32.mrf.mxu1 }
  0xa1   : > { %448 = vmatpush.msra.mxu2 %v324_v11  ;;  %468 = vmatpush.msra.mxu3 %v347_v12  ;;  %v278_v13 = vpop.f32.mrf.mxu2  ;;  %v301_v14 = vpop.f32.mrf.mxu3 }
  0xa2   : > { %408 = vmatpush.msra.mxu0 %v278_v13  ;;  %428 = vmatpush.msra.mxu1 %v301_v14 }
  0xa3   : > { %663 = vmatmul.msk.f32.vlgmr.msra.gmra.mxu2 %vm205_vm0, %v204_v8  ;;  %664 = vmatmul.msk.f32.vlgmr.msra.gmra.mxu3 %vm205_vm0, %v204_v8 }
  0xa4   : > { %661 = vmatmul.msk.f32.vlgmr.msra.gmra.mxu0 %vm205_vm0, %v204_v8  ;;  %662 = vmatmul.msk.f32.vlgmr.msra.gmra.mxu1 %vm205_vm0, %v204_v8 }
 0x11d   : > { %v370_v15 = vpop.f32.mrf.mxu2  ;;  %v390_v16 = vpop.f32.mrf.mxu3 }
 0x11e   : > { %v473_v17 = vpack.c.bf16 %v370_v15, %v370_v15  ;;  %v474_v18 = vpack.c.bf16 %v390_v16, %v390_v16 }
 0x120   : > { %480 = vst.msk [vmem:[%s186_s28] sm:$0xf] %vm479_vm1, %v473_v17 }
 0x121   : > { %481 = vst.msk [vmem:[%s186_s28 + $0x4] sm:$0xf] %vm479_vm1, %v474_v18  ;;  %v410_v19 = vpop.f32.mrf.mxu0  ;;  %v430_v20 = vpop.f32.mrf.mxu1 }
 0x122   : > { %v475_v21 = vpack.c.bf16 %v410_v19, %v410_v19  ;;  %v476_v22 = vpack.c.bf16 %v430_v20, %v430_v20 }
 0x124   : > { %482 = vst.msk [vmem:[%s186_s28 + $0x8] sm:$0xf] %vm479_vm1, %v475_v21 }
 0x125   : > { %483 = vst.msk [vmem:[%s186_s28 + $0xc] sm:$0xf] %vm479_vm1, %v476_v22 }
 0x126   : > { %v450_v23 = vpop.f32.mrf.mxu2  ;;  %v470_v24 = vpop.f32.mrf.mxu3  ;;  %492 = sbr.rel (!%p849_p5) target bundleno = 307 (0x133), region = 36 }
 0x127   : > { %v477_v25 = vpack.c.bf16 %v450_v23, %v450_v23  ;;  %v478_v26 = vpack.c.bf16 %v470_v24, %v470_v24  ;;  %v513_v27 = vld [vmem:[%s186_s28] sm:$0xf] (%p849_p5) }
 0x128   : > { %v515_v28 = vld [vmem:[%s186_s28 + $0x4] sm:$0xf] (%p849_p5)  ;;  %514 = vst [vmem:[%s496_s6] sm:$0xf] (%p849_p5), %v513_v27 }
 0x129   : > { %484 = vst.msk [vmem:[%s186_s28 + $0x10] sm:$0xf] %vm479_vm1, %v477_v25 }
 0x12a   : > { %485 = vst.msk [vmem:[%s186_s28 + $0x14] sm:$0xf] %vm479_vm1, %v478_v26 }
 0x12b   : > { %v517_v29 = vld [vmem:[%s186_s28 + $0x8] sm:$0xf]  ;;  %516 = vst [vmem:[%s496_s6 + $0x8] sm:$0xf] %v515_v28 }
 0x12c   : > { %v519_v30 = vld [vmem:[%s186_s28 + $0xc] sm:$0xf]  ;;  %518 = vst [vmem:[%s496_s6 + $0x10] sm:$0xf] %v517_v29 }
 0x12d   : > { %520 = vst [vmem:[%s496_s6 + $0x18] sm:$0xf] %v519_v30 }
 0x130   : > { %v521_v31 = vld [vmem:[%s186_s28 + $0x10] sm:$0xf] }
 0x131   : > { %v523_v32 = vld [vmem:[%s186_s28 + $0x14] sm:$0xf]  ;;  %522 = vst [vmem:[%s496_s6 + $0x20] sm:$0xf] %v521_v31 }
 0x132   : > { %524 = vst [vmem:[%s496_s6 + $0x28] sm:$0xf] %v523_v32 }
 0x133 PF: > { %s13_s18 = sadd.s32 1, %s781_s18   ;;  %s942_s12 = smov %s761_s13 }
 0x134   : > { %p10_p11 = scmp.ge.s32.totalorder %s13_s18, 6   ;;  %s943_s13 = smov %s860_s27 }
 0x135   : > { %s944_s14 = smov %s773_s16  ;;  %s945_s15 = smov %s777_s17 }
 0x136   : > { %s946_s16 = smov %s949_s19  ;;  %s947_s17 = smov %s953_s20 }
 0x137   :  { %12 = sbr.rel (!%p10_p11) target bundleno = 4 (0x4), region = 106 }

// kernel: up_forward.5
= control target key start
LH: loop header
LB: loop body
LE: loop exit
PB: predicated region body
PF: predicated region fallthrough
CT: control target
= control target key end

     0   :  { %s2366_s18 = smov 0   ;;  %s2368_s19 = smov 0   ;;  %s3208_s0 = inlined_call_operand.vmem [shape: bf16[2,18,18,8], index: 0, kind: input, shape index: {}, may-alias: {0,1}]   ;;  %s3209_s1 = inlined_call_operand.vmem [shape: bf16[2,18,18,8], index: 1, kind: input, shape index: {}, may-alias: {0,1}]   ;;  %s3210_s2 = inlined_call_operand.vmem [shape: bf16[9,8,8], index: 2, kind: input, shape index: {}]   ;;  %s3211_s3 = inlined_call_operand.vmem [shape: f32[1,8], index: 3, kind: input, shape index: {}]   ;;  %s3212_s4 = inlined_call_operand.vmem [shape: f32[1,8], index: 4, kind: input, shape index: {}]   ;;  %s3213_s5 = inlined_call_operand.vmem [shape: f32[2,16,16,8], index: 5, kind: output, shape index: {}]  }
   0x1   :  { %s2370_s20 = smov 0   ;;  %s2372_s21 = smov 0  }
   0x2   :  { %s2374_s22 = smov 0  }
   0x3 LB: > { %s24_s23 = sadd.s32 1, %s2325_s20  ;;  %s27_s24 = sadd.s32 1, %s2329_s21  ;;  %s2333_s22 = sphi %s2374_s22, %s15_s22   ;;  %s2329_s21 = sphi %s2372_s21, %s3221_s21   ;;  %s2325_s20 = sphi %s2370_s20, %s3220_s20   ;;  %s2321_s19 = sphi %s2368_s19, %s3219_s19   ;;  %s2317_s18 = sphi %s2366_s18, %s3218_s18  }
   0x4   : > { %p25_p0 = scmp.ge.s32.totalorder %s24_s23, 2  ;;  %p2085_p1 = scmp.ge.s32.totalorder %s2333_s22, 1 }
   0x5   : > { %p245_p2 = scmp.lt.s32.totalorder %s2333_s22, 5 }
   0x6   : > { %s3223_s23 = smov (%p25_p0, %s24_s23), 0  ;;  %s3225_s24 = smov (!%p25_p0, %s27_s24), %s2329_s21 }
   0x7   : > { %p246_p3 = pnand %p2085_p1, %p245_p2  ;;  %p29_p4 = scmp.ge.s32.totalorder %s3225_s24, 2 }
   0x8   : > { %s2399_s27 = sshll.u32 (!%p246_p3), %s2317_s18, 3  ;;  %p306_p5 = scmp.lt.s32.totalorder (!%p246_p3), %s2321_s19, 1 }
   0x9   : > { %s3227_s24 = smov (%p29_p4, %s3225_s24), 0  ;;  %249 = sbr.rel (%p246_p3) target bundleno = 478 (0x1de), region = 40 }
   0xa   : > { %p308_p6 = scmp.lt.s32.totalorder (!%p246_p3), %s2399_s27, 17  ;;  %p339_p8 = scmp.lt.s32.totalorder (!%p246_p3), %s2399_s27, 15 }
   0xe   : > { %v411_v0 = vld [vmem:[%s3210_s2] sm:$0xf]  ;;  %vm476_vm0 = vcmask 1043456   ;;  %v2135_v2 = vld [vmem:[%s3210_s2 + $0xc] sm:$0xf]  ;;  %s3229_s19 = smov (!%p306_p5, %s2321_s19), 1 }
   0xf   : > { %v478_v1 = vsel %vm476_vm0, %v411_v0, 0  ;;  %v2148_v3 = vld [vmem:[%s3210_s2 + $0x18] sm:$0xf]  ;;  %v588_v4 = vsel %vm476_vm0, %v2135_v2, 0  ;;  %v2161_v6 = vld [vmem:[%s3210_s2 + $0x4] sm:$0xf] }
  0x10   : > { %2246 = vmatpush.bf16.msra.mxu1 %v478_v1  ;;  %2247 = vmatpush.bf16.msra.mxu2 %v478_v1  ;;  %v698_v5 = vsel %vm476_vm0, %v2148_v3, 0  ;;  %s309_s9 = scalar_select %p308_p6, %s2399_s27, 17  ;;  %v1091_v7 = vsel %vm476_vm0, %v2161_v6, 0  ;;  %v2170_v8 = vld [vmem:[%s3210_s2 + $0x10] sm:$0xf]  ;;  %vm348_vm1 = vcmask 64512  }
  0x11   : > { %2248 = vmatpush.bf16.msra.mxu3 %v478_v1  ;;  %s2250_s12 = smul.u32 54, %s3229_s19  ;;  %v1199_v9 = vsel %vm476_vm0, %v2170_v8, 0  ;;  %487 = vmatpush.bf16.msra.mxu0 %v478_v1  ;;  %v2179_v14 = vld [vmem:[%s3210_s2 + $0x1c] sm:$0xf]  ;;  %v2198_v16 = vld [vmem:[%s3210_s2 + $0x8] sm:$0xf] }
  0x12   : > { %s2249_s13 = smul.u32 3, %s309_s9  ;;  %v1307_v15 = vsel %vm476_vm0, %v2179_v14, 0  ;;  %v1540_v18 = vsel %vm476_vm0, %v2198_v16, 0  ;;  %v2207_v20 = vld [vmem:[%s3210_s2 + $0x14] sm:$0xf]  ;;  %s2245_s9 = sadd.s32 8, %s2399_s27 }
  0x13   : > { %v1648_v23 = vsel %vm476_vm0, %v2207_v20, 0  ;;  %vm781_vm2 = vsmask.f32 3328  ;;  %vm782_vm3 = vsmask.f32 7440  ;;  %p326_p7 = scmp.lt.s32.totalorder %s2245_s9, 17 }
  0x14   : > { %597 = vmatpush.bf16.msrb.mxu1 %v588_v4  ;;  %707 = vmatpush.bf16.msrb.mxu2 %v698_v5  ;;  %s312_s14 = sadd.s32 %s2250_s12, %s2249_s13  ;;  %v2216_v58 = vld [vmem:[%s3210_s2 + $0x20] sm:$0xf]  ;;  %vm2507_vm4 = vmor %vm781_vm2, %vm782_vm3  ;;  %vm1400_vm5 = vcmask 1042432   ;;  %vm1401_vm6 = vcmask 1046532   ;;  %s3233_s27 = smov (!%p339_p8, %s2399_s27), 15 }
  0x15   : > { %1100 = vmatpush.bf16.msrb.mxu3 %v1091_v7  ;;  %1208 = vmatpush.bf16.msrb.mxu0 %v1199_v9  ;;  %s2087_s15 = sshll.u32 %s312_s14, 2  ;;  %v1756_v60 = vsel %vm476_vm0, %v2216_v58, 0  ;;  %s3231_s9 = smov (!%p326_p7, %s2245_s9), 17  ;;  %vm2734_vm7 = vmor %vm1400_vm5, %vm1401_vm6 }
  0x16   : > { %s2428_s18 = scalar_lea.vmem %s3208_s0, %s2087_s15  ;;  %s2251_s10 = smul.u32 3, %s3231_s9 }
  0x17   : > { %v2431_v10 = vld [vmem:[%s2428_s18 + $0x18] sm:$0xff]  ;;  %v2434_v11 = vld [vmem:[%s2428_s18 + $0x30] sm:$0xff]  ;;  %v2437_v12 = vld [vmem:[%s2428_s18 + $0x48] sm:$0xff]  ;;  %s2093_s17 = sshll.u32 %s3229_s19, 5 }
  0x18   : > { %v2234_v13 = vld [vmem:[%s2428_s18] sm:$0xff]  ;;  %2129 = vmatmul.msk.bf16.vlgmr.msra.gmra.mxu1 %vm348_vm1, %v2431_v10  ;;  %2131 = vmatmul.msk.bf16.vlgmr.msra.gmra.mxu2 %vm348_vm1, %v2434_v11  ;;  %v2470_v28 = vld [vmem:[%s2428_s18 + $0xc] sm:$0xf]  ;;  %v2473_v29 = vld [vmem:[%s2428_s18 + $0x10] sm:$0xf]  ;;  %s330_s11 = sadd.s32 %s2251_s10, %s2250_s12  ;;  %s2092_s12 = sshll.u32 %s3233_s27, 1 }
  0x19   : > { %2133 = vmatmul.msk.bf16.vlgmr.msra.gmra.mxu3 %vm348_vm1, %v2437_v12  ;;  %2127 = vmatmul.msk.bf16.vlgmr.msra.gmra.mxu0 %vm348_vm1, %v2234_v13  ;;  %v2455_v17 = vld [vmem:[%s2428_s18] sm:$0xf]  ;;  %v2459_v19 = vld [vmem:[%s2428_s18 + $0x4] sm:$0xf]  ;;  %v2476_v30 = vld [vmem:[%s2428_s18 + $0x8] sm:$0x1]  ;;  %s343_s26 = sadd.s32 %s2093_s17, %s2092_s12 }
  0x1a   : > { %1316 = vmatpush.bf16.msra.mxu1 %v1307_v15  ;;  %1549 = vmatpush.bf16.msra.mxu2 %v1540_v18  ;;  %v785_v21 = vshrl.u32 %v2455_v17, 16  ;;  %v788_v22 = vshll.u32 %v2455_v17, 16  ;;  %v794_v24 = vshll.u32 %v2459_v19, 16  ;;  %v798_v25 = vshrl.u32 %v2459_v19, 16  ;;  %v2483_v37 = vld [vmem:[%s2428_s18 + $0x24] sm:$0xff]  ;;  %v2486_v40 = vld [vmem:[%s2428_s18 + $0x3c] sm:$0xff] }
  0x1b   : > { %1657 = vmatpush.bf16.msra.mxu3 %v1648_v23  ;;  %v809_v33 = vshrl.u32 %v2470_v28, 16  ;;  %v812_v34 = vshll.u32 %v2470_v28, 16  ;;  %v818_v35 = vshll.u32 %v2473_v29, 16  ;;  %v822_v36 = vshrl.u32 %v2473_v29, 16  ;;  %v2490_v43 = vld [vmem:[%s2428_s18 + $0x14] sm:$0x1]  ;;  %1765 = vmatpush.bf16.msra.mxu0 %v1756_v60 }
  0x1c   : > { %v787_v26 = vrot.slane %v785_v21, 4  ;;  %v790_v27 = vrot.slane %v788_v22, 5  ;;  %v796_v31 = vrot.slane %v794_v24, 5  ;;  %v800_v32 = vrot.slane %v798_v25, 4  ;;  %v2493_v46 = vld [vmem:[%s2428_s18 + $0x54] sm:$0xff]  ;;  %v2235_v51 = vld [vmem:[%s2428_s18 + $0xc] sm:$0xff] }
  0x1d   : > { %v811_v38 = vrot.slane %v809_v33, 4  ;;  %v814_v39 = vrot.slane %v812_v34, 5  ;;  %v804_v42 = vshll.u32 %v2476_v30, 16  ;;  %v820_v44 = vrot.slane %v818_v35, 5  ;;  %v2521_v5 = vld [vmem:[%s2428_s18 + $0x18] sm:$0xf] }
  0x1e   : > { %v791_v41 = vor.u32 %v790_v27, %v787_v26  ;;  %v824_v45 = vrot.slane %v822_v36, 4  ;;  %v801_v47 = vor.u32 %v800_v32, %v796_v31  ;;  %v828_v49 = vshll.u32 %v2490_v43, 16  ;;  %v2524_v6 = vld [vmem:[%s2428_s18 + $0x1c] sm:$0xf]  ;;  %v2531_v21 = vld [vmem:[%s2428_s18 + $0x20] sm:$0x1] }
  0x1f   : > { %v815_v48 = vor.u32 %v814_v39, %v811_v38  ;;  %v806_v53 = vrot.slane %v804_v42, 5  ;;  %v833_v7 = vshrl.u32 %v2521_v5, 16  ;;  %v836_v8 = vshll.u32 %v2521_v5, 16  ;;  %v2544_v36 = vld [vmem:[%s2428_s18 + $0x24] sm:$0xf]  ;;  %s2090_s13 = sshll.u32 %s330_s11, 2 }
  0x20   : > { %v825_v50 = vor.u32 %v824_v45, %v820_v44  ;;  %v792_v52 = vrot.slane %v791_v41, 4  ;;  %v802_v54 = vrot.slane %v801_v47, 4  ;;  %v830_v57 = vrot.slane %v828_v49, 5  ;;  %v2547_v38 = vld [vmem:[%s2428_s18 + $0x28] sm:$0xf]  ;;  %s2705_s16 = scalar_lea.vmem %s3209_s1, %s2090_s13  ;;  %s2094_s19 = sshll.u32 %s343_s26, 3 }
  0x21   : > { %v816_v55 = vrot.slane %v815_v48, 4  ;;  %v842_v9 = vshll.u32 %v2524_v6, 16  ;;  %v846_v13 = vshrl.u32 %v2524_v6, 16  ;;  %v835_v14 = vrot.slane %v833_v7, 4  ;;  %s3077_s6 = scalar_lea.vmem %s3213_s5, %s2094_s19 }
  0x22   : > { %v826_v56 = vrot.slane %v825_v50, 4  ;;  %v797_v61 = vsel %vm2507_vm4, %v792_v52, %v796_v31  ;;  %v807_v62 = vsel %vm2507_vm4, %v802_v54, %v806_v53  ;;  %v838_v15 = vrot.slane %v836_v8, 5  ;;  %v2554_v50 = vld [vmem:[%s2428_s18 + $0x2c] sm:$0x1] }
  0x23   : > { %v821_v63 = vsel %vm2507_vm4, %v816_v55, %v820_v44  ;;  %v1042_v1 = vunpack.c.l.b16 %v797_v61  ;;  %v1043_v2 = vunpack.c.l.b16 %v807_v62  ;;  %v844_v16 = vrot.slane %v842_v9, 5  ;;  %v2571_v62 = vld [vmem:[%s2428_s18 + $0x30] sm:$0xf] }
  0x24   : > { %v831_v0 = vsel %vm2507_vm4, %v826_v56, %v830_v57  ;;  %v1044_v3 = vunpack.c.l.b16 %v821_v63  ;;  %v848_v18 = vrot.slane %v846_v13, 4  ;;  %v839_v23 = vor.u32 %v838_v15, %v835_v14  ;;  %v2574_v63 = vld [vmem:[%s2428_s18 + $0x34] sm:$0xf]  ;;  %v2581_v13 = vld [vmem:[%s2428_s18 + $0x38] sm:$0x1] }
  0x25   : > { %v1045_v4 = vunpack.c.l.b16 %v831_v0  ;;  %v1058_v20 = vpack.c.b16 %v1043_v2, %v1042_v1  ;;  %v852_v25 = vshll.u32 %v2531_v21, 16  ;;  %v857_v39 = vshrl.u32 %v2544_v36, 16 }
  0x26   : > { %v849_v24 = vor.u32 %v848_v18, %v844_v16  ;;  %v840_v26 = vrot.slane %v839_v23, 4  ;;  %v860_v41 = vshll.u32 %v2544_v36, 16  ;;  %v866_v42 = vshll.u32 %v2547_v38, 16 }
  0x27   : > { %v1059_v22 = vpack.c.b16 %v1045_v4, %v1044_v3  ;;  %v854_v31 = vrot.slane %v852_v25, 5  ;;  %v870_v44 = vshrl.u32 %v2547_v38, 16  ;;  %v859_v45 = vrot.slane %v857_v39, 4 }
  0x28   : > { %2130 = vmatmul.msk.bf16.gmra.mxu1 %vm348_vm1, %v2483_v37  ;;  %2132 = vmatmul.msk.bf16.gmra.mxu2 %vm348_vm1, %v2486_v40  ;;  %v850_v27 = vrot.slane %v849_v24, 4  ;;  %v845_v32 = vsel %vm2507_vm4, %v840_v26, %v844_v16  ;;  %v862_v47 = vrot.slane %v860_v41, 5  ;;  %v868_v48 = vrot.slane %v866_v42, 5 }
  0x29   : > { %2134 = vmatmul.msk.bf16.gmra.mxu3 %vm348_vm1, %v2493_v46  ;;  %2128 = vmatmul.msk.bf16.gmra.mxu0 %vm348_vm1, %v2235_v51  ;;  %v1046_v34 = vunpack.c.l.b16 %v845_v32  ;;  %v872_v49 = vrot.slane %v870_v44, 4  ;;  %v876_v54 = vshll.u32 %v2554_v50, 16  ;;  %v881_v0 = vshrl.u32 %v2571_v62, 16 }
  0x2a   : > { %v855_v33 = vsel %vm2507_vm4, %v850_v27, %v854_v31  ;;  %v863_v52 = vor.u32 %v862_v47, %v859_v45  ;;  %v884_v1 = vshll.u32 %v2571_v62, 16  ;;  %v890_v2 = vshll.u32 %v2574_v63, 16  ;;  %v2599_v27 = vld [vmem:[%s2428_s18 + $0x3c] sm:$0xf]  ;;  %v2602_v31 = vld [vmem:[%s2428_s18 + $0x40] sm:$0xf] }
  0x2b   : > { %v1047_v35 = vunpack.c.l.b16 %v855_v33  ;;  %v873_v53 = vor.u32 %v872_v49, %v868_v48  ;;  %v878_v57 = vrot.slane %v876_v54, 5  ;;  %v894_v3 = vshrl.u32 %v2574_v63, 16  ;;  %v2609_v45 = vld [vmem:[%s2428_s18 + $0x44] sm:$0x1] }
  0x2c   : > { %v864_v55 = vrot.slane %v863_v52, 4  ;;  %v883_v4 = vrot.slane %v881_v0, 4  ;;  %v886_v7 = vrot.slane %v884_v1, 5  ;;  %v892_v8 = vrot.slane %v890_v2, 5 }
  0x2d   : > { %v874_v56 = vrot.slane %v873_v53, 4  ;;  %v896_v9 = vrot.slane %v894_v3, 4  ;;  %v900_v18 = vshll.u32 %v2581_v13, 16  ;;  %v905_v32 = vshrl.u32 %v2599_v27, 16 }
  0x2e   : > { %v869_v58 = vsel %vm2507_vm4, %v864_v55, %v868_v48  ;;  %v887_v15 = vor.u32 %v886_v7, %v883_v4  ;;  %v908_v33 = vshll.u32 %v2599_v27, 16  ;;  %v924_v52 = vshll.u32 %v2609_v45, 16 }
  0x2f   : > { %v879_v60 = vsel %vm2507_vm4, %v874_v56, %v878_v57  ;;  %v1048_v61 = vunpack.c.l.b16 %v869_v58  ;;  %v897_v16 = vor.u32 %v896_v9, %v892_v8  ;;  %v902_v23 = vrot.slane %v900_v18, 5 }
  0x30   : > { %v907_v39 = vrot.slane %v905_v32, 4  ;;  %v910_v41 = vrot.slane %v908_v33, 5  ;;  %v926_v55 = vrot.slane %v924_v52, 5  ;;  %v2335_v56 = vmov 0.0  }
  0x31   : > { %353 = vst.msk [vmem:[#allocation2 + $0x20] sm:$0xff] %vm348_vm1, %v2335_v56 }
  0x32   : > { %v911_v48 = vor.u32 %v910_v41, %v907_v39  ;;  %349 = vst.msk [vmem:[#allocation2] sm:$0xff] %vm348_vm1, %v2335_v56 }
  0x33   : > { %350 = vst.msk [vmem:[#allocation2 + $0x8] sm:$0xff] %vm348_vm1, %v2335_v56 }
  0x34   : > { %v912_v53 = vrot.slane %v911_v48, 4  ;;  %351 = vst.msk [vmem:[#allocation2 + $0x10] sm:$0xff] %vm348_vm1, %v2335_v56 }
  0x35   : > { %352 = vst.msk [vmem:[#allocation2 + $0x18] sm:$0xff] %vm348_vm1, %v2335_v56 }
  0x36   : > { %354 = vst.msk [vmem:[#allocation2 + $0x28] sm:$0xff] %vm348_vm1, %v2335_v56 }
  0x37   : > { %355 = vst.msk [vmem:[#allocation2 + $0x30] sm:$0xff] %vm348_vm1, %v2335_v56 }
  0x38   : > { %2140 = vmatmul.msk.bf16.vlgmr.msrb.gmra.mxu1 %vm348_vm1, %v2235_v51  ;;  %2153 = vmatmul.msk.bf16.vlgmr.msrb.gmra.mxu2 %vm348_vm1, %v2431_v10  ;;  %v2556_v51 = vpack.c.b16 %v1047_v35, %v1046_v34  ;;  %v914_v34 = vshll.u32 %v2602_v31, 16  ;;  %v918_v35 = vshrl.u32 %v2602_v31, 16  ;;  %356 = vst.msk [vmem:[#allocation2 + $0x38] sm:$0xff] %vm348_vm1, %v2335_v56 }
  0x39   : > { %2162 = vmatmul.msk.bf16.vlgmr.msrb.gmra.mxu3 %vm348_vm1, %v1058_v20  ;;  %2171 = vmatmul.msk.bf16.vlgmr.msrb.gmra.mxu0 %vm348_vm1, %v1059_v22  ;;  %v888_v20 = vrot.slane %v887_v15, 4  ;;  %357 = vst.msk [vmem:[#allocation2 + $0x40] sm:$0xff] %vm348_vm1, %v2335_v56  ;;  %v2648_v15 = vld [vmem:[%s2428_s18 + $0x50] sm:$0x1] }
  0x3a   : > { %v916_v42 = vrot.slane %v914_v34, 5  ;;  %v920_v44 = vrot.slane %v918_v35, 4  ;;  %358 = vst.msk [vmem:[#allocation2 + $0x48] sm:$0xff] %vm348_vm1, %v2335_v56  ;;  %v2675_v34 = vld [vmem:[%s2428_s18 + $0x58] sm:$0xf] }
  0x3b   : > { %v893_v24 = vsel %vm2507_vm4, %v888_v20, %v892_v8  ;;  %359 = vst.msk [vmem:[#allocation2 + $0x50] sm:$0xff] %vm348_vm1, %v2335_v56  ;;  %v962_v41 = vshll.u32 %v2675_v34, 16 }
  0x3c   : > { %v921_v49 = vor.u32 %v920_v44, %v916_v42  ;;  %360 = vst.msk [vmem:[#allocation2 + $0x58] sm:$0xff] %vm348_vm1, %v2335_v56 }
  0x3d   : > { %361 = vst.msk [vmem:[#allocation2 + $0x60] sm:$0xff] %vm348_vm1, %v2335_v56  ;;  %v964_v52 = vrot.slane %v962_v41, 5 }
  0x3e   : > { %v922_v54 = vrot.slane %v921_v49, 4  ;;  %362 = vst.msk [vmem:[#allocation2 + $0x68] sm:$0xff] %vm348_vm1, %v2335_v56  ;;  %v2682_v49 = vld [vmem:[%s2428_s18 + $0x5c] sm:$0x1] }
  0x3f   : > { %363 = vst.msk [vmem:[#allocation2 + $0x70] sm:$0xff] %vm348_vm1, %v2335_v56 }
  0x40   : > { %v927_v57 = vsel %vm2507_vm4, %v922_v54, %v926_v55  ;;  %364 = vst.msk [vmem:[#allocation2 + $0x78] sm:$0xff] %vm348_vm1, %v2335_v56  ;;  %v972_v56 = vshll.u32 %v2682_v49, 16 }
  0x48   : > { %2141 = vmatmul.msk.bf16.gmra.mxu1 %vm348_vm1, %v2431_v10  ;;  %2154 = vmatmul.msk.bf16.gmra.mxu2 %vm348_vm1, %v2483_v37  ;;  %v1049_v10 = vunpack.c.l.b16 %v879_v60  ;;  %v1053_v60 = vunpack.c.l.b16 %v927_v57 }
  0x49   : > { %2163 = vmatmul.msk.bf16.gmra.mxu3 %vm348_vm1, %v1059_v22  ;;  %2172 = vmatmul.msk.bf16.gmra.mxu0 %vm348_vm1, %v2556_v51  ;;  %v898_v22 = vrot.slane %v897_v16, 4 }
  0x4a   : > { %v2583_v14 = vpack.c.b16 %v1049_v10, %v1048_v61  ;;  %v2634_v61 = vld [vmem:[%s2428_s18 + $0x48] sm:$0xf]  ;;  %v2637_v10 = vld [vmem:[%s2428_s18 + $0x4c] sm:$0xf] }
  0x4b   : > { %v903_v25 = vsel %vm2507_vm4, %v898_v22, %v902_v23  ;;  %v929_v0 = vshrl.u32 %v2634_v61, 16  ;;  %v932_v1 = vshll.u32 %v2634_v61, 16  ;;  %v938_v2 = vshll.u32 %v2637_v10, 16 }
  0x4c   : > { %v1051_v26 = vunpack.c.l.b16 %v903_v25  ;;  %v942_v3 = vshrl.u32 %v2637_v10, 16  ;;  %v948_v22 = vshll.u32 %v2648_v15, 16 }
  0x4d   : > { %v931_v4 = vrot.slane %v929_v0, 4  ;;  %v934_v7 = vrot.slane %v932_v1, 5  ;;  %v940_v8 = vrot.slane %v938_v2, 5  ;;  %v1412_v1 = vrot.slane %v2473_v29, 5 }
  0x4e   : > { %v944_v9 = vrot.slane %v942_v3, 4  ;;  %v950_v25 = vrot.slane %v948_v22, 5  ;;  %v399_v22 = vld [vmem:[#allocation2 + $0x20] sm:$0xff] }
  0x4f   : > { %v935_v18 = vor.u32 %v934_v7, %v931_v4  ;;  %v2708_v4 = vld [vmem:[%s2705_s16] sm:$0xf]  ;;  %v2189_v7 = vrot.slane %v2470_v28, 9  ;;  %v2725_v28 = vld [vmem:[%s2705_s16 + $0x8] sm:$0x1] }
  0x50   : > { %v945_v20 = vor.u32 %v944_v9, %v940_v8  ;;  %v977_v9 = vshrl.u32 %v2708_v4, 16  ;;  %v980_v29 = vshll.u32 %v2708_v4, 16 }
  0x51   : > { %v936_v23 = vrot.slane %v935_v18, 4  ;;  %v1414_v18 = vrot.slane %v1412_v1, 4 }
  0x58   : > { %2142 = vmatmul.msk.bf16.gmra.mxu1 %vm348_vm1, %v2483_v37  ;;  %2155 = vmatmul.msk.bf16.gmra.mxu2 %vm348_vm1, %v2434_v11  ;;  %v1050_v37 = vunpack.c.l.b16 %v893_v24  ;;  %v946_v24 = vrot.slane %v945_v20, 4  ;;  %v1415_v20 = vrot.slane %v2490_v43, 5  ;;  %v996_v43 = vshll.u32 %v2725_v28, 16 }
  0x59   : > { %2164 = vmatmul.msk.bf16.gmra.mxu3 %vm348_vm1, %v2556_v51  ;;  %2173 = vmatmul.msk.bf16.gmra.mxu0 %vm348_vm1, %v2583_v14 }
  0x5a   : > { %v2611_v47 = vpack.c.b16 %v1051_v26, %v1050_v37  ;;  %v951_v37 = vsel %vm2507_vm4, %v946_v24, %v950_v25  ;;  %v2672_v26 = vld [vmem:[%s2428_s18 + $0x54] sm:$0xf] }
  0x5b   : > { %v1055_v33 = vunpack.c.l.b16 %v951_v37  ;;  %v953_v35 = vshrl.u32 %v2672_v26, 16  ;;  %v956_v39 = vshll.u32 %v2672_v26, 16 }
  0x5d   : > { %v955_v44 = vrot.slane %v953_v35, 4  ;;  %v958_v48 = vrot.slane %v956_v39, 5 }
  0x5f   : > { %v959_v55 = vor.u32 %v958_v48, %v955_v44 }
  0x61   : > { %v960_v57 = vrot.slane %v959_v55, 4 }
  0x63   : > { %v965_v0 = vsel %vm2507_vm4, %v960_v57, %v964_v52  ;;  %v1416_v57 = vsel %vm2734_vm7, %v1414_v18, %v1415_v20 }
  0x64   : > { %v1056_v2 = vunpack.c.l.b16 %v965_v0 }
  0x68   : > { %2143 = vmatmul.msk.bf16.gmra.mxu1 %vm348_vm1, %v2434_v11  ;;  %2156 = vmatmul.msk.bf16.gmra.mxu2 %vm348_vm1, %v2486_v40  ;;  %v917_v11 = vsel %vm2507_vm4, %v912_v53, %v916_v42  ;;  %v966_v42 = vshrl.u32 %v2675_v34, 16 }
  0x69   : > { %2165 = vmatmul.msk.bf16.gmra.mxu3 %vm348_vm1, %v2583_v14  ;;  %2174 = vmatmul.msk.bf16.gmra.mxu0 %vm348_vm1, %v2611_v47  ;;  %v1052_v58 = vunpack.c.l.b16 %v917_v11 }
  0x6a   : > { %v968_v53 = vrot.slane %v966_v42, 4 }
  0x6b   : > { %v2650_v16 = vpack.c.b16 %v1053_v60, %v1052_v58  ;;  %v974_v60 = vrot.slane %v972_v56, 5  ;;  %v403_v56 = vld [vmem:[#allocation2 + $0x40] sm:$0xff] }
  0x6c   : > { %v969_v11 = vor.u32 %v968_v53, %v964_v52 }
  0x6e   : > { %v970_v58 = vrot.slane %v969_v11, 4  ;;  %v998_v11 = vrot.slane %v996_v43, 5 }
  0x78   : > { %2144 = vmatmul.msk.bf16.gmra.mxu1 %vm348_vm1, %v2486_v40  ;;  %2157 = vmatmul.msk.bf16.gmra.mxu2 %vm348_vm1, %v2437_v12  ;;  %v941_v40 = vsel %vm2507_vm4, %v936_v23, %v940_v8  ;;  %v2712_v8 = vld [vmem:[%s2705_s16 + $0x4] sm:$0xf] }
  0x79   : > { %2166 = vmatmul.msk.bf16.gmra.mxu3 %vm348_vm1, %v2611_v47  ;;  %2175 = vmatmul.msk.bf16.gmra.mxu0 %vm348_vm1, %v2650_v16  ;;  %v1054_v32 = vunpack.c.l.b16 %v941_v40  ;;  %v2718_v23 = vld [vmem:[%s2705_s16] sm:$0xff]  ;;  %v986_v24 = vshll.u32 %v2712_v8, 16  ;;  %v990_v25 = vshrl.u32 %v2712_v8, 16 }
  0x7a   : > { %v395_v40 = vld [vmem:[#allocation2] sm:$0xff] }
  0x7b   : > { %v2684_v54 = vpack.c.b16 %v1055_v33, %v1054_v32  ;;  %v979_v32 = vrot.slane %v977_v9, 4  ;;  %v982_v33 = vrot.slane %v980_v29, 5  ;;  %v988_v39 = vrot.slane %v986_v24, 5  ;;  %v400_v9 = vld [vmem:[#allocation2 + $0x28] sm:$0xff] }
  0x7c   : > { %v992_v41 = vrot.slane %v990_v25, 4  ;;  %v396_v24 = vld [vmem:[#allocation2 + $0x8] sm:$0xff] }
  0x7d   : > { %v983_v48 = vor.u32 %v982_v33, %v979_v32 }
  0x7e   : > { %v993_v53 = vor.u32 %v992_v41, %v988_v39 }
  0x80   : > { %v994_v0 = vrot.slane %v993_v53, 4  ;;  %v2243_v53 = vld [vmem:[%s2705_s16 + $0xc] sm:$0xff] }
  0x82   : > { %v999_v20 = vsel %vm2507_vm4, %v994_v0, %v998_v11  ;;  %v1405_v11 = vrot.slane %v2459_v19, 5  ;;  %v1408_v19 = vrot.slane %v2476_v30, 5  ;;  %v402_v30 = vld [vmem:[#allocation2 + $0x38] sm:$0xff] }
  0x83   : > { %v1193_v43 = vunpack.c.l.b16 %v999_v20 }
  0x88   : > { %2145 = vmatmul.msk.bf16.gmra.mxu1 %vm348_vm1, %v2437_v12  ;;  %2158 = vmatmul.msk.bf16.gmra.mxu2 %vm348_vm1, %v2493_v46  ;;  %v975_v12 = vsel %vm2507_vm4, %v970_v58, %v974_v60  ;;  %v407_v58 = vld [vmem:[#allocation2 + $0x60] sm:$0xff]  ;;  %v984_v60 = vrot.slane %v983_v48, 4  ;;  %v401_v48 = vld [vmem:[#allocation2 + $0x30] sm:$0xff] }
  0x89   : > { %2167 = vmatmul.msk.bf16.gmra.mxu3 %vm348_vm1, %v2650_v16  ;;  %2176 = vmatmul.msk.bf16.gmra.mxu0 %vm348_vm1, %v2684_v54  ;;  %v1057_v3 = vunpack.c.l.b16 %v975_v12 }
  0x8a   : > { %v989_v18 = vsel %vm2507_vm4, %v984_v60, %v988_v39  ;;  %v397_v39 = vld [vmem:[#allocation2 + $0x10] sm:$0xff] }
  0x8b   : > { %v2722_v37 = vpack.c.b16 %v1057_v3, %v1056_v2  ;;  %v1494_v2 = vunpack.c.l.b16 %v1416_v57  ;;  %v1192_v41 = vunpack.c.l.b16 %v989_v18 }
  0x95   : > { %v499_v35 = vpop.f32.mrf.mxu1 }
  0x96   : > { %v533_v42 = vadd.f32 %v499_v35, %v399_v22  ;;  %v489_v44 = vpop.f32.mrf.mxu0  ;;  %v404_v35 = vld [vmem:[#allocation2 + $0x48] sm:$0xff] }
  0x97   : > { %v529_v52 = vadd.f32 %v489_v44, %v395_v40 }
  0x98   : > { %549 = vst.msk [vmem:[#allocation2 + $0x20] sm:$0xff] %vm348_vm1, %v533_v42  ;;  %2146 = vmatmul.msk.bf16.gmra.mxu1 %vm348_vm1, %v2493_v46  ;;  %2159 = vmatmul.msk.bf16.gmra.mxu2 %vm348_vm1, %v2718_v23  ;;  %v1413_v46 = vsel %vm2734_vm7, %v2189_v7, %v1412_v1  ;;  %v408_v42 = vld [vmem:[#allocation2 + $0x68] sm:$0xff] }
  0x99   : > { %2168 = vmatmul.msk.bf16.gmra.mxu3 %vm348_vm1, %v2684_v54  ;;  %545 = vst.msk [vmem:[#allocation2] sm:$0xff] %vm348_vm1, %v529_v52  ;;  %2177 = vmatmul.msk.bf16.gmra.mxu0 %vm348_vm1, %v2722_v37  ;;  %v1493_v12 = vunpack.c.l.b16 %v1413_v46 }
  0x9b   : > { %v509_v3 = vpop.f32.mrf.mxu2  ;;  %v2747_v25 = vpack.c.b16 %v1494_v2, %v1493_v12  ;;  %v1419_v12 = vrot.slane %v2524_v6, 5  ;;  %v409_v6 = vld [vmem:[#allocation2 + $0x70] sm:$0xff] }
  0x9c   : > { %v537_v29 = vadd.f32 %v509_v3, %v403_v56  ;;  %v519_v22 = vpop.f32.mrf.mxu3  ;;  %v405_v3 = vld [vmem:[#allocation2 + $0x50] sm:$0xff] }
  0x9d   : > { %v501_v40 = vpop.f32.mrf.mxu1  ;;  %v541_v32 = vadd.f32 %v519_v22, %v407_v58  ;;  %v2759_v58 = vpack.c.b16 %v1193_v43, %v1192_v41  ;;  %v2190_v22 = vrot.slane %v2521_v5, 9 }
  0x9e   : > { %553 = vst.msk [vmem:[#allocation2 + $0x40] sm:$0xff] %vm348_vm1, %v537_v29  ;;  %v534_v1 = vadd.f32 %v501_v40, %v400_v9  ;;  %v491_v7 = vpop.f32.mrf.mxu0  ;;  %v2188_v9 = vrot.slane %v2455_v17, 9  ;;  %v1407_v29 = vrot.slane %v1405_v11, 4 }
  0x9f   : > { %557 = vst.msk [vmem:[#allocation2 + $0x60] sm:$0xff] %vm348_vm1, %v541_v32  ;;  %v530_v33 = vadd.f32 %v491_v7, %v396_v24  ;;  %v1422_v24 = vrot.slane %v2531_v21, 5  ;;  %v398_v7 = vld [vmem:[#allocation2 + $0x18] sm:$0xff]  ;;  %v1420_v21 = vsel %vm2734_vm7, %v2190_v22, %v1419_v12 }
  0xa0   : > { %550 = vst.msk [vmem:[#allocation2 + $0x28] sm:$0xff] %vm348_vm1, %v534_v1  ;;  %v1406_v17 = vsel %vm2734_vm7, %v2188_v9, %v1405_v11  ;;  %v1426_v9 = vrot.slane %v2547_v38, 5 }
  0xa1   : > { %546 = vst.msk [vmem:[#allocation2 + $0x8] sm:$0xff] %vm348_vm1, %v530_v33  ;;  %v1409_v33 = vsel %vm2734_vm7, %v1407_v29, %v1408_v19  ;;  %v1429_v29 = vrot.slane %v2554_v50, 5 }
  0xa2   : > { %v1428_v38 = vrot.slane %v1426_v9, 4 }
  0xa3   : > { %v511_v44 = vpop.f32.mrf.mxu2 }
  0xa4   : > { %v538_v52 = vadd.f32 %v511_v44, %v404_v35  ;;  %v521_v56 = vpop.f32.mrf.mxu3  ;;  %v1492_v44 = vunpack.c.l.b16 %v1409_v33 }
  0xa5   : > { %v504_v46 = vpop.f32.mrf.mxu1  ;;  %v542_v57 = vadd.f32 %v521_v56, %v408_v42  ;;  %v1491_v42 = vunpack.c.l.b16 %v1406_v17  ;;  %v410_v56 = vld [vmem:[#allocation2 + $0x78] sm:$0xff] }
  0xa6   : > { %554 = vst.msk [vmem:[#allocation2 + $0x48] sm:$0xff] %vm348_vm1, %v538_v52  ;;  %v535_v60 = vadd.f32 %v504_v46, %v401_v48  ;;  %v494_v0 = vpop.f32.mrf.mxu0  ;;  %v406_v48 = vld [vmem:[#allocation2 + $0x58] sm:$0xff]  ;;  %v1495_v52 = vunpack.c.l.b16 %v1420_v21  ;;  %v561_v46 = vld [vmem:[#allocation2] sm:$0xff] }
  0xa7   : > { %558 = vst.msk [vmem:[#allocation2 + $0x68] sm:$0xff] %vm348_vm1, %v542_v57  ;;  %v531_v2 = vadd.f32 %v494_v0, %v397_v39  ;;  %v1507_v11 = vpack.c.b16 %v1492_v44, %v1491_v42 }
  0xa8   : > { %551 = vst.msk [vmem:[#allocation2 + $0x30] sm:$0xff] %vm348_vm1, %v535_v60  ;;  %2147 = vmatmul.msk.bf16.gmra.mxu1 %vm348_vm1, %v2718_v23  ;;  %2160 = vmatmul.msk.bf16.gmra.mxu2 %vm348_vm1, %v2243_v53  ;;  %v1421_v23 = vrot.slane %v1419_v12, 4 }
  0xa9   : > { %2169 = vmatmul.msk.bf16.gmra.mxu3 %vm348_vm1, %v2722_v37  ;;  %547 = vst.msk [vmem:[#allocation2 + $0x10] sm:$0xff] %vm348_vm1, %v531_v2  ;;  %2178 = vmatmul.msk.bf16.gmra.mxu0 %vm348_vm1, %v2759_v58 }
  0xaa   : > { %v1423_v41 = vsel %vm2734_vm7, %v1421_v23, %v1422_v24  ;;  %v562_v23 = vld [vmem:[#allocation2 + $0x8] sm:$0xff] }
  0xab   : > { %v514_v40 = vpop.f32.mrf.mxu2  ;;  %v1496_v53 = vunpack.c.l.b16 %v1423_v41 }
  0xac   : > { %v539_v32 = vadd.f32 %v514_v40, %v405_v3  ;;  %v524_v1 = vpop.f32.mrf.mxu3 }
  0xad   : > { %v506_v18 = vpop.f32.mrf.mxu1  ;;  %v543_v20 = vadd.f32 %v524_v1, %v409_v6  ;;  %v2789_v2 = vpack.c.b16 %v1496_v53, %v1495_v52  ;;  %v2191_v6 = vrot.slane %v2544_v36, 9  ;;  %v1430_v1 = vsel %vm2734_vm7, %v1428_v38, %v1429_v29 }
  0xae   : > { %555 = vst.msk [vmem:[#allocation2 + $0x50] sm:$0xff] %vm348_vm1, %v539_v32  ;;  %v536_v35 = vadd.f32 %v506_v18, %v402_v30  ;;  %v496_v5 = vpop.f32.mrf.mxu0  ;;  %v1498_v36 = vunpack.c.l.b16 %v1430_v1  ;;  %v1436_v52 = vrot.slane %v2581_v13, 5  ;;  %v2192_v53 = vrot.slane %v2571_v62, 9 }
  0xaf   : > { %559 = vst.msk [vmem:[#allocation2 + $0x70] sm:$0xff] %vm348_vm1, %v543_v20  ;;  %v532_v43 = vadd.f32 %v496_v5, %v398_v7 }
  0xb0   : > { %552 = vst.msk [vmem:[#allocation2 + $0x38] sm:$0xff] %vm348_vm1, %v536_v35  ;;  %v563_v17 = vld [vmem:[#allocation2 + $0x10] sm:$0xff] }
  0xb1   : > { %548 = vst.msk [vmem:[#allocation2 + $0x18] sm:$0xff] %vm348_vm1, %v532_v43  ;;  %v1433_v43 = vrot.slane %v2574_v63, 5 }
  0xb3   : > { %v516_v39 = vpop.f32.mrf.mxu2 }
  0xb4   : > { %v540_v57 = vadd.f32 %v516_v39, %v406_v48  ;;  %v526_v60 = vpop.f32.mrf.mxu3 }
  0xb5   : > { %v599_v0 = vpop.f32.mrf.mxu1  ;;  %v544_v12 = vadd.f32 %v526_v60, %v410_v56  ;;  %v1435_v56 = vrot.slane %v1433_v43, 4  ;;  %v1434_v60 = vsel %vm2734_vm7, %v2192_v53, %v1433_v43 }
  0xb6   : > { %556 = vst.msk [vmem:[#allocation2 + $0x58] sm:$0xff] %vm348_vm1, %v540_v57  ;;  %v639_v19 = vadd.f32 %v599_v0, %v561_v46  ;;  %v2792_v3 = vpop.f32.mrf.mxu0 }
  0xb7   : > { %560 = vst.msk [vmem:[#allocation2 + $0x78] sm:$0xff] %vm348_vm1, %v544_v12  ;;  %v1437_v13 = vsel %vm2734_vm7, %v1435_v56, %v1436_v52 }
  0xb8   : > { %655 = vst.msk [vmem:[#allocation2] sm:$0xff] %vm348_vm1, %v639_v19  ;;  %2180 = vmatmul.msk.bf16.vlgmr.msra.gmra.mxu1 %vm348_vm1, %v2556_v51  ;;  %2199 = vmatmul.msk.bf16.vlgmr.msra.gmra.mxu2 %vm348_vm1, %v1507_v11  ;;  %v1427_v51 = vsel %vm2734_vm7, %v2191_v6, %v1426_v9  ;;  %v1499_v19 = vunpack.c.l.b16 %v1434_v60  ;;  %v1500_v9 = vunpack.c.l.b16 %v1437_v13 }
  0xb9   : > { %2208 = vmatmul.msk.bf16.vlgmr.msra.gmra.mxu3 %vm348_vm1, %v2747_v25  ;;  %2217 = vmatmul.msk.bf16.vlgmr.msra.gmra.mxu0 %vm348_vm1, %v2789_v2  ;;  %v1497_v50 = vunpack.c.l.b16 %v1427_v51 }
  0xbb   : > { %v709_v22 = vpop.f32.mrf.mxu2  ;;  %v2814_v5 = vpack.c.b16 %v1498_v36, %v1497_v50  ;;  %v1443_v36 = vrot.slane %v2609_v45, 5 }
  0xbc   : > { %v1102_v24 = vpop.f32.mrf.mxu3 }
  0xbd   : > { %v601_v40 = vpop.f32.mrf.mxu1 }
  0xbe   : > { %v640_v30 = vadd.f32 %v601_v40, %v562_v23  ;;  %v2806_v32 = vpop.f32.mrf.mxu0 }
  0xbf   : > { %v671_v7 = vld [vmem:[#allocation2] sm:$0xff] }
  0xc0   : > { %v749_v18 = vadd.f32 %v709_v22, %v671_v7  ;;  %656 = vst.msk [vmem:[#allocation2 + $0x8] sm:$0xff] %vm348_vm1, %v640_v30  ;;  %v2842_v30 = vpack.c.b16 %v1500_v9, %v1499_v19  ;;  %v1440_v7 = vrot.slane %v2602_v31, 5 }
  0xc2   : > { %765 = vst.msk [vmem:[#allocation2] sm:$0xff] %vm348_vm1, %v749_v18 }
  0xc3   : > { %v711_v20 = vpop.f32.mrf.mxu2 }
  0xc4   : > { %v1104_v33 = vpop.f32.mrf.mxu3 }
  0xc5   : > { %v604_v35 = vpop.f32.mrf.mxu1 }
  0xc6   : > { %v641_v21 = vadd.f32 %v604_v35, %v563_v17  ;;  %v2816_v41 = vpop.f32.mrf.mxu0  ;;  %v1442_v17 = vrot.slane %v1440_v7, 4 }
  0xc7   : > { %v672_v42 = vld [vmem:[#allocation2 + $0x8] sm:$0xff] }
  0xc8   : > { %v750_v44 = vadd.f32 %v711_v20, %v672_v42  ;;  %657 = vst.msk [vmem:[#allocation2 + $0x10] sm:$0xff] %vm348_vm1, %v641_v21  ;;  %2181 = vmatmul.msk.bf16.gmra.mxu1 %vm348_vm1, %v2583_v14  ;;  %2200 = vmatmul.msk.bf16.gmra.mxu2 %vm348_vm1, %v2747_v25  ;;  %v564_v14 = vld [vmem:[#allocation2 + $0x18] sm:$0xff]  ;;  %v2193_v20 = vrot.slane %v2599_v27, 9  ;;  %v566_v21 = vld [vmem:[#allocation2 + $0x28] sm:$0xff]  ;;  %v1444_v27 = vsel %vm2734_vm7, %v1442_v17, %v1443_v36 }
  0xc9   : > { %v1024_v48 = vld [vmem:[#allocation2] sm:$0xff]  ;;  %2209 = vmatmul.msk.bf16.gmra.mxu3 %vm348_vm1, %v2789_v2  ;;  %2218 = vmatmul.msk.bf16.gmra.mxu0 %vm348_vm1, %v2814_v5  ;;  %v1502_v53 = vunpack.c.l.b16 %v1444_v27 }
  0xca   : > { %v1142_v63 = vadd.f32 %v1102_v24, %v1024_v48  ;;  %766 = vst.msk [vmem:[#allocation2 + $0x8] sm:$0xff] %vm348_vm1, %v750_v44  ;;  %v565_v24 = vld [vmem:[#allocation2 + $0x20] sm:$0xff]  ;;  %v1441_v45 = vsel %vm2734_vm7, %v2193_v20, %v1440_v7 }
  0xcb   : > { %v714_v39 = vpop.f32.mrf.mxu2 }
  0xcc   : > { %1158 = vst.msk [vmem:[#allocation2] sm:$0xff] %vm348_vm1, %v1142_v63  ;;  %v1107_v25 = vpop.f32.mrf.mxu3 }
  0xcd   : > { %v606_v46 = vpop.f32.mrf.mxu1 }
  0xce   : > { %v642_v57 = vadd.f32 %v606_v46, %v564_v14  ;;  %v2832_v11 = vpop.f32.mrf.mxu0 }
  0xcf   : > { %v673_v0 = vld [vmem:[#allocation2 + $0x10] sm:$0xff] }
  0xd0   : > { %v751_v12 = vadd.f32 %v714_v39, %v673_v0  ;;  %658 = vst.msk [vmem:[#allocation2 + $0x18] sm:$0xff] %vm348_vm1, %v642_v57  ;;  %v567_v57 = vld [vmem:[#allocation2 + $0x30] sm:$0xff] }
  0xd1   : > { %v1025_v62 = vld [vmem:[#allocation2 + $0x8] sm:$0xff] }
  0xd2   : > { %v1143_v29 = vadd.f32 %v1104_v33, %v1025_v62  ;;  %767 = vst.msk [vmem:[#allocation2 + $0x10] sm:$0xff] %vm348_vm1, %v751_v12  ;;  %v1447_v62 = vrot.slane %v2637_v10, 5 }
  0xd3   : > { %v1174_v6 = vld [vmem:[#allocation2] sm:$0xff]  ;;  %v716_v38 = vpop.f32.mrf.mxu2 }
  0xd4   : > { %1159 = vst.msk [vmem:[#allocation2 + $0x8] sm:$0xff] %vm348_vm1, %v1143_v29  ;;  %v1250_v22 = vadd.f32 %v2792_v3, %v1174_v6  ;;  %v1109_v23 = vpop.f32.mrf.mxu3  ;;  %v1450_v29 = vrot.slane %v2648_v15, 5  ;;  %v2194_v6 = vrot.slane %v2634_v61, 9 }
  0xd5   : > { %v609_v40 = vpop.f32.mrf.mxu1 }
  0xd6   : > { %1266 = vst.msk [vmem:[#allocation2] sm:$0xff] %vm348_vm1, %v1250_v22  ;;  %v643_v51 = vadd.f32 %v609_v40, %v565_v24  ;;  %v2845_v1 = vpop.f32.mrf.mxu0  ;;  %v568_v24 = vld [vmem:[#allocation2 + $0x38] sm:$0xff]  ;;  %v1448_v15 = vsel %vm2734_vm7, %v2194_v6, %v1447_v62  ;;  %v571_v6 = vld [vmem:[#allocation2 + $0x50] sm:$0xff] }
  0xd7   : > { %v674_v18 = vld [vmem:[#allocation2 + $0x18] sm:$0xff] }
  0xd8   : > { %v752_v50 = vadd.f32 %v716_v38, %v674_v18  ;;  %659 = vst.msk [vmem:[#allocation2 + $0x20] sm:$0xff] %vm348_vm1, %v643_v51  ;;  %2182 = vmatmul.msk.bf16.gmra.mxu1 %vm348_vm1, %v2611_v47  ;;  %2201 = vmatmul.msk.bf16.gmra.mxu2 %vm348_vm1, %v2789_v2  ;;  %v1449_v38 = vrot.slane %v1447_v62, 4 }
  0xd9   : > { %v1026_v3 = vld [vmem:[#allocation2 + $0x10] sm:$0xff]  ;;  %2210 = vmatmul.msk.bf16.gmra.mxu3 %vm348_vm1, %v2814_v5  ;;  %2219 = vmatmul.msk.bf16.gmra.mxu0 %vm348_vm1, %v2842_v30 }
  0xda   : > { %v1144_v31 = vadd.f32 %v1107_v25, %v1026_v3  ;;  %768 = vst.msk [vmem:[#allocation2 + $0x18] sm:$0xff] %vm348_vm1, %v752_v50  ;;  %v1451_v61 = vsel %vm2734_vm7, %v1449_v38, %v1450_v29 }
  0xdb   : > { %v1175_v33 = vld [vmem:[#allocation2 + $0x8] sm:$0xff]  ;;  %v719_v47 = vpop.f32.mrf.mxu2  ;;  %v1504_v36 = vunpack.c.l.b16 %v1451_v61  ;;  %v2956_v61 = vld [vmem:[%s2705_s16 + $0x10] sm:$0xf] }
  0xdc   : > { %1160 = vst.msk [vmem:[#allocation2 + $0x10] sm:$0xff] %vm348_vm1, %v1144_v31  ;;  %v1251_v2 = vadd.f32 %v2806_v32, %v1175_v33  ;;  %v1112_v35 = vpop.f32.mrf.mxu3  ;;  %v1501_v32 = vunpack.c.l.b16 %v1441_v45  ;;  %v1454_v45 = vrot.slane %v2675_v34, 5 }
  0xdd   : > { %v611_v43 = vpop.f32.mrf.mxu1 }
  0xde   : > { %1267 = vst.msk [vmem:[#allocation2 + $0x8] sm:$0xff] %vm348_vm1, %v1251_v2  ;;  %v644_v42 = vadd.f32 %v611_v43, %v566_v21  ;;  %v2863_v44 = vpop.f32.mrf.mxu0  ;;  %v2873_v13 = vpack.c.b16 %v1502_v53, %v1501_v32  ;;  %v569_v2 = vld [vmem:[#allocation2 + $0x40] sm:$0xff]  ;;  %v1456_v32 = vrot.slane %v1454_v45, 4 }
  0xdf   : > { %v675_v48 = vld [vmem:[#allocation2 + $0x20] sm:$0xff] }
  0xe0   : > { %v753_v52 = vadd.f32 %v719_v47, %v675_v48  ;;  %660 = vst.msk [vmem:[#allocation2 + $0x28] sm:$0xff] %vm348_vm1, %v644_v42 }
  0xe1   : > { %v1027_v63 = vld [vmem:[#allocation2 + $0x18] sm:$0xff] }
  0xe2   : > { %v1145_v56 = vadd.f32 %v1109_v23, %v1027_v63  ;;  %769 = vst.msk [vmem:[#allocation2 + $0x20] sm:$0xff] %vm348_vm1, %v753_v52  ;;  %v1457_v52 = vrot.slane %v2682_v49, 5  ;;  %v2195_v63 = vrot.slane %v2672_v26, 9 }
  0xe3   : > { %v1176_v39 = vld [vmem:[#allocation2 + $0x10] sm:$0xff]  ;;  %v721_v14 = vpop.f32.mrf.mxu2 }
  0xe4   : > { %1161 = vst.msk [vmem:[#allocation2 + $0x18] sm:$0xff] %vm348_vm1, %v1145_v56  ;;  %v1252_v25 = vadd.f32 %v2816_v41, %v1176_v39  ;;  %v1114_v46 = vpop.f32.mrf.mxu3  ;;  %v570_v39 = vld [vmem:[#allocation2 + $0x48] sm:$0xff]  ;;  %v1455_v49 = vsel %vm2734_vm7, %v2195_v63, %v1454_v45  ;;  %v1458_v26 = vsel %vm2734_vm7, %v1456_v32, %v1457_v52 }
  0xe5   : > { %v614_v60 = vpop.f32.mrf.mxu1  ;;  %v1506_v62 = vunpack.c.l.b16 %v1458_v26 }
  0xe6   : > { %1268 = vst.msk [vmem:[#allocation2 + $0x10] sm:$0xff] %vm348_vm1, %v1252_v25  ;;  %v645_v0 = vadd.f32 %v614_v60, %v567_v57  ;;  %v2876_v12 = vpop.f32.mrf.mxu0 }
  0xe7   : > { %v676_v19 = vld [vmem:[#allocation2 + $0x28] sm:$0xff] }
  0xe8   : > { %v754_v9 = vadd.f32 %v721_v14, %v676_v19  ;;  %661 = vst.msk [vmem:[#allocation2 + $0x30] sm:$0xff] %vm348_vm1, %v645_v0  ;;  %2183 = vmatmul.msk.bf16.gmra.mxu1 %vm348_vm1, %v2650_v16  ;;  %2202 = vmatmul.msk.bf16.gmra.mxu2 %vm348_vm1, %v2814_v5 }
  0xe9   : > { %v1028_v41 = vld [vmem:[#allocation2 + $0x20] sm:$0xff]  ;;  %2211 = vmatmul.msk.bf16.gmra.mxu3 %vm348_vm1, %v2842_v30  ;;  %2220 = vmatmul.msk.bf16.gmra.mxu0 %vm348_vm1, %v2873_v13 }
  0xea   : > { %v1146_v10 = vadd.f32 %v1112_v35, %v1028_v41  ;;  %770 = vst.msk [vmem:[#allocation2 + $0x28] sm:$0xff] %vm348_vm1, %v754_v9 }
  0xeb   : > { %v1177_v22 = vld [vmem:[#allocation2 + $0x18] sm:$0xff]  ;;  %v724_v16 = vpop.f32.mrf.mxu2 }
  0xec   : > { %1162 = vst.msk [vmem:[#allocation2 + $0x20] sm:$0xff] %vm348_vm1, %v1146_v10  ;;  %v1253_v5 = vadd.f32 %v2832_v11, %v1177_v22  ;;  %v1117_v23 = vpop.f32.mrf.mxu3  ;;  %v1503_v11 = vunpack.c.l.b16 %v1448_v15 }
  0xed   : > { %v616_v40 = vpop.f32.mrf.mxu1 }
  0xee   : > { %1269 = vst.msk [vmem:[#allocation2 + $0x18] sm:$0xff] %vm348_vm1, %v1253_v5  ;;  %v646_v51 = vadd.f32 %v616_v40, %v568_v24  ;;  %v2894_v7 = vpop.f32.mrf.mxu0  ;;  %v2904_v21 = vpack.c.b16 %v1504_v36, %v1503_v11 }
  0xef   : > { %v677_v18 = vld [vmem:[#allocation2 + $0x30] sm:$0xff] }
  0xf0   : > { %v755_v50 = vadd.f32 %v724_v16, %v677_v18  ;;  %662 = vst.msk [vmem:[#allocation2 + $0x38] sm:$0xff] %vm348_vm1, %v646_v51  ;;  %v2951_v51 = vld [vmem:[%s2705_s16 + $0xc] sm:$0xf] }
  0xf1   : > { %v1029_v3 = vld [vmem:[#allocation2 + $0x28] sm:$0xff]  ;;  %v1001_v36 = vshrl.u32 %v2951_v51, 16 }
  0xf2   : > { %v1147_v31 = vadd.f32 %v1114_v46, %v1029_v3  ;;  %771 = vst.msk [vmem:[#allocation2 + $0x30] sm:$0xff] %vm348_vm1, %v755_v50 }
  0xf3   : > { %v1178_v20 = vld [vmem:[#allocation2 + $0x20] sm:$0xff]  ;;  %v726_v17 = vpop.f32.mrf.mxu2  ;;  %v1003_v45 = vrot.slane %v1001_v36, 4 }
  0xf4   : > { %1163 = vst.msk [vmem:[#allocation2 + $0x28] sm:$0xff] %vm348_vm1, %v1147_v31  ;;  %v1254_v33 = vadd.f32 %v2845_v1, %v1178_v20  ;;  %v1119_v47 = vpop.f32.mrf.mxu3  ;;  %v1004_v31 = vshll.u32 %v2951_v51, 16 }
  0xf5   : > { %v619_v35 = vpop.f32.mrf.mxu1 }
  0xf6   : > { %1270 = vst.msk [vmem:[#allocation2 + $0x20] sm:$0xff] %vm348_vm1, %v1254_v33  ;;  %v647_v43 = vadd.f32 %v619_v35, %v569_v2  ;;  %v2907_v42 = vpop.f32.mrf.mxu0  ;;  %v1014_v33 = vshrl.u32 %v2956_v61, 16 }
  0xf7   : > { %v678_v27 = vld [vmem:[#allocation2 + $0x38] sm:$0xff] }
  0xf8   : > { %v756_v48 = vadd.f32 %v726_v17, %v678_v27  ;;  %663 = vst.msk [vmem:[#allocation2 + $0x40] sm:$0xff] %vm348_vm1, %v647_v43  ;;  %2184 = vmatmul.msk.bf16.gmra.mxu1 %vm348_vm1, %v2684_v54  ;;  %2203 = vmatmul.msk.bf16.gmra.mxu2 %vm348_vm1, %v2842_v30  ;;  %v1010_v17 = vshll.u32 %v2956_v61, 16  ;;  %v1006_v27 = vrot.slane %v1004_v31, 5  ;;  %v1016_v52 = vrot.slane %v1014_v33, 4 }
  0xf9   : > { %v1030_v1 = vld [vmem:[#allocation2 + $0x30] sm:$0xff]  ;;  %2212 = vmatmul.msk.bf16.gmra.mxu3 %vm348_vm1, %v2873_v13  ;;  %2221 = vmatmul.msk.bf16.gmra.mxu0 %vm348_vm1, %v2904_v21 }
  0xfa   : > { %v1148_v34 = vadd.f32 %v1117_v23, %v1030_v1  ;;  %772 = vst.msk [vmem:[#allocation2 + $0x38] sm:$0xff] %vm348_vm1, %v756_v48  ;;  %v1461_v23 = vrot.slane %v2712_v8, 5  ;;  %v1464_v8 = vrot.slane %v2725_v28, 5  ;;  %v572_v28 = vld [vmem:[#allocation2 + $0x58] sm:$0xff]  ;;  %v1012_v1 = vrot.slane %v1010_v17, 5 }
  0xfb   : > { %v1179_v53 = vld [vmem:[#allocation2 + $0x28] sm:$0xff]  ;;  %v729_v54 = vpop.f32.mrf.mxu2 }
  0xfc   : > { %1164 = vst.msk [vmem:[#allocation2 + $0x30] sm:$0xff] %vm348_vm1, %v1148_v34  ;;  %v1255_v30 = vadd.f32 %v2863_v44, %v1179_v53  ;;  %v1122_v56 = vpop.f32.mrf.mxu3  ;;  %v1505_v44 = vunpack.c.l.b16 %v1455_v49  ;;  %v1463_v18 = vrot.slane %v1461_v23, 4  ;;  %v394_v53 = vld [vmem:[%s2705_s16 + $0x14] sm:$0x1]  ;;  %v1007_v49 = vor.u32 %v1006_v27, %v1003_v45 }
  0xfd   : > { %v621_v14 = vpop.f32.mrf.mxu1  ;;  %v1017_v26 = vor.u32 %v1016_v52, %v1012_v1 }
  0xfe   : > { %1271 = vst.msk [vmem:[#allocation2 + $0x28] sm:$0xff] %vm348_vm1, %v1255_v30  ;;  %v648_v25 = vadd.f32 %v621_v14, %v570_v39  ;;  %v2925_v46 = vpop.f32.mrf.mxu0  ;;  %v2935_v22 = vpack.c.b16 %v1506_v62, %v1505_v44  ;;  %v1465_v2 = vsel %vm2734_vm7, %v1463_v18, %v1464_v8  ;;  %v573_v14 = vld [vmem:[#allocation2 + $0x60] sm:$0xff]  ;;  %v1468_v62 = vrot.slane %v2956_v61, 5 }
  0xff   : > { %v679_v57 = vld [vmem:[#allocation2 + $0x40] sm:$0xff]  ;;  %v1642_v63 = vunpack.c.l.b16 %v1465_v2 }
 0x100   : > { %v757_v60 = vadd.f32 %v729_v54, %v679_v57  ;;  %664 = vst.msk [vmem:[#allocation2 + $0x48] sm:$0xff] %vm348_vm1, %v648_v25  ;;  %v1020_v57 = vshll.u32 %v394_v53, 16 }
 0x101   : > { %v1031_v0 = vld [vmem:[#allocation2 + $0x38] sm:$0xff] }
 0x102   : > { %v1149_v19 = vadd.f32 %v1119_v47, %v1031_v0  ;;  %773 = vst.msk [vmem:[#allocation2 + $0x40] sm:$0xff] %vm348_vm1, %v757_v60 }
 0x103   : > { %v1180_v9 = vld [vmem:[#allocation2 + $0x30] sm:$0xff]  ;;  %v731_v41 = vpop.f32.mrf.mxu2 }
 0x104   : > { %1165 = vst.msk [vmem:[#allocation2 + $0x38] sm:$0xff] %vm348_vm1, %v1149_v19  ;;  %v1256_v29 = vadd.f32 %v2876_v12, %v1180_v9  ;;  %v1124_v10 = vpop.f32.mrf.mxu3 }
 0x105   : > { %v624_v38 = vpop.f32.mrf.mxu1 }
 0x106   : > { %1272 = vst.msk [vmem:[#allocation2 + $0x30] sm:$0xff] %vm348_vm1, %v1256_v29  ;;  %v649_v16 = vadd.f32 %v624_v38, %v571_v6  ;;  %v2938_v5 = vpop.f32.mrf.mxu0  ;;  %v1018_v29 = vrot.slane %v1017_v26, 4  ;;  %v2197_v38 = vrot.slane %v2951_v51, 9 }
 0x107   : > { %v680_v24 = vld [vmem:[#allocation2 + $0x48] sm:$0xff] }
 0x108   : > { %v758_v40 = vadd.f32 %v731_v41, %v680_v24  ;;  %665 = vst.msk [vmem:[#allocation2 + $0x50] sm:$0xff] %vm348_vm1, %v649_v16  ;;  %2185 = vmatmul.msk.bf16.gmra.mxu1 %vm348_vm1, %v2722_v37  ;;  %2204 = vmatmul.msk.bf16.gmra.mxu2 %vm348_vm1, %v2873_v13  ;;  %v2196_v37 = vrot.slane %v2708_v4, 9  ;;  %v1008_v41 = vrot.slane %v1007_v49, 4  ;;  %v1470_v16 = vrot.slane %v1468_v62, 4 }
 0x109   : > { %v1032_v12 = vld [vmem:[#allocation2 + $0x40] sm:$0xff]  ;;  %2213 = vmatmul.msk.bf16.gmra.mxu3 %vm348_vm1, %v2904_v21  ;;  %2222 = vmatmul.msk.bf16.gmra.mxu0 %vm348_vm1, %v2935_v22  ;;  %v1469_v18 = vsel %vm2734_vm7, %v2197_v38, %v1468_v62 }
 0x10a   : > { %v1150_v15 = vadd.f32 %v1122_v56, %v1032_v12  ;;  %774 = vst.msk [vmem:[#allocation2 + $0x48] sm:$0xff] %vm348_vm1, %v758_v40  ;;  %v574_v12 = vld [vmem:[#allocation2 + $0x68] sm:$0xff]  ;;  %v1749_v59 = vunpack.c.l.b16 %v1469_v18  ;;  %v1284_v18 = vld [vmem:[#allocation2 + $0x10] sm:$0xff] }
 0x10b   : > { %v1181_v13 = vld [vmem:[#allocation2 + $0x38] sm:$0xff]  ;;  %v734_v50 = vpop.f32.mrf.mxu2 }
 0x10c   : > { %1166 = vst.msk [vmem:[#allocation2 + $0x40] sm:$0xff] %vm348_vm1, %v1150_v15  ;;  %v1257_v3 = vadd.f32 %v2894_v7, %v1181_v13  ;;  %v1127_v11 = vpop.f32.mrf.mxu3  ;;  %v1462_v7 = vsel %vm2734_vm7, %v2196_v37, %v1461_v23  ;;  %v1013_v15 = vsel %vm2507_vm4, %v1008_v41, %v1012_v1 }
 0x10d   : > { %v626_v20 = vpop.f32.mrf.mxu1  ;;  %v1641_v34 = vunpack.c.l.b16 %v1462_v7  ;;  %v575_v7 = vld [vmem:[#allocation2 + $0x70] sm:$0xff] }
 0x10e   : > { %1273 = vst.msk [vmem:[#allocation2 + $0x38] sm:$0xff] %vm348_vm1, %v1257_v3  ;;  %v650_v4 = vadd.f32 %v626_v20, %v572_v28  ;;  %v2966_v47 = vpop.f32.mrf.mxu0  ;;  %v1300_v3 = vunpack.c.l.b16 %v1013_v15 }
 0x10f   : > { %v681_v35 = vld [vmem:[#allocation2 + $0x50] sm:$0xff]  ;;  %v2977_v60 = vpack.c.b16 %v1642_v63, %v1641_v34 }
 0x110   : > { %v759_v43 = vadd.f32 %v734_v50, %v681_v35  ;;  %666 = vst.msk [vmem:[#allocation2 + $0x58] sm:$0xff] %vm348_vm1, %v650_v4 }
 0x111   : > { %v1033_v48 = vld [vmem:[#allocation2 + $0x48] sm:$0xff] }
 0x112   : > { %v1151_v32 = vadd.f32 %v1124_v10, %v1033_v48  ;;  %775 = vst.msk [vmem:[#allocation2 + $0x50] sm:$0xff] %vm348_vm1, %v759_v43  ;;  %v1022_v10 = vrot.slane %v1020_v57, 5 }
 0x113   : > { %v1182_v54 = vld [vmem:[#allocation2 + $0x40] sm:$0xff]  ;;  %v736_v30 = vpop.f32.mrf.mxu2 }
 0x114   : > { %1167 = vst.msk [vmem:[#allocation2 + $0x48] sm:$0xff] %vm348_vm1, %v1151_v32  ;;  %v1258_v56 = vadd.f32 %v2907_v42, %v1182_v54  ;;  %v1129_v39 = vpop.f32.mrf.mxu3  ;;  %v1023_v61 = vsel %vm2507_vm4, %v1018_v29, %v1022_v10 }
 0x115   : > { %v629_v25 = vpop.f32.mrf.mxu1 }
 0x116   : > { %1274 = vst.msk [vmem:[#allocation2 + $0x40] sm:$0xff] %vm348_vm1, %v1258_v56  ;;  %v651_v0 = vadd.f32 %v629_v25, %v573_v14  ;;  %v2980_v44 = vpop.f32.mrf.mxu0 }
 0x117   : > { %v682_v19 = vld [vmem:[#allocation2 + $0x58] sm:$0xff] }
 0x118   : > { %v760_v9 = vadd.f32 %v736_v30, %v682_v19  ;;  %667 = vst.msk [vmem:[#allocation2 + $0x60] sm:$0xff] %vm348_vm1, %v651_v0  ;;  %2186 = vmatmul.msk.bf16.gmra.mxu1 %vm348_vm1, %v2759_v58  ;;  %2205 = vmatmul.msk.bf16.gmra.mxu2 %vm348_vm1, %v2904_v21  ;;  %v1471_v58 = vrot.slane %v394_v53, 5  ;;  %v576_v53 = vld [vmem:[#allocation2 + $0x78] sm:$0xff] }
 0x119   : > { %v1034_v42 = vld [vmem:[#allocation2 + $0x50] sm:$0xff]  ;;  %2214 = vmatmul.msk.bf16.gmra.mxu3 %vm348_vm1, %v2935_v22  ;;  %2223 = vmatmul.msk.bf16.gmra.mxu0 %vm348_vm1, %v2977_v60 }
 0x11a   : > { %v1152_v6 = vadd.f32 %v1127_v11, %v1034_v42  ;;  %776 = vst.msk [vmem:[#allocation2 + $0x58] sm:$0xff] %vm348_vm1, %v760_v9  ;;  %v1301_v11 = vunpack.c.l.b16 %v1023_v61 }
 0x11b   : > { %v1183_v23 = vld [vmem:[#allocation2 + $0x48] sm:$0xff]  ;;  %v739_v24 = vpop.f32.mrf.mxu2 }
 0x11c   : > { %1168 = vst.msk [vmem:[#allocation2 + $0x50] sm:$0xff] %vm348_vm1, %v1152_v6  ;;  %v1259_v21 = vadd.f32 %v2925_v46, %v1183_v23  ;;  %v1132_v40 = vpop.f32.mrf.mxu3  ;;  %v1472_v46 = vsel %vm2734_vm7, %v1470_v16, %v1471_v58  ;;  %v1302_v55 = vpack.c.b16 %v1301_v11, %v1300_v3  ;;  %v1283_v16 = vld [vmem:[#allocation2 + $0x8] sm:$0xff] }
 0x11d   : > { %v631_v8 = vpop.f32.mrf.mxu1  ;;  %v1750_v31 = vunpack.c.l.b16 %v1472_v46 }
 0x11e   : > { %1275 = vst.msk [vmem:[#allocation2 + $0x48] sm:$0xff] %vm348_vm1, %v1259_v21  ;;  %v652_v51 = vadd.f32 %v631_v8, %v574_v12  ;;  %v3001_v37 = vpop.f32.mrf.mxu0 }
 0x11f   : > { %v683_v13 = vld [vmem:[#allocation2 + $0x60] sm:$0xff]  ;;  %v1751_v35 = vpack.c.b16 %v1750_v31, %v1749_v59 }
 0x120   : > { %v761_v50 = vadd.f32 %v739_v24, %v683_v13  ;;  %668 = vst.msk [vmem:[#allocation2 + $0x68] sm:$0xff] %vm348_vm1, %v652_v51 }
 0x121   : > { %v1035_v36 = vld [vmem:[#allocation2 + $0x58] sm:$0xff] }
 0x122   : > { %v1153_v28 = vadd.f32 %v1129_v39, %v1035_v36  ;;  %777 = vst.msk [vmem:[#allocation2 + $0x60] sm:$0xff] %vm348_vm1, %v761_v50 }
 0x123   : > { %v1184_v20 = vld [vmem:[#allocation2 + $0x50] sm:$0xff]  ;;  %v741_v17 = vpop.f32.mrf.mxu2 }
 0x124   : > { %1169 = vst.msk [vmem:[#allocation2 + $0x58] sm:$0xff] %vm348_vm1, %v1153_v28  ;;  %v1260_v33 = vadd.f32 %v2938_v5, %v1184_v20  ;;  %v1134_v4 = vpop.f32.mrf.mxu3 }
 0x125   : > { %v634_v2 = vpop.f32.mrf.mxu1 }
 0x126   : > { %1276 = vst.msk [vmem:[#allocation2 + $0x50] sm:$0xff] %vm348_vm1, %v1260_v33  ;;  %v653_v43 = vadd.f32 %v634_v2, %v575_v7  ;;  %v1245_v45 = vpop.f32.mrf.mxu0  ;;  %v1285_v33 = vld [vmem:[#allocation2 + $0x18] sm:$0xff] }
 0x127   : > { %v684_v27 = vld [vmem:[#allocation2 + $0x68] sm:$0xff] }
 0x128   : > { %v762_v48 = vadd.f32 %v741_v17, %v684_v27  ;;  %669 = vst.msk [vmem:[#allocation2 + $0x70] sm:$0xff] %vm348_vm1, %v653_v43  ;;  %2187 = vmatmul.msk.bf16.gmra.mxu1 %vm348_vm1, %v1302_v55  ;;  %2206 = vmatmul.msk.bf16.gmra.mxu2 %vm348_vm1, %v2935_v22 }
 0x129   : > { %v1036_v1 = vld [vmem:[#allocation2 + $0x60] sm:$0xff]  ;;  %2215 = vmatmul.msk.bf16.gmra.mxu3 %vm348_vm1, %v2977_v60  ;;  %2224 = vmatmul.msk.bf16.gmra.mxu0 %vm348_vm1, %v1751_v35 }
 0x12a   : > { %v1154_v5 = vadd.f32 %v1132_v40, %v1036_v1  ;;  %778 = vst.msk [vmem:[#allocation2 + $0x68] sm:$0xff] %vm348_vm1, %v762_v48  ;;  %v1282_v60 = vld [vmem:[#allocation2] sm:$0xff] }
 0x12b   : > { %v1185_v52 = vld [vmem:[#allocation2 + $0x58] sm:$0xff]  ;;  %v744_v34 = vpop.f32.mrf.mxu2 }
 0x12c   : > { %1170 = vst.msk [vmem:[#allocation2 + $0x60] sm:$0xff] %vm348_vm1, %v1154_v5  ;;  %v1261_v63 = vadd.f32 %v2966_v47, %v1185_v52  ;;  %v1137_v32 = vpop.f32.mrf.mxu3  ;;  %v1286_v52 = vld [vmem:[#allocation2 + $0x20] sm:$0xff] }
 0x12d   : > { %v636_v54 = vpop.f32.mrf.mxu1 }
 0x12e   : > { %1277 = vst.msk [vmem:[#allocation2 + $0x58] sm:$0xff] %vm348_vm1, %v1261_v63  ;;  %v654_v22 = vadd.f32 %v636_v54, %v576_v53  ;;  %v1247_v30 = vpop.f32.mrf.mxu0 }
 0x12f   : > { %v685_v56 = vld [vmem:[#allocation2 + $0x70] sm:$0xff] }
 0x130   : > { %v763_v39 = vadd.f32 %v744_v34, %v685_v56  ;;  %670 = vst.msk [vmem:[#allocation2 + $0x78] sm:$0xff] %vm348_vm1, %v654_v22  ;;  %v3058_v22 = vld [vmem:[%s3211_s3] ss:$0 sm:$0xff] }
 0x131   : > { %v1037_v14 = vld [vmem:[#allocation2 + $0x68] sm:$0xff] }
 0x132   : > { %v1155_v25 = vadd.f32 %v1134_v4, %v1037_v14  ;;  %779 = vst.msk [vmem:[#allocation2 + $0x70] sm:$0xff] %vm348_vm1, %v763_v39  ;;  %v3064_v14 = vld [vmem:[%s3212_s4] ss:$0 sm:$0xff] }
 0x133   : > { %v1186_v49 = vld [vmem:[#allocation2 + $0x60] sm:$0xff]  ;;  %v746_v26 = vpop.f32.mrf.mxu2 }
 0x134   : > { %1171 = vst.msk [vmem:[#allocation2 + $0x68] sm:$0xff] %vm348_vm1, %v1155_v25  ;;  %v1262_v47 = vadd.f32 %v2980_v44, %v1186_v49  ;;  %v1139_v57 = vpop.f32.mrf.mxu3 }
 0x135   : > { %v1318_v0 = vpop.f32.mrf.mxu1 }
 0x136   : > { %1278 = vst.msk [vmem:[#allocation2 + $0x60] sm:$0xff] %vm348_vm1, %v1262_v47  ;;  %v1358_v62 = vadd.f32 %v1318_v0, %v1282_v60  ;;  %v1767_v19 = vpop.f32.mrf.mxu0 }
 0x137   : > { %v686_v9 = vld [vmem:[#allocation2 + $0x78] sm:$0xff] }
 0x138   : > { %v764_v42 = vadd.f32 %v746_v26, %v686_v9  ;;  %1374 = vst.msk [vmem:[#allocation2] sm:$0xff] %vm348_vm1, %v1358_v62 }
 0x139   : > { %v1038_v41 = vld [vmem:[#allocation2 + $0x70] sm:$0xff] }
 0x13a   : > { %v1156_v29 = vadd.f32 %v1137_v32, %v1038_v41  ;;  %780 = vst.msk [vmem:[#allocation2 + $0x78] sm:$0xff] %vm348_vm1, %v764_v42 }
 0x13b   : > { %v1187_v10 = vld [vmem:[#allocation2 + $0x68] sm:$0xff]  ;;  %v1551_v6 = vpop.f32.mrf.mxu2 }
 0x13c   : > { %1172 = vst.msk [vmem:[#allocation2 + $0x70] sm:$0xff] %vm348_vm1, %v1156_v29  ;;  %v1263_v44 = vadd.f32 %v3001_v37, %v1187_v10  ;;  %v1659_v38 = vpop.f32.mrf.mxu3 }
 0x13d   : > { %v1320_v58 = vpop.f32.mrf.mxu1 }
 0x13e   : > { %1279 = vst.msk [vmem:[#allocation2 + $0x68] sm:$0xff] %vm348_vm1, %v1263_v44  ;;  %v1359_v23 = vadd.f32 %v1320_v58, %v1283_v16  ;;  %v3033_v24 = vpop.f32.mrf.mxu0 }
 0x13f   : > { %v1473_v21 = vld [vmem:[#allocation2] sm:$0xff] }
 0x140   : > { %v1591_v40 = vadd.f32 %v1551_v6, %v1473_v21  ;;  %1375 = vst.msk [vmem:[#allocation2 + $0x8] sm:$0xff] %vm348_vm1, %v1359_v23 }
 0x141   : > { %v1039_v12 = vld [vmem:[#allocation2 + $0x78] sm:$0xff] }
 0x142   : > { %v1157_v8 = vadd.f32 %v1139_v57, %v1039_v12  ;;  %1607 = vst.msk [vmem:[#allocation2] sm:$0xff] %vm348_vm1, %v1591_v40  ;;  %v1287_v57 = vld [vmem:[#allocation2 + $0x28] sm:$0xff] }
 0x143   : > { %v1188_v15 = vld [vmem:[#allocation2 + $0x70] sm:$0xff]  ;;  %v1553_v61 = vpop.f32.mrf.mxu2 }
 0x144   : > { %1173 = vst.msk [vmem:[#allocation2 + $0x78] sm:$0xff] %vm348_vm1, %v1157_v8  ;;  %v1264_v51 = vadd.f32 %v1245_v45, %v1188_v15  ;;  %v1661_v37 = vpop.f32.mrf.mxu3 }
 0x145   : > { %v1323_v46 = vpop.f32.mrf.mxu1 }
 0x146   : > { %1280 = vst.msk [vmem:[#allocation2 + $0x70] sm:$0xff] %vm348_vm1, %v1264_v51  ;;  %v1360_v13 = vadd.f32 %v1323_v46, %v1284_v18  ;;  %v3040_v11 = vpop.f32.mrf.mxu0 }
 0x147   : > { %v1474_v50 = vld [vmem:[#allocation2 + $0x8] sm:$0xff] }
 0x148   : > { %v1592_v3 = vadd.f32 %v1553_v61, %v1474_v50  ;;  %1376 = vst.msk [vmem:[#allocation2 + $0x10] sm:$0xff] %vm348_vm1, %v1360_v13 }
 0x149   : > { %v1623_v36 = vld [vmem:[#allocation2] sm:$0xff] }
 0x14a   : > { %v1699_v59 = vadd.f32 %v1659_v38, %v1623_v36  ;;  %1608 = vst.msk [vmem:[#allocation2 + $0x8] sm:$0xff] %vm348_vm1, %v1592_v3 }
 0x14b   : > { %v1189_v31 = vld [vmem:[#allocation2 + $0x78] sm:$0xff]  ;;  %v1556_v28 = vpop.f32.mrf.mxu2 }
 0x14c   : > { %1715 = vst.msk [vmem:[#allocation2] sm:$0xff] %vm348_vm1, %v1699_v59  ;;  %v1265_v20 = vadd.f32 %v1247_v30, %v1189_v31  ;;  %v1664_v17 = vpop.f32.mrf.mxu3  ;;  %v1289_v31 = vld [vmem:[#allocation2 + $0x38] sm:$0xff] }
 0x14d   : > { %v1325_v55 = vpop.f32.mrf.mxu1 }
 0x14e   : > { %1281 = vst.msk [vmem:[#allocation2 + $0x78] sm:$0xff] %vm348_vm1, %v1265_v20  ;;  %v1361_v4 = vadd.f32 %v1325_v55, %v1285_v33  ;;  %v3048_v45 = vpop.f32.mrf.mxu0 }
 0x14f   : > { %v1475_v7 = vld [vmem:[#allocation2 + $0x10] sm:$0xff] }
 0x150   : > { %v1593_v2 = vadd.f32 %v1556_v28, %v1475_v7  ;;  %1377 = vst.msk [vmem:[#allocation2 + $0x18] sm:$0xff] %vm348_vm1, %v1361_v4 }
 0x151   : > { %v1624_v35 = vld [vmem:[#allocation2 + $0x8] sm:$0xff] }
 0x152   : > { %v1700_v43 = vadd.f32 %v1661_v37, %v1624_v35  ;;  %1609 = vst.msk [vmem:[#allocation2 + $0x10] sm:$0xff] %vm348_vm1, %v1593_v2 }
 0x153   : > { %v1731_v27 = vld [vmem:[#allocation2] sm:$0xff]  ;;  %v1558_v48 = vpop.f32.mrf.mxu2 }
 0x154   : > { %1716 = vst.msk [vmem:[#allocation2 + $0x8] sm:$0xff] %vm348_vm1, %v1700_v43  ;;  %v1807_v1 = vadd.f32 %v1767_v19, %v1731_v27  ;;  %v1666_v5 = vpop.f32.mrf.mxu3 }
 0x155   : > { %v1328_v34 = vpop.f32.mrf.mxu1 }
 0x156   : > { %1823 = vst.msk [vmem:[#allocation2] sm:$0xff] %vm348_vm1, %v1807_v1  ;;  %v1362_v63 = vadd.f32 %v1328_v34, %v1286_v52  ;;  %v3068_v26 = vpop.f32.mrf.mxu0  ;;  %v1290_v34 = vld [vmem:[#allocation2 + $0x40] sm:$0xff] }
 0x157   : > { %v1476_v32 = vld [vmem:[#allocation2 + $0x18] sm:$0xff] }
 0x158   : > { %v1594_v53 = vadd.f32 %v1558_v48, %v1476_v32  ;;  %1378 = vst.msk [vmem:[#allocation2 + $0x20] sm:$0xff] %vm348_vm1, %v1362_v63 }
 0x159   : > { %v1625_v54 = vld [vmem:[#allocation2 + $0x10] sm:$0xff] }
 0x15a   : > { %v1701_v30 = vadd.f32 %v1664_v17, %v1625_v54  ;;  %1610 = vst.msk [vmem:[#allocation2 + $0x18] sm:$0xff] %vm348_vm1, %v1594_v53 }
 0x15b   : > { %v1732_v56 = vld [vmem:[#allocation2 + $0x8] sm:$0xff]  ;;  %v1561_v39 = vpop.f32.mrf.mxu2 }
 0x15c   : > { %1717 = vst.msk [vmem:[#allocation2 + $0x10] sm:$0xff] %vm348_vm1, %v1701_v30  ;;  %v1808_v25 = vadd.f32 %v3033_v24, %v1732_v56  ;;  %v1669_v49 = vpop.f32.mrf.mxu3  ;;  %v1288_v24 = vld [vmem:[#allocation2 + $0x30] sm:$0xff] }
 0x15d   : > { %v1839_v47 = vld [vmem:[#allocation2] sm:$0xff]  ;;  %v1330_v60 = vpop.f32.mrf.mxu1 }
 0x15e   : > { %v1859_v0 = vmul.f32 %v3058_v22, %v1839_v47  ;;  %1824 = vst.msk [vmem:[#allocation2 + $0x8] sm:$0xff] %vm348_vm1, %v1808_v25  ;;  %v1363_v62 = vadd.f32 %v1330_v60, %v1287_v57  ;;  %v1779_v8 = vpop.f32.mrf.mxu0 }
 0x15f   : > { %v1477_v19 = vld [vmem:[#allocation2 + $0x20] sm:$0xff] }
 0x160   : > { %v1879_v9 = vadd.f32 %v3064_v14, %v1859_v0  ;;  %v1595_v42 = vadd.f32 %v1561_v39, %v1477_v19  ;;  %1379 = vst.msk [vmem:[#allocation2 + $0x28] sm:$0xff] %vm348_vm1, %v1363_v62 }
 0x161   : > { %v1626_v41 = vld [vmem:[#allocation2 + $0x18] sm:$0xff] }
 0x162   : > { %vm1895_vm8 = vcmp.ge.f32.partialorder %v1879_v9, 0.0  ;;  %v1911_v29 = vmul.f32 0.01, %v1879_v9  ;;  %v1702_v10 = vadd.f32 %v1666_v5, %v1626_v41  ;;  %1611 = vst.msk [vmem:[#allocation2 + $0x20] sm:$0xff] %vm348_vm1, %v1595_v42 }
 0x163   : > { %v1733_v6 = vld [vmem:[#allocation2 + $0x10] sm:$0xff]  ;;  %v1563_v44 = vpop.f32.mrf.mxu2 }
 0x164   : > { %v1927_v38 = vsel %vm1895_vm8, %v1879_v9, %v1911_v29  ;;  %1718 = vst.msk [vmem:[#allocation2 + $0x18] sm:$0xff] %vm348_vm1, %v1702_v10  ;;  %v1809_v16 = vadd.f32 %v3040_v11, %v1733_v6  ;;  %v1671_v58 = vpop.f32.mrf.mxu3  ;;  %v1291_v9 = vld [vmem:[#allocation2 + $0x48] sm:$0xff] }
 0x165   : > { %1943 = vst.msk [vmem:[%s3077_s6] sm:$0xff] %vm348_vm1, %v1927_v38  ;;  %v1840_v23 = vld [vmem:[#allocation2 + $0x8] sm:$0xff]  ;;  %v1333_v21 = vpop.f32.mrf.mxu1 }
 0x166   : > { %v1860_v40 = vmul.f32 %v3058_v22, %v1840_v23  ;;  %1825 = vst.msk [vmem:[#allocation2 + $0x10] sm:$0xff] %vm348_vm1, %v1809_v16  ;;  %v1364_v12 = vadd.f32 %v1333_v21, %v1288_v24  ;;  %v1782_v7 = vpop.f32.mrf.mxu0 }
 0x167   : > { %v1478_v15 = vld [vmem:[#allocation2 + $0x28] sm:$0xff] }
 0x168   : > { %v1880_v61 = vadd.f32 %v3064_v14, %v1860_v40  ;;  %v1596_v51 = vadd.f32 %v1563_v44, %v1478_v15  ;;  %1380 = vst.msk [vmem:[#allocation2 + $0x30] sm:$0xff] %vm348_vm1, %v1364_v12 }
 0x169   : > { %v1627_v37 = vld [vmem:[#allocation2 + $0x20] sm:$0xff] }
 0x16a   : > { %vm1896_vm9 = vcmp.ge.f32.partialorder %v1880_v61, 0.0  ;;  %v1912_v18 = vmul.f32 0.01, %v1880_v61  ;;  %v1703_v46 = vadd.f32 %v1669_v49, %v1627_v37  ;;  %1612 = vst.msk [vmem:[#allocation2 + $0x28] sm:$0xff] %vm348_vm1, %v1596_v51 }
 0x16b   : > { %v1734_v13 = vld [vmem:[#allocation2 + $0x18] sm:$0xff]  ;;  %v1566_v50 = vpop.f32.mrf.mxu2 }
 0x16c   : > { %v1928_v3 = vsel %vm1896_vm9, %v1880_v61, %v1912_v18  ;;  %1719 = vst.msk [vmem:[#allocation2 + $0x20] sm:$0xff] %vm348_vm1, %v1703_v46  ;;  %v1810_v11 = vadd.f32 %v3048_v45, %v1734_v13  ;;  %v1674_v36 = vpop.f32.mrf.mxu3  ;;  %v1292_v61 = vld [vmem:[#allocation2 + $0x50] sm:$0xff] }
 0x16d   : > { %1944 = vst.msk [vmem:[%s3077_s6 + $0x8] sm:$0xff] %vm348_vm1, %v1928_v3  ;;  %v1841_v59 = vld [vmem:[#allocation2 + $0x10] sm:$0xff]  ;;  %v1335_v28 = vpop.f32.mrf.mxu1 }
 0x16e   : > { %v1861_v20 = vmul.f32 %v3058_v22, %v1841_v59  ;;  %1826 = vst.msk [vmem:[#allocation2 + $0x18] sm:$0xff] %vm348_vm1, %v1810_v11  ;;  %v1365_v17 = vadd.f32 %v1335_v28, %v1289_v31 }
 0x16f   : > { %v1479_v33 = vld [vmem:[#allocation2 + $0x30] sm:$0xff] }
 0x170   : > { %v1881_v55 = vadd.f32 %v3064_v14, %v1861_v20  ;;  %v1597_v4 = vadd.f32 %v1566_v50, %v1479_v33  ;;  %1381 = vst.msk [vmem:[#allocation2 + $0x38] sm:$0xff] %vm348_vm1, %v1365_v17  ;;  %v1293_v33 = vld [vmem:[#allocation2 + $0x58] sm:$0xff] }
 0x171   : > { %v1628_v2 = vld [vmem:[#allocation2 + $0x28] sm:$0xff] }
 0x172   : > { %vm1897_vm10 = vcmp.ge.f32.partialorder %v1881_v55, 0.0  ;;  %v1913_v35 = vmul.f32 0.01, %v1881_v55  ;;  %v1704_v43 = vadd.f32 %v1671_v58, %v1628_v2  ;;  %1613 = vst.msk [vmem:[#allocation2 + $0x30] sm:$0xff] %vm348_vm1, %v1597_v4 }
 0x173   : > { %v1735_v45 = vld [vmem:[#allocation2 + $0x20] sm:$0xff]  ;;  %v1568_v27 = vpop.f32.mrf.mxu2 }
 0x174   : > { %v1929_v48 = vsel %vm1897_vm10, %v1881_v55, %v1913_v35  ;;  %1720 = vst.msk [vmem:[#allocation2 + $0x28] sm:$0xff] %vm348_vm1, %v1704_v43  ;;  %v1811_v1 = vadd.f32 %v3068_v26, %v1735_v45  ;;  %v1676_v5 = vpop.f32.mrf.mxu3  ;;  %v1784_v26 = vpop.f32.mrf.mxu0 }
 0x175   : > { %1945 = vst.msk [vmem:[%s3077_s6 + $0x10] sm:$0xff] %vm348_vm1, %v1929_v48  ;;  %v1842_v52 = vld [vmem:[#allocation2 + $0x18] sm:$0xff]  ;;  %v1338_v63 = vpop.f32.mrf.mxu1 }
 0x176   : > { %v1862_v32 = vmul.f32 %v3058_v22, %v1842_v52  ;;  %1827 = vst.msk [vmem:[#allocation2 + $0x20] sm:$0xff] %vm348_vm1, %v1811_v1  ;;  %v1366_v53 = vadd.f32 %v1338_v63, %v1290_v34 }
 0x177   : > { %v1480_v54 = vld [vmem:[#allocation2 + $0x38] sm:$0xff] }
 0x178   : > { %v1882_v30 = vadd.f32 %v3064_v14, %v1862_v32  ;;  %v1598_v56 = vadd.f32 %v1568_v27, %v1480_v54  ;;  %1382 = vst.msk [vmem:[#allocation2 + $0x40] sm:$0xff] %vm348_vm1, %v1366_v53  ;;  %v1294_v54 = vld [vmem:[#allocation2 + $0x60] sm:$0xff] }
 0x179   : > { %v1629_v39 = vld [vmem:[#allocation2 + $0x30] sm:$0xff] }
 0x17a   : > { %vm1898_vm11 = vcmp.ge.f32.partialorder %v1882_v30, 0.0  ;;  %v1914_v25 = vmul.f32 0.01, %v1882_v30  ;;  %v1705_v49 = vadd.f32 %v1674_v36, %v1629_v39  ;;  %1614 = vst.msk [vmem:[#allocation2 + $0x38] sm:$0xff] %vm348_vm1, %v1598_v56 }
 0x17b   : > { %v1736_v47 = vld [vmem:[#allocation2 + $0x28] sm:$0xff]  ;;  %v1571_v57 = vpop.f32.mrf.mxu2 }
 0x17c   : > { %v1930_v60 = vsel %vm1898_vm11, %v1882_v30, %v1914_v25  ;;  %1721 = vst.msk [vmem:[#allocation2 + $0x30] sm:$0xff] %vm348_vm1, %v1705_v49  ;;  %v1812_v0 = vadd.f32 %v1779_v8, %v1736_v47  ;;  %v1679_v62 = vpop.f32.mrf.mxu3  ;;  %v1787_v8 = vpop.f32.mrf.mxu0 }
 0x17d   : > { %1946 = vst.msk [vmem:[%s3077_s6 + $0x18] sm:$0xff] %vm348_vm1, %v1930_v60  ;;  %v1843_v19 = vld [vmem:[#allocation2 + $0x20] sm:$0xff]  ;;  %v1340_v42 = vpop.f32.mrf.mxu1 }
 0x17e   : > { %v1863_v41 = vmul.f32 %v3058_v22, %v1843_v19  ;;  %1828 = vst.msk [vmem:[#allocation2 + $0x28] sm:$0xff] %vm348_vm1, %v1812_v0  ;;  %v1367_v29 = vadd.f32 %v1340_v42, %v1291_v9 }
 0x17f   : > { %v1481_v10 = vld [vmem:[#allocation2 + $0x40] sm:$0xff] }
 0x180   : > { %v1883_v6 = vadd.f32 %v3064_v14, %v1863_v41  ;;  %v1599_v44 = vadd.f32 %v1571_v57, %v1481_v10  ;;  %1383 = vst.msk [vmem:[#allocation2 + $0x48] sm:$0xff] %vm348_vm1, %v1367_v29  ;;  %v1295_v10 = vld [vmem:[#allocation2 + $0x68] sm:$0xff] }
 0x181   : > { %v1630_v38 = vld [vmem:[#allocation2 + $0x38] sm:$0xff] }
 0x182   : > { %vm1899_vm12 = vcmp.ge.f32.partialorder %v1883_v6, 0.0  ;;  %v1915_v16 = vmul.f32 0.01, %v1883_v6  ;;  %v1706_v58 = vadd.f32 %v1676_v5, %v1630_v38  ;;  %1615 = vst.msk [vmem:[#allocation2 + $0x40] sm:$0xff] %vm348_vm1, %v1599_v44 }
 0x183   : > { %v1737_v23 = vld [vmem:[#allocation2 + $0x30] sm:$0xff]  ;;  %v1573_v24 = vpop.f32.mrf.mxu2 }
 0x184   : > { %v1931_v21 = vsel %vm1899_vm12, %v1883_v6, %v1915_v16  ;;  %1722 = vst.msk [vmem:[#allocation2 + $0x38] sm:$0xff] %vm348_vm1, %v1706_v58  ;;  %v1813_v40 = vadd.f32 %v1782_v7, %v1737_v23  ;;  %v1681_v12 = vpop.f32.mrf.mxu3  ;;  %v1789_v35 = vpop.f32.mrf.mxu0 }
 0x185   : > { %1947 = vst.msk [vmem:[%s3077_s6 + $0x20] sm:$0xff] %vm348_vm1, %v1931_v21  ;;  %v1844_v15 = vld [vmem:[#allocation2 + $0x28] sm:$0xff]  ;;  %v1343_v51 = vpop.f32.mrf.mxu1 }
 0x186   : > { %v1864_v37 = vmul.f32 %v3058_v22, %v1844_v15  ;;  %1829 = vst.msk [vmem:[#allocation2 + $0x30] sm:$0xff] %vm348_vm1, %v1813_v40  ;;  %v1368_v18 = vadd.f32 %v1343_v51, %v1292_v61 }
 0x187   : > { %v1482_v46 = vld [vmem:[#allocation2 + $0x48] sm:$0xff] }
 0x188   : > { %v1884_v13 = vadd.f32 %v3064_v14, %v1864_v37  ;;  %v1600_v50 = vadd.f32 %v1573_v24, %v1482_v46  ;;  %1384 = vst.msk [vmem:[#allocation2 + $0x50] sm:$0xff] %vm348_vm1, %v1368_v18  ;;  %v1296_v46 = vld [vmem:[#allocation2 + $0x70] sm:$0xff] }
 0x189   : > { %v1631_v3 = vld [vmem:[#allocation2 + $0x40] sm:$0xff] }
 0x18a   : > { %vm1900_vm13 = vcmp.ge.f32.partialorder %v1884_v13, 0.0  ;;  %v1916_v11 = vmul.f32 0.01, %v1884_v13  ;;  %v1707_v36 = vadd.f32 %v1679_v62, %v1631_v3  ;;  %1616 = vst.msk [vmem:[#allocation2 + $0x48] sm:$0xff] %vm348_vm1, %v1600_v50 }
 0x18b   : > { %v1738_v59 = vld [vmem:[#allocation2 + $0x38] sm:$0xff]  ;;  %v1576_v31 = vpop.f32.mrf.mxu2 }
 0x18c   : > { %v1932_v28 = vsel %vm1900_vm13, %v1884_v13, %v1916_v11  ;;  %1723 = vst.msk [vmem:[#allocation2 + $0x40] sm:$0xff] %vm348_vm1, %v1707_v36  ;;  %v1814_v20 = vadd.f32 %v1784_v26, %v1738_v59  ;;  %v1684_v2 = vpop.f32.mrf.mxu3  ;;  %v1792_v57 = vpop.f32.mrf.mxu0 }
 0x18d   : > { %1948 = vst.msk [vmem:[%s3077_s6 + $0x28] sm:$0xff] %vm348_vm1, %v1932_v28  ;;  %v1845_v17 = vld [vmem:[#allocation2 + $0x30] sm:$0xff]  ;;  %v1345_v55 = vpop.f32.mrf.mxu1 }
 0x18e   : > { %v1865_v4 = vmul.f32 %v3058_v22, %v1845_v17  ;;  %1830 = vst.msk [vmem:[#allocation2 + $0x38] sm:$0xff] %vm348_vm1, %v1814_v20  ;;  %v1369_v7 = vadd.f32 %v1345_v55, %v1293_v33 }
 0x18f   : > { %v1483_v43 = vld [vmem:[#allocation2 + $0x50] sm:$0xff] }
 0x190   : > { %v1885_v45 = vadd.f32 %v3064_v14, %v1865_v4  ;;  %v1601_v27 = vadd.f32 %v1576_v31, %v1483_v43  ;;  %1385 = vst.msk [vmem:[#allocation2 + $0x58] sm:$0xff] %vm348_vm1, %v1369_v7  ;;  %v1297_v43 = vld [vmem:[#allocation2 + $0x78] sm:$0xff] }
 0x191   : > { %v1632_v48 = vld [vmem:[#allocation2 + $0x48] sm:$0xff] }
 0x192   : > { %vm1901_vm14 = vcmp.ge.f32.partialorder %v1885_v45, 0.0  ;;  %v1917_v1 = vmul.f32 0.01, %v1885_v45  ;;  %v1708_v5 = vadd.f32 %v1681_v12, %v1632_v48  ;;  %1617 = vst.msk [vmem:[#allocation2 + $0x50] sm:$0xff] %vm348_vm1, %v1601_v27 }
 0x193   : > { %v1739_v52 = vld [vmem:[#allocation2 + $0x40] sm:$0xff]  ;;  %v1578_v34 = vpop.f32.mrf.mxu2 }
 0x194   : > { %v1933_v63 = vsel %vm1901_vm14, %v1885_v45, %v1917_v1  ;;  %1724 = vst.msk [vmem:[#allocation2 + $0x48] sm:$0xff] %vm348_vm1, %v1708_v5  ;;  %v1815_v32 = vadd.f32 %v1787_v8, %v1739_v52  ;;  %v1686_v47 = vpop.f32.mrf.mxu3  ;;  %v1794_v8 = vpop.f32.mrf.mxu0 }
 0x195   : > { %1949 = vst.msk [vmem:[%s3077_s6 + $0x30] sm:$0xff] %vm348_vm1, %v1933_v63  ;;  %v1846_v53 = vld [vmem:[#allocation2 + $0x38] sm:$0xff]  ;;  %v1348_v30 = vpop.f32.mrf.mxu1 }
 0x196   : > { %v1866_v56 = vmul.f32 %v3058_v22, %v1846_v53  ;;  %1831 = vst.msk [vmem:[#allocation2 + $0x40] sm:$0xff] %vm348_vm1, %v1815_v32  ;;  %v1370_v39 = vadd.f32 %v1348_v30, %v1294_v54 }
 0x197   : > { %v1484_v25 = vld [vmem:[#allocation2 + $0x58] sm:$0xff] }
 0x198   : > { %v1886_v49 = vadd.f32 %v3064_v14, %v1866_v56  ;;  %v1602_v26 = vadd.f32 %v1578_v34, %v1484_v25  ;;  %1386 = vst.msk [vmem:[#allocation2 + $0x60] sm:$0xff] %vm348_vm1, %v1370_v39 }
 0x199   : > { %v1633_v60 = vld [vmem:[#allocation2 + $0x50] sm:$0xff] }
 0x19a   : > { %vm1902_vm15 = vcmp.ge.f32.partialorder %v1886_v49, 0.0  ;;  %v1918_v0 = vmul.f32 0.01, %v1886_v49  ;;  %v1709_v62 = vadd.f32 %v1684_v2, %v1633_v60  ;;  %1618 = vst.msk [vmem:[#allocation2 + $0x58] sm:$0xff] %vm348_vm1, %v1602_v26 }
 0x19b   : > { %v1740_v19 = vld [vmem:[#allocation2 + $0x48] sm:$0xff]  ;;  %v1581_v9 = vpop.f32.mrf.mxu2 }
 0x19c   : > { %v1934_v42 = vsel %vm1902_vm15, %v1886_v49, %v1918_v0  ;;  %1725 = vst.msk [vmem:[#allocation2 + $0x50] sm:$0xff] %vm348_vm1, %v1709_v62  ;;  %v1816_v41 = vadd.f32 %v1789_v35, %v1740_v19  ;;  %v1689_v12 = vpop.f32.mrf.mxu3  ;;  %v1797_v7 = vpop.f32.mrf.mxu0 }
 0x19d   : > { %1950 = vst.msk [vmem:[%s3077_s6 + $0x38] sm:$0xff] %vm348_vm1, %v1934_v42  ;;  %v1847_v29 = vld [vmem:[#allocation2 + $0x40] sm:$0xff]  ;;  %v1350_v6 = vpop.f32.mrf.mxu1 }
 0x19e   : > { %v1867_v44 = vmul.f32 %v3058_v22, %v1847_v29  ;;  %1832 = vst.msk [vmem:[#allocation2 + $0x48] sm:$0xff] %vm348_vm1, %v1816_v41  ;;  %v1371_v38 = vadd.f32 %v1350_v6, %v1295_v10 }
 0x19f   : > { %v1485_v16 = vld [vmem:[#allocation2 + $0x60] sm:$0xff] }
 0x1a0   : > { %v1887_v58 = vadd.f32 %v3064_v14, %v1867_v44  ;;  %v1603_v23 = vadd.f32 %v1581_v9, %v1485_v16  ;;  %1387 = vst.msk [vmem:[#allocation2 + $0x68] sm:$0xff] %vm348_vm1, %v1371_v38 }
 0x1a1   : > { %v1634_v24 = vld [vmem:[#allocation2 + $0x58] sm:$0xff] }
 0x1a2   : > { %vm1903_vm0 = vcmp.ge.f32.partialorder %v1887_v58, 0.0  ;;  %v1919_v21 = vmul.f32 0.01, %v1887_v58  ;;  %v1710_v40 = vadd.f32 %v1686_v47, %v1634_v24  ;;  %1619 = vst.msk [vmem:[#allocation2 + $0x60] sm:$0xff] %vm348_vm1, %v1603_v23 }
 0x1a3   : > { %v1741_v15 = vld [vmem:[#allocation2 + $0x50] sm:$0xff]  ;;  %v1583_v61 = vpop.f32.mrf.mxu2 }
 0x1a4   : > { %v1935_v51 = vsel %vm1903_vm0, %v1887_v58, %v1919_v21  ;;  %1726 = vst.msk [vmem:[#allocation2 + $0x58] sm:$0xff] %vm348_vm1, %v1710_v40  ;;  %v1817_v37 = vadd.f32 %v1792_v57, %v1741_v15  ;;  %v1691_v4 = vpop.f32.mrf.mxu3  ;;  %v1799_v25 = vpop.f32.mrf.mxu0 }
 0x1a5   : > { %1951 = vst.msk [vmem:[%s3077_s6 + $0x40] sm:$0xff] %vm348_vm1, %v1935_v51  ;;  %v1848_v18 = vld [vmem:[#allocation2 + $0x48] sm:$0xff]  ;;  %v1353_v13 = vpop.f32.mrf.mxu1 }
 0x1a6   : > { %v1868_v50 = vmul.f32 %v3058_v22, %v1848_v18  ;;  %1833 = vst.msk [vmem:[#allocation2 + $0x50] sm:$0xff] %vm348_vm1, %v1817_v37  ;;  %v1372_v3 = vadd.f32 %v1353_v13, %v1296_v46 }
 0x1a7   : > { %v1486_v11 = vld [vmem:[#allocation2 + $0x68] sm:$0xff] }
 0x1a8   : > { %v1888_v36 = vadd.f32 %v3064_v14, %v1868_v50  ;;  %v1604_v59 = vadd.f32 %v1583_v61, %v1486_v11  ;;  %1388 = vst.msk [vmem:[#allocation2 + $0x70] sm:$0xff] %vm348_vm1, %v1372_v3 }
 0x1a9   : > { %v1635_v31 = vld [vmem:[#allocation2 + $0x60] sm:$0xff] }
 0x1aa   : > { %vm1904_vm2 = vcmp.ge.f32.partialorder %v1888_v36, 0.0  ;;  %v1920_v28 = vmul.f32 0.01, %v1888_v36  ;;  %v1711_v20 = vadd.f32 %v1689_v12, %v1635_v31  ;;  %1620 = vst.msk [vmem:[#allocation2 + $0x68] sm:$0xff] %vm348_vm1, %v1604_v59 }
 0x1ab   : > { %v1742_v17 = vld [vmem:[#allocation2 + $0x58] sm:$0xff]  ;;  %v1586_v35 = vpop.f32.mrf.mxu2 }
 0x1ac   : > { %v1936_v33 = vsel %vm1904_vm2, %v1888_v36, %v1920_v28  ;;  %1727 = vst.msk [vmem:[#allocation2 + $0x60] sm:$0xff] %vm348_vm1, %v1711_v20  ;;  %v1818_v55 = vadd.f32 %v1794_v8, %v1742_v17  ;;  %v1694_v49 = vpop.f32.mrf.mxu3  ;;  %v1802_v16 = vpop.f32.mrf.mxu0 }
 0x1ad   : > { %1952 = vst.msk [vmem:[%s3077_s6 + $0x48] sm:$0xff] %vm348_vm1, %v1936_v33  ;;  %v1849_v2 = vld [vmem:[#allocation2 + $0x50] sm:$0xff]  ;;  %v1355_v45 = vpop.f32.mrf.mxu1 }
 0x1ae   : > { %v1869_v27 = vmul.f32 %v3058_v22, %v1849_v2  ;;  %1834 = vst.msk [vmem:[#allocation2 + $0x58] sm:$0xff] %vm348_vm1, %v1818_v55  ;;  %v1373_v48 = vadd.f32 %v1355_v45, %v1297_v43 }
 0x1af   : > { %v1487_v1 = vld [vmem:[#allocation2 + $0x70] sm:$0xff] }
 0x1b0   : > { %v1889_v5 = vadd.f32 %v3064_v14, %v1869_v27  ;;  %v1605_v52 = vadd.f32 %v1586_v35, %v1487_v1  ;;  %1389 = vst.msk [vmem:[#allocation2 + $0x78] sm:$0xff] %vm348_vm1, %v1373_v48 }
 0x1b1   : > { %v1636_v34 = vld [vmem:[#allocation2 + $0x68] sm:$0xff] }
 0x1b2   : > { %vm1905_vm3 = vcmp.ge.f32.partialorder %v1889_v5, 0.0  ;;  %v1921_v63 = vmul.f32 0.01, %v1889_v5  ;;  %v1712_v32 = vadd.f32 %v1691_v4, %v1636_v34  ;;  %1621 = vst.msk [vmem:[#allocation2 + $0x70] sm:$0xff] %vm348_vm1, %v1605_v52 }
 0x1b3   : > { %v1743_v53 = vld [vmem:[#allocation2 + $0x60] sm:$0xff]  ;;  %v1588_v47 = vpop.f32.mrf.mxu2 }
 0x1b4   : > { %v1937_v54 = vsel %vm1905_vm3, %v1889_v5, %v1921_v63  ;;  %1728 = vst.msk [vmem:[#allocation2 + $0x68] sm:$0xff] %vm348_vm1, %v1712_v32  ;;  %v1819_v30 = vadd.f32 %v1797_v7, %v1743_v53  ;;  %v1696_v38 = vpop.f32.mrf.mxu3  ;;  %v1804_v37 = vpop.f32.mrf.mxu0 }
 0x1b5   : > { %1953 = vst.msk [vmem:[%s3077_s6 + $0x50] sm:$0xff] %vm348_vm1, %v1937_v54  ;;  %v1850_v56 = vld [vmem:[#allocation2 + $0x58] sm:$0xff] }
 0x1b6   : > { %v1870_v39 = vmul.f32 %v3058_v22, %v1850_v56  ;;  %1835 = vst.msk [vmem:[#allocation2 + $0x60] sm:$0xff] %vm348_vm1, %v1819_v30 }
 0x1b7   : > { %v1488_v26 = vld [vmem:[#allocation2 + $0x78] sm:$0xff] }
 0x1b8   : > { %v1890_v57 = vadd.f32 %v3064_v14, %v1870_v39  ;;  %v1606_v60 = vadd.f32 %v1588_v47, %v1488_v26 }
 0x1b9   : > { %v1637_v0 = vld [vmem:[#allocation2 + $0x70] sm:$0xff] }
 0x1ba   : > { %vm1906_vm4 = vcmp.ge.f32.partialorder %v1890_v57, 0.0  ;;  %v1922_v62 = vmul.f32 0.01, %v1890_v57  ;;  %v1713_v19 = vadd.f32 %v1694_v49, %v1637_v0  ;;  %1622 = vst.msk [vmem:[#allocation2 + $0x78] sm:$0xff] %vm348_vm1, %v1606_v60 }
 0x1bb   : > { %v1744_v9 = vld [vmem:[#allocation2 + $0x68] sm:$0xff] }
 0x1bc   : > { %v1938_v42 = vsel %vm1906_vm4, %v1890_v57, %v1922_v62  ;;  %1729 = vst.msk [vmem:[#allocation2 + $0x70] sm:$0xff] %vm348_vm1, %v1713_v19  ;;  %v1820_v41 = vadd.f32 %v1799_v25, %v1744_v9 }
 0x1bd   : > { %1954 = vst.msk [vmem:[%s3077_s6 + $0x58] sm:$0xff] %vm348_vm1, %v1938_v42  ;;  %v1851_v29 = vld [vmem:[#allocation2 + $0x60] sm:$0xff] }
 0x1be   : > { %v1871_v10 = vmul.f32 %v3058_v22, %v1851_v29  ;;  %1836 = vst.msk [vmem:[#allocation2 + $0x68] sm:$0xff] %vm348_vm1, %v1820_v41 }
 0x1c0   : > { %v1891_v6 = vadd.f32 %v3064_v14, %v1871_v10 }
 0x1c1   : > { %v1638_v44 = vld [vmem:[#allocation2 + $0x78] sm:$0xff] }
 0x1c2   : > { %vm1907_vm5 = vcmp.ge.f32.partialorder %v1891_v6, 0.0  ;;  %v1923_v58 = vmul.f32 0.01, %v1891_v6  ;;  %v1714_v23 = vadd.f32 %v1696_v38, %v1638_v44 }
 0x1c3   : > { %v1745_v24 = vld [vmem:[#allocation2 + $0x70] sm:$0xff] }
 0x1c4   : > { %v1939_v21 = vsel %vm1907_vm5, %v1891_v6, %v1923_v58  ;;  %1730 = vst.msk [vmem:[#allocation2 + $0x78] sm:$0xff] %vm348_vm1, %v1714_v23  ;;  %v1821_v40 = vadd.f32 %v1802_v16, %v1745_v24 }
 0x1c5   : > { %1955 = vst.msk [vmem:[%s3077_s6 + $0x60] sm:$0xff] %vm348_vm1, %v1939_v21  ;;  %v1852_v12 = vld [vmem:[#allocation2 + $0x68] sm:$0xff] }
 0x1c6   : > { %v1872_v8 = vmul.f32 %v3058_v22, %v1852_v12  ;;  %1837 = vst.msk [vmem:[#allocation2 + $0x70] sm:$0xff] %vm348_vm1, %v1821_v40 }
 0x1c8   : > { %v1892_v15 = vadd.f32 %v3064_v14, %v1872_v8 }
 0x1ca   : > { %vm1908_vm6 = vcmp.ge.f32.partialorder %v1892_v15, 0.0  ;;  %v1924_v61 = vmul.f32 0.01, %v1892_v15 }
 0x1cb   : > { %v1746_v51 = vld [vmem:[#allocation2 + $0x78] sm:$0xff] }
 0x1cc   : > { %v1940_v18 = vsel %vm1908_vm6, %v1892_v15, %v1924_v61  ;;  %v1822_v46 = vadd.f32 %v1804_v37, %v1746_v51 }
 0x1cd   : > { %1956 = vst.msk [vmem:[%s3077_s6 + $0x68] sm:$0xff] %vm348_vm1, %v1940_v18  ;;  %v1853_v13 = vld [vmem:[#allocation2 + $0x70] sm:$0xff] }
 0x1ce   : > { %v1873_v50 = vmul.f32 %v3058_v22, %v1853_v13  ;;  %1838 = vst.msk [vmem:[#allocation2 + $0x78] sm:$0xff] %vm348_vm1, %v1822_v46 }
 0x1d0   : > { %v1893_v3 = vadd.f32 %v3064_v14, %v1873_v50 }
 0x1d2   : > { %vm1909_vm7 = vcmp.ge.f32.partialorder %v1893_v3, 0.0  ;;  %v1925_v11 = vmul.f32 0.01, %v1893_v3 }
 0x1d4   : > { %v1941_v36 = vsel %vm1909_vm7, %v1893_v3, %v1925_v11 }
 0x1d5   : > { %1957 = vst.msk [vmem:[%s3077_s6 + $0x70] sm:$0xff] %vm348_vm1, %v1941_v36  ;;  %v1854_v59 = vld [vmem:[#allocation2 + $0x78] sm:$0xff] }
 0x1d6   : > { %v1874_v31 = vmul.f32 %v3058_v22, %v1854_v59 }
 0x1d8   : > { %v1894_v28 = vadd.f32 %v3064_v14, %v1874_v31 }
 0x1da   : > { %vm1910_vm8 = vcmp.ge.f32.partialorder %v1894_v28, 0.0  ;;  %v1926_v20 = vmul.f32 0.01, %v1894_v28 }
 0x1dc   : > { %v1942_v17 = vsel %vm1910_vm8, %v1894_v28, %v1926_v20 }
 0x1dd   : > { %1958 = vst.msk [vmem:[%s3077_s6 + $0x78] sm:$0xff] %vm348_vm1, %v1942_v17 }
 0x1de PF: > { %s15_s22 = sadd.s32 1, %s2333_s22   ;;  %s3218_s18 = smov %s2325_s20 }
 0x1df   : > { %p12_p9 = scmp.ge.s32.totalorder %s15_s22, 6   ;;  %s3219_s19 = smov %s2329_s21 }
 0x1e0   : > { %s3220_s20 = smov %s3223_s23  ;;  %s3221_s21 = smov %s3227_s24 }
 0x1e1   :  { %14 = sbr.rel (!%p12_p9) target bundleno = 3 (0x3), region = 81 }

// kernel: up_forward.4
= control target key start
LH: loop header
LB: loop body
LE: loop exit
PB: predicated region body
PF: predicated region fallthrough
CT: control target
= control target key end

     0   :  { %s4372_s27 = smov 0   ;;  %s4374_s28 = smov 0   ;;  %s6142_s0 = inlined_call_operand.vmem [shape: bf16[2,18,18,10], index: 0, kind: input, shape index: {}, may-alias: {0,1}]   ;;  %s6143_s1 = inlined_call_operand.vmem [shape: bf16[2,18,18,10], index: 1, kind: input, shape index: {}, may-alias: {0,1}]   ;;  %s6144_s2 = inlined_call_operand.vmem [shape: bf16[2,18,18,6], index: 2, kind: input, shape index: {}, may-alias: {2,3}]   ;;  %s6145_s3 = inlined_call_operand.vmem [shape: bf16[2,18,18,6], index: 3, kind: input, shape index: {}, may-alias: {2,3}]   ;;  %s6146_s4 = inlined_call_operand.vmem [shape: bf16[9,10,8], index: 4, kind: input, shape index: {}]   ;;  %s6147_s5 = inlined_call_operand.vmem [shape: bf16[9,6,8], index: 5, kind: input, shape index: {}]   ;;  %s6148_s6 = inlined_call_operand.vmem [shape: f32[1,8], index: 6, kind: input, shape index: {}]   ;;  %s6149_s7 = inlined_call_operand.vmem [shape: f32[1,8], index: 7, kind: input, shape index: {}]   ;;  %s6150_s8 = inlined_call_operand.vmem [shape: bf16[2,16,16,8], index: 8, kind: output, shape index: {}]  }
   0x1   :  { %s4376_s29 = smov 0   ;;  %s4378_s30 = smov 0  }
   0x2   :  { %s4380_s9 = smov 0  }
   0x3 LB: > { %s27_s10 = sadd.s32 1, %s4316_s29  ;;  %s30_s11 = sadd.s32 1, %s4320_s30  ;;  %s4324_s9 = sphi %s4380_s9, %s18_s9   ;;  %s4320_s30 = sphi %s4378_s30, %s6158_s30   ;;  %s4316_s29 = sphi %s4376_s29, %s6157_s29   ;;  %s4312_s28 = sphi %s4374_s28, %s6156_s28   ;;  %s4308_s27 = sphi %s4372_s27, %s6155_s27  }
   0x4   : > { %p28_p0 = scmp.ge.s32.totalorder %s27_s10, 2  ;;  %p3868_p1 = scmp.ge.s32.totalorder %s4324_s9, 1 }
   0x5   : > { %p374_p2 = scmp.lt.s32.totalorder %s4324_s9, 5 }
   0x6   : > { %s6160_s10 = smov (%p28_p0, %s27_s10), 0  ;;  %s6162_s11 = smov (!%p28_p0, %s30_s11), %s4320_s30 }
   0x7   : > { %p375_p3 = pnand %p3868_p1, %p374_p2  ;;  %p32_p4 = scmp.ge.s32.totalorder %s6162_s11, 2 }
   0x8   : > { %s4408_s16 = sshll.u32 (!%p375_p3), %s4308_s27, 3  ;;  %p468_p5 = scmp.lt.s32.totalorder (!%p375_p3), %s4312_s28, 1 }
   0x9   : > { %s6164_s11 = smov (%p32_p4, %s6162_s11), 0  ;;  %378 = sbr.rel (%p375_p3) target bundleno = 775 (0x307), region = 52 }
   0xa   : > { %p470_p6 = scmp.lt.s32.totalorder (!%p375_p3), %s4408_s16, 17  ;;  %s4233_s14 = sadd.s32 (!%p375_p3), 8, %s4408_s16 }
   0xb   : > { %p488_p7 = scmp.lt.s32.totalorder (!%p375_p3), %s4233_s14, 17  ;;  %p537_p8 = scmp.lt.s32.totalorder (!%p375_p3), %s4408_s16, 15 }
   0xe   : > { %v3917_v0 = vld [vmem:[%s6146_s4] sm:$0xf]  ;;  %v4213_v1 = vld [vmem:[%s6146_s4] sm:$0x10]  ;;  %vm681_vm0 = vcmask 1044480   ;;  %s6166_s28 = smov (!%p468_p5, %s4312_s28), 1 }
   0xf   : > { %v3918_v2 = vor.u32 %v4213_v1, %v3917_v0  ;;  %v3935_v3 = vld [vmem:[%s6146_s4 + $0x18] sm:$0xf]  ;;  %v4214_v4 = vld [vmem:[%s6146_s4 + $0x18] sm:$0x10]  ;;  %v3953_v6 = vld [vmem:[%s6146_s4 + $0x30] sm:$0xf] }
  0x10   : > { %v3936_v5 = vor.u32 %v4214_v4, %v3935_v3  ;;  %v4215_v7 = vld [vmem:[%s6146_s4 + $0x30] sm:$0x10]  ;;  %v3967_v10 = vld [vmem:[%s6146_s4 + $0x8] sm:$0xf]  ;;  %v4216_v11 = vld [vmem:[%s6146_s4 + $0x8] sm:$0x10] }
  0x11   : > { %v683_v8 = vsel %vm681_vm0, %v3918_v2, 0  ;;  %v3954_v9 = vor.u32 %v4215_v7, %v3953_v6  ;;  %s471_s13 = scalar_select %p470_p6, %s4408_s16, 17  ;;  %v3968_v13 = vor.u32 %v4216_v11, %v3967_v10  ;;  %v3981_v14 = vld [vmem:[%s6146_s4 + $0x20] sm:$0xf]  ;;  %v4217_v15 = vld [vmem:[%s6146_s4 + $0x20] sm:$0x10] }
  0x12   : > { %4236 = vmatpush.bf16.msra.mxu2 %v683_v8  ;;  %v799_v12 = vsel %vm681_vm0, %v3936_v5, 0  ;;  %692 = vmatpush.bf16.msra.mxu0 %v683_v8  ;;  %s4239_s19 = smul.u32 54, %s6166_s28  ;;  %v3982_v17 = vor.u32 %v4217_v15, %v3981_v14  ;;  %vm656_vm1 = vcmask 80896   ;;  %v3995_v24 = vld [vmem:[%s6146_s4 + $0x38] sm:$0xf]  ;;  %s6168_s14 = smov (!%p488_p7, %s4233_s14), 17 }
  0x13   : > { %4237 = vmatpush.bf16.msra.mxu3 %v799_v12  ;;  %v915_v16 = vsel %vm681_vm0, %v3954_v9, 0  ;;  %808 = vmatpush.bf16.msra.mxu1 %v799_v12  ;;  %s4238_s20 = smul.u32 3, %s471_s13  ;;  %v1314_v18 = vsel %vm681_vm0, %v3968_v13, 0  ;;  %v4218_v25 = vld [vmem:[%s6146_s4 + $0x38] sm:$0x10]  ;;  %vm1635_vm4 = vcmask 1042432  }
  0x14   : > { %v1428_v19 = vsel %vm681_vm0, %v3982_v17, 0  ;;  %v3996_v26 = vor.u32 %v4218_v25, %v3995_v24  ;;  %s4240_s15 = smul.u32 3, %s6168_s14  ;;  %v4019_v37 = vld [vmem:[%s6146_s4 + $0x10] sm:$0xf]  ;;  %v4219_v38 = vld [vmem:[%s6146_s4 + $0x10] sm:$0x10] }
  0x15   : > { %s4446_s21 = sadd.s32 %s4239_s19, %s4238_s20  ;;  %v4020_v40 = vor.u32 %v4219_v38, %v4019_v37  ;;  %v4033_v41 = vld [vmem:[%s6146_s4 + $0x28] sm:$0xf]  ;;  %v4220_v42 = vld [vmem:[%s6146_s4 + $0x28] sm:$0x10]  ;;  %vm998_vm2 = vsmask.f32 3328 }
  0x16   : > { %924 = vmatpush.bf16.msrb.mxu2 %v915_v16  ;;  %1437 = vmatpush.bf16.msrb.mxu0 %v1428_v19  ;;  %s3870_s22 = sshll.u32 %s4446_s21, 2  ;;  %v1542_v27 = vsel %vm681_vm0, %v3996_v26, 0  ;;  %v4034_v43 = vor.u32 %v4220_v42, %v4033_v41  ;;  %s4529_s13 = sadd.s32 %s4240_s15, %s4239_s19  ;;  %vm999_vm3 = vsmask.f32 7440  ;;  %vm1636_vm5 = vcmask 1046532  }
  0x17   : > { %1323 = vmatpush.bf16.msrb.mxu3 %v1314_v18  ;;  %s4454_s25 = scalar_lea.vmem %s6142_s0, %s3870_s22  ;;  %1551 = vmatpush.bf16.msrb.mxu1 %v1542_v27  ;;  %v1781_v44 = vsel %vm681_vm0, %v4020_v40, 0  ;;  %s3873_s19 = sshll.u32 %s4529_s13, 2  ;;  %v4047_v17 = vld [vmem:[%s6146_s4 + $0x40] sm:$0xf]  ;;  %vm4583_vm6 = vmor %vm998_vm2, %vm999_vm3  ;;  %vm546_vm8 = vcmask 64512   ;;  %vm2179_vm9 = vcmask 48128  }
  0x18   : > { %v4457_v20 = vld [vmem:[%s4454_s25 + $0x30] sm:$0xff]  ;;  %v4460_v21 = vld [vmem:[%s4454_s25 + $0x3c] sm:$0xff]  ;;  %v4478_v28 = vld [vmem:[%s4454_s25 + $0x48] sm:$0xff]  ;;  %v1895_v49 = vsel %vm681_vm0, %v4034_v43, 0  ;;  %s4554_s17 = scalar_lea.vmem %s6143_s1, %s3873_s19  ;;  %s4907_s20 = scalar_lea.vmem %s6144_s2, %s3870_s22  ;;  %vm3681_vm11 = vcmask 60416  }
  0x19   : > { %v4203_v22 = vld [vmem:[%s4454_s25] sm:$0xff]  ;;  %v4204_v23 = vld [vmem:[%s4454_s25 + $0xc] sm:$0xff]  ;;  %3923 = vmatmul.msk.bf16.vlgmr.msra.gmra.mxu2 %vm656_vm1, %v4457_v20  ;;  %3941 = vmatmul.msk.bf16.vlgmr.msra.gmra.mxu3 %vm656_vm1, %v4460_v21  ;;  %v4481_v29 = vld [vmem:[%s4454_s25 + $0x18] sm:$0xff]  ;;  %s5546_s23 = scalar_lea.vmem %s6145_s3, %s3873_s19  ;;  %s6170_s16 = smov (!%p537_p8, %s4408_s16), 15 }
  0x1a   : > { %3919 = vmatmul.msk.bf16.vlgmr.msra.gmra.mxu0 %vm656_vm1, %v4203_v22  ;;  %3937 = vmatmul.msk.bf16.vlgmr.msra.gmra.mxu1 %vm656_vm1, %v4204_v23  ;;  %v4492_v30 = vld [vmem:[%s4454_s25 + $0x54] sm:$0xff]  ;;  %v4495_v31 = vld [vmem:[%s4454_s25] sm:$0xf]  ;;  %v4498_v32 = vld [vmem:[%s4454_s25 + $0x4] sm:$0xf]  ;;  %s3881_s24 = sshll.u32 %s6166_s28, 5 }
  0x1b   : > { %v4501_v33 = vld [vmem:[%s4454_s25 + $0x24] sm:$0xff]  ;;  %v1002_v34 = vshrl.u32 %v4495_v31, 16  ;;  %v1005_v35 = vshll.u32 %v4495_v31, 16  ;;  %v1011_v36 = vshll.u32 %v4498_v32, 16  ;;  %v1015_v39 = vshrl.u32 %v4498_v32, 16  ;;  %1790 = vmatpush.bf16.msra.mxu2 %v1781_v44  ;;  %1904 = vmatpush.bf16.msra.mxu3 %v1895_v49  ;;  %vm4604_vm7 = vmor %vm1635_vm4, %vm1636_vm5 }
  0x1c   : > { %v4536_v50 = vld [vmem:[%s4454_s25 + $0xc] sm:$0xf]  ;;  %v4539_v51 = vld [vmem:[%s4454_s25 + $0x10] sm:$0xf]  ;;  %v4547_v56 = vld [vmem:[%s4454_s25 + $0x8] sm:$0x1] }
  0x1d   : > { %v1004_v45 = vrot.slane %v1002_v34, 4  ;;  %v1007_v46 = vrot.slane %v1005_v35, 5  ;;  %v4532_v47 = vrot.slane %v1011_v36, 5  ;;  %v1017_v48 = vrot.slane %v1015_v39, 4  ;;  %v568_v63 = vld [vmem:[%s4454_s25 + $0x14] sm:$0x1] }
  0x1e   : > { %v1026_v52 = vshrl.u32 %v4536_v50, 16  ;;  %v1029_v53 = vshll.u32 %v4536_v50, 16  ;;  %v1035_v54 = vshll.u32 %v4539_v51, 16  ;;  %v1039_v55 = vshrl.u32 %v4539_v51, 16  ;;  %v4560_v2 = vld [vmem:[%s4554_s17] sm:$0xff] }
  0x1f   : > { %v1008_v61 = vor.u32 %v1007_v46, %v1004_v45  ;;  %v1018_v62 = vor.u32 %v1017_v48, %v4532_v47  ;;  %v1021_v0 = vshll.u32 %v4547_v56, 16  ;;  %v1045_v4 = vshll.u32 %v568_v63, 16  ;;  %v4563_v9 = vld [vmem:[%s4454_s25 + $0x18] sm:$0xf]  ;;  %v4566_v10 = vld [vmem:[%s4454_s25 + $0x1c] sm:$0xf] }
  0x20   : > { %v1028_v57 = vrot.slane %v1026_v52, 4  ;;  %v1031_v58 = vrot.slane %v1029_v53, 5  ;;  %v1037_v59 = vrot.slane %v1035_v54, 5  ;;  %v1041_v60 = vrot.slane %v1039_v55, 4  ;;  %v4594_v24 = vld [vmem:[%s4454_s25 + $0x20] sm:$0x1] }
  0x21   : > { %v1009_v5 = vrot.slane %v1008_v61, 4  ;;  %v1019_v6 = vrot.slane %v1018_v62, 4  ;;  %v1023_v7 = vrot.slane %v1021_v0, 5  ;;  %v1050_v11 = vshrl.u32 %v4563_v9, 16  ;;  %v4626_v0 = vld [vmem:[%s4454_s25 + $0x24] sm:$0xf] }
  0x22   : > { %v1032_v1 = vor.u32 %v1031_v58, %v1028_v57  ;;  %v1042_v3 = vor.u32 %v1041_v60, %v1037_v59  ;;  %v1053_v12 = vshll.u32 %v4563_v9, 16  ;;  %v1059_v13 = vshll.u32 %v4566_v10, 16 }
  0x23   : > { %v1063_v14 = vshrl.u32 %v4566_v10, 16  ;;  %v1047_v16 = vrot.slane %v1045_v4, 5  ;;  %v1647_v19 = vrot.slane %v4539_v51, 5  ;;  %v1650_v22 = vrot.slane %v568_v63, 5 }
  0x24   : > { %v1033_v8 = vrot.slane %v1032_v1, 4  ;;  %v1043_v15 = vrot.slane %v1042_v3, 4  ;;  %v1052_v26 = vrot.slane %v1050_v11, 4  ;;  %v1055_v27 = vrot.slane %v1053_v12, 5  ;;  %v4629_v1 = vld [vmem:[%s4454_s25 + $0x28] sm:$0xf] }
  0x25   : > { %v1061_v34 = vrot.slane %v1059_v13, 5  ;;  %v1649_v35 = vrot.slane %v1647_v19, 4  ;;  %v1065_v36 = vrot.slane %v1063_v14, 4  ;;  %v1069_v37 = vshll.u32 %v4594_v24, 16 }
  0x26   : > { %v1014_v38 = vsel %vm4583_vm6, %v1009_v5, %v4532_v47  ;;  %v1056_v41 = vor.u32 %v1055_v27, %v1052_v26  ;;  %v1024_v42 = vsel %vm4583_vm6, %v1019_v6, %v1023_v7  ;;  %v1038_v46 = vsel %vm4583_vm6, %v1033_v8, %v1037_v59  ;;  %v2138_v7 = vld [vmem:[%s6147_s5] sm:$0x7]  ;;  %v4642_v8 = vld [vmem:[%s4454_s25 + $0x2c] sm:$0x1] }
  0x27   : > { %v4613_v43 = vsel %vm4604_vm7, %v1649_v35, %v1650_v22  ;;  %v1066_v44 = vor.u32 %v1065_v36, %v1061_v34  ;;  %v1071_v45 = vrot.slane %v1069_v37, 5  ;;  %v1048_v47 = vsel %vm4583_vm6, %v1043_v15, %v1047_v16  ;;  %v4656_v37 = vld [vmem:[%s4454_s25 + $0x30] sm:$0xf] }
  0x28   : > { %v1057_v48 = vrot.slane %v1056_v41, 4  ;;  %v1260_v52 = vunpack.c.l.b16 %v1014_v38  ;;  %v1261_v53 = vunpack.c.l.b16 %v1024_v42  ;;  %v1262_v55 = vunpack.c.l.b16 %v1038_v46  ;;  %v4659_v38 = vld [vmem:[%s4454_s25 + $0x34] sm:$0xf] }
  0x29   : > { %3924 = vmatmul.msk.bf16.gmra.mxu2 %vm656_vm1, %v4460_v21  ;;  %3942 = vmatmul.msk.bf16.gmra.mxu3 %vm656_vm1, %v4478_v28  ;;  %v1067_v49 = vrot.slane %v1066_v44, 4  ;;  %v1263_v57 = vunpack.c.l.b16 %v1048_v47  ;;  %v1074_v3 = vshrl.u32 %v4626_v0, 16  ;;  %v1077_v4 = vshll.u32 %v4626_v0, 16 }
  0x2a   : > { %3920 = vmatmul.msk.bf16.gmra.mxu0 %vm656_vm1, %v4204_v23  ;;  %3938 = vmatmul.msk.bf16.gmra.mxu1 %vm656_vm1, %v4481_v29  ;;  %v4221_v23 = vld [vmem:[%s6146_s4 + $0x40] sm:$0x10]  ;;  %v1062_v54 = vsel %vm4583_vm6, %v1057_v48, %v1061_v34  ;;  %v1276_v59 = vpack.c.b16 %v1261_v53, %v1260_v52  ;;  %v1083_v5 = vshll.u32 %v4629_v1, 16  ;;  %v1087_v6 = vshrl.u32 %v4629_v1, 16 }
  0x2b   : > { %v4048_v25 = vor.u32 %v4221_v23, %v4047_v17  ;;  %v1072_v58 = vsel %vm4583_vm6, %v1067_v49, %v1071_v45  ;;  %v1264_v60 = vunpack.c.l.b16 %v1062_v54  ;;  %v1277_v62 = vpack.c.b16 %v1263_v57, %v1262_v55  ;;  %v4669_v45 = vld [vmem:[%s4454_s25 + $0x38] sm:$0x1] }
  0x2c   : > { %v1265_v61 = vunpack.c.l.b16 %v1072_v58  ;;  %v2206_v11 = vsel %vm1635_vm4, %v2138_v7, 0  ;;  %v1076_v12 = vrot.slane %v1074_v3, 4  ;;  %v1079_v13 = vrot.slane %v1077_v4, 5  ;;  %v4686_v4 = vld [vmem:[%s4454_s25 + $0x3c] sm:$0xf] }
  0x2d   : > { %v2009_v40 = vsel %vm681_vm0, %v4048_v25, 0  ;;  %2215 = vmatpush.bf16.msra.mxu1 %v2206_v11  ;;  %v1089_v14 = vrot.slane %v1087_v6, 4  ;;  %v1093_v15 = vshll.u32 %v4642_v8, 16  ;;  %v1101_v41 = vshll.u32 %v4656_v37, 16 }
  0x2e   : > { %2018 = vmatpush.bf16.msra.mxu0 %v2009_v40  ;;  %v4623_v63 = vpack.c.b16 %v1265_v61, %v1264_v60  ;;  %v1080_v16 = vor.u32 %v1079_v13, %v1076_v12  ;;  %v1098_v40 = vshrl.u32 %v4656_v37, 16  ;;  %v1107_v42 = vshll.u32 %v4659_v38, 16 }
  0x2f   : > { %v1095_v22 = vrot.slane %v1093_v15, 5  ;;  %v1111_v44 = vshrl.u32 %v4659_v38, 16  ;;  %v1103_v47 = vrot.slane %v1101_v41, 5  ;;  %v1117_v52 = vshll.u32 %v4669_v45, 16  ;;  %v4727_v41 = vld [vmem:[%s4454_s25 + $0x48] sm:$0xf] }
  0x30   : > { %v1081_v23 = vrot.slane %v1080_v16, 4  ;;  %v1100_v46 = vrot.slane %v1098_v40, 4  ;;  %v1109_v48 = vrot.slane %v1107_v42, 5  ;;  %v1122_v6 = vshrl.u32 %v4686_v4, 16  ;;  %v4730_v42 = vld [vmem:[%s4454_s25 + $0x4c] sm:$0xf] }
  0x31   : > { %v1113_v49 = vrot.slane %v1111_v44, 4  ;;  %v1119_v54 = vrot.slane %v1117_v52, 5  ;;  %v1125_v7 = vshll.u32 %v4686_v4, 16  ;;  %v1146_v44 = vshrl.u32 %v4727_v41, 16 }
  0x32   : > { %v1104_v53 = vor.u32 %v1103_v47, %v1100_v46  ;;  %v1124_v13 = vrot.slane %v1122_v6, 4  ;;  %v1149_v46 = vshll.u32 %v4727_v41, 16  ;;  %v1155_v47 = vshll.u32 %v4730_v42, 16 }
  0x34   : > { %v1105_v55 = vrot.slane %v1104_v53, 4  ;;  %v1151_v52 = vrot.slane %v1149_v46, 5  ;;  %v1157_v53 = vrot.slane %v1155_v47, 5 }
  0x36   : > { %v1110_v58 = vsel %vm4583_vm6, %v1105_v55, %v1109_v48 }
  0x37   : > { %v1268_v61 = vunpack.c.l.b16 %v1110_v58 }
  0x39   : > { %3925 = vmatmul.msk.bf16.gmra.mxu2 %vm656_vm1, %v4478_v28  ;;  %3943 = vmatmul.msk.bf16.gmra.mxu3 %vm656_vm1, %v4492_v30 }
  0x3a   : > { %3921 = vmatmul.msk.bf16.gmra.mxu0 %vm656_vm1, %v4481_v29  ;;  %3939 = vmatmul.msk.bf16.gmra.mxu1 %vm656_vm1, %v4501_v33 }
  0x49   : > { %3926 = vmatmul.msk.bf16.gmra.mxu2 %vm656_vm1, %v4492_v30  ;;  %3944 = vmatmul.msk.bf16.gmra.mxu3 %vm656_vm1, %v4560_v2 }
  0x4a   : > { %3922 = vmatmul.msk.bf16.gmra.mxu0 %vm656_vm1, %v4501_v33  ;;  %3940 = vmatmul.msk.bf16.gmra.mxu1 %vm656_vm1, %v4457_v20 }
  0x59   : > { %3955 = vmatmul.msk.bf16.vlgmr.msrb.gmra.mxu2 %vm656_vm1, %v4481_v29  ;;  %3969 = vmatmul.msk.bf16.vlgmr.msrb.gmra.mxu3 %vm656_vm1, %v1276_v59  ;;  %v1085_v29 = vrot.slane %v1083_v5, 5  ;;  %v4689_v5 = vld [vmem:[%s4454_s25 + $0x40] sm:$0xf] }
  0x5a   : > { %3983 = vmatmul.msk.bf16.vlgmr.msrb.gmra.mxu0 %vm656_vm1, %v1277_v62  ;;  %3997 = vmatmul.msk.bf16.vlgmr.msrb.gmra.mxu1 %vm656_vm1, %v4623_v63  ;;  %v1131_v11 = vshll.u32 %v4689_v5, 16  ;;  %v1135_v12 = vshrl.u32 %v4689_v5, 16 }
  0x5b   : > { %v1090_v17 = vor.u32 %v1089_v14, %v1085_v29  ;;  %v1086_v26 = vsel %vm4583_vm6, %v1081_v23, %v1085_v29  ;;  %v1127_v29 = vrot.slane %v1125_v7, 5 }
  0x5c   : > { %v1266_v34 = vunpack.c.l.b16 %v1086_v26  ;;  %v1133_v14 = vrot.slane %v1131_v11, 5  ;;  %v1137_v15 = vrot.slane %v1135_v12, 4 }
  0x5d   : > { %v1091_v25 = vrot.slane %v1090_v17, 4 }
  0x5e   : > { %v1138_v16 = vor.u32 %v1137_v15, %v1133_v14 }
  0x5f   : > { %v1096_v27 = vsel %vm4583_vm6, %v1091_v25, %v1095_v22 }
  0x60   : > { %v1267_v35 = vunpack.c.l.b16 %v1096_v27  ;;  %v1139_v23 = vrot.slane %v1138_v16, 4 }
  0x62   : > { %v4653_v36 = vpack.c.b16 %v1267_v35, %v1266_v34 }
  0x69   : > { %3956 = vmatmul.msk.bf16.gmra.mxu2 %vm656_vm1, %v4501_v33  ;;  %3970 = vmatmul.msk.bf16.gmra.mxu3 %vm656_vm1, %v1277_v62  ;;  %v1114_v33 = vor.u32 %v1113_v49, %v1109_v48  ;;  %v4326_v62 = vmov 0.0   ;;  %v1159_v48 = vshrl.u32 %v4730_v42, 16  ;;  %v1148_v49 = vrot.slane %v1146_v44, 4 }
  0x6a   : > { %3984 = vmatmul.msk.bf16.gmra.mxu0 %vm656_vm1, %v4623_v63  ;;  %3998 = vmatmul.msk.bf16.gmra.mxu1 %vm656_vm1, %v4653_v36  ;;  %555 = vst.msk [vmem:[#allocation2 + $0x40] sm:$0xff] %vm546_vm8, %v4326_v62 }
  0x6b   : > { %v1115_v57 = vrot.slane %v1114_v33, 4  ;;  %547 = vst.msk [vmem:[#allocation2] sm:$0xff] %vm546_vm8, %v4326_v62  ;;  %v1161_v33 = vrot.slane %v1159_v48, 4  ;;  %v1152_v55 = vor.u32 %v1151_v52, %v1148_v49 }
  0x6c   : > { %548 = vst.msk [vmem:[#allocation2 + $0x8] sm:$0xff] %vm546_vm8, %v4326_v62 }
  0x6d   : > { %v1120_v60 = vsel %vm4583_vm6, %v1115_v57, %v1119_v54  ;;  %549 = vst.msk [vmem:[#allocation2 + $0x10] sm:$0xff] %vm546_vm8, %v4326_v62  ;;  %v4745_v54 = vld [vmem:[%s4454_s25 + $0x50] sm:$0x1]  ;;  %v1162_v57 = vor.u32 %v1161_v33, %v1157_v53  ;;  %v1153_v58 = vrot.slane %v1152_v55, 4 }
  0x6e   : > { %v1269_v59 = vunpack.c.l.b16 %v1120_v60  ;;  %550 = vst.msk [vmem:[#allocation2 + $0x18] sm:$0xff] %vm546_vm8, %v4326_v62 }
  0x6f   : > { %551 = vst.msk [vmem:[#allocation2 + $0x20] sm:$0xff] %vm546_vm8, %v4326_v62 }
  0x70   : > { %v4681_v3 = vpack.c.b16 %v1269_v59, %v1268_v61  ;;  %552 = vst.msk [vmem:[#allocation2 + $0x28] sm:$0xff] %vm546_vm8, %v4326_v62  ;;  %v1158_v61 = vsel %vm4583_vm6, %v1153_v58, %v1157_v53 }
  0x71   : > { %553 = vst.msk [vmem:[#allocation2 + $0x30] sm:$0xff] %vm546_vm8, %v4326_v62 }
  0x72   : > { %554 = vst.msk [vmem:[#allocation2 + $0x38] sm:$0xff] %vm546_vm8, %v4326_v62  ;;  %v593_v7 = vld [vmem:[#allocation2] sm:$0xff] }
  0x73   : > { %556 = vst.msk [vmem:[#allocation2 + $0x48] sm:$0xff] %vm546_vm8, %v4326_v62  ;;  %v594_v48 = vld [vmem:[#allocation2 + $0x8] sm:$0xff] }
  0x74   : > { %557 = vst.msk [vmem:[#allocation2 + $0x50] sm:$0xff] %vm546_vm8, %v4326_v62 }
  0x75   : > { %558 = vst.msk [vmem:[#allocation2 + $0x58] sm:$0xff] %vm546_vm8, %v4326_v62 }
  0x76   : > { %559 = vst.msk [vmem:[#allocation2 + $0x60] sm:$0xff] %vm546_vm8, %v4326_v62 }
  0x77   : > { %560 = vst.msk [vmem:[#allocation2 + $0x68] sm:$0xff] %vm546_vm8, %v4326_v62 }
  0x78   : > { %561 = vst.msk [vmem:[#allocation2 + $0x70] sm:$0xff] %vm546_vm8, %v4326_v62 }
  0x79   : > { %3957 = vmatmul.msk.bf16.gmra.mxu2 %vm656_vm1, %v4457_v20  ;;  %3971 = vmatmul.msk.bf16.gmra.mxu3 %vm656_vm1, %v4623_v63  ;;  %v4708_v20 = vld [vmem:[%s4454_s25 + $0x44] sm:$0x1]  ;;  %v1128_v63 = vor.u32 %v1127_v29, %v1124_v13  ;;  %562 = vst.msk [vmem:[#allocation2 + $0x78] sm:$0xff] %vm546_vm8, %v4326_v62  ;;  %v1272_v62 = vunpack.c.l.b16 %v1158_v61  ;;  %v4755_v29 = vld [vmem:[%s4454_s25 + $0x54] sm:$0xf] }
  0x7a   : > { %3985 = vmatmul.msk.bf16.gmra.mxu0 %vm656_vm1, %v4653_v36  ;;  %3999 = vmatmul.msk.bf16.gmra.mxu1 %vm656_vm1, %v4681_v3  ;;  %v1141_v17 = vshll.u32 %v4708_v20, 16  ;;  %v1173_v16 = vshll.u32 %v4755_v29, 16  ;;  %v602_v61 = vld [vmem:[#allocation2 + $0x48] sm:$0xff] }
  0x7b   : > { %v1129_v22 = vrot.slane %v1128_v63, 4  ;;  %v1170_v63 = vshrl.u32 %v4755_v29, 16 }
  0x7c   : > { %v1143_v25 = vrot.slane %v1141_v17, 5 }
  0x7d   : > { %v1134_v26 = vsel %vm4583_vm6, %v1129_v22, %v1133_v14  ;;  %v4758_v14 = vld [vmem:[%s4454_s25 + $0x58] sm:$0xf] }
  0x7e   : > { %v1144_v27 = vsel %vm4583_vm6, %v1139_v23, %v1143_v25  ;;  %v1270_v34 = vunpack.c.l.b16 %v1134_v26  ;;  %v1179_v17 = vshll.u32 %v4758_v14, 16  ;;  %v1183_v22 = vshrl.u32 %v4758_v14, 16  ;;  %v601_v23 = vld [vmem:[#allocation2 + $0x40] sm:$0xff] }
  0x7f   : > { %v1271_v35 = vunpack.c.l.b16 %v1144_v27  ;;  %v1172_v25 = vrot.slane %v1170_v63, 4  ;;  %v1175_v26 = vrot.slane %v1173_v16, 5  ;;  %v595_v63 = vld [vmem:[#allocation2 + $0x10] sm:$0xff] }
  0x80   : > { %v1181_v27 = vrot.slane %v1179_v17, 5 }
  0x81   : > { %v4724_v40 = vpack.c.b16 %v1271_v35, %v1270_v34  ;;  %v4774_v34 = vld [vmem:[%s4454_s25 + $0x5c] sm:$0x1] }
  0x82   : > { %v1189_v46 = vshll.u32 %v4774_v34, 16 }
  0x84   : > { %v1191_v53 = vrot.slane %v1189_v46, 5 }
  0x89   : > { %3958 = vmatmul.msk.bf16.gmra.mxu2 %vm656_vm1, %v4460_v21  ;;  %3972 = vmatmul.msk.bf16.gmra.mxu3 %vm656_vm1, %v4653_v36  ;;  %v1165_v21 = vshll.u32 %v4745_v54, 16  ;;  %v1163_v36 = vrot.slane %v1162_v57, 4 }
  0x8a   : > { %3986 = vmatmul.msk.bf16.gmra.mxu0 %vm656_vm1, %v4681_v3  ;;  %4000 = vmatmul.msk.bf16.gmra.mxu1 %vm656_vm1, %v4724_v40 }
  0x8b   : > { %v1167_v60 = vrot.slane %v1165_v21, 5 }
  0x8d   : > { %v1168_v59 = vsel %vm4583_vm6, %v1163_v36, %v1167_v60 }
  0x8e   : > { %v1273_v6 = vunpack.c.l.b16 %v1168_v59 }
  0x90   : > { %v4752_v11 = vpack.c.b16 %v1273_v6, %v1272_v62 }
  0x97   : > { %v694_v12 = vpop.f32.mrf.mxu0  ;;  %v810_v13 = vpop.f32.mrf.mxu1 }
  0x98   : > { %v734_v15 = vadd.f32 %v694_v12, %v593_v7 }
  0x99   : > { %3959 = vmatmul.msk.bf16.gmra.mxu2 %vm656_vm1, %v4478_v28  ;;  %3973 = vmatmul.msk.bf16.gmra.mxu3 %vm656_vm1, %v4681_v3  ;;  %v1185_v28 = vrot.slane %v1183_v22, 4  ;;  %v1176_v3 = vor.u32 %v1175_v26, %v1172_v25  ;;  %v4788_v26 = vld [vmem:[%s4554_s17] sm:$0xf] }
  0x9a   : > { %750 = vst.msk [vmem:[#allocation2] sm:$0xff] %vm546_vm8, %v734_v15  ;;  %3987 = vmatmul.msk.bf16.gmra.mxu0 %vm656_vm1, %v4724_v40  ;;  %4001 = vmatmul.msk.bf16.gmra.mxu1 %vm656_vm1, %v4752_v11 }
  0x9b   : > { %v1186_v49 = vor.u32 %v1185_v28, %v1181_v27  ;;  %v1177_v52 = vrot.slane %v1176_v3, 4  ;;  %v1194_v28 = vshrl.u32 %v4788_v26, 16 }
  0x9c   : > { %v714_v35 = vpop.f32.mrf.mxu2  ;;  %v830_v44 = vpop.f32.mrf.mxu3 }
  0x9d   : > { %v742_v47 = vadd.f32 %v714_v35, %v601_v23  ;;  %v1187_v57 = vrot.slane %v1186_v49, 4  ;;  %v1182_v58 = vsel %vm4583_vm6, %v1177_v52, %v1181_v27  ;;  %v4791_v27 = vld [vmem:[%s4554_s17 + $0x4] sm:$0xf]  ;;  %v1197_v35 = vshll.u32 %v4788_v26, 16 }
  0x9e   : > { %v1274_v62 = vunpack.c.l.b16 %v1182_v58  ;;  %v1203_v3 = vshll.u32 %v4791_v27, 16  ;;  %v1207_v46 = vshrl.u32 %v4791_v27, 16  ;;  %v1196_v49 = vrot.slane %v1194_v28, 4 }
  0x9f   : > { %758 = vst.msk [vmem:[#allocation2 + $0x40] sm:$0xff] %vm546_vm8, %v742_v47  ;;  %v696_v33 = vpop.f32.mrf.mxu0  ;;  %v812_v55 = vpop.f32.mrf.mxu1  ;;  %v1192_v60 = vsel %vm4583_vm6, %v1187_v57, %v1191_v53  ;;  %v603_v47 = vld [vmem:[#allocation2 + $0x50] sm:$0xff]  ;;  %v1199_v52 = vrot.slane %v1197_v35, 5 }
  0xa0   : > { %v735_v21 = vadd.f32 %v696_v33, %v594_v48  ;;  %v1275_v6 = vunpack.c.l.b16 %v1192_v60  ;;  %v1205_v53 = vrot.slane %v1203_v3, 5  ;;  %v1209_v33 = vrot.slane %v1207_v46, 4  ;;  %v596_v60 = vld [vmem:[#allocation2 + $0x18] sm:$0xff] }
  0xa1   : > { %v766_v36 = vld [vmem:[#allocation2] sm:$0xff]  ;;  %v1200_v58 = vor.u32 %v1199_v52, %v1196_v49 }
  0xa2   : > { %751 = vst.msk [vmem:[#allocation2 + $0x8] sm:$0xff] %vm546_vm8, %v735_v21  ;;  %v850_v59 = vadd.f32 %v810_v13, %v766_v36  ;;  %v4784_v17 = vpack.c.b16 %v1275_v6, %v1274_v62 }
  0xa3   : > { %v1201_v62 = vrot.slane %v1200_v58, 4 }
  0xa4   : > { %v716_v7 = vpop.f32.mrf.mxu2  ;;  %v832_v12 = vpop.f32.mrf.mxu3  ;;  %866 = vst.msk [vmem:[#allocation2] sm:$0xff] %vm546_vm8, %v850_v59 }
  0xa5   : > { %v743_v15 = vadd.f32 %v716_v7, %v602_v61  ;;  %v1210_v61 = vor.u32 %v1209_v33, %v1205_v53  ;;  %v4005_v7 = vrot.slane %v4495_v31, 9  ;;  %v1206_v28 = vsel %vm4583_vm6, %v1201_v62, %v1205_v53  ;;  %v597_v33 = vld [vmem:[#allocation2 + $0x20] sm:$0xff]  ;;  %v4839_v62 = vld [vmem:[%s4554_s17 + $0xc] sm:$0xf] }
  0xa6   : > { %v774_v16 = vld [vmem:[#allocation2 + $0x40] sm:$0xff]  ;;  %v4006_v31 = vrot.slane %v4536_v50, 9  ;;  %v1416_v46 = vunpack.c.l.b16 %v1206_v28  ;;  %v1730_v50 = vunpack.c.l.b16 %v4613_v43  ;;  %v1221_v51 = vshll.u32 %v4839_v62, 16 }
  0xa7   : > { %v858_v22 = vadd.f32 %v830_v44, %v774_v16  ;;  %759 = vst.msk [vmem:[#allocation2 + $0x48] sm:$0xff] %vm546_vm8, %v743_v15  ;;  %v699_v23 = vpop.f32.mrf.mxu0  ;;  %v815_v25 = vpop.f32.mrf.mxu1  ;;  %v1211_v16 = vrot.slane %v1210_v61, 4 }
  0xa8   : > { %v736_v13 = vadd.f32 %v699_v23, %v595_v63  ;;  %v1643_v23 = vrot.slane %v4547_v56, 5 }
  0xa9   : > { %874 = vst.msk [vmem:[#allocation2 + $0x40] sm:$0xff] %vm546_vm8, %v858_v22  ;;  %3960 = vmatmul.msk.bf16.gmra.mxu2 %vm656_vm1, %v4492_v30  ;;  %3974 = vmatmul.msk.bf16.gmra.mxu3 %vm656_vm1, %v4724_v40  ;;  %v767_v44 = vld [vmem:[#allocation2 + $0x8] sm:$0xff]  ;;  %v1640_v40 = vrot.slane %v4498_v32, 5 }
  0xaa   : > { %752 = vst.msk [vmem:[#allocation2 + $0x10] sm:$0xff] %vm546_vm8, %v736_v13  ;;  %v851_v48 = vadd.f32 %v812_v55, %v767_v44  ;;  %3988 = vmatmul.msk.bf16.gmra.mxu0 %vm656_vm1, %v4752_v11  ;;  %4002 = vmatmul.msk.bf16.gmra.mxu1 %vm656_vm1, %v4784_v17  ;;  %v4808_v30 = vld [vmem:[%s4554_s17 + $0x8] sm:$0x1] }
  0xab   : > { %v1213_v55 = vshll.u32 %v4808_v30, 16  ;;  %v1642_v22 = vrot.slane %v1640_v40, 4  ;;  %v1641_v49 = vsel %vm4604_vm7, %v4005_v7, %v1640_v40 }
  0xac   : > { %v719_v57 = vpop.f32.mrf.mxu2  ;;  %v835_v21 = vpop.f32.mrf.mxu3  ;;  %867 = vst.msk [vmem:[#allocation2 + $0x8] sm:$0xff] %vm546_vm8, %v851_v48 }
  0xad   : > { %v744_v36 = vadd.f32 %v719_v57, %v603_v47  ;;  %v1215_v6 = vrot.slane %v1213_v55, 5  ;;  %v1644_v52 = vsel %vm4604_vm7, %v1642_v22, %v1643_v23  ;;  %v1727_v57 = vunpack.c.l.b16 %v1641_v49  ;;  %v605_v22 = vld [vmem:[#allocation2 + $0x60] sm:$0xff] }
  0xae   : > { %v775_v59 = vld [vmem:[#allocation2 + $0x48] sm:$0xff] }
  0xaf   : > { %v859_v15 = vadd.f32 %v832_v12, %v775_v59  ;;  %760 = vst.msk [vmem:[#allocation2 + $0x50] sm:$0xff] %vm546_vm8, %v744_v36  ;;  %v701_v63 = vpop.f32.mrf.mxu0  ;;  %v817_v32 = vpop.f32.mrf.mxu1  ;;  %v1216_v3 = vsel %vm4583_vm6, %v1211_v16, %v1215_v6  ;;  %v604_v12 = vld [vmem:[#allocation2 + $0x58] sm:$0xff]  ;;  %v1648_v36 = vsel %vm4604_vm7, %v4006_v31, %v1647_v19  ;;  %v4842_v6 = vld [vmem:[%s4554_s17 + $0x10] sm:$0xf] }
  0xb0   : > { %v737_v13 = vadd.f32 %v701_v63, %v596_v60  ;;  %v1417_v47 = vunpack.c.l.b16 %v1216_v3  ;;  %v1729_v43 = vunpack.c.l.b16 %v1648_v36  ;;  %v1227_v19 = vshll.u32 %v4842_v6, 16 }
  0xb1   : > { %875 = vst.msk [vmem:[#allocation2 + $0x48] sm:$0xff] %vm546_vm8, %v859_v15  ;;  %v768_v35 = vld [vmem:[#allocation2 + $0x10] sm:$0xff]  ;;  %v1218_v15 = vshrl.u32 %v4839_v62, 16  ;;  %v1231_v16 = vshrl.u32 %v4842_v6, 16 }
  0xb2   : > { %753 = vst.msk [vmem:[#allocation2 + $0x18] sm:$0xff] %vm546_vm8, %v737_v13  ;;  %v852_v44 = vadd.f32 %v815_v25, %v768_v35  ;;  %v1728_v25 = vunpack.c.l.b16 %v1644_v52  ;;  %v4829_v55 = vpack.c.b16 %v1417_v47, %v1416_v46  ;;  %v4852_v63 = vpack.c.b16 %v1730_v50, %v1729_v43  ;;  %v4861_v35 = vld [vmem:[%s4554_s17 + $0x14] sm:$0x1]  ;;  %v598_v46 = vld [vmem:[#allocation2 + $0x28] sm:$0xff] }
  0xb3   : > { %v1220_v13 = vrot.slane %v1218_v15, 4  ;;  %v1229_v28 = vrot.slane %v1227_v19, 5 }
  0xb4   : > { %v721_v48 = vpop.f32.mrf.mxu2  ;;  %v837_v56 = vpop.f32.mrf.mxu3  ;;  %868 = vst.msk [vmem:[#allocation2 + $0x10] sm:$0xff] %vm546_vm8, %v852_v44  ;;  %v4836_v59 = vpack.c.b16 %v1728_v25, %v1727_v57  ;;  %v1237_v44 = vshll.u32 %v4861_v35, 16 }
  0xb5   : > { %v745_v53 = vadd.f32 %v721_v48, %v604_v12 }
  0xb6   : > { %v776_v58 = vld [vmem:[#allocation2 + $0x50] sm:$0xff]  ;;  %v1239_v52 = vrot.slane %v1237_v44, 5 }
  0xb7   : > { %v860_v40 = vadd.f32 %v835_v21, %v776_v58  ;;  %761 = vst.msk [vmem:[#allocation2 + $0x58] sm:$0xff] %vm546_vm8, %v745_v53  ;;  %v704_v60 = vpop.f32.mrf.mxu0  ;;  %v820_v61 = vpop.f32.mrf.mxu1 }
  0xb8   : > { %v738_v7 = vadd.f32 %v704_v60, %v597_v33  ;;  %v606_v60 = vld [vmem:[#allocation2 + $0x68] sm:$0xff] }
  0xb9   : > { %876 = vst.msk [vmem:[#allocation2 + $0x50] sm:$0xff] %vm546_vm8, %v860_v40  ;;  %3961 = vmatmul.msk.bf16.gmra.mxu2 %vm656_vm1, %v4560_v2  ;;  %3975 = vmatmul.msk.bf16.gmra.mxu3 %vm656_vm1, %v4752_v11  ;;  %v769_v21 = vld [vmem:[#allocation2 + $0x18] sm:$0xff]  ;;  %v1223_v2 = vrot.slane %v1221_v51, 5  ;;  %v1233_v11 = vrot.slane %v1231_v16, 4  ;;  %v4097_v40 = vld [vmem:[%s6147_s5 + $0xc] sm:$0x7] }
  0xba   : > { %754 = vst.msk [vmem:[#allocation2 + $0x20] sm:$0xff] %vm546_vm8, %v738_v7  ;;  %v853_v23 = vadd.f32 %v817_v32, %v769_v21  ;;  %3989 = vmatmul.msk.bf16.gmra.mxu0 %vm656_vm1, %v4784_v17  ;;  %4003 = vmatmul.msk.bf16.gmra.mxu1 %vm656_vm1, %v4829_v55  ;;  %v2316_v7 = vsel %vm1635_vm4, %v4097_v40, 0  ;;  %v608_v40 = vld [vmem:[#allocation2 + $0x78] sm:$0xff] }
  0xbb   : > { %v1224_v12 = vor.u32 %v1223_v2, %v1220_v13  ;;  %v1234_v47 = vor.u32 %v1233_v11, %v1229_v28  ;;  %2325 = vmatpush.bf16.msrb.mxu2 %v2316_v7 }
  0xbc   : > { %v724_v3 = vpop.f32.mrf.mxu2  ;;  %v840_v31 = vpop.f32.mrf.mxu3  ;;  %869 = vst.msk [vmem:[#allocation2 + $0x18] sm:$0xff] %vm546_vm8, %v853_v23  ;;  %v599_v23 = vld [vmem:[#allocation2 + $0x30] sm:$0xff] }
  0xbd   : > { %v746_v32 = vadd.f32 %v724_v3, %v605_v22  ;;  %v1225_v49 = vrot.slane %v1224_v12, 4  ;;  %v1235_v57 = vrot.slane %v1234_v47, 4  ;;  %v4212_v22 = vld [vmem:[%s4554_s17 + $0xc] sm:$0xff]  ;;  %v4007_v47 = vrot.slane %v4563_v9, 9 }
  0xbe   : > { %v777_v48 = vld [vmem:[#allocation2 + $0x58] sm:$0xff] }
  0xbf   : > { %v861_v50 = vadd.f32 %v837_v56, %v777_v48  ;;  %762 = vst.msk [vmem:[#allocation2 + $0x60] sm:$0xff] %vm546_vm8, %v746_v32  ;;  %v706_v53 = vpop.f32.mrf.mxu0  ;;  %v822_v33 = vpop.f32.mrf.mxu1  ;;  %v1230_v58 = vsel %vm4583_vm6, %v1225_v49, %v1229_v28  ;;  %v1240_v56 = vsel %vm4583_vm6, %v1235_v57, %v1239_v52  ;;  %v4110_v32 = vld [vmem:[%s6147_s5 + $0x18] sm:$0x7]  ;;  %v1657_v48 = vrot.slane %v4594_v24, 5 }
  0xc0   : > { %v739_v25 = vadd.f32 %v706_v53, %v598_v46  ;;  %v1530_v15 = vunpack.c.l.b16 %v1230_v58  ;;  %v1531_v51 = vunpack.c.l.b16 %v1240_v56  ;;  %v600_v53 = vld [vmem:[#allocation2 + $0x38] sm:$0xff] }
  0xc1   : > { %877 = vst.msk [vmem:[#allocation2 + $0x58] sm:$0xff] %vm546_vm8, %v861_v50  ;;  %v770_v36 = vld [vmem:[#allocation2 + $0x20] sm:$0xff] }
  0xc2   : > { %755 = vst.msk [vmem:[#allocation2 + $0x28] sm:$0xff] %vm546_vm8, %v739_v25  ;;  %v854_v43 = vadd.f32 %v820_v61, %v770_v36  ;;  %v1532_v2 = vpack.c.b16 %v1531_v51, %v1530_v15  ;;  %v1654_v61 = vrot.slane %v4566_v10, 5  ;;  %v2426_v10 = vsel %vm1635_vm4, %v4110_v32, 0 }
  0xc3   : > { %2435 = vmatpush.bf16.msrb.mxu3 %v2426_v10 }
  0xc4   : > { %v726_v19 = vpop.f32.mrf.mxu2  ;;  %v842_v21 = vpop.f32.mrf.mxu3  ;;  %870 = vst.msk [vmem:[#allocation2 + $0x20] sm:$0xff] %vm546_vm8, %v854_v43  ;;  %v1655_v58 = vsel %vm4604_vm7, %v4007_v47, %v1654_v61 }
  0xc5   : > { %v747_v16 = vadd.f32 %v726_v19, %v606_v60  ;;  %v1731_v60 = vunpack.c.l.b16 %v1655_v58 }
  0xc6   : > { %v778_v13 = vld [vmem:[#allocation2 + $0x60] sm:$0xff] }
  0xc7   : > { %v862_v28 = vadd.f32 %v840_v31, %v778_v13  ;;  %763 = vst.msk [vmem:[#allocation2 + $0x68] sm:$0xff] %vm546_vm8, %v747_v16  ;;  %v709_v11 = vpop.f32.mrf.mxu0  ;;  %v825_v3 = vpop.f32.mrf.mxu1  ;;  %v607_v31 = vld [vmem:[#allocation2 + $0x70] sm:$0xff]  ;;  %v4222_v16 = vld [vmem:[%s4907_s20] sm:$0xff] }
  0xc8   : > { %v740_v12 = vadd.f32 %v709_v11, %v599_v23 }
  0xc9   : > { %878 = vst.msk [vmem:[#allocation2 + $0x60] sm:$0xff] %vm546_vm8, %v862_v28  ;;  %3962 = vmatmul.msk.bf16.gmra.mxu2 %vm656_vm1, %v4212_v22  ;;  %3976 = vmatmul.msk.bf16.gmra.mxu3 %vm656_vm1, %v4784_v17  ;;  %v771_v44 = vld [vmem:[#allocation2 + $0x28] sm:$0xff]  ;;  %v1656_v17 = vrot.slane %v1654_v61, 4  ;;  %v4008_v61 = vrot.slane %v4626_v0, 9 }
  0xca   : > { %756 = vst.msk [vmem:[#allocation2 + $0x30] sm:$0xff] %vm546_vm8, %v740_v12  ;;  %v855_v46 = vadd.f32 %v822_v33, %v771_v44  ;;  %3990 = vmatmul.msk.bf16.gmra.mxu0 %vm656_vm1, %v4829_v55  ;;  %4004 = vmatmul.msk.bf16.gmra.mxu1 %vm656_vm1, %v1532_v2  ;;  %v1661_v2 = vrot.slane %v4629_v1, 5  ;;  %v882_v12 = vld [vmem:[#allocation2] sm:$0xff] }
  0xcb   : > { %v1658_v9 = vsel %vm4604_vm7, %v1656_v17, %v1657_v48 }
  0xcc   : > { %v729_v49 = vpop.f32.mrf.mxu2  ;;  %v845_v52 = vpop.f32.mrf.mxu3  ;;  %871 = vst.msk [vmem:[#allocation2 + $0x28] sm:$0xff] %vm546_vm8, %v855_v46  ;;  %v1732_v43 = vunpack.c.l.b16 %v1658_v9  ;;  %v1663_v1 = vrot.slane %v1661_v2, 4  ;;  %v1662_v17 = vsel %vm4604_vm7, %v4008_v61, %v1661_v2 }
  0xcd   : > { %v748_v50 = vadd.f32 %v729_v49, %v607_v31  ;;  %v4123_v31 = vld [vmem:[%s6147_s5 + $0x4] sm:$0x7]  ;;  %v1733_v49 = vunpack.c.l.b16 %v1662_v17 }
  0xce   : > { %v779_v33 = vld [vmem:[#allocation2 + $0x68] sm:$0xff]  ;;  %v2816_v10 = vsel %vm1635_vm4, %v4123_v31, 0 }
  0xcf   : > { %v863_v57 = vadd.f32 %v842_v21, %v779_v33  ;;  %764 = vst.msk [vmem:[#allocation2 + $0x70] sm:$0xff] %vm546_vm8, %v748_v50  ;;  %v711_v55 = vpop.f32.mrf.mxu0  ;;  %v827_v25 = vpop.f32.mrf.mxu1  ;;  %v4910_v21 = vpack.c.b16 %v1732_v43, %v1731_v60  ;;  %2825 = vmatpush.bf16.msrb.mxu0 %v2816_v10  ;;  %v883_v50 = vld [vmem:[#allocation2 + $0x8] sm:$0xff]  ;;  %v1668_v60 = vrot.slane %v4659_v38, 5  ;;  %v1671_v43 = vrot.slane %v4669_v45, 5  ;;  %v884_v38 = vld [vmem:[#allocation2 + $0x10] sm:$0xff]  ;;  %v4983_v10 = vld [vmem:[%s4907_s20 + $0x18] sm:$0xff] }
  0xd0   : > { %v741_v24 = vadd.f32 %v711_v55, %v600_v53  ;;  %v4132_v55 = vld [vmem:[%s6147_s5 + $0x10] sm:$0x7] }
  0xd1   : > { %879 = vst.msk [vmem:[#allocation2 + $0x68] sm:$0xff] %vm546_vm8, %v863_v57  ;;  %v772_v36 = vld [vmem:[#allocation2 + $0x30] sm:$0xff]  ;;  %v2924_v9 = vsel %vm1635_vm4, %v4132_v55, 0 }
  0xd2   : > { %757 = vst.msk [vmem:[#allocation2 + $0x38] sm:$0xff] %vm546_vm8, %v741_v24  ;;  %v856_v56 = vadd.f32 %v825_v3, %v772_v36  ;;  %v1664_v3 = vrot.slane %v4642_v8, 5  ;;  %v4949_v24 = vld [vmem:[%s4907_s20 + $0xc] sm:$0xff]  ;;  %2933 = vmatpush.bf16.msrb.mxu1 %v2924_v9 }
  0xd4   : > { %v731_v7 = vpop.f32.mrf.mxu2  ;;  %v847_v15 = vpop.f32.mrf.mxu3  ;;  %872 = vst.msk [vmem:[#allocation2 + $0x30] sm:$0xff] %vm546_vm8, %v856_v56  ;;  %v1665_v48 = vsel %vm4604_vm7, %v1663_v1, %v1664_v3 }
  0xd5   : > { %v749_v51 = vadd.f32 %v731_v7, %v608_v40  ;;  %v4009_v7 = vrot.slane %v4656_v37, 9 }
  0xd6   : > { %v780_v19 = vld [vmem:[#allocation2 + $0x70] sm:$0xff] }
  0xd7   : > { %v864_v22 = vadd.f32 %v845_v52, %v780_v19  ;;  %765 = vst.msk [vmem:[#allocation2 + $0x78] sm:$0xff] %vm546_vm8, %v749_v51  ;;  %v4914_v23 = vpop.f32.mrf.mxu0  ;;  %v4916_v13 = vpop.f32.mrf.mxu1  ;;  %v1734_v52 = vunpack.c.l.b16 %v1665_v48 }
  0xd9   : > { %880 = vst.msk [vmem:[#allocation2 + $0x70] sm:$0xff] %vm546_vm8, %v864_v22  ;;  %4021 = vmatmul.msk.bf16.vlgmr.msra.gmra.mxu2 %vm656_vm1, %v4836_v59  ;;  %4035 = vmatmul.msk.bf16.vlgmr.msra.gmra.mxu3 %vm656_vm1, %v4852_v63  ;;  %v773_v28 = vld [vmem:[#allocation2 + $0x38] sm:$0xff]  ;;  %v4945_v58 = vpack.c.b16 %v1734_v52, %v1733_v49 }
  0xda   : > { %v857_v11 = vadd.f32 %v827_v25, %v773_v28  ;;  %4049 = vmatmul.msk.bf16.vlgmr.msra.gmra.mxu0 %vm656_vm1, %v4910_v21  ;;  %4089 = vmatmul.msk.bf16.vlgmr.msra.gmra.mxu1 %vm2179_vm9, %v4222_v16 }
  0xdc   : > { %v926_v44 = vpop.f32.mrf.mxu2  ;;  %v1325_v32 = vpop.f32.mrf.mxu3  ;;  %873 = vst.msk [vmem:[#allocation2 + $0x38] sm:$0xff] %vm546_vm8, %v857_v11  ;;  %v1669_v11 = vsel %vm4604_vm7, %v4009_v7, %v1668_v60 }
  0xdd   : > { %v966_v59 = vadd.f32 %v926_v44, %v882_v12  ;;  %v1735_v61 = vunpack.c.l.b16 %v1669_v11  ;;  %v885_v12 = vld [vmem:[#allocation2 + $0x18] sm:$0xff] }
  0xde   : > { %v781_v46 = vld [vmem:[#allocation2 + $0x78] sm:$0xff] }
  0xdf   : > { %v865_v47 = vadd.f32 %v847_v15, %v781_v46  ;;  %982 = vst.msk [vmem:[#allocation2] sm:$0xff] %vm546_vm8, %v966_v59  ;;  %v1441_v8 = vpop.f32.mrf.mxu0  ;;  %v4935_v0 = vpop.f32.mrf.mxu1  ;;  %v1670_v15 = vrot.slane %v1668_v60, 4 }
  0xe1   : > { %881 = vst.msk [vmem:[#allocation2 + $0x78] sm:$0xff] %vm546_vm8, %v865_v47  ;;  %v1672_v37 = vsel %vm4604_vm7, %v1670_v15, %v1671_v43 }
  0xe2   : > { %v1736_v1 = vunpack.c.l.b16 %v1672_v37 }
  0xe4   : > { %v928_v53 = vpop.f32.mrf.mxu2  ;;  %v1327_v33 = vpop.f32.mrf.mxu3  ;;  %v4980_v46 = vpack.c.b16 %v1736_v1, %v1735_v61 }
  0xe5   : > { %v967_v57 = vadd.f32 %v928_v53, %v883_v50  ;;  %v1678_v53 = vrot.slane %v4708_v20, 5 }
  0xe6   : > { %v1241_v25 = vld [vmem:[#allocation2] sm:$0xff] }
  0xe7   : > { %v1365_v36 = vadd.f32 %v1325_v32, %v1241_v25  ;;  %983 = vst.msk [vmem:[#allocation2 + $0x8] sm:$0xff] %vm546_vm8, %v967_v57  ;;  %v4952_v40 = vpop.f32.mrf.mxu0  ;;  %v4954_v56 = vpop.f32.mrf.mxu1 }
  0xe9   : > { %1381 = vst.msk [vmem:[#allocation2] sm:$0xff] %vm546_vm8, %v1365_v36  ;;  %4022 = vmatmul.msk.bf16.gmra.mxu2 %vm656_vm1, %v4852_v63  ;;  %4036 = vmatmul.msk.bf16.gmra.mxu3 %vm656_vm1, %v4910_v21 }
  0xea   : > { %4050 = vmatmul.msk.bf16.gmra.mxu0 %vm656_vm1, %v4945_v58  ;;  %4090 = vmatmul.msk.bf16.gmra.mxu1 %vm2179_vm9, %v4949_v24 }
  0xec   : > { %v931_v51 = vpop.f32.mrf.mxu2  ;;  %v1330_v19 = vpop.f32.mrf.mxu3 }
  0xed   : > { %v968_v16 = vadd.f32 %v931_v51, %v884_v38 }
  0xee   : > { %v1242_v22 = vld [vmem:[#allocation2 + $0x8] sm:$0xff] }
  0xef   : > { %v1366_v63 = vadd.f32 %v1327_v33, %v1242_v22  ;;  %984 = vst.msk [vmem:[#allocation2 + $0x10] sm:$0xff] %vm546_vm8, %v968_v16  ;;  %v4969_v2 = vpop.f32.mrf.mxu0  ;;  %v4971_v28 = vpop.f32.mrf.mxu1  ;;  %v887_v16 = vld [vmem:[#allocation2 + $0x28] sm:$0xff] }
  0xf0   : > { %v1397_v45 = vld [vmem:[#allocation2] sm:$0xff] }
  0xf1   : > { %1382 = vst.msk [vmem:[#allocation2 + $0x8] sm:$0xff] %vm546_vm8, %v1366_v63  ;;  %v1479_v3 = vadd.f32 %v4914_v23, %v1397_v45  ;;  %v1675_v23 = vrot.slane %v4689_v5, 5 }
  0xf3   : > { %1495 = vst.msk [vmem:[#allocation2] sm:$0xff] %vm546_vm8, %v1479_v3  ;;  %v1677_v33 = vrot.slane %v1675_v23, 4  ;;  %v5022_v3 = vld [vmem:[%s4907_s20 + $0x24] sm:$0xff] }
  0xf4   : > { %v933_v44 = vpop.f32.mrf.mxu2  ;;  %v1332_v32 = vpop.f32.mrf.mxu3 }
  0xf5   : > { %v969_v59 = vadd.f32 %v933_v44, %v885_v12 }
  0xf6   : > { %v1243_v31 = vld [vmem:[#allocation2 + $0x10] sm:$0xff] }
  0xf7   : > { %v1367_v47 = vadd.f32 %v1330_v19, %v1243_v31  ;;  %985 = vst.msk [vmem:[#allocation2 + $0x18] sm:$0xff] %vm546_vm8, %v969_v59  ;;  %v4986_v17 = vpop.f32.mrf.mxu0  ;;  %v4988_v48 = vpop.f32.mrf.mxu1 }
  0xf8   : > { %v1398_v49 = vld [vmem:[#allocation2 + $0x8] sm:$0xff] }
  0xf9   : > { %1383 = vst.msk [vmem:[#allocation2 + $0x10] sm:$0xff] %vm546_vm8, %v1367_v47  ;;  %v1480_v52 = vadd.f32 %v1441_v8, %v1398_v49  ;;  %4023 = vmatmul.msk.bf16.gmra.mxu2 %vm656_vm1, %v4910_v21  ;;  %4037 = vmatmul.msk.bf16.gmra.mxu3 %vm656_vm1, %v4945_v58  ;;  %v4010_v8 = vrot.slane %v4686_v4, 9  ;;  %v886_v21 = vld [vmem:[#allocation2 + $0x20] sm:$0xff]  ;;  %v1679_v4 = vsel %vm4604_vm7, %v1677_v33, %v1678_v53 }
  0xfa   : > { %v1511_v50 = vld [vmem:[#allocation2] sm:$0xff]  ;;  %4051 = vmatmul.msk.bf16.gmra.mxu0 %vm656_vm1, %v4980_v46  ;;  %4091 = vmatmul.msk.bf16.gmra.mxu1 %vm2179_vm9, %v4983_v10  ;;  %v1738_v51 = vunpack.c.l.b16 %v1679_v4 }
  0xfb   : > { %1496 = vst.msk [vmem:[#allocation2 + $0x8] sm:$0xff] %vm546_vm8, %v1480_v52  ;;  %v1593_v5 = vadd.f32 %v4916_v13, %v1511_v50  ;;  %v1676_v13 = vsel %vm4604_vm7, %v4010_v8, %v1675_v23 }
  0xfc   : > { %v936_v57 = vpop.f32.mrf.mxu2  ;;  %v1335_v55 = vpop.f32.mrf.mxu3  ;;  %v1737_v38 = vunpack.c.l.b16 %v1676_v13 }
  0xfd   : > { %1609 = vst.msk [vmem:[#allocation2] sm:$0xff] %vm546_vm8, %v1593_v5  ;;  %v970_v25 = vadd.f32 %v936_v57, %v886_v21 }
  0xfe   : > { %v1244_v9 = vld [vmem:[#allocation2 + $0x18] sm:$0xff]  ;;  %v5019_v45 = vpack.c.b16 %v1738_v51, %v1737_v38 }
  0xff   : > { %v1368_v36 = vadd.f32 %v1332_v32, %v1244_v9  ;;  %986 = vst.msk [vmem:[#allocation2 + $0x20] sm:$0xff] %vm546_vm8, %v970_v25  ;;  %v5006_v60 = vpop.f32.mrf.mxu0  ;;  %v5008_v20 = vpop.f32.mrf.mxu1  ;;  %v889_v25 = vld [vmem:[#allocation2 + $0x38] sm:$0xff] }
 0x100   : > { %v1399_v43 = vld [vmem:[#allocation2 + $0x10] sm:$0xff] }
 0x101   : > { %1384 = vst.msk [vmem:[#allocation2 + $0x18] sm:$0xff] %vm546_vm8, %v1368_v36  ;;  %v1481_v7 = vadd.f32 %v4952_v40, %v1399_v43 }
 0x102   : > { %v1512_v15 = vld [vmem:[#allocation2 + $0x8] sm:$0xff] }
 0x103   : > { %1497 = vst.msk [vmem:[#allocation2 + $0x10] sm:$0xff] %vm546_vm8, %v1481_v7  ;;  %v1594_v19 = vadd.f32 %v4935_v0, %v1512_v15  ;;  %v1682_v0 = vrot.slane %v4730_v42, 5  ;;  %v1685_v42 = vrot.slane %v4745_v54, 5  ;;  %v5062_v7 = vld [vmem:[%s4907_s20 + $0x30] sm:$0xff] }
 0x104   : > { %v938_v22 = vpop.f32.mrf.mxu2  ;;  %v1337_v63 = vpop.f32.mrf.mxu3 }
 0x105   : > { %1610 = vst.msk [vmem:[#allocation2 + $0x8] sm:$0xff] %vm546_vm8, %v1594_v19  ;;  %v971_v11 = vadd.f32 %v938_v22, %v887_v16  ;;  %v1684_v31 = vrot.slane %v1682_v0, 4 }
 0x106   : > { %v1245_v37 = vld [vmem:[#allocation2 + $0x20] sm:$0xff] }
 0x107   : > { %v1369_v61 = vadd.f32 %v1335_v55, %v1245_v37  ;;  %987 = vst.msk [vmem:[#allocation2 + $0x28] sm:$0xff] %vm546_vm8, %v971_v11  ;;  %v5025_v40 = vpop.f32.mrf.mxu0  ;;  %v5027_v1 = vpop.f32.mrf.mxu1 }
 0x108   : > { %v1400_v12 = vld [vmem:[#allocation2 + $0x18] sm:$0xff] }
 0x109   : > { %1385 = vst.msk [vmem:[#allocation2 + $0x20] sm:$0xff] %vm546_vm8, %v1369_v61  ;;  %v1482_v44 = vadd.f32 %v4969_v2, %v1400_v12  ;;  %4024 = vmatmul.msk.bf16.gmra.mxu2 %vm656_vm1, %v4945_v58  ;;  %4038 = vmatmul.msk.bf16.gmra.mxu3 %vm656_vm1, %v4980_v46  ;;  %v4011_v2 = vrot.slane %v4727_v41, 9  ;;  %v888_v58 = vld [vmem:[#allocation2 + $0x30] sm:$0xff]  ;;  %v1686_v41 = vsel %vm4604_vm7, %v1684_v31, %v1685_v42 }
 0x10a   : > { %v1513_v32 = vld [vmem:[#allocation2 + $0x10] sm:$0xff]  ;;  %4052 = vmatmul.msk.bf16.gmra.mxu0 %vm656_vm1, %v5019_v45  ;;  %4092 = vmatmul.msk.bf16.gmra.mxu1 %vm2179_vm9, %v5022_v3  ;;  %v1740_v57 = vunpack.c.l.b16 %v1686_v41  ;;  %v5102_v41 = vld [vmem:[%s4907_s20 + $0x3c] sm:$0xff] }
 0x10b   : > { %1498 = vst.msk [vmem:[#allocation2 + $0x18] sm:$0xff] %vm546_vm8, %v1482_v44  ;;  %v1595_v59 = vadd.f32 %v4954_v56, %v1513_v32  ;;  %v1683_v56 = vsel %vm4604_vm7, %v4011_v2, %v1682_v0 }
 0x10c   : > { %v941_v47 = vpop.f32.mrf.mxu2  ;;  %v1340_v23 = vpop.f32.mrf.mxu3  ;;  %v1739_v21 = vunpack.c.l.b16 %v1683_v56 }
 0x10d   : > { %1611 = vst.msk [vmem:[#allocation2 + $0x10] sm:$0xff] %vm546_vm8, %v1595_v59  ;;  %v972_v49 = vadd.f32 %v941_v47, %v888_v58  ;;  %v891_v47 = vld [vmem:[#allocation2 + $0x48] sm:$0xff] }
 0x10e   : > { %v1246_v52 = vld [vmem:[#allocation2 + $0x28] sm:$0xff]  ;;  %v5059_v43 = vpack.c.b16 %v1740_v57, %v1739_v21 }
 0x10f   : > { %v1370_v50 = vadd.f32 %v1337_v63, %v1246_v52  ;;  %988 = vst.msk [vmem:[#allocation2 + $0x30] sm:$0xff] %vm546_vm8, %v972_v49  ;;  %v5046_v53 = vpop.f32.mrf.mxu0  ;;  %v5048_v54 = vpop.f32.mrf.mxu1 }
 0x110   : > { %v1401_v5 = vld [vmem:[#allocation2 + $0x20] sm:$0xff] }
 0x111   : > { %1386 = vst.msk [vmem:[#allocation2 + $0x28] sm:$0xff] %vm546_vm8, %v1370_v50  ;;  %v1483_v8 = vadd.f32 %v4986_v17, %v1401_v5 }
 0x112   : > { %v1514_v33 = vld [vmem:[#allocation2 + $0x18] sm:$0xff] }
 0x113   : > { %1499 = vst.msk [vmem:[#allocation2 + $0x20] sm:$0xff] %vm546_vm8, %v1483_v8  ;;  %v1596_v55 = vadd.f32 %v4971_v28, %v1514_v33  ;;  %v1689_v28 = vrot.slane %v4758_v14, 5  ;;  %v1692_v14 = vrot.slane %v4774_v34, 5 }
 0x114   : > { %v943_v9 = vpop.f32.mrf.mxu2  ;;  %v1342_v36 = vpop.f32.mrf.mxu3 }
 0x115   : > { %1612 = vst.msk [vmem:[#allocation2 + $0x18] sm:$0xff] %vm546_vm8, %v1596_v55  ;;  %v973_v13 = vadd.f32 %v943_v9, %v889_v25  ;;  %v1691_v63 = vrot.slane %v1689_v28, 4 }
 0x116   : > { %v1247_v4 = vld [vmem:[#allocation2 + $0x30] sm:$0xff] }
 0x117   : > { %v1371_v15 = vadd.f32 %v1340_v23, %v1247_v4  ;;  %989 = vst.msk [vmem:[#allocation2 + $0x38] sm:$0xff] %vm546_vm8, %v973_v13  ;;  %v5065_v17 = vpop.f32.mrf.mxu0  ;;  %v5067_v38 = vpop.f32.mrf.mxu1 }
 0x118   : > { %v1402_v51 = vld [vmem:[#allocation2 + $0x28] sm:$0xff] }
 0x119   : > { %1387 = vst.msk [vmem:[#allocation2 + $0x30] sm:$0xff] %vm546_vm8, %v1371_v15  ;;  %v1484_v19 = vadd.f32 %v5006_v60, %v1402_v51  ;;  %4025 = vmatmul.msk.bf16.gmra.mxu2 %vm656_vm1, %v4980_v46  ;;  %4039 = vmatmul.msk.bf16.gmra.mxu3 %vm656_vm1, %v5019_v45  ;;  %v4012_v60 = vrot.slane %v4755_v29, 9  ;;  %v890_v46 = vld [vmem:[#allocation2 + $0x40] sm:$0xff]  ;;  %v1693_v29 = vsel %vm4604_vm7, %v1691_v63, %v1692_v14  ;;  %v893_v63 = vld [vmem:[#allocation2 + $0x58] sm:$0xff] }
 0x11a   : > { %v1515_v16 = vld [vmem:[#allocation2 + $0x20] sm:$0xff]  ;;  %4053 = vmatmul.msk.bf16.gmra.mxu0 %vm656_vm1, %v5059_v43  ;;  %4093 = vmatmul.msk.bf16.gmra.mxu1 %vm2179_vm9, %v5062_v7  ;;  %v1742_v31 = vunpack.c.l.b16 %v1693_v29 }
 0x11b   : > { %1500 = vst.msk [vmem:[#allocation2 + $0x28] sm:$0xff] %vm546_vm8, %v1484_v19  ;;  %v1597_v22 = vadd.f32 %v4988_v48, %v1515_v16  ;;  %v1690_v48 = vsel %vm4604_vm7, %v4012_v60, %v1689_v28 }
 0x11c   : > { %v946_v11 = vpop.f32.mrf.mxu2  ;;  %v1345_v37 = vpop.f32.mrf.mxu3  ;;  %v1741_v2 = vunpack.c.l.b16 %v1690_v48 }
 0x11d   : > { %1613 = vst.msk [vmem:[#allocation2 + $0x20] sm:$0xff] %vm546_vm8, %v1597_v22  ;;  %v974_v61 = vadd.f32 %v946_v11, %v890_v46 }
 0x11e   : > { %v1248_v0 = vld [vmem:[#allocation2 + $0x38] sm:$0xff]  ;;  %v5099_v56 = vpack.c.b16 %v1742_v31, %v1741_v2  ;;  %v4014_v2 = vrot.slane %v4839_v62, 9  ;;  %v894_v31 = vld [vmem:[#allocation2 + $0x60] sm:$0xff] }
 0x11f   : > { %v1372_v12 = vadd.f32 %v1342_v36, %v1248_v0  ;;  %990 = vst.msk [vmem:[#allocation2 + $0x40] sm:$0xff] %vm546_vm8, %v974_v61  ;;  %v5086_v44 = vpop.f32.mrf.mxu0  ;;  %v5088_v34 = vpop.f32.mrf.mxu1 }
 0x120   : > { %v1403_v32 = vld [vmem:[#allocation2 + $0x30] sm:$0xff] }
 0x121   : > { %1388 = vst.msk [vmem:[#allocation2 + $0x38] sm:$0xff] %vm546_vm8, %v1372_v12  ;;  %v1485_v42 = vadd.f32 %v5025_v40, %v1403_v32  ;;  %v5142_v12 = vld [vmem:[%s4907_s20 + $0x48] sm:$0xff] }
 0x122   : > { %v1516_v59 = vld [vmem:[#allocation2 + $0x28] sm:$0xff] }
 0x123   : > { %1501 = vst.msk [vmem:[#allocation2 + $0x30] sm:$0xff] %vm546_vm8, %v1485_v42  ;;  %v1598_v58 = vadd.f32 %v5008_v20, %v1516_v59  ;;  %v1696_v20 = vrot.slane %v4791_v27, 5  ;;  %v1699_v27 = vrot.slane %v4808_v30, 5 }
 0x124   : > { %v948_v23 = vpop.f32.mrf.mxu2  ;;  %v1347_v49 = vpop.f32.mrf.mxu3 }
 0x125   : > { %1614 = vst.msk [vmem:[#allocation2 + $0x28] sm:$0xff] %vm546_vm8, %v1598_v58  ;;  %v975_v52 = vadd.f32 %v948_v23, %v891_v47  ;;  %v1698_v25 = vrot.slane %v1696_v20, 4  ;;  %v2092_v23 = vld [vmem:[%s4907_s20] sm:$0xf] }
 0x126   : > { %v1249_v50 = vld [vmem:[#allocation2 + $0x40] sm:$0xff] }
 0x127   : > { %v1373_v5 = vadd.f32 %v1345_v37, %v1249_v50  ;;  %991 = vst.msk [vmem:[#allocation2 + $0x48] sm:$0xff] %vm546_vm8, %v975_v52  ;;  %v5105_v40 = vpop.f32.mrf.mxu0  ;;  %v5107_v8 = vpop.f32.mrf.mxu1 }
 0x128   : > { %v1404_v33 = vld [vmem:[#allocation2 + $0x38] sm:$0xff] }
 0x129   : > { %1389 = vst.msk [vmem:[#allocation2 + $0x40] sm:$0xff] %vm546_vm8, %v1373_v5  ;;  %v1486_v21 = vadd.f32 %v5046_v53, %v1404_v33  ;;  %4026 = vmatmul.msk.bf16.gmra.mxu2 %vm656_vm1, %v5019_v45  ;;  %4040 = vmatmul.msk.bf16.gmra.mxu3 %vm656_vm1, %v5059_v43  ;;  %v4013_v53 = vrot.slane %v4788_v26, 9  ;;  %v892_v45 = vld [vmem:[#allocation2 + $0x50] sm:$0xff]  ;;  %v1700_v26 = vsel %vm4604_vm7, %v1698_v25, %v1699_v27  ;;  %v2510_v5 = vshrl.u32 %v2092_v23, 16 }
 0x12a   : > { %v1517_v57 = vld [vmem:[#allocation2 + $0x30] sm:$0xff]  ;;  %4054 = vmatmul.msk.bf16.gmra.mxu0 %vm656_vm1, %v5099_v56  ;;  %4094 = vmatmul.msk.bf16.gmra.mxu1 %vm2179_vm9, %v5102_v41  ;;  %v1884_v22 = vunpack.c.l.b16 %v1700_v26 }
 0x12b   : > { %1502 = vst.msk [vmem:[#allocation2 + $0x38] sm:$0xff] %vm546_vm8, %v1486_v21  ;;  %v1599_v55 = vadd.f32 %v5027_v1, %v1517_v57  ;;  %v1697_v1 = vsel %vm4604_vm7, %v4013_v53, %v1696_v20  ;;  %v2513_v21 = vshll.u32 %v2092_v23, 16 }
 0x12c   : > { %v951_v9 = vpop.f32.mrf.mxu2  ;;  %v1350_v36 = vpop.f32.mrf.mxu3  ;;  %v1883_v14 = vunpack.c.l.b16 %v1697_v1 }
 0x12d   : > { %1615 = vst.msk [vmem:[#allocation2 + $0x30] sm:$0xff] %vm546_vm8, %v1599_v55  ;;  %v976_v13 = vadd.f32 %v951_v9, %v892_v45 }
 0x12e   : > { %v1250_v4 = vld [vmem:[#allocation2 + $0x48] sm:$0xff]  ;;  %v5139_v0 = vpack.c.b16 %v1884_v22, %v1883_v14 }
 0x12f   : > { %v1374_v15 = vadd.f32 %v1347_v49, %v1250_v4  ;;  %992 = vst.msk [vmem:[#allocation2 + $0x50] sm:$0xff] %vm546_vm8, %v976_v13  ;;  %v5126_v28 = vpop.f32.mrf.mxu0  ;;  %v5128_v30 = vpop.f32.mrf.mxu1  ;;  %v2093_v49 = vld [vmem:[%s4907_s20 + $0x4] sm:$0xf]  ;;  %v4141_v4 = vld [vmem:[%s6147_s5 + $0x1c] sm:$0x7] }
 0x130   : > { %v1405_v51 = vld [vmem:[#allocation2 + $0x40] sm:$0xff]  ;;  %v2519_v57 = vshll.u32 %v2093_v49, 16  ;;  %v2523_v27 = vshrl.u32 %v2093_v49, 16  ;;  %v5187_v14 = vld [vmem:[%s4907_s20 + $0x8] sm:$0x1] }
 0x131   : > { %1390 = vst.msk [vmem:[#allocation2 + $0x48] sm:$0xff] %vm546_vm8, %v1374_v15  ;;  %v1487_v19 = vadd.f32 %v5065_v17, %v1405_v51  ;;  %v1703_v17 = vrot.slane %v4842_v6, 5  ;;  %v1706_v6 = vrot.slane %v4861_v35, 5  ;;  %v2515_v15 = vrot.slane %v2513_v21, 5  ;;  %v895_v51 = vld [vmem:[#allocation2 + $0x68] sm:$0xff] }
 0x132   : > { %v1518_v16 = vld [vmem:[#allocation2 + $0x38] sm:$0xff]  ;;  %v5183_v1 = vrot.slane %v2519_v57, 5  ;;  %v2525_v26 = vrot.slane %v2523_v27, 4 }
 0x133   : > { %1503 = vst.msk [vmem:[#allocation2 + $0x40] sm:$0xff] %vm546_vm8, %v1487_v19  ;;  %v1600_v60 = vadd.f32 %v5048_v54, %v1518_v16  ;;  %v1704_v50 = vsel %vm4604_vm7, %v4014_v2, %v1703_v17  ;;  %v3032_v16 = vsel %vm1635_vm4, %v4141_v4, 0 }
 0x134   : > { %v953_v46 = vpop.f32.mrf.mxu2  ;;  %v1352_v11 = vpop.f32.mrf.mxu3  ;;  %v1997_v45 = vunpack.c.l.b16 %v1704_v50  ;;  %3041 = vmatpush.bf16.msra.mxu2 %v3032_v16 }
 0x135   : > { %1616 = vst.msk [vmem:[#allocation2 + $0x38] sm:$0xff] %vm546_vm8, %v1600_v60  ;;  %v977_v37 = vadd.f32 %v953_v46, %v893_v63  ;;  %v5191_v63 = vld [vmem:[%s4907_s20 + $0x54] sm:$0xff] }
 0x136   : > { %v1251_v61 = vld [vmem:[#allocation2 + $0x50] sm:$0xff] }
 0x137   : > { %v1375_v48 = vadd.f32 %v1350_v36, %v1251_v61  ;;  %993 = vst.msk [vmem:[#allocation2 + $0x58] sm:$0xff] %vm546_vm8, %v977_v37  ;;  %v5146_v29 = vpop.f32.mrf.mxu0  ;;  %v5148_v32 = vpop.f32.mrf.mxu1  ;;  %v2512_v36 = vrot.slane %v2510_v5, 4 }
 0x138   : > { %v1406_v54 = vld [vmem:[#allocation2 + $0x48] sm:$0xff] }
 0x139   : > { %1391 = vst.msk [vmem:[#allocation2 + $0x50] sm:$0xff] %vm546_vm8, %v1375_v48  ;;  %v1488_v42 = vadd.f32 %v5086_v44, %v1406_v54  ;;  %4027 = vmatmul.msk.bf16.gmra.mxu2 %vm656_vm1, %v5059_v43  ;;  %4041 = vmatmul.msk.bf16.gmra.mxu3 %vm656_vm1, %v5099_v56  ;;  %v1705_v44 = vrot.slane %v1703_v17, 4  ;;  %v2516_v61 = vor.u32 %v2515_v15, %v2512_v36  ;;  %v2529_v48 = vshll.u32 %v5187_v14, 16  ;;  %v5201_v54 = vld [vmem:[%s4907_s20 + $0xc] sm:$0xf] }
 0x13a   : > { %v1519_v59 = vld [vmem:[#allocation2 + $0x40] sm:$0xff]  ;;  %4055 = vmatmul.msk.bf16.gmra.mxu0 %vm656_vm1, %v5139_v0  ;;  %4095 = vmatmul.msk.bf16.gmra.mxu1 %vm2179_vm9, %v5142_v12  ;;  %v2526_v17 = vor.u32 %v2525_v26, %v5183_v1  ;;  %v2537_v2 = vshll.u32 %v5201_v54, 16 }
 0x13b   : > { %1504 = vst.msk [vmem:[#allocation2 + $0x48] sm:$0xff] %vm546_vm8, %v1488_v42  ;;  %v1601_v43 = vadd.f32 %v5067_v38, %v1519_v59  ;;  %v1707_v62 = vsel %vm4604_vm7, %v1705_v44, %v1706_v6  ;;  %v5204_v42 = vld [vmem:[%s4907_s20 + $0x10] sm:$0xf]  ;;  %v2534_v59 = vshrl.u32 %v5201_v54, 16 }
 0x13c   : > { %v956_v58 = vpop.f32.mrf.mxu2  ;;  %v1355_v47 = vpop.f32.mrf.mxu3  ;;  %v1998_v9 = vunpack.c.l.b16 %v1707_v62  ;;  %v2543_v44 = vshll.u32 %v5204_v42, 16  ;;  %v2527_v50 = vrot.slane %v2526_v17, 4  ;;  %v5222_v62 = vld [vmem:[%s4907_s20 + $0x14] sm:$0x1] }
 0x13d   : > { %1617 = vst.msk [vmem:[#allocation2 + $0x40] sm:$0xff] %vm546_vm8, %v1601_v43  ;;  %v978_v35 = vadd.f32 %v956_v58, %v894_v31  ;;  %v2547_v43 = vshrl.u32 %v5204_v42, 16  ;;  %v2553_v27 = vshll.u32 %v5222_v62, 16 }
 0x13e   : > { %v1252_v52 = vld [vmem:[#allocation2 + $0x58] sm:$0xff]  ;;  %v1999_v60 = vpack.c.b16 %v1998_v9, %v1997_v45  ;;  %v2545_v23 = vrot.slane %v2543_v44, 5 }
 0x13f   : > { %v1376_v20 = vadd.f32 %v1352_v11, %v1252_v52  ;;  %994 = vst.msk [vmem:[#allocation2 + $0x60] sm:$0xff] %vm546_vm8, %v978_v35  ;;  %v5172_v38 = vpop.f32.mrf.mxu0  ;;  %v5174_v33 = vpop.f32.mrf.mxu1  ;;  %v2539_v35 = vrot.slane %v2537_v2, 5  ;;  %v2549_v49 = vrot.slane %v2547_v43, 4  ;;  %v2517_v52 = vrot.slane %v2516_v61, 4 }
 0x140   : > { %v1407_v55 = vld [vmem:[#allocation2 + $0x50] sm:$0xff]  ;;  %v2555_v36 = vrot.slane %v2553_v27, 5  ;;  %v5278_v27 = vld [vmem:[%s4907_s20 + $0x20] sm:$0x1] }
 0x141   : > { %1392 = vst.msk [vmem:[#allocation2 + $0x58] sm:$0xff] %vm546_vm8, %v1376_v20  ;;  %v1489_v53 = vadd.f32 %v5105_v40, %v1407_v55  ;;  %v2550_v57 = vor.u32 %v2549_v49, %v2545_v23  ;;  %v2522_v26 = vsel %vm4583_vm6, %v2517_v52, %v5183_v1 }
 0x142   : > { %v1520_v25 = vld [vmem:[#allocation2 + $0x48] sm:$0xff] }
 0x143   : > { %1505 = vst.msk [vmem:[#allocation2 + $0x50] sm:$0xff] %vm546_vm8, %v1489_v53  ;;  %v1602_v13 = vadd.f32 %v5088_v34, %v1520_v25  ;;  %v4160_v53 = vld [vmem:[%s6147_s5 + $0x8] sm:$0x7]  ;;  %v2551_v9 = vrot.slane %v2550_v57, 4 }
 0x144   : > { %v958_v19 = vpop.f32.mrf.mxu2  ;;  %v1357_v40 = vpop.f32.mrf.mxu3  ;;  %v3262_v25 = vsel %vm1635_vm4, %v4160_v53, 0 }
 0x145   : > { %1618 = vst.msk [vmem:[#allocation2 + $0x48] sm:$0xff] %vm546_vm8, %v1602_v13  ;;  %v979_v34 = vadd.f32 %v958_v19, %v895_v51  ;;  %3271 = vmatpush.bf16.msra.mxu3 %v3262_v25 }
 0x146   : > { %v1253_v22 = vld [vmem:[#allocation2 + $0x60] sm:$0xff] }
 0x147   : > { %v1377_v46 = vadd.f32 %v1355_v47, %v1253_v22  ;;  %995 = vst.msk [vmem:[#allocation2 + $0x68] sm:$0xff] %vm546_vm8, %v979_v34  ;;  %v5194_v11 = vpop.f32.mrf.mxu0  ;;  %v5196_v37 = vpop.f32.mrf.mxu1  ;;  %v2536_v47 = vrot.slane %v2534_v59, 4 }
 0x148   : > { %v1408_v6 = vld [vmem:[#allocation2 + $0x58] sm:$0xff] }
 0x149   : > { %1393 = vst.msk [vmem:[#allocation2 + $0x60] sm:$0xff] %vm546_vm8, %v1377_v46  ;;  %v1490_v31 = vadd.f32 %v5126_v28, %v1408_v6  ;;  %4028 = vmatmul.msk.bf16.gmra.mxu2 %vm656_vm1, %v5099_v56  ;;  %4042 = vmatmul.msk.bf16.gmra.mxu3 %vm656_vm1, %v5139_v0  ;;  %v2531_v56 = vrot.slane %v2529_v48, 5  ;;  %v896_v0 = vld [vmem:[#allocation2 + $0x70] sm:$0xff]  ;;  %v2540_v21 = vor.u32 %v2539_v35, %v2536_v47  ;;  %v897_v48 = vld [vmem:[#allocation2 + $0x78] sm:$0xff] }
 0x14a   : > { %v1521_v58 = vld [vmem:[#allocation2 + $0x50] sm:$0xff]  ;;  %4056 = vmatmul.msk.bf16.gmra.mxu0 %vm656_vm1, %v1999_v60  ;;  %4096 = vmatmul.msk.bf16.gmra.mxu1 %vm2179_vm9, %v5191_v63  ;;  %v2767_v60 = vunpack.c.l.b16 %v2522_v26  ;;  %v5257_v35 = vld [vmem:[%s4907_s20 + $0x18] sm:$0xf] }
 0x14b   : > { %1506 = vst.msk [vmem:[#allocation2 + $0x58] sm:$0xff] %vm546_vm8, %v1490_v31  ;;  %v1603_v28 = vadd.f32 %v5107_v8, %v1521_v58  ;;  %v2541_v45 = vrot.slane %v2540_v21, 4  ;;  %v2532_v51 = vsel %vm4583_vm6, %v2527_v50, %v2531_v56  ;;  %v2558_v49 = vshrl.u32 %v5257_v35, 16 }
 0x14c   : > { %v961_v5 = vpop.f32.mrf.mxu2  ;;  %v1360_v20 = vpop.f32.mrf.mxu3  ;;  %v2768_v46 = vunpack.c.l.b16 %v2532_v51 }
 0x14d   : > { %1619 = vst.msk [vmem:[#allocation2 + $0x50] sm:$0xff] %vm546_vm8, %v1603_v28  ;;  %v980_v55 = vadd.f32 %v961_v5, %v896_v0  ;;  %v2546_v16 = vsel %vm4583_vm6, %v2541_v45, %v2545_v23  ;;  %v2561_v28 = vshll.u32 %v5257_v35, 16  ;;  %v2560_v5 = vrot.slane %v2558_v49, 4 }
 0x14e   : > { %v1254_v8 = vld [vmem:[#allocation2 + $0x68] sm:$0xff]  ;;  %v2769_v61 = vunpack.c.l.b16 %v2546_v16  ;;  %v2783_v43 = vpack.c.b16 %v2768_v46, %v2767_v60  ;;  %v2577_v45 = vshll.u32 %v5278_v27, 16 }
 0x14f   : > { %v1378_v13 = vadd.f32 %v1357_v40, %v1254_v8  ;;  %996 = vst.msk [vmem:[#allocation2 + $0x70] sm:$0xff] %vm546_vm8, %v980_v55  ;;  %v5231_v4 = vpop.f32.mrf.mxu0  ;;  %v5233_v15 = vpop.f32.mrf.mxu1  ;;  %v2556_v40 = vsel %vm4583_vm6, %v2551_v9, %v2555_v36  ;;  %v4169_v36 = vld [vmem:[%s6147_s5 + $0x14] sm:$0x7] }
 0x150   : > { %v1409_v19 = vld [vmem:[#allocation2 + $0x60] sm:$0xff]  ;;  %v2770_v1 = vunpack.c.l.b16 %v2556_v40  ;;  %v3370_v26 = vsel %vm1635_vm4, %v4169_v36, 0 }
 0x151   : > { %1394 = vst.msk [vmem:[#allocation2 + $0x68] sm:$0xff] %vm546_vm8, %v1378_v13  ;;  %v1491_v34 = vadd.f32 %v5146_v29, %v1409_v19  ;;  %v2579_v19 = vrot.slane %v2577_v45, 5  ;;  %3379 = vmatpush.bf16.msra.mxu0 %v3370_v26  ;;  %v5334_v45 = vld [vmem:[%s4907_s20 + $0x2c] sm:$0x1] }
 0x152   : > { %v1522_v22 = vld [vmem:[#allocation2 + $0x58] sm:$0xff]  ;;  %v5249_v29 = vpack.c.b16 %v2770_v1, %v2769_v61 }
 0x153   : > { %1507 = vst.msk [vmem:[#allocation2 + $0x60] sm:$0xff] %vm546_vm8, %v1491_v34  ;;  %v1604_v17 = vadd.f32 %v5128_v30, %v1522_v22  ;;  %v5260_v30 = vld [vmem:[%s4907_s20 + $0x1c] sm:$0xf] }
 0x154   : > { %v963_v6 = vpop.f32.mrf.mxu2  ;;  %v1362_v59 = vpop.f32.mrf.mxu3  ;;  %v2567_v52 = vshll.u32 %v5260_v30, 16  ;;  %v2571_v50 = vshrl.u32 %v5260_v30, 16 }
 0x155   : > { %1620 = vst.msk [vmem:[#allocation2 + $0x58] sm:$0xff] %vm546_vm8, %v1604_v17  ;;  %v981_v2 = vadd.f32 %v963_v6, %v897_v48 }
 0x156   : > { %v1255_v44 = vld [vmem:[#allocation2 + $0x70] sm:$0xff]  ;;  %v2569_v21 = vrot.slane %v2567_v52, 5  ;;  %v2573_v57 = vrot.slane %v2571_v50, 4  ;;  %v5312_v50 = vld [vmem:[%s4907_s20 + $0x24] sm:$0xf] }
 0x157   : > { %v1379_v31 = vadd.f32 %v1360_v20, %v1255_v44  ;;  %997 = vst.msk [vmem:[#allocation2 + $0x78] sm:$0xff] %vm546_vm8, %v981_v2  ;;  %v5252_v58 = vpop.f32.mrf.mxu0  ;;  %v5254_v47 = vpop.f32.mrf.mxu1  ;;  %v2563_v20 = vrot.slane %v2561_v28, 5 }
 0x158   : > { %v1410_v23 = vld [vmem:[#allocation2 + $0x68] sm:$0xff]  ;;  %v2574_v25 = vor.u32 %v2573_v57, %v2569_v21 }
 0x159   : > { %1395 = vst.msk [vmem:[#allocation2 + $0x70] sm:$0xff] %vm546_vm8, %v1379_v31  ;;  %v1492_v56 = vadd.f32 %v5172_v38, %v1410_v23  ;;  %4102 = vmatmul.msk.bf16.vlgmr.msrb.gmra.mxu2 %vm2179_vm9, %v4949_v24  ;;  %4115 = vmatmul.msk.bf16.vlgmr.msrb.gmra.mxu3 %vm2179_vm9, %v4983_v10  ;;  %v1708_v24 = vld [vmem:[#allocation2] sm:$0xff]  ;;  %v2564_v8 = vor.u32 %v2563_v20, %v2560_v5  ;;  %v2582_v5 = vshrl.u32 %v5312_v50, 16  ;;  %v2585_v20 = vshll.u32 %v5312_v50, 16 }
 0x15a   : > { %v1523_v0 = vld [vmem:[#allocation2 + $0x60] sm:$0xff]  ;;  %4124 = vmatmul.msk.bf16.vlgmr.msrb.gmra.mxu0 %vm2179_vm9, %v2783_v43  ;;  %4133 = vmatmul.msk.bf16.vlgmr.msrb.gmra.mxu1 %vm2179_vm9, %v5249_v29  ;;  %v2575_v51 = vrot.slane %v2574_v25, 4 }
 0x15b   : > { %1508 = vst.msk [vmem:[#allocation2 + $0x68] sm:$0xff] %vm546_vm8, %v1492_v56  ;;  %v1605_v38 = vadd.f32 %v5148_v32, %v1523_v0  ;;  %v2565_v32 = vrot.slane %v2564_v8, 4  ;;  %v4178_v31 = vld [vmem:[%s6147_s5 + $0x20] sm:$0x7]  ;;  %v5315_v56 = vld [vmem:[%s4907_s20 + $0x28] sm:$0xf] }
 0x15c   : > { %v1792_v55 = vpop.f32.mrf.mxu2  ;;  %v1906_v53 = vpop.f32.mrf.mxu3  ;;  %v2580_v46 = vsel %vm4583_vm6, %v2575_v51, %v2579_v19  ;;  %v3478_v23 = vsel %vm1635_vm4, %v4178_v31, 0  ;;  %v2595_v57 = vshrl.u32 %v5315_v56, 16 }
 0x15d   : > { %1621 = vst.msk [vmem:[#allocation2 + $0x60] sm:$0xff] %vm546_vm8, %v1605_v38  ;;  %v1832_v9 = vadd.f32 %v1792_v55, %v1708_v24  ;;  %v2570_v60 = vsel %vm4583_vm6, %v2565_v32, %v2569_v21  ;;  %v2772_v48 = vunpack.c.l.b16 %v2580_v46  ;;  %3487 = vmatpush.bf16.msra.mxu1 %v3478_v23  ;;  %v2591_v21 = vshll.u32 %v5315_v56, 16 }
 0x15e   : > { %v1256_v13 = vld [vmem:[#allocation2 + $0x78] sm:$0xff]  ;;  %v2771_v17 = vunpack.c.l.b16 %v2570_v60  ;;  %v2584_v55 = vrot.slane %v2582_v5, 4  ;;  %v2597_v25 = vrot.slane %v2595_v57, 4  ;;  %v5363_v57 = vld [vmem:[%s4907_s20 + $0x34] sm:$0xf] }
 0x15f   : > { %v1380_v16 = vadd.f32 %v1362_v59, %v1256_v13  ;;  %1848 = vst.msk [vmem:[#allocation2] sm:$0xff] %vm546_vm8, %v1832_v9  ;;  %v5287_v40 = vpop.f32.mrf.mxu0  ;;  %v5289_v34 = vpop.f32.mrf.mxu1  ;;  %v1709_v59 = vld [vmem:[#allocation2 + $0x8] sm:$0xff]  ;;  %v2593_v8 = vrot.slane %v2591_v21, 5  ;;  %v5360_v21 = vld [vmem:[%s4907_s20 + $0x30] sm:$0xf] }
 0x160   : > { %v1411_v22 = vld [vmem:[#allocation2 + $0x70] sm:$0xff]  ;;  %v5304_v49 = vpack.c.b16 %v2772_v48, %v2771_v17 }
 0x161   : > { %1396 = vst.msk [vmem:[#allocation2 + $0x78] sm:$0xff] %vm546_vm8, %v1380_v16  ;;  %v1493_v61 = vadd.f32 %v5194_v11, %v1411_v22  ;;  %v2598_v26 = vor.u32 %v2597_v25, %v2593_v8 }
 0x162   : > { %v1524_v1 = vld [vmem:[#allocation2 + $0x68] sm:$0xff] }
 0x163   : > { %1509 = vst.msk [vmem:[#allocation2 + $0x70] sm:$0xff] %vm546_vm8, %v1493_v61  ;;  %v1606_v6 = vadd.f32 %v5174_v33, %v1524_v1  ;;  %v2599_v16 = vrot.slane %v2598_v26, 4 }
 0x164   : > { %v1794_v2 = vpop.f32.mrf.mxu2  ;;  %v1908_v44 = vpop.f32.mrf.mxu3 }
 0x165   : > { %1622 = vst.msk [vmem:[#allocation2 + $0x68] sm:$0xff] %vm546_vm8, %v1606_v6  ;;  %v1833_v43 = vadd.f32 %v1794_v2, %v1709_v59 }
 0x166   : > { %v1864_v11 = vld [vmem:[#allocation2] sm:$0xff] }
 0x167   : > { %v1946_v28 = vadd.f32 %v1906_v53, %v1864_v11  ;;  %1849 = vst.msk [vmem:[#allocation2 + $0x8] sm:$0xff] %vm546_vm8, %v1833_v43  ;;  %v5307_v33 = vpop.f32.mrf.mxu0  ;;  %v5309_v52 = vpop.f32.mrf.mxu1  ;;  %v2587_v53 = vrot.slane %v2585_v20, 5  ;;  %v1711_v43 = vld [vmem:[#allocation2 + $0x18] sm:$0xff] }
 0x168   : > { %v1412_v0 = vld [vmem:[#allocation2 + $0x78] sm:$0xff] }
 0x169   : > { %1962 = vst.msk [vmem:[#allocation2] sm:$0xff] %vm546_vm8, %v1946_v28  ;;  %v1494_v38 = vadd.f32 %v5231_v4, %v1412_v0  ;;  %4103 = vmatmul.msk.bf16.gmra.mxu2 %vm2179_vm9, %v4983_v10  ;;  %4116 = vmatmul.msk.bf16.gmra.mxu3 %vm2179_vm9, %v5022_v3  ;;  %v1710_v10 = vld [vmem:[#allocation2 + $0x10] sm:$0xff]  ;;  %v2588_v13 = vor.u32 %v2587_v53, %v2584_v55  ;;  %v2615_v55 = vshll.u32 %v5363_v57, 16  ;;  %v2619_v53 = vshrl.u32 %v5363_v57, 16 }
 0x16a   : > { %v1525_v24 = vld [vmem:[#allocation2 + $0x70] sm:$0xff]  ;;  %4125 = vmatmul.msk.bf16.gmra.mxu0 %vm2179_vm9, %v5249_v29  ;;  %4134 = vmatmul.msk.bf16.gmra.mxu1 %vm2179_vm9, %v5304_v49  ;;  %v2601_v29 = vshll.u32 %v5334_v45, 16 }
 0x16b   : > { %1510 = vst.msk [vmem:[#allocation2 + $0x78] sm:$0xff] %vm546_vm8, %v1494_v38  ;;  %v1607_v4 = vadd.f32 %v5196_v37, %v1525_v24  ;;  %v2589_v19 = vrot.slane %v2588_v13, 4  ;;  %v2606_v38 = vshrl.u32 %v5360_v21, 16  ;;  %v2609_v24 = vshll.u32 %v5360_v21, 16  ;;  %v5382_v13 = vld [vmem:[%s4907_s20 + $0x38] sm:$0x1] }
 0x16c   : > { %v1797_v9 = vpop.f32.mrf.mxu2  ;;  %v1911_v36 = vpop.f32.mrf.mxu3  ;;  %v2603_v22 = vrot.slane %v2601_v29, 5 }
 0x16d   : > { %1623 = vst.msk [vmem:[#allocation2 + $0x70] sm:$0xff] %vm546_vm8, %v1607_v4  ;;  %v1834_v32 = vadd.f32 %v1797_v9, %v1710_v10  ;;  %v2594_v1 = vsel %vm4583_vm6, %v2589_v19, %v2593_v8  ;;  %v2608_v4 = vrot.slane %v2606_v38, 4  ;;  %v2611_v10 = vrot.slane %v2609_v24, 5 }
 0x16e   : > { %v1865_v51 = vld [vmem:[#allocation2 + $0x8] sm:$0xff]  ;;  %v2604_v17 = vsel %vm4583_vm6, %v2599_v16, %v2603_v22  ;;  %v2773_v59 = vunpack.c.l.b16 %v2594_v1  ;;  %v2617_v9 = vrot.slane %v2615_v55, 5  ;;  %v2625_v19 = vshll.u32 %v5382_v13, 16 }
 0x16f   : > { %v1947_v60 = vadd.f32 %v1908_v44, %v1865_v51  ;;  %1850 = vst.msk [vmem:[#allocation2 + $0x10] sm:$0xff] %vm546_vm8, %v1834_v32  ;;  %v5339_v37 = vpop.f32.mrf.mxu0  ;;  %v5341_v46 = vpop.f32.mrf.mxu1  ;;  %v2774_v2 = vunpack.c.l.b16 %v2604_v17  ;;  %v2612_v32 = vor.u32 %v2611_v10, %v2608_v4  ;;  %v5411_v4 = vld [vmem:[%s4907_s20 + $0x40] sm:$0xf] }
 0x170   : > { %v1978_v61 = vld [vmem:[#allocation2] sm:$0xff]  ;;  %v2627_v1 = vrot.slane %v2625_v19, 5 }
 0x171   : > { %1963 = vst.msk [vmem:[#allocation2 + $0x8] sm:$0xff] %vm546_vm8, %v1947_v60  ;;  %v2060_v48 = vadd.f32 %v5252_v58, %v1978_v61  ;;  %v5352_v0 = vpack.c.b16 %v2774_v2, %v2773_v59  ;;  %v2613_v60 = vrot.slane %v2612_v32, 4 }
 0x172   : > { %v1526_v6 = vld [vmem:[#allocation2 + $0x78] sm:$0xff] }
 0x173   : > { %2076 = vst.msk [vmem:[#allocation2] sm:$0xff] %vm546_vm8, %v2060_v48  ;;  %v1608_v44 = vadd.f32 %v5233_v15, %v1526_v6  ;;  %v2618_v59 = vsel %vm4583_vm6, %v2613_v60, %v2617_v9 }
 0x174   : > { %v1799_v31 = vpop.f32.mrf.mxu2  ;;  %v1913_v11 = vpop.f32.mrf.mxu3 }
 0x175   : > { %1624 = vst.msk [vmem:[#allocation2 + $0x78] sm:$0xff] %vm546_vm8, %v1608_v44  ;;  %v1835_v23 = vadd.f32 %v1799_v31, %v1711_v43  ;;  %v2775_v31 = vunpack.c.l.b16 %v2618_v59 }
 0x176   : > { %v1866_v28 = vld [vmem:[#allocation2 + $0x10] sm:$0xff] }
 0x177   : > { %v1948_v5 = vadd.f32 %v1911_v36, %v1866_v28  ;;  %1851 = vst.msk [vmem:[#allocation2 + $0x18] sm:$0xff] %vm546_vm8, %v1835_v23  ;;  %v5355_v58 = vpop.f32.mrf.mxu0  ;;  %v5357_v20 = vpop.f32.mrf.mxu1  ;;  %v2621_v36 = vrot.slane %v2619_v53, 4  ;;  %v1713_v28 = vld [vmem:[#allocation2 + $0x28] sm:$0xff] }
 0x178   : > { %v1979_v15 = vld [vmem:[#allocation2 + $0x8] sm:$0xff] }
 0x179   : > { %1964 = vst.msk [vmem:[#allocation2 + $0x10] sm:$0xff] %vm546_vm8, %v1948_v5  ;;  %v2061_v8 = vadd.f32 %v5287_v40, %v1979_v15  ;;  %4104 = vmatmul.msk.bf16.gmra.mxu2 %vm2179_vm9, %v5022_v3  ;;  %4117 = vmatmul.msk.bf16.gmra.mxu3 %vm2179_vm9, %v5062_v7  ;;  %v1712_v3 = vld [vmem:[#allocation2 + $0x20] sm:$0xff]  ;;  %v2622_v51 = vor.u32 %v2621_v36, %v2617_v9  ;;  %v2639_v36 = vshll.u32 %v5411_v4, 16 }
 0x17a   : > { %v2122_v25 = vld [vmem:[#allocation2] sm:$0xff]  ;;  %4126 = vmatmul.msk.bf16.gmra.mxu0 %vm2179_vm9, %v5304_v49  ;;  %4135 = vmatmul.msk.bf16.gmra.mxu1 %vm2179_vm9, %v5352_v0 }
 0x17b   : > { %2077 = vst.msk [vmem:[#allocation2 + $0x8] sm:$0xff] %vm546_vm8, %v2061_v8  ;;  %v2257_v40 = vadd.f32 %v5254_v47, %v2122_v25  ;;  %v2623_v61 = vrot.slane %v2622_v51, 4  ;;  %v5408_v25 = vld [vmem:[%s4907_s20 + $0x3c] sm:$0xf]  ;;  %v2641_v51 = vrot.slane %v2639_v36, 5 }
 0x17c   : > { %v1802_v26 = vpop.f32.mrf.mxu2  ;;  %v1916_v29 = vpop.f32.mrf.mxu3  ;;  %v2630_v10 = vshrl.u32 %v5408_v25, 16  ;;  %v2633_v9 = vshll.u32 %v5408_v25, 16 }
 0x17d   : > { %2273 = vst.msk [vmem:[#allocation2] sm:$0xff] %vm546_vm8, %v2257_v40  ;;  %v1836_v16 = vadd.f32 %v1802_v26, %v1712_v3  ;;  %v2628_v2 = vsel %vm4583_vm6, %v2623_v61, %v2627_v1  ;;  %v2643_v40 = vshrl.u32 %v5411_v4, 16 }
 0x17e   : > { %v1867_v22 = vld [vmem:[#allocation2 + $0x18] sm:$0xff]  ;;  %v2635_v32 = vrot.slane %v2633_v9, 5 }
 0x17f   : > { %v1949_v17 = vadd.f32 %v1913_v11, %v1867_v22  ;;  %1852 = vst.msk [vmem:[#allocation2 + $0x20] sm:$0xff] %vm546_vm8, %v1836_v16  ;;  %v5387_v47 = vpop.f32.mrf.mxu0  ;;  %v5389_v48 = vpop.f32.mrf.mxu1  ;;  %v2776_v11 = vunpack.c.l.b16 %v2628_v2  ;;  %v2645_v19 = vrot.slane %v2643_v40, 4  ;;  %v5430_v16 = vld [vmem:[%s4907_s20 + $0x44] sm:$0x1] }
 0x180   : > { %v1980_v6 = vld [vmem:[#allocation2 + $0x10] sm:$0xff] }
 0x181   : > { %1965 = vst.msk [vmem:[#allocation2 + $0x18] sm:$0xff] %vm546_vm8, %v1949_v17  ;;  %v2062_v44 = vadd.f32 %v5307_v33, %v1980_v6  ;;  %v5400_v55 = vpack.c.b16 %v2776_v11, %v2775_v31  ;;  %v2646_v1 = vor.u32 %v2645_v19, %v2641_v51  ;;  %v2649_v17 = vshll.u32 %v5430_v16, 16  ;;  %v5459_v19 = vld [vmem:[%s4907_s20 + $0x4c] sm:$0xf] }
 0x182   : > { %v2123_v43 = vld [vmem:[#allocation2 + $0x8] sm:$0xff] }
 0x183   : > { %2078 = vst.msk [vmem:[#allocation2 + $0x10] sm:$0xff] %vm546_vm8, %v2062_v44  ;;  %v2258_v23 = vadd.f32 %v5289_v34, %v2123_v43  ;;  %v2647_v44 = vrot.slane %v2646_v1, 4  ;;  %v2651_v43 = vrot.slane %v2649_v17, 5 }
 0x184   : > { %v1804_v5 = vpop.f32.mrf.mxu2  ;;  %v1918_v15 = vpop.f32.mrf.mxu3 }
 0x185   : > { %2274 = vst.msk [vmem:[#allocation2 + $0x8] sm:$0xff] %vm546_vm8, %v2258_v23  ;;  %v1837_v38 = vadd.f32 %v1804_v5, %v1713_v28  ;;  %v2652_v5 = vsel %vm4583_vm6, %v2647_v44, %v2651_v43  ;;  %v5478_v44 = vld [vmem:[%s4907_s20 + $0x50] sm:$0x1] }
 0x186   : > { %v1868_v24 = vld [vmem:[#allocation2 + $0x20] sm:$0xff] }
 0x187   : > { %v1950_v53 = vadd.f32 %v1916_v29, %v1868_v24  ;;  %1853 = vst.msk [vmem:[#allocation2 + $0x28] sm:$0xff] %vm546_vm8, %v1837_v38  ;;  %v5403_v33 = vpop.f32.mrf.mxu0  ;;  %v5405_v8 = vpop.f32.mrf.mxu1  ;;  %v2632_v29 = vrot.slane %v2630_v10, 4  ;;  %v1715_v10 = vld [vmem:[#allocation2 + $0x38] sm:$0xff] }
 0x188   : > { %v1981_v34 = vld [vmem:[#allocation2 + $0x18] sm:$0xff] }
 0x189   : > { %1966 = vst.msk [vmem:[#allocation2 + $0x20] sm:$0xff] %vm546_vm8, %v1950_v53  ;;  %v2063_v3 = vadd.f32 %v5339_v37, %v1981_v34  ;;  %4105 = vmatmul.msk.bf16.gmra.mxu2 %vm2179_vm9, %v5062_v7  ;;  %4118 = vmatmul.msk.bf16.gmra.mxu3 %vm2179_vm9, %v5102_v41  ;;  %v1714_v7 = vld [vmem:[#allocation2 + $0x30] sm:$0xff]  ;;  %v2636_v61 = vor.u32 %v2635_v32, %v2632_v29  ;;  %v2778_v53 = vunpack.c.l.b16 %v2652_v5  ;;  %v2673_v5 = vshll.u32 %v5478_v44, 16 }
 0x18a   : > { %v2124_v26 = vld [vmem:[#allocation2 + $0x10] sm:$0xff]  ;;  %4127 = vmatmul.msk.bf16.gmra.mxu0 %vm2179_vm9, %v5352_v0  ;;  %4136 = vmatmul.msk.bf16.gmra.mxu1 %vm2179_vm9, %v5400_v55 }
 0x18b   : > { %2079 = vst.msk [vmem:[#allocation2 + $0x18] sm:$0xff] %vm546_vm8, %v2063_v3  ;;  %v2259_v37 = vadd.f32 %v5309_v52, %v2124_v26  ;;  %v2637_v2 = vrot.slane %v2636_v61, 4 }
 0x18c   : > { %v1807_v22 = vpop.f32.mrf.mxu2  ;;  %v1921_v60 = vpop.f32.mrf.mxu3 }
 0x18d   : > { %2275 = vst.msk [vmem:[#allocation2 + $0x10] sm:$0xff] %vm546_vm8, %v2259_v37  ;;  %v1838_v6 = vadd.f32 %v1807_v22, %v1714_v7  ;;  %v2642_v28 = vsel %vm4583_vm6, %v2637_v2, %v2641_v51  ;;  %v5456_v51 = vld [vmem:[%s4907_s20 + $0x48] sm:$0xf]  ;;  %v2663_v22 = vshll.u32 %v5459_v19, 16 }
 0x18e   : > { %v1869_v59 = vld [vmem:[#allocation2 + $0x28] sm:$0xff]  ;;  %v2654_v37 = vshrl.u32 %v5456_v51, 16  ;;  %v2657_v7 = vshll.u32 %v5456_v51, 16 }
 0x18f   : > { %v1951_v31 = vadd.f32 %v1918_v15, %v1869_v59  ;;  %1854 = vst.msk [vmem:[#allocation2 + $0x30] sm:$0xff] %vm546_vm8, %v1838_v6  ;;  %v5435_v52 = vpop.f32.mrf.mxu0  ;;  %v5437_v11 = vpop.f32.mrf.mxu1  ;;  %v2777_v15 = vunpack.c.l.b16 %v2642_v28  ;;  %v2665_v59 = vrot.slane %v2663_v22, 5 }
 0x190   : > { %v1982_v23 = vld [vmem:[#allocation2 + $0x20] sm:$0xff]  ;;  %v2656_v17 = vrot.slane %v2654_v37, 4  ;;  %v2659_v6 = vrot.slane %v2657_v7, 5 }
 0x191   : > { %1967 = vst.msk [vmem:[#allocation2 + $0x28] sm:$0xff] %vm546_vm8, %v1951_v31  ;;  %v2064_v38 = vadd.f32 %v5355_v58, %v1982_v23  ;;  %v5448_v26 = vpack.c.b16 %v2778_v53, %v2777_v15 }
 0x192   : > { %v2125_v24 = vld [vmem:[#allocation2 + $0x18] sm:$0xff]  ;;  %v2660_v23 = vor.u32 %v2659_v6, %v2656_v17 }
 0x193   : > { %2080 = vst.msk [vmem:[#allocation2 + $0x20] sm:$0xff] %vm546_vm8, %v2064_v38  ;;  %v2260_v34 = vadd.f32 %v5341_v46, %v2125_v24 }
 0x194   : > { %v1809_v9 = vpop.f32.mrf.mxu2  ;;  %v1923_v36 = vpop.f32.mrf.mxu3  ;;  %v2661_v15 = vrot.slane %v2660_v23, 4 }
 0x195   : > { %2276 = vst.msk [vmem:[#allocation2 + $0x18] sm:$0xff] %vm546_vm8, %v2260_v34  ;;  %v1839_v40 = vadd.f32 %v1809_v9, %v1715_v10  ;;  %v2675_v34 = vrot.slane %v2673_v5, 5 }
 0x196   : > { %v1870_v3 = vld [vmem:[#allocation2 + $0x30] sm:$0xff] }
 0x197   : > { %v1952_v29 = vadd.f32 %v1921_v60, %v1870_v3  ;;  %1855 = vst.msk [vmem:[#allocation2 + $0x38] sm:$0xff] %vm546_vm8, %v1839_v40  ;;  %v5451_v58 = vpop.f32.mrf.mxu0  ;;  %v5453_v32 = vpop.f32.mrf.mxu1  ;;  %v2667_v60 = vshrl.u32 %v5459_v19, 16  ;;  %v2666_v3 = vsel %vm4583_vm6, %v2661_v15, %v2665_v59 }
 0x198   : > { %v1983_v46 = vld [vmem:[#allocation2 + $0x28] sm:$0xff] }
 0x199   : > { %1968 = vst.msk [vmem:[#allocation2 + $0x30] sm:$0xff] %vm546_vm8, %v1952_v29  ;;  %v2065_v61 = vadd.f32 %v5387_v47, %v1983_v46  ;;  %4106 = vmatmul.msk.bf16.gmra.mxu2 %vm2179_vm9, %v5102_v41  ;;  %4119 = vmatmul.msk.bf16.gmra.mxu3 %vm2179_vm9, %v5142_v12  ;;  %v2669_v2 = vrot.slane %v2667_v60, 4  ;;  %v1716_v41 = vld [vmem:[#allocation2 + $0x40] sm:$0xff]  ;;  %v1717_v60 = vld [vmem:[#allocation2 + $0x48] sm:$0xff] }
 0x19a   : > { %v2126_v1 = vld [vmem:[#allocation2 + $0x20] sm:$0xff]  ;;  %4128 = vmatmul.msk.bf16.gmra.mxu0 %vm2179_vm9, %v5400_v55  ;;  %4137 = vmatmul.msk.bf16.gmra.mxu1 %vm2179_vm9, %v5448_v26 }
 0x19b   : > { %2081 = vst.msk [vmem:[#allocation2 + $0x28] sm:$0xff] %vm546_vm8, %v2065_v61  ;;  %v2261_v47 = vadd.f32 %v5357_v20, %v2126_v1  ;;  %v2670_v28 = vor.u32 %v2669_v2, %v2665_v59 }
 0x19c   : > { %v1812_v43 = vpop.f32.mrf.mxu2  ;;  %v1926_v31 = vpop.f32.mrf.mxu3 }
 0x19d   : > { %2277 = vst.msk [vmem:[#allocation2 + $0x20] sm:$0xff] %vm546_vm8, %v2261_v47  ;;  %v1840_v38 = vadd.f32 %v1812_v43, %v1716_v41  ;;  %v2671_v53 = vrot.slane %v2670_v28, 4  ;;  %v5504_v41 = vld [vmem:[%s4907_s20 + $0x54] sm:$0xf]  ;;  %v5507_v43 = vld [vmem:[%s4907_s20 + $0x58] sm:$0xf] }
 0x19e   : > { %v1871_v24 = vld [vmem:[#allocation2 + $0x38] sm:$0xff]  ;;  %v2678_v23 = vshrl.u32 %v5504_v41, 16  ;;  %v2681_v28 = vshll.u32 %v5504_v41, 16  ;;  %v2687_v5 = vshll.u32 %v5507_v43, 16 }
 0x19f   : > { %v1953_v10 = vadd.f32 %v1923_v36, %v1871_v24  ;;  %1856 = vst.msk [vmem:[#allocation2 + $0x40] sm:$0xff] %vm546_vm8, %v1840_v38  ;;  %v5483_v20 = vpop.f32.mrf.mxu0  ;;  %v5485_v9 = vpop.f32.mrf.mxu1  ;;  %v2676_v29 = vsel %vm4583_vm6, %v2671_v53, %v2675_v34  ;;  %v2779_v36 = vunpack.c.l.b16 %v2666_v3 }
 0x1a0   : > { %v1984_v40 = vld [vmem:[#allocation2 + $0x30] sm:$0xff]  ;;  %v2780_v7 = vunpack.c.l.b16 %v2676_v29  ;;  %v2680_v15 = vrot.slane %v2678_v23, 4  ;;  %v2683_v53 = vrot.slane %v2681_v28, 5  ;;  %v2689_v34 = vrot.slane %v2687_v5, 5 }
 0x1a1   : > { %1969 = vst.msk [vmem:[#allocation2 + $0x38] sm:$0xff] %vm546_vm8, %v1953_v10  ;;  %v2066_v46 = vadd.f32 %v5403_v33, %v1984_v40  ;;  %v5526_v40 = vld [vmem:[%s4907_s20 + $0x5c] sm:$0x1] }
 0x1a2   : > { %v2127_v37 = vld [vmem:[#allocation2 + $0x28] sm:$0xff]  ;;  %v5496_v59 = vpack.c.b16 %v2780_v7, %v2779_v36  ;;  %v2697_v36 = vshll.u32 %v5526_v40, 16 }
 0x1a3   : > { %2082 = vst.msk [vmem:[#allocation2 + $0x30] sm:$0xff] %vm546_vm8, %v2066_v46  ;;  %v2262_v22 = vadd.f32 %v5389_v48, %v2127_v37  ;;  %v2684_v46 = vor.u32 %v2683_v53, %v2680_v15  ;;  %v1719_v15 = vld [vmem:[#allocation2 + $0x58] sm:$0xff] }
 0x1a4   : > { %v1814_v61 = vpop.f32.mrf.mxu2  ;;  %v1928_v1 = vpop.f32.mrf.mxu3 }
 0x1a5   : > { %2278 = vst.msk [vmem:[#allocation2 + $0x28] sm:$0xff] %vm546_vm8, %v2262_v22  ;;  %v1841_v17 = vadd.f32 %v1814_v61, %v1717_v60  ;;  %v2685_v60 = vrot.slane %v2684_v46, 4 }
 0x1a6   : > { %v1872_v6 = vld [vmem:[#allocation2 + $0x40] sm:$0xff] }
 0x1a7   : > { %v1954_v2 = vadd.f32 %v1926_v31, %v1872_v6  ;;  %1857 = vst.msk [vmem:[#allocation2 + $0x48] sm:$0xff] %vm546_vm8, %v1841_v17  ;;  %v5499_v33 = vpop.f32.mrf.mxu0  ;;  %v5501_v47 = vpop.f32.mrf.mxu1  ;;  %v2691_v31 = vshrl.u32 %v5507_v43, 16  ;;  %v2699_v17 = vrot.slane %v2697_v36, 5  ;;  %v2690_v23 = vsel %vm4583_vm6, %v2685_v60, %v2689_v34  ;;  %v5562_v36 = vld [vmem:[%s5546_s23] sm:$0xf] }
 0x1a8   : > { %v1985_v48 = vld [vmem:[#allocation2 + $0x38] sm:$0xff]  ;;  %v2705_v60 = vshll.u32 %v5562_v36, 16 }
 0x1a9   : > { %1970 = vst.msk [vmem:[#allocation2 + $0x40] sm:$0xff] %vm546_vm8, %v1954_v2  ;;  %v2067_v38 = vadd.f32 %v5435_v52, %v1985_v48  ;;  %4107 = vmatmul.msk.bf16.gmra.mxu2 %vm2179_vm9, %v5142_v12  ;;  %4120 = vmatmul.msk.bf16.gmra.mxu3 %vm2179_vm9, %v5191_v63  ;;  %v2693_v10 = vrot.slane %v2691_v31, 4  ;;  %v1718_v12 = vld [vmem:[#allocation2 + $0x50] sm:$0xff]  ;;  %v2781_v31 = vunpack.c.l.b16 %v2690_v23 }
 0x1aa   : > { %v2128_v24 = vld [vmem:[#allocation2 + $0x30] sm:$0xff]  ;;  %4129 = vmatmul.msk.bf16.gmra.mxu0 %vm2179_vm9, %v5448_v26  ;;  %4138 = vmatmul.msk.bf16.gmra.mxu1 %vm2179_vm9, %v5496_v59  ;;  %v2707_v23 = vrot.slane %v2705_v60, 5 }
 0x1ab   : > { %2083 = vst.msk [vmem:[#allocation2 + $0x38] sm:$0xff] %vm546_vm8, %v2067_v38  ;;  %v2263_v52 = vadd.f32 %v5405_v8, %v2128_v24  ;;  %v2694_v37 = vor.u32 %v2693_v10, %v2689_v34  ;;  %v5552_v10 = vld [vmem:[%s5546_s23] sm:$0xff] }
 0x1ac   : > { %v1817_v3 = vpop.f32.mrf.mxu2  ;;  %v1931_v29 = vpop.f32.mrf.mxu3 }
 0x1ad   : > { %2279 = vst.msk [vmem:[#allocation2 + $0x30] sm:$0xff] %vm546_vm8, %v2263_v52  ;;  %v1842_v7 = vadd.f32 %v1817_v3, %v1718_v12  ;;  %v2695_v61 = vrot.slane %v2694_v37, 4 }
 0x1ae   : > { %v1873_v22 = vld [vmem:[#allocation2 + $0x48] sm:$0xff] }
 0x1af   : > { %v1955_v6 = vadd.f32 %v1928_v1, %v1873_v22  ;;  %1858 = vst.msk [vmem:[#allocation2 + $0x50] sm:$0xff] %vm546_vm8, %v1842_v7  ;;  %v5531_v8 = vpop.f32.mrf.mxu0  ;;  %v5533_v2 = vpop.f32.mrf.mxu1  ;;  %v2700_v28 = vsel %vm4583_vm6, %v2695_v61, %v2699_v17  ;;  %v2702_v22 = vshrl.u32 %v5562_v36, 16 }
 0x1b0   : > { %v1986_v48 = vld [vmem:[#allocation2 + $0x40] sm:$0xff]  ;;  %v2782_v38 = vunpack.c.l.b16 %v2700_v28 }
 0x1b1   : > { %1971 = vst.msk [vmem:[#allocation2 + $0x48] sm:$0xff] %vm546_vm8, %v1955_v6  ;;  %v2068_v5 = vadd.f32 %v5451_v58, %v1986_v48  ;;  %v2704_v48 = vrot.slane %v2702_v22, 4 }
 0x1b2   : > { %v2129_v1 = vld [vmem:[#allocation2 + $0x38] sm:$0xff]  ;;  %v5554_v12 = vpack.c.b16 %v2782_v38, %v2781_v31 }
 0x1b3   : > { %2084 = vst.msk [vmem:[#allocation2 + $0x40] sm:$0xff] %vm546_vm8, %v2068_v5  ;;  %v2264_v24 = vadd.f32 %v5437_v11, %v2129_v1  ;;  %v5565_v11 = vld [vmem:[%s5546_s23 + $0x4] sm:$0xf]  ;;  %v5584_v1 = vld [vmem:[%s5546_s23 + $0x8] sm:$0x1] }
 0x1b4   : > { %v1819_v53 = vpop.f32.mrf.mxu2  ;;  %v1933_v34 = vpop.f32.mrf.mxu3  ;;  %v2711_v61 = vshll.u32 %v5565_v11, 16 }
 0x1b5   : > { %2280 = vst.msk [vmem:[#allocation2 + $0x38] sm:$0xff] %vm546_vm8, %v2264_v24  ;;  %v1843_v58 = vadd.f32 %v1819_v53, %v1719_v15  ;;  %v2708_v24 = vor.u32 %v2707_v23, %v2704_v48  ;;  %v2721_v53 = vshll.u32 %v5584_v1, 16 }
 0x1b6   : > { %v1874_v52 = vld [vmem:[#allocation2 + $0x50] sm:$0xff]  ;;  %v2713_v28 = vrot.slane %v2711_v61, 5 }
 0x1b7   : > { %v1956_v3 = vadd.f32 %v1931_v29, %v1874_v52  ;;  %1859 = vst.msk [vmem:[#allocation2 + $0x58] sm:$0xff] %vm546_vm8, %v1843_v58  ;;  %v5557_v46 = vpop.f32.mrf.mxu0  ;;  %v5559_v37 = vpop.f32.mrf.mxu1  ;;  %v2715_v29 = vshrl.u32 %v5565_v11, 16  ;;  %v2723_v22 = vrot.slane %v2721_v53, 5 }
 0x1b8   : > { %v1987_v7 = vld [vmem:[#allocation2 + $0x48] sm:$0xff] }
 0x1b9   : > { %1972 = vst.msk [vmem:[#allocation2 + $0x50] sm:$0xff] %vm546_vm8, %v1956_v3  ;;  %v2069_v17 = vadd.f32 %v5483_v20, %v1987_v7  ;;  %4108 = vmatmul.msk.bf16.gmra.mxu2 %vm2179_vm9, %v5191_v63  ;;  %4121 = vmatmul.msk.bf16.gmra.mxu3 %vm2179_vm9, %v5552_v10  ;;  %v2717_v5 = vrot.slane %v2715_v29, 4  ;;  %v1720_v63 = vld [vmem:[#allocation2 + $0x60] sm:$0xff]  ;;  %v2709_v3 = vrot.slane %v2708_v24, 4 }
 0x1ba   : > { %v2130_v6 = vld [vmem:[#allocation2 + $0x40] sm:$0xff]  ;;  %4130 = vmatmul.msk.bf16.gmra.mxu0 %vm2179_vm9, %v5496_v59  ;;  %4139 = vmatmul.msk.bf16.gmra.mxu1 %vm2179_vm9, %v5554_v12 }
 0x1bb   : > { %2085 = vst.msk [vmem:[#allocation2 + $0x48] sm:$0xff] %vm546_vm8, %v2069_v17  ;;  %v2265_v20 = vadd.f32 %v5453_v32, %v2130_v6  ;;  %v2718_v15 = vor.u32 %v2717_v5, %v2713_v28  ;;  %v2714_v17 = vsel %vm4583_vm6, %v2709_v3, %v2713_v28 }
 0x1bc   : > { %v1822_v31 = vpop.f32.mrf.mxu2  ;;  %v1936_v38 = vpop.f32.mrf.mxu3  ;;  %v2917_v23 = vunpack.c.l.b16 %v2714_v17 }
 0x1bd   : > { %2281 = vst.msk [vmem:[#allocation2 + $0x40] sm:$0xff] %vm546_vm8, %v2265_v20  ;;  %v1844_v58 = vadd.f32 %v1822_v31, %v1720_v63  ;;  %v2719_v7 = vrot.slane %v2718_v15, 4  ;;  %v1721_v63 = vld [vmem:[#allocation2 + $0x68] sm:$0xff] }
 0x1be   : > { %v1875_v52 = vld [vmem:[#allocation2 + $0x58] sm:$0xff]  ;;  %v4231_v15 = vld [vmem:[%s5546_s23 + $0xc] sm:$0xff] }
 0x1bf   : > { %v1957_v60 = vadd.f32 %v1933_v34, %v1875_v52  ;;  %1860 = vst.msk [vmem:[#allocation2 + $0x60] sm:$0xff] %vm546_vm8, %v1844_v58  ;;  %v5589_v32 = vpop.f32.mrf.mxu0  ;;  %v5591_v61 = vpop.f32.mrf.mxu1  ;;  %v2724_v6 = vsel %vm4583_vm6, %v2719_v7, %v2723_v22  ;;  %v4284_v58 = vld [vmem:[%s4907_s20 + $0x4] sm:$0xf] }
 0x1c0   : > { %v1988_v29 = vld [vmem:[#allocation2 + $0x50] sm:$0xff]  ;;  %v2918_v5 = vunpack.c.l.b16 %v2724_v6  ;;  %v3127_v52 = vrot.slane %v4284_v58, 5 }
 0x1c1   : > { %1973 = vst.msk [vmem:[#allocation2 + $0x58] sm:$0xff] %vm546_vm8, %v1957_v60  ;;  %v2070_v48 = vadd.f32 %v5499_v33, %v1988_v29  ;;  %v3141_v60 = vrot.slane %v5260_v30, 5 }
 0x1c2   : > { %v2131_v34 = vld [vmem:[#allocation2 + $0x48] sm:$0xff]  ;;  %v5604_v3 = vpack.c.b16 %v2918_v5, %v2917_v23  ;;  %v3137_v23 = vrot.slane %v5222_v62, 5  ;;  %v4152_v5 = vrot.slane %v5257_v35, 9 }
 0x1c3   : > { %2086 = vst.msk [vmem:[#allocation2 + $0x50] sm:$0xff] %vm546_vm8, %v2070_v48  ;;  %v2266_v20 = vadd.f32 %v5485_v9, %v2131_v34  ;;  %v3134_v9 = vrot.slane %v5204_v42, 5  ;;  %v3129_v34 = vrot.slane %v3127_v52, 4  ;;  %v3130_v42 = vrot.slane %v5187_v14, 5 }
 0x1c4   : > { %v1824_v31 = vpop.f32.mrf.mxu2  ;;  %v1938_v24 = vpop.f32.mrf.mxu3 }
 0x1c5   : > { %2282 = vst.msk [vmem:[#allocation2 + $0x48] sm:$0xff] %vm546_vm8, %v2266_v20  ;;  %v1845_v28 = vadd.f32 %v1824_v31, %v1721_v63  ;;  %v3143_v20 = vrot.slane %v3141_v60, 4  ;;  %v3144_v63 = vrot.slane %v5278_v27, 5  ;;  %v1722_v31 = vld [vmem:[#allocation2 + $0x70] sm:$0xff] }
 0x1c6   : > { %v1876_v53 = vld [vmem:[#allocation2 + $0x60] sm:$0xff] }
 0x1c7   : > { %v1958_v33 = vadd.f32 %v1936_v38, %v1876_v53  ;;  %1861 = vst.msk [vmem:[#allocation2 + $0x68] sm:$0xff] %vm546_vm8, %v1845_v28  ;;  %v5607_v7 = vpop.f32.mrf.mxu0  ;;  %v5609_v22 = vpop.f32.mrf.mxu1  ;;  %v4285_v38 = vld [vmem:[%s4907_s20] sm:$0xf]  ;;  %s3880_s20 = sshll.u32 %s6170_s16, 1 }
 0x1c8   : > { %v1989_v29 = vld [vmem:[#allocation2 + $0x58] sm:$0xff]  ;;  %v4150_v6 = vrot.slane %v4285_v38, 9  ;;  %s541_s25 = sadd.s32 %s3881_s24, %s3880_s20 }
 0x1c9   : > { %1974 = vst.msk [vmem:[#allocation2 + $0x60] sm:$0xff] %vm546_vm8, %v1958_v33  ;;  %v2071_v17 = vadd.f32 %v5531_v8, %v1989_v29  ;;  %4109 = vmatmul.msk.bf16.gmra.mxu2 %vm2179_vm9, %v5552_v10  ;;  %4122 = vmatmul.msk.bf16.gmra.mxu3 %vm2179_vm9, %v4231_v15  ;;  %v4151_v8 = vrot.slane %v5201_v54, 9  ;;  %v3136_v10 = vrot.slane %v3134_v9, 4  ;;  %v3131_v54 = vsel %vm4604_vm7, %v3129_v34, %v3130_v42  ;;  %s3882_s28 = sshll.u32 %s541_s25, 2 }
 0x1ca   : > { %v2132_v48 = vld [vmem:[#allocation2 + $0x50] sm:$0xff]  ;;  %4131 = vmatmul.msk.bf16.gmra.mxu0 %vm2179_vm9, %v5554_v12  ;;  %4140 = vmatmul.msk.bf16.gmra.mxu1 %vm2179_vm9, %v5604_v3  ;;  %v3128_v53 = vsel %vm4604_vm7, %v4150_v6, %v3127_v52  ;;  %v3142_v52 = vsel %vm4604_vm7, %v4152_v5, %v3141_v60  ;;  %v3214_v6 = vunpack.c.l.b16 %v3131_v54  ;;  %v1723_v60 = vld [vmem:[#allocation2 + $0x78] sm:$0xff]  ;;  %s6010_s14 = scalar_lea.vmem %s6150_s8, %s3882_s28 }
 0x1cb   : > { %2087 = vst.msk [vmem:[#allocation2 + $0x58] sm:$0xff] %vm546_vm8, %v2071_v17  ;;  %v2267_v30 = vadd.f32 %v5501_v47, %v2132_v48  ;;  %v3135_v27 = vsel %vm4604_vm7, %v4151_v8, %v3134_v9  ;;  %v3138_v33 = vsel %vm4604_vm7, %v3136_v10, %v3137_v23  ;;  %v3213_v17 = vunpack.c.l.b16 %v3128_v53 }
 0x1cc   : > { %v1827_v28 = vpop.f32.mrf.mxu2  ;;  %v1941_v14 = vpop.f32.mrf.mxu3  ;;  %v3217_v48 = vunpack.c.l.b16 %v3142_v52  ;;  %v3215_v9 = vunpack.c.l.b16 %v3135_v27 }
 0x1cd   : > { %2283 = vst.msk [vmem:[#allocation2 + $0x50] sm:$0xff] %vm546_vm8, %v2267_v30  ;;  %v1846_v15 = vadd.f32 %v1827_v28, %v1722_v31  ;;  %v3216_v30 = vunpack.c.l.b16 %v3138_v33 }
 0x1ce   : > { %v1877_v47 = vld [vmem:[#allocation2 + $0x68] sm:$0xff] }
 0x1cf   : > { %v1959_v58 = vadd.f32 %v1938_v24, %v1877_v47  ;;  %1862 = vst.msk [vmem:[#allocation2 + $0x70] sm:$0xff] %vm546_vm8, %v1846_v15  ;;  %v5636_v62 = vpop.f32.mrf.mxu0  ;;  %v5638_v35 = vpop.f32.mrf.mxu1  ;;  %v3145_v24 = vsel %vm4604_vm7, %v3143_v20, %v3144_v63  ;;  %v3229_v63 = vpack.c.b16 %v3214_v6, %v3213_v17  ;;  %v3230_v31 = vpack.c.b16 %v3216_v30, %v3215_v9 }
 0x1d0   : > { %v1990_v29 = vld [vmem:[#allocation2 + $0x60] sm:$0xff]  ;;  %v3218_v34 = vunpack.c.l.b16 %v3145_v24  ;;  %v4153_v17 = vrot.slane %v5312_v50, 9  ;;  %v3151_v24 = vrot.slane %v5334_v45, 5 }
 0x1d1   : > { %1975 = vst.msk [vmem:[#allocation2 + $0x68] sm:$0xff] %vm546_vm8, %v1959_v58  ;;  %v2072_v38 = vadd.f32 %v5557_v46, %v1990_v29  ;;  %v2289_v58 = vld [vmem:[#allocation2] sm:$0xff] }
 0x1d2   : > { %v2133_v42 = vld [vmem:[#allocation2 + $0x58] sm:$0xff]  ;;  %v5652_v10 = vpack.c.b16 %v3218_v34, %v3217_v48 }
 0x1d3   : > { %2088 = vst.msk [vmem:[#allocation2 + $0x60] sm:$0xff] %vm546_vm8, %v2072_v38  ;;  %v2268_v8 = vadd.f32 %v5533_v2, %v2133_v42 }
 0x1d4   : > { %v1829_v23 = vpop.f32.mrf.mxu2  ;;  %v1943_v5 = vpop.f32.mrf.mxu3 }
 0x1d5   : > { %2284 = vst.msk [vmem:[#allocation2 + $0x58] sm:$0xff] %vm546_vm8, %v2268_v8  ;;  %v1847_v20 = vadd.f32 %v1829_v23, %v1723_v60  ;;  %v2290_v8 = vld [vmem:[#allocation2 + $0x8] sm:$0xff] }
 0x1d6   : > { %v1878_v46 = vld [vmem:[#allocation2 + $0x70] sm:$0xff] }
 0x1d7   : > { %v1960_v28 = vadd.f32 %v1941_v14, %v1878_v46  ;;  %1863 = vst.msk [vmem:[#allocation2 + $0x78] sm:$0xff] %vm546_vm8, %v1847_v20  ;;  %v5656_v15 = vpop.f32.mrf.mxu0  ;;  %v5658_v53 = vpop.f32.mrf.mxu1 }
 0x1d8   : > { %v1991_v47 = vld [vmem:[#allocation2 + $0x68] sm:$0xff] }
 0x1d9   : > { %1976 = vst.msk [vmem:[#allocation2 + $0x70] sm:$0xff] %vm546_vm8, %v1960_v28  ;;  %v2073_v2 = vadd.f32 %v5589_v32, %v1991_v47  ;;  %4142 = vmatmul.msk.bf16.vlgmr.msra.gmra.mxu2 %vm2179_vm9, %v5304_v49  ;;  %4161 = vmatmul.msk.bf16.vlgmr.msra.gmra.mxu3 %vm2179_vm9, %v3229_v63  ;;  %v3148_v32 = vrot.slane %v5315_v56, 5 }
 0x1da   : > { %v2134_v54 = vld [vmem:[#allocation2 + $0x60] sm:$0xff]  ;;  %4170 = vmatmul.msk.bf16.vlgmr.msra.gmra.mxu0 %vm2179_vm9, %v3230_v31  ;;  %4179 = vmatmul.msk.bf16.vlgmr.msra.gmra.mxu1 %vm2179_vm9, %v5652_v10 }
 0x1db   : > { %2089 = vst.msk [vmem:[#allocation2 + $0x68] sm:$0xff] %vm546_vm8, %v2073_v2  ;;  %v2269_v14 = vadd.f32 %v5559_v37, %v2134_v54  ;;  %v3150_v52 = vrot.slane %v3148_v32, 4  ;;  %v3149_v56 = vsel %vm4604_vm7, %v4153_v17, %v3148_v32 }
 0x1dc   : > { %v2327_v27 = vpop.f32.mrf.mxu2  ;;  %v2437_v33 = vpop.f32.mrf.mxu3  ;;  %v3219_v45 = vunpack.c.l.b16 %v3149_v56 }
 0x1dd   : > { %2285 = vst.msk [vmem:[#allocation2 + $0x60] sm:$0xff] %vm546_vm8, %v2269_v14  ;;  %v2367_v49 = vadd.f32 %v2327_v27, %v2289_v58  ;;  %v3152_v34 = vsel %vm4604_vm7, %v3150_v52, %v3151_v24  ;;  %v2291_v14 = vld [vmem:[#allocation2 + $0x10] sm:$0xff] }
 0x1de   : > { %v1879_v29 = vld [vmem:[#allocation2 + $0x78] sm:$0xff]  ;;  %v3220_v9 = vunpack.c.l.b16 %v3152_v34 }
 0x1df   : > { %v1961_v38 = vadd.f32 %v1943_v5, %v1879_v29  ;;  %2383 = vst.msk [vmem:[#allocation2] sm:$0xff] %vm546_vm8, %v2367_v49  ;;  %v5675_v6 = vpop.f32.mrf.mxu0  ;;  %v5677_v37 = vpop.f32.mrf.mxu1  ;;  %v3158_v49 = vrot.slane %v5382_v13, 5  ;;  %v2292_v34 = vld [vmem:[#allocation2 + $0x18] sm:$0xff] }
 0x1e0   : > { %v1992_v48 = vld [vmem:[#allocation2 + $0x70] sm:$0xff]  ;;  %v5688_v63 = vpack.c.b16 %v3220_v9, %v3219_v45 }
 0x1e1   : > { %1977 = vst.msk [vmem:[#allocation2 + $0x78] sm:$0xff] %vm546_vm8, %v1961_v38  ;;  %v2074_v50 = vadd.f32 %v5607_v7, %v1992_v48 }
 0x1e2   : > { %v2135_v42 = vld [vmem:[#allocation2 + $0x68] sm:$0xff] }
 0x1e3   : > { %2090 = vst.msk [vmem:[#allocation2 + $0x70] sm:$0xff] %vm546_vm8, %v2074_v50  ;;  %v2270_v30 = vadd.f32 %v5591_v61, %v2135_v42 }
 0x1e4   : > { %v2329_v60 = vpop.f32.mrf.mxu2  ;;  %v2439_v23 = vpop.f32.mrf.mxu3 }
 0x1e5   : > { %2286 = vst.msk [vmem:[#allocation2 + $0x68] sm:$0xff] %vm546_vm8, %v2270_v30  ;;  %v2368_v5 = vadd.f32 %v2329_v60, %v2290_v8 }
 0x1e6   : > { %v2399_v20 = vld [vmem:[#allocation2] sm:$0xff] }
 0x1e7   : > { %v2477_v46 = vadd.f32 %v2437_v33, %v2399_v20  ;;  %2384 = vst.msk [vmem:[#allocation2 + $0x8] sm:$0xff] %vm546_vm8, %v2368_v5  ;;  %v5691_v7 = vpop.f32.mrf.mxu0  ;;  %v5693_v28 = vpop.f32.mrf.mxu1  ;;  %v4154_v33 = vrot.slane %v5360_v21, 9 }
 0x1e8   : > { %v1993_v47 = vld [vmem:[#allocation2 + $0x78] sm:$0xff] }
 0x1e9   : > { %2493 = vst.msk [vmem:[#allocation2] sm:$0xff] %vm546_vm8, %v2477_v46  ;;  %v2075_v61 = vadd.f32 %v5636_v62, %v1993_v47  ;;  %4143 = vmatmul.msk.bf16.gmra.mxu2 %vm2179_vm9, %v5352_v0  ;;  %4162 = vmatmul.msk.bf16.gmra.mxu3 %vm2179_vm9, %v3230_v31  ;;  %v3155_v62 = vrot.slane %v5363_v57, 5  ;;  %v2293_v46 = vld [vmem:[#allocation2 + $0x20] sm:$0xff] }
 0x1ea   : > { %v2136_v2 = vld [vmem:[#allocation2 + $0x70] sm:$0xff]  ;;  %4171 = vmatmul.msk.bf16.gmra.mxu0 %vm2179_vm9, %v5652_v10  ;;  %4180 = vmatmul.msk.bf16.gmra.mxu1 %vm2179_vm9, %v5688_v63 }
 0x1eb   : > { %2091 = vst.msk [vmem:[#allocation2 + $0x78] sm:$0xff] %vm546_vm8, %v2075_v61  ;;  %v2271_v54 = vadd.f32 %v5609_v22, %v2136_v2  ;;  %v3157_v32 = vrot.slane %v3155_v62, 4  ;;  %v3156_v57 = vsel %vm4604_vm7, %v4154_v33, %v3155_v62  ;;  %v3162_v61 = vrot.slane %v5411_v4, 5 }
 0x1ec   : > { %v2332_v58 = vpop.f32.mrf.mxu2  ;;  %v2442_v27 = vpop.f32.mrf.mxu3  ;;  %v3221_v13 = vunpack.c.l.b16 %v3156_v57  ;;  %v4155_v2 = vrot.slane %v5408_v25, 9 }
 0x1ed   : > { %2287 = vst.msk [vmem:[#allocation2 + $0x70] sm:$0xff] %vm546_vm8, %v2271_v54  ;;  %v2369_v0 = vadd.f32 %v2332_v58, %v2291_v14  ;;  %v3159_v24 = vsel %vm4604_vm7, %v3157_v32, %v3158_v49  ;;  %v3164_v54 = vrot.slane %v3162_v61, 4  ;;  %v3165_v14 = vrot.slane %v5430_v16, 5  ;;  %v2294_v49 = vld [vmem:[#allocation2 + $0x28] sm:$0xff] }
 0x1ee   : > { %v2400_v31 = vld [vmem:[#allocation2 + $0x8] sm:$0xff]  ;;  %v3222_v48 = vunpack.c.l.b16 %v3159_v24  ;;  %v3163_v4 = vsel %vm4604_vm7, %v4155_v2, %v3162_v61 }
 0x1ef   : > { %v2478_v29 = vadd.f32 %v2439_v23, %v2400_v31  ;;  %2385 = vst.msk [vmem:[#allocation2 + $0x10] sm:$0xff] %vm546_vm8, %v2369_v0  ;;  %v5711_v17 = vpop.f32.mrf.mxu0  ;;  %v5713_v22 = vpop.f32.mrf.mxu1  ;;  %v3166_v0 = vsel %vm4604_vm7, %v3164_v54, %v3165_v14  ;;  %v3223_v16 = vunpack.c.l.b16 %v3163_v4 }
 0x1f0   : > { %v2749_v52 = vld [vmem:[#allocation2] sm:$0xff]  ;;  %v5724_v30 = vpack.c.b16 %v3222_v48, %v3221_v13  ;;  %v3224_v33 = vunpack.c.l.b16 %v3166_v0 }
 0x1f1   : > { %2494 = vst.msk [vmem:[#allocation2 + $0x8] sm:$0xff] %vm546_vm8, %v2478_v29  ;;  %v2867_v21 = vadd.f32 %v5656_v15, %v2749_v52 }
 0x1f2   : > { %v2137_v38 = vld [vmem:[#allocation2 + $0x78] sm:$0xff] }
 0x1f3   : > { %2883 = vst.msk [vmem:[#allocation2] sm:$0xff] %vm546_vm8, %v2867_v21  ;;  %v2272_v56 = vadd.f32 %v5638_v35, %v2137_v38  ;;  %v5761_v21 = vpack.c.b16 %v3224_v33, %v3223_v16  ;;  %v2297_v16 = vld [vmem:[#allocation2 + $0x40] sm:$0xff] }
 0x1f4   : > { %v2334_v50 = vpop.f32.mrf.mxu2  ;;  %v2444_v42 = vpop.f32.mrf.mxu3 }
 0x1f5   : > { %2288 = vst.msk [vmem:[#allocation2 + $0x78] sm:$0xff] %vm546_vm8, %v2272_v56  ;;  %v2370_v45 = vadd.f32 %v2334_v50, %v2292_v34  ;;  %v2295_v50 = vld [vmem:[#allocation2 + $0x30] sm:$0xff] }
 0x1f6   : > { %v2401_v9 = vld [vmem:[#allocation2 + $0x10] sm:$0xff] }
 0x1f7   : > { %v2479_v8 = vadd.f32 %v2442_v27, %v2401_v9  ;;  %2386 = vst.msk [vmem:[#allocation2 + $0x18] sm:$0xff] %vm546_vm8, %v2370_v45  ;;  %v5727_v15 = vpop.f32.mrf.mxu0  ;;  %v5729_v60 = vpop.f32.mrf.mxu1  ;;  %v3169_v45 = vrot.slane %v5459_v19, 5  ;;  %v4156_v9 = vrot.slane %v5456_v51, 9 }
 0x1f8   : > { %v2750_v23 = vld [vmem:[#allocation2 + $0x8] sm:$0xff] }
 0x1f9   : > { %2495 = vst.msk [vmem:[#allocation2 + $0x10] sm:$0xff] %vm546_vm8, %v2479_v8  ;;  %v2868_v35 = vadd.f32 %v5675_v6, %v2750_v23  ;;  %4144 = vmatmul.msk.bf16.gmra.mxu2 %vm2179_vm9, %v5400_v55  ;;  %4163 = vmatmul.msk.bf16.gmra.mxu3 %vm2179_vm9, %v5652_v10  ;;  %v3171_v8 = vrot.slane %v3169_v45, 4  ;;  %v3172_v23 = vrot.slane %v5478_v44, 5  ;;  %v3170_v19 = vsel %vm4604_vm7, %v4156_v9, %v3169_v45 }
 0x1fa   : > { %v2899_v5 = vld [vmem:[#allocation2] sm:$0xff]  ;;  %4172 = vmatmul.msk.bf16.gmra.mxu0 %vm2179_vm9, %v5688_v63  ;;  %4181 = vmatmul.msk.bf16.gmra.mxu1 %vm2179_vm9, %v5724_v30  ;;  %v3225_v44 = vunpack.c.l.b16 %v3170_v19  ;;  %v5856_v19 = vld [vmem:[%s5546_s23 + $0x10] sm:$0xf] }
 0x1fb   : > { %2884 = vst.msk [vmem:[#allocation2 + $0x8] sm:$0xff] %vm546_vm8, %v2868_v35  ;;  %v2975_v20 = vadd.f32 %v5658_v53, %v2899_v5 }
 0x1fc   : > { %v2337_v47 = vpop.f32.mrf.mxu2  ;;  %v2447_v6 = vpop.f32.mrf.mxu3 }
 0x1fd   : > { %2991 = vst.msk [vmem:[#allocation2] sm:$0xff] %vm546_vm8, %v2975_v20  ;;  %v2371_v55 = vadd.f32 %v2337_v47, %v2293_v46  ;;  %v3173_v46 = vsel %vm4604_vm7, %v3171_v8, %v3172_v23 }
 0x1fe   : > { %v2402_v10 = vld [vmem:[#allocation2 + $0x18] sm:$0xff] }
 0x1ff   : > { %v2480_v58 = vadd.f32 %v2444_v42, %v2402_v10  ;;  %2387 = vst.msk [vmem:[#allocation2 + $0x20] sm:$0xff] %vm546_vm8, %v2371_v55  ;;  %v5748_v27 = vpop.f32.mrf.mxu0  ;;  %v5750_v53 = vpop.f32.mrf.mxu1  ;;  %v2296_v55 = vld [vmem:[#allocation2 + $0x38] sm:$0xff] }
 0x200   : > { %v2751_v62 = vld [vmem:[#allocation2 + $0x10] sm:$0xff] }
 0x201   : > { %2496 = vst.msk [vmem:[#allocation2 + $0x18] sm:$0xff] %vm546_vm8, %v2480_v58  ;;  %v2869_v25 = vadd.f32 %v5691_v7, %v2751_v62 }
 0x202   : > { %v2900_v31 = vld [vmem:[#allocation2 + $0x8] sm:$0xff] }
 0x203   : > { %2885 = vst.msk [vmem:[#allocation2 + $0x10] sm:$0xff] %vm546_vm8, %v2869_v25  ;;  %v2976_v32 = vadd.f32 %v5677_v37, %v2900_v31 }
 0x204   : > { %v2339_v29 = vpop.f32.mrf.mxu2  ;;  %v2449_v52 = vpop.f32.mrf.mxu3 }
 0x205   : > { %2992 = vst.msk [vmem:[#allocation2 + $0x8] sm:$0xff] %vm546_vm8, %v2976_v32  ;;  %v2372_v57 = vadd.f32 %v2339_v29, %v2294_v49  ;;  %v3176_v32 = vrot.slane %v5507_v43, 5  ;;  %v4157_v49 = vrot.slane %v5504_v41, 9 }
 0x206   : > { %v2403_v24 = vld [vmem:[#allocation2 + $0x20] sm:$0xff] }
 0x207   : > { %v2481_v38 = vadd.f32 %v2447_v6, %v2403_v24  ;;  %2388 = vst.msk [vmem:[#allocation2 + $0x28] sm:$0xff] %vm546_vm8, %v2372_v57  ;;  %v5764_v7 = vpop.f32.mrf.mxu0  ;;  %v5766_v13 = vpop.f32.mrf.mxu1  ;;  %v3226_v6 = vunpack.c.l.b16 %v3173_v46  ;;  %v3178_v29 = vrot.slane %v3176_v32, 4  ;;  %v3177_v43 = vsel %vm4604_vm7, %v4157_v49, %v3176_v32  ;;  %v2299_v46 = vld [vmem:[#allocation2 + $0x50] sm:$0xff] }
 0x208   : > { %v2752_v48 = vld [vmem:[#allocation2 + $0x18] sm:$0xff]  ;;  %v2121_v49 = vld [vmem:[%s5546_s23 + $0x14] sm:$0x1] }
 0x209   : > { %2497 = vst.msk [vmem:[#allocation2 + $0x20] sm:$0xff] %vm546_vm8, %v2481_v38  ;;  %v2870_v37 = vadd.f32 %v5711_v17, %v2752_v48  ;;  %4145 = vmatmul.msk.bf16.gmra.mxu2 %vm2179_vm9, %v5448_v26  ;;  %4164 = vmatmul.msk.bf16.gmra.mxu3 %vm2179_vm9, %v5688_v63  ;;  %v5798_v58 = vpack.c.b16 %v3226_v6, %v3225_v44 }
 0x20a   : > { %v2901_v56 = vld [vmem:[#allocation2 + $0x10] sm:$0xff]  ;;  %4173 = vmatmul.msk.bf16.gmra.mxu0 %vm2179_vm9, %v5724_v30  ;;  %4182 = vmatmul.msk.bf16.gmra.mxu1 %vm2179_vm9, %v5761_v21 }
 0x20b   : > { %2886 = vst.msk [vmem:[#allocation2 + $0x18] sm:$0xff] %vm546_vm8, %v2870_v37  ;;  %v2977_v34 = vadd.f32 %v5693_v28, %v2901_v56 }
 0x20c   : > { %v2342_v42 = vpop.f32.mrf.mxu2  ;;  %v2452_v17 = vpop.f32.mrf.mxu3 }
 0x20d   : > { %2993 = vst.msk [vmem:[#allocation2 + $0x10] sm:$0xff] %vm546_vm8, %v2977_v34  ;;  %v2373_v26 = vadd.f32 %v2342_v42, %v2295_v50  ;;  %v2298_v50 = vld [vmem:[#allocation2 + $0x48] sm:$0xff] }
 0x20e   : > { %v2404_v63 = vld [vmem:[#allocation2 + $0x28] sm:$0xff] }
 0x20f   : > { %v2482_v35 = vadd.f32 %v2449_v52, %v2404_v63  ;;  %2389 = vst.msk [vmem:[#allocation2 + $0x30] sm:$0xff] %vm546_vm8, %v2373_v26  ;;  %v5785_v5 = vpop.f32.mrf.mxu0  ;;  %v5787_v28 = vpop.f32.mrf.mxu1  ;;  %v3179_v52 = vrot.slane %v5526_v40, 5  ;;  %v3227_v40 = vunpack.c.l.b16 %v3177_v43 }
 0x210   : > { %v2753_v20 = vld [vmem:[#allocation2 + $0x20] sm:$0xff] }
 0x211   : > { %2498 = vst.msk [vmem:[#allocation2 + $0x28] sm:$0xff] %vm546_vm8, %v2482_v35  ;;  %v2871_v51 = vadd.f32 %v5727_v15, %v2753_v20  ;;  %v3180_v48 = vsel %vm4604_vm7, %v3178_v29, %v3179_v52  ;;  %v5853_v20 = vld [vmem:[%s5546_s23 + $0xc] sm:$0xf]  ;;  %v2300_v29 = vld [vmem:[#allocation2 + $0x58] sm:$0xff] }
 0x212   : > { %v2902_v47 = vld [vmem:[#allocation2 + $0x18] sm:$0xff]  ;;  %v3228_v56 = vunpack.c.l.b16 %v3180_v48  ;;  %v2726_v44 = vshrl.u32 %v5853_v20, 16  ;;  %v2729_v6 = vshll.u32 %v5853_v20, 16 }
 0x213   : > { %2887 = vst.msk [vmem:[#allocation2 + $0x20] sm:$0xff] %vm546_vm8, %v2871_v51  ;;  %v2978_v61 = vadd.f32 %v5713_v22, %v2902_v47 }
 0x214   : > { %v2344_v10 = vpop.f32.mrf.mxu2  ;;  %v2454_v2 = vpop.f32.mrf.mxu3  ;;  %v5835_v63 = vpack.c.b16 %v3228_v56, %v3227_v40 }
 0x215   : > { %2994 = vst.msk [vmem:[#allocation2 + $0x18] sm:$0xff] %vm546_vm8, %v2978_v61  ;;  %v2374_v54 = vadd.f32 %v2344_v10, %v2296_v55  ;;  %v2735_v61 = vshll.u32 %v5856_v19, 16  ;;  %v2739_v10 = vshrl.u32 %v5856_v19, 16 }
 0x216   : > { %v2405_v14 = vld [vmem:[#allocation2 + $0x30] sm:$0xff] }
 0x217   : > { %v2483_v62 = vadd.f32 %v2452_v17, %v2405_v14  ;;  %2390 = vst.msk [vmem:[#allocation2 + $0x38] sm:$0xff] %vm546_vm8, %v2374_v54  ;;  %v5801_v15 = vpop.f32.mrf.mxu0  ;;  %v5803_v4 = vpop.f32.mrf.mxu1  ;;  %v3186_v54 = vrot.slane %v5584_v1, 5  ;;  %v2728_v1 = vrot.slane %v2726_v44, 4 }
 0x218   : > { %v2754_v0 = vld [vmem:[#allocation2 + $0x28] sm:$0xff] }
 0x219   : > { %2499 = vst.msk [vmem:[#allocation2 + $0x30] sm:$0xff] %vm546_vm8, %v2483_v62  ;;  %v2872_v22 = vadd.f32 %v5748_v27, %v2754_v0  ;;  %4146 = vmatmul.msk.bf16.gmra.mxu2 %vm2179_vm9, %v5496_v59  ;;  %4165 = vmatmul.msk.bf16.gmra.mxu3 %vm2179_vm9, %v5724_v30 }
 0x21a   : > { %v2903_v25 = vld [vmem:[#allocation2 + $0x20] sm:$0xff]  ;;  %4174 = vmatmul.msk.bf16.gmra.mxu0 %vm2179_vm9, %v5761_v21  ;;  %4183 = vmatmul.msk.bf16.gmra.mxu1 %vm2179_vm9, %v5798_v58 }
 0x21b   : > { %2888 = vst.msk [vmem:[#allocation2 + $0x28] sm:$0xff] %vm546_vm8, %v2872_v22  ;;  %v2979_v31 = vadd.f32 %v5729_v60, %v2903_v25 }
 0x21c   : > { %v2347_v33 = vpop.f32.mrf.mxu2  ;;  %v2457_v27 = vpop.f32.mrf.mxu3 }
 0x21d   : > { %2995 = vst.msk [vmem:[#allocation2 + $0x20] sm:$0xff] %vm546_vm8, %v2979_v31  ;;  %v2375_v59 = vadd.f32 %v2347_v33, %v2297_v16  ;;  %v2731_v31 = vrot.slane %v2729_v6, 5  ;;  %v2737_v33 = vrot.slane %v2735_v61, 5 }
 0x21e   : > { %v2406_v30 = vld [vmem:[#allocation2 + $0x38] sm:$0xff] }
 0x21f   : > { %v2484_v57 = vadd.f32 %v2454_v2, %v2406_v30  ;;  %2391 = vst.msk [vmem:[#allocation2 + $0x40] sm:$0xff] %vm546_vm8, %v2375_v59  ;;  %v5822_v24 = vpop.f32.mrf.mxu0  ;;  %v5824_v60 = vpop.f32.mrf.mxu1  ;;  %v4158_v2 = vrot.slane %v5562_v36, 9  ;;  %v2732_v43 = vor.u32 %v2731_v31, %v2728_v1 }
 0x220   : > { %v2755_v38 = vld [vmem:[#allocation2 + $0x30] sm:$0xff] }
 0x221   : > { %2500 = vst.msk [vmem:[#allocation2 + $0x38] sm:$0xff] %vm546_vm8, %v2484_v57  ;;  %v2873_v41 = vadd.f32 %v5764_v7, %v2755_v38 }
 0x222   : > { %v2904_v37 = vld [vmem:[#allocation2 + $0x28] sm:$0xff] }
 0x223   : > { %2889 = vst.msk [vmem:[#allocation2 + $0x30] sm:$0xff] %vm546_vm8, %v2873_v41  ;;  %v2980_v34 = vadd.f32 %v5750_v53, %v2904_v37  ;;  %v2745_v41 = vshll.u32 %v2121_v49, 16 }
 0x224   : > { %v2349_v42 = vpop.f32.mrf.mxu2  ;;  %v2459_v17 = vpop.f32.mrf.mxu3 }
 0x225   : > { %2996 = vst.msk [vmem:[#allocation2 + $0x28] sm:$0xff] %vm546_vm8, %v2980_v34  ;;  %v2376_v45 = vadd.f32 %v2349_v42, %v2298_v50  ;;  %v2733_v42 = vrot.slane %v2732_v43, 4 }
 0x226   : > { %v2407_v26 = vld [vmem:[#allocation2 + $0x40] sm:$0xff] }
 0x227   : > { %v2485_v9 = vadd.f32 %v2457_v27, %v2407_v26  ;;  %2392 = vst.msk [vmem:[#allocation2 + $0x48] sm:$0xff] %vm546_vm8, %v2376_v45  ;;  %v5838_v7 = vpop.f32.mrf.mxu0  ;;  %v5840_v8 = vpop.f32.mrf.mxu1  ;;  %v2741_v27 = vrot.slane %v2739_v10, 4  ;;  %v2747_v26 = vrot.slane %v2745_v41, 5 }
 0x228   : > { %v2756_v23 = vld [vmem:[#allocation2 + $0x38] sm:$0xff] }
 0x229   : > { %2501 = vst.msk [vmem:[#allocation2 + $0x40] sm:$0xff] %vm546_vm8, %v2485_v9  ;;  %v2874_v53 = vadd.f32 %v5785_v5, %v2756_v23  ;;  %4147 = vmatmul.msk.bf16.gmra.mxu2 %vm2179_vm9, %v5554_v12  ;;  %4166 = vmatmul.msk.bf16.gmra.mxu3 %vm2179_vm9, %v5761_v21  ;;  %v3183_v21 = vrot.slane %v5565_v11, 5  ;;  %v2742_v48 = vor.u32 %v2741_v27, %v2737_v33  ;;  %v2301_v9 = vld [vmem:[#allocation2 + $0x60] sm:$0xff] }
 0x22a   : > { %v2905_v35 = vld [vmem:[#allocation2 + $0x30] sm:$0xff]  ;;  %4175 = vmatmul.msk.bf16.gmra.mxu0 %vm2179_vm9, %v5798_v58  ;;  %4184 = vmatmul.msk.bf16.gmra.mxu1 %vm2179_vm9, %v5835_v63 }
 0x22b   : > { %2890 = vst.msk [vmem:[#allocation2 + $0x38] sm:$0xff] %vm546_vm8, %v2874_v53  ;;  %v2981_v5 = vadd.f32 %v5766_v13, %v2905_v35  ;;  %v3185_v13 = vrot.slane %v3183_v21, 4  ;;  %v3184_v22 = vsel %vm4604_vm7, %v4158_v2, %v3183_v21  ;;  %v2743_v45 = vrot.slane %v2742_v48, 4  ;;  %v2304_v48 = vld [vmem:[#allocation2 + $0x78] sm:$0xff] }
 0x22c   : > { %v2352_v12 = vpop.f32.mrf.mxu2  ;;  %v2462_v51 = vpop.f32.mrf.mxu3  ;;  %v3363_v32 = vunpack.c.l.b16 %v3184_v22  ;;  %v3190_v53 = vrot.slane %v5856_v19, 5  ;;  %v2738_v35 = vsel %vm4583_vm6, %v2733_v42, %v2737_v33  ;;  %v3193_v21 = vrot.slane %v2121_v49, 5 }
 0x22d   : > { %2997 = vst.msk [vmem:[#allocation2 + $0x30] sm:$0xff] %vm546_vm8, %v2981_v5  ;;  %v2377_v47 = vadd.f32 %v2352_v12, %v2299_v46  ;;  %v3187_v25 = vsel %vm4604_vm7, %v3185_v13, %v3186_v54  ;;  %v2748_v46 = vsel %vm4583_vm6, %v2743_v45, %v2747_v26  ;;  %v4159_v12 = vrot.slane %v5853_v20, 9 }
 0x22e   : > { %v2408_v55 = vld [vmem:[#allocation2 + $0x48] sm:$0xff]  ;;  %v3364_v59 = vunpack.c.l.b16 %v3187_v25  ;;  %v3025_v20 = vunpack.c.l.b16 %v2738_v35 }
 0x22f   : > { %v2486_v14 = vadd.f32 %v2459_v17, %v2408_v55  ;;  %2393 = vst.msk [vmem:[#allocation2 + $0x50] sm:$0xff] %vm546_vm8, %v2377_v47  ;;  %v5869_v11 = vpop.f32.mrf.mxu0  ;;  %v5871_v62 = vpop.f32.mrf.mxu1  ;;  %v3191_v6 = vsel %vm4604_vm7, %v4159_v12, %v3190_v53  ;;  %v3026_v55 = vunpack.c.l.b16 %v2748_v46 }
 0x230   : > { %v2757_v0 = vld [vmem:[#allocation2 + $0x40] sm:$0xff]  ;;  %v5883_v37 = vpack.c.b16 %v3364_v59, %v3363_v32  ;;  %v3471_v2 = vunpack.c.l.b16 %v3191_v6  ;;  %v2303_v59 = vld [vmem:[#allocation2 + $0x70] sm:$0xff] }
 0x231   : > { %2502 = vst.msk [vmem:[#allocation2 + $0x48] sm:$0xff] %vm546_vm8, %v2486_v14  ;;  %v2875_v36 = vadd.f32 %v5801_v15, %v2757_v0  ;;  %v2302_v14 = vld [vmem:[#allocation2 + $0x68] sm:$0xff]  ;;  %v3027_v25 = vpack.c.b16 %v3026_v55, %v3025_v20 }
 0x232   : > { %v2906_v16 = vld [vmem:[#allocation2 + $0x38] sm:$0xff] }
 0x233   : > { %2891 = vst.msk [vmem:[#allocation2 + $0x40] sm:$0xff] %vm546_vm8, %v2875_v36  ;;  %v2982_v30 = vadd.f32 %v5787_v28, %v2906_v16 }
 0x234   : > { %v2354_v52 = vpop.f32.mrf.mxu2  ;;  %v2464_v57 = vpop.f32.mrf.mxu3 }
 0x235   : > { %2998 = vst.msk [vmem:[#allocation2 + $0x38] sm:$0xff] %vm546_vm8, %v2982_v30  ;;  %v2378_v38 = vadd.f32 %v2354_v52, %v2300_v29 }
 0x236   : > { %v2409_v15 = vld [vmem:[#allocation2 + $0x50] sm:$0xff] }
 0x237   : > { %v2487_v40 = vadd.f32 %v2462_v51, %v2409_v15  ;;  %2394 = vst.msk [vmem:[#allocation2 + $0x58] sm:$0xff] %vm546_vm8, %v2378_v38  ;;  %v5886_v56 = vpop.f32.mrf.mxu0  ;;  %v5888_v34 = vpop.f32.mrf.mxu1  ;;  %v3192_v51 = vrot.slane %v3190_v53, 4 }
 0x238   : > { %v2758_v28 = vld [vmem:[#allocation2 + $0x48] sm:$0xff] }
 0x239   : > { %2503 = vst.msk [vmem:[#allocation2 + $0x50] sm:$0xff] %vm546_vm8, %v2487_v40  ;;  %v2876_v50 = vadd.f32 %v5822_v24, %v2758_v28  ;;  %4148 = vmatmul.msk.bf16.gmra.mxu2 %vm2179_vm9, %v5604_v3  ;;  %4167 = vmatmul.msk.bf16.gmra.mxu3 %vm2179_vm9, %v5798_v58  ;;  %v3194_v61 = vsel %vm4604_vm7, %v3192_v51, %v3193_v21  ;;  %v3008_v51 = vld [vmem:[#allocation2 + $0x8] sm:$0xff] }
 0x23a   : > { %v2907_v17 = vld [vmem:[#allocation2 + $0x40] sm:$0xff]  ;;  %4176 = vmatmul.msk.bf16.gmra.mxu0 %vm2179_vm9, %v5835_v63  ;;  %4185 = vmatmul.msk.bf16.gmra.mxu1 %vm2179_vm9, %v5883_v37  ;;  %v3472_v13 = vunpack.c.l.b16 %v3194_v61 }
 0x23b   : > { %2892 = vst.msk [vmem:[#allocation2 + $0x48] sm:$0xff] %vm546_vm8, %v2876_v50  ;;  %v2983_v24 = vadd.f32 %v5803_v4, %v2907_v17 }
 0x23c   : > { %v2357_v23 = vpop.f32.mrf.mxu2  ;;  %v2467_v3 = vpop.f32.mrf.mxu3  ;;  %v3473_v1 = vpack.c.b16 %v3472_v13, %v3471_v2  ;;  %v3009_v2 = vld [vmem:[#allocation2 + $0x10] sm:$0xff] }
 0x23d   : > { %2999 = vst.msk [vmem:[#allocation2 + $0x40] sm:$0xff] %vm546_vm8, %v2983_v24  ;;  %v2379_v58 = vadd.f32 %v2357_v23, %v2301_v9  ;;  %v3007_v24 = vld [vmem:[#allocation2] sm:$0xff] }
 0x23e   : > { %v2410_v5 = vld [vmem:[#allocation2 + $0x58] sm:$0xff] }
 0x23f   : > { %v2488_v4 = vadd.f32 %v2464_v57, %v2410_v5  ;;  %2395 = vst.msk [vmem:[#allocation2 + $0x60] sm:$0xff] %vm546_vm8, %v2379_v58  ;;  %v5910_v47 = vpop.f32.mrf.mxu0  ;;  %v5912_v19 = vpop.f32.mrf.mxu1 }
 0x240   : > { %v2759_v44 = vld [vmem:[#allocation2 + $0x50] sm:$0xff] }
 0x241   : > { %2504 = vst.msk [vmem:[#allocation2 + $0x58] sm:$0xff] %vm546_vm8, %v2488_v4  ;;  %v2877_v18 = vadd.f32 %v5838_v7, %v2759_v44 }
 0x242   : > { %v2908_v10 = vld [vmem:[#allocation2 + $0x48] sm:$0xff] }
 0x243   : > { %2893 = vst.msk [vmem:[#allocation2 + $0x50] sm:$0xff] %vm546_vm8, %v2877_v18  ;;  %v2984_v54 = vadd.f32 %v5824_v60, %v2908_v10 }
 0x244   : > { %v2359_v0 = vpop.f32.mrf.mxu2  ;;  %v2469_v22 = vpop.f32.mrf.mxu3 }
 0x245   : > { %3000 = vst.msk [vmem:[#allocation2 + $0x48] sm:$0xff] %vm546_vm8, %v2984_v54  ;;  %v2380_v39 = vadd.f32 %v2359_v0, %v2302_v14 }
 0x246   : > { %v2411_v36 = vld [vmem:[#allocation2 + $0x60] sm:$0xff] }
 0x247   : > { %v2489_v31 = vadd.f32 %v2467_v3, %v2411_v36  ;;  %2396 = vst.msk [vmem:[#allocation2 + $0x68] sm:$0xff] %vm546_vm8, %v2380_v39  ;;  %v2862_v7 = vpop.f32.mrf.mxu0  ;;  %v5924_v16 = vpop.f32.mrf.mxu1 }
 0x248   : > { %v2760_v33 = vld [vmem:[#allocation2 + $0x58] sm:$0xff] }
 0x249   : > { %2505 = vst.msk [vmem:[#allocation2 + $0x60] sm:$0xff] %vm546_vm8, %v2489_v31  ;;  %v2878_v60 = vadd.f32 %v5869_v11, %v2760_v33  ;;  %4149 = vmatmul.msk.bf16.gmra.mxu2 %vm2179_vm9, %v3027_v25  ;;  %4168 = vmatmul.msk.bf16.gmra.mxu3 %vm2179_vm9, %v5835_v63 }
 0x24a   : > { %v2909_v27 = vld [vmem:[#allocation2 + $0x50] sm:$0xff]  ;;  %4177 = vmatmul.msk.bf16.gmra.mxu0 %vm2179_vm9, %v5883_v37  ;;  %4186 = vmatmul.msk.bf16.gmra.mxu1 %vm2179_vm9, %v3473_v1 }
 0x24b   : > { %2894 = vst.msk [vmem:[#allocation2 + $0x58] sm:$0xff] %vm546_vm8, %v2878_v60  ;;  %v2985_v32 = vadd.f32 %v5840_v8, %v2909_v27 }
 0x24c   : > { %v2362_v30 = vpop.f32.mrf.mxu2  ;;  %v2472_v49 = vpop.f32.mrf.mxu3 }
 0x24d   : > { %3001 = vst.msk [vmem:[#allocation2 + $0x50] sm:$0xff] %vm546_vm8, %v2985_v32  ;;  %v2381_v11 = vadd.f32 %v2362_v30, %v2303_v59 }
 0x24e   : > { %v2412_v29 = vld [vmem:[#allocation2 + $0x68] sm:$0xff] }
 0x24f   : > { %v2490_v52 = vadd.f32 %v2469_v22, %v2412_v29  ;;  %2397 = vst.msk [vmem:[#allocation2 + $0x70] sm:$0xff] %vm546_vm8, %v2381_v11  ;;  %v2864_v63 = vpop.f32.mrf.mxu0  ;;  %v5940_v43 = vpop.f32.mrf.mxu1 }
 0x250   : > { %v2761_v57 = vld [vmem:[#allocation2 + $0x60] sm:$0xff] }
 0x251   : > { %2506 = vst.msk [vmem:[#allocation2 + $0x68] sm:$0xff] %vm546_vm8, %v2490_v52  ;;  %v2879_v38 = vadd.f32 %v5886_v56, %v2761_v57  ;;  %v3011_v57 = vld [vmem:[#allocation2 + $0x20] sm:$0xff] }
 0x252   : > { %v2910_v15 = vld [vmem:[#allocation2 + $0x58] sm:$0xff] }
 0x253   : > { %2895 = vst.msk [vmem:[#allocation2 + $0x60] sm:$0xff] %vm546_vm8, %v2879_v38  ;;  %v2986_v8 = vadd.f32 %v5871_v62, %v2910_v15 }
 0x254   : > { %v2364_v41 = vpop.f32.mrf.mxu2  ;;  %v2474_v37 = vpop.f32.mrf.mxu3 }
 0x255   : > { %3002 = vst.msk [vmem:[#allocation2 + $0x58] sm:$0xff] %vm546_vm8, %v2986_v8  ;;  %v2382_v40 = vadd.f32 %v2364_v41, %v2304_v48 }
 0x256   : > { %v2413_v28 = vld [vmem:[#allocation2 + $0x70] sm:$0xff] }
 0x257   : > { %v2491_v50 = vadd.f32 %v2472_v49, %v2413_v28  ;;  %2398 = vst.msk [vmem:[#allocation2 + $0x78] sm:$0xff] %vm546_vm8, %v2382_v40  ;;  %v3381_v42 = vpop.f32.mrf.mxu0  ;;  %v5950_v26 = vpop.f32.mrf.mxu1 }
 0x258   : > { %v2762_v17 = vld [vmem:[#allocation2 + $0x68] sm:$0xff] }
 0x259   : > { %2507 = vst.msk [vmem:[#allocation2 + $0x70] sm:$0xff] %vm546_vm8, %v2491_v50  ;;  %v2880_v56 = vadd.f32 %v5910_v47, %v2762_v17  ;;  %v5994_v50 = vld [vmem:[%s6149_s7] ss:$0 sm:$0xff] }
 0x25a   : > { %v2911_v45 = vld [vmem:[#allocation2 + $0x60] sm:$0xff] }
 0x25b   : > { %2896 = vst.msk [vmem:[#allocation2 + $0x68] sm:$0xff] %vm546_vm8, %v2880_v56  ;;  %v2987_v62 = vadd.f32 %v5888_v34, %v2911_v45 }
 0x25c   : > { %v3043_v9 = vpop.f32.mrf.mxu2  ;;  %v3273_v23 = vpop.f32.mrf.mxu3 }
 0x25d   : > { %3003 = vst.msk [vmem:[#allocation2 + $0x60] sm:$0xff] %vm546_vm8, %v2987_v62  ;;  %v3083_v3 = vadd.f32 %v3043_v9, %v3007_v24  ;;  %v3012_v62 = vld [vmem:[#allocation2 + $0x28] sm:$0xff] }
 0x25e   : > { %v2414_v53 = vld [vmem:[#allocation2 + $0x78] sm:$0xff] }
 0x25f   : > { %v2492_v58 = vadd.f32 %v2474_v37, %v2414_v53  ;;  %3099 = vst.msk [vmem:[#allocation2] sm:$0xff] %vm546_vm8, %v3083_v3  ;;  %v3383_v35 = vpop.f32.mrf.mxu0  ;;  %v3491_v44 = vpop.f32.mrf.mxu1  ;;  %v5987_v37 = vld [vmem:[%s6148_s6] ss:$0 sm:$0xff] }
 0x260   : > { %v2763_v5 = vld [vmem:[#allocation2 + $0x70] sm:$0xff] }
 0x261   : > { %2508 = vst.msk [vmem:[#allocation2 + $0x78] sm:$0xff] %vm546_vm8, %v2492_v58  ;;  %v2881_v46 = vadd.f32 %v2862_v7, %v2763_v5 }
 0x262   : > { %v2912_v12 = vld [vmem:[#allocation2 + $0x68] sm:$0xff] }
 0x263   : > { %2897 = vst.msk [vmem:[#allocation2 + $0x70] sm:$0xff] %vm546_vm8, %v2881_v46  ;;  %v2988_v34 = vadd.f32 %v5912_v19, %v2912_v12 }
 0x264   : > { %v3045_v21 = vpop.f32.mrf.mxu2  ;;  %v3275_v4 = vpop.f32.mrf.mxu3 }
 0x265   : > { %3004 = vst.msk [vmem:[#allocation2 + $0x68] sm:$0xff] %vm546_vm8, %v2988_v34  ;;  %v3084_v47 = vadd.f32 %v3045_v21, %v3008_v51 }
 0x266   : > { %v3195_v6 = vld [vmem:[#allocation2] sm:$0xff] }
 0x267   : > { %v3313_v61 = vadd.f32 %v3273_v23, %v3195_v6  ;;  %3100 = vst.msk [vmem:[#allocation2 + $0x8] sm:$0xff] %vm546_vm8, %v3084_v47  ;;  %v3386_v18 = vpop.f32.mrf.mxu0  ;;  %v5966_v25 = vpop.f32.mrf.mxu1  ;;  %v3013_v47 = vld [vmem:[#allocation2 + $0x30] sm:$0xff] }
 0x268   : > { %v2764_v20 = vld [vmem:[#allocation2 + $0x78] sm:$0xff] }
 0x269   : > { %3329 = vst.msk [vmem:[#allocation2] sm:$0xff] %vm546_vm8, %v3313_v61  ;;  %v2882_v55 = vadd.f32 %v2864_v63, %v2764_v20 }
 0x26a   : > { %v2913_v10 = vld [vmem:[#allocation2 + $0x70] sm:$0xff] }
 0x26b   : > { %2898 = vst.msk [vmem:[#allocation2 + $0x78] sm:$0xff] %vm546_vm8, %v2882_v55  ;;  %v2989_v19 = vadd.f32 %v5924_v16, %v2913_v10  ;;  %v3010_v16 = vld [vmem:[#allocation2 + $0x18] sm:$0xff] }
 0x26c   : > { %v3048_v13 = vpop.f32.mrf.mxu2  ;;  %v3278_v54 = vpop.f32.mrf.mxu3 }
 0x26d   : > { %3005 = vst.msk [vmem:[#allocation2 + $0x70] sm:$0xff] %vm546_vm8, %v2989_v19  ;;  %v3085_v14 = vadd.f32 %v3048_v13, %v3009_v2 }
 0x26e   : > { %v3196_v0 = vld [vmem:[#allocation2 + $0x8] sm:$0xff] }
 0x26f   : > { %v3314_v22 = vadd.f32 %v3275_v4, %v3196_v0  ;;  %3101 = vst.msk [vmem:[#allocation2 + $0x10] sm:$0xff] %vm546_vm8, %v3085_v14  ;;  %v5964_v39 = vpop.f32.mrf.mxu0  ;;  %v5976_v29 = vpop.f32.mrf.mxu1 }
 0x270   : > { %v3345_v36 = vld [vmem:[#allocation2] sm:$0xff] }
 0x271   : > { %3330 = vst.msk [vmem:[#allocation2 + $0x8] sm:$0xff] %vm546_vm8, %v3314_v22  ;;  %v3421_v1 = vadd.f32 %v3381_v42, %v3345_v36 }
 0x272   : > { %v2914_v31 = vld [vmem:[#allocation2 + $0x78] sm:$0xff] }
 0x273   : > { %3437 = vst.msk [vmem:[#allocation2] sm:$0xff] %vm546_vm8, %v3421_v1  ;;  %v2990_v7 = vadd.f32 %v5940_v43, %v2914_v31  ;;  %v3014_v1 = vld [vmem:[#allocation2 + $0x38] sm:$0xff] }
 0x274   : > { %v3050_v33 = vpop.f32.mrf.mxu2  ;;  %v3280_v60 = vpop.f32.mrf.mxu3 }
 0x275   : > { %3006 = vst.msk [vmem:[#allocation2 + $0x78] sm:$0xff] %vm546_vm8, %v2990_v7  ;;  %v3086_v27 = vadd.f32 %v3050_v33, %v3010_v16 }
 0x276   : > { %v3197_v32 = vld [vmem:[#allocation2 + $0x10] sm:$0xff] }
 0x277   : > { %v3315_v59 = vadd.f32 %v3278_v54, %v3197_v32  ;;  %3102 = vst.msk [vmem:[#allocation2 + $0x18] sm:$0xff] %vm546_vm8, %v3086_v27  ;;  %v5974_v11 = vpop.f32.mrf.mxu0  ;;  %v5999_v56 = vpop.f32.mrf.mxu1 }
 0x278   : > { %v3346_v30 = vld [vmem:[#allocation2 + $0x8] sm:$0xff] }
 0x279   : > { %3331 = vst.msk [vmem:[#allocation2 + $0x10] sm:$0xff] %vm546_vm8, %v3315_v59  ;;  %v3422_v49 = vadd.f32 %v3383_v35, %v3346_v30 }
 0x27a   : > { %v3453_v52 = vld [vmem:[#allocation2] sm:$0xff] }
 0x27b   : > { %3438 = vst.msk [vmem:[#allocation2 + $0x8] sm:$0xff] %vm546_vm8, %v3422_v49  ;;  %v3529_v63 = vadd.f32 %v5950_v26, %v3453_v52 }
 0x27c   : > { %v3053_v38 = vpop.f32.mrf.mxu2  ;;  %v3283_v43 = vpop.f32.mrf.mxu3 }
 0x27d   : > { %3545 = vst.msk [vmem:[#allocation2] sm:$0xff] %vm546_vm8, %v3529_v63  ;;  %v3087_v15 = vadd.f32 %v3053_v38, %v3011_v57 }
 0x27e   : > { %v3198_v8 = vld [vmem:[#allocation2 + $0x18] sm:$0xff] }
 0x27f   : > { %v3316_v48 = vadd.f32 %v3280_v60, %v3198_v8  ;;  %3103 = vst.msk [vmem:[#allocation2 + $0x20] sm:$0xff] %vm546_vm8, %v3087_v15  ;;  %v5997_v17 = vpop.f32.mrf.mxu0  ;;  %v3501_v55 = vpop.f32.mrf.mxu1  ;;  %v3015_v15 = vld [vmem:[#allocation2 + $0x40] sm:$0xff] }
 0x280   : > { %v3347_v41 = vld [vmem:[#allocation2 + $0x10] sm:$0xff] }
 0x281   : > { %3332 = vst.msk [vmem:[#allocation2 + $0x18] sm:$0xff] %vm546_vm8, %v3316_v48  ;;  %v3423_v40 = vadd.f32 %v3386_v18, %v3347_v41 }
 0x282   : > { %v3454_v28 = vld [vmem:[#allocation2 + $0x8] sm:$0xff] }
 0x283   : > { %3439 = vst.msk [vmem:[#allocation2 + $0x10] sm:$0xff] %vm546_vm8, %v3423_v40  ;;  %v3530_v42 = vadd.f32 %v3491_v44, %v3454_v28 }
 0x284   : > { %v3561_v45 = vld [vmem:[#allocation2] sm:$0xff]  ;;  %v3055_v26 = vpop.f32.mrf.mxu2  ;;  %v3285_v24 = vpop.f32.mrf.mxu3 }
 0x285   : > { %v3581_v9 = vmul.f32 %v5987_v37, %v3561_v45  ;;  %3546 = vst.msk [vmem:[#allocation2 + $0x8] sm:$0xff] %vm546_vm8, %v3530_v42  ;;  %v3088_v23 = vadd.f32 %v3055_v26, %v3012_v62 }
 0x286   : > { %v3199_v3 = vld [vmem:[#allocation2 + $0x20] sm:$0xff] }
 0x287   : > { %v3601_v53 = vadd.f32 %v5994_v50, %v3581_v9  ;;  %v3317_v58 = vadd.f32 %v3283_v43, %v3199_v3  ;;  %3104 = vst.msk [vmem:[#allocation2 + $0x28] sm:$0xff] %vm546_vm8, %v3088_v23  ;;  %v3396_v20 = vpop.f32.mrf.mxu0  ;;  %v3504_v30 = vpop.f32.mrf.mxu1 }
 0x288   : > { %v3348_v35 = vld [vmem:[#allocation2 + $0x18] sm:$0xff] }
 0x289   : > { %vm3617_vm10 = vcmp.ge.f32.partialorder %v3601_v53, 0.0  ;;  %v3633_v5 = vmul.f32 0.01, %v3601_v53  ;;  %3333 = vst.msk [vmem:[#allocation2 + $0x20] sm:$0xff] %vm546_vm8, %v3317_v58  ;;  %v3424_v46 = vadd.f32 %v5964_v39, %v3348_v35  ;;  %v3016_v35 = vld [vmem:[#allocation2 + $0x48] sm:$0xff] }
 0x28a   : > { %v3455_v12 = vld [vmem:[#allocation2 + $0x10] sm:$0xff] }
 0x28b   : > { %v3649_v34 = vsel %vm3617_vm10, %v3601_v53, %v3633_v5  ;;  %3440 = vst.msk [vmem:[#allocation2 + $0x18] sm:$0xff] %vm546_vm8, %v3424_v46  ;;  %v3531_v51 = vadd.f32 %v5966_v25, %v3455_v12 }
 0x28c   : > { %v3665_v21 = vpack.c.bf16 %v3649_v34, %v3649_v34  ;;  %v3562_v4 = vld [vmem:[#allocation2 + $0x8] sm:$0xff]  ;;  %v3058_v44 = vpop.f32.mrf.mxu2  ;;  %v3288_v6 = vpop.f32.mrf.mxu3 }
 0x28d   : > { %v3582_v61 = vmul.f32 %v5987_v37, %v3562_v4  ;;  %3547 = vst.msk [vmem:[#allocation2 + $0x10] sm:$0xff] %vm546_vm8, %v3531_v51  ;;  %v3089_v18 = vadd.f32 %v3058_v44, %v3013_v47 }
 0x28e   : > { %3682 = vst.msk [vmem:[%s6010_s14] sm:$0xf] %vm3681_vm11, %v3665_v21  ;;  %v3200_v10 = vld [vmem:[#allocation2 + $0x28] sm:$0xff] }
 0x28f   : > { %v3602_v19 = vadd.f32 %v5994_v50, %v3582_v61  ;;  %v3318_v2 = vadd.f32 %v3285_v24, %v3200_v10  ;;  %3105 = vst.msk [vmem:[#allocation2 + $0x30] sm:$0xff] %vm546_vm8, %v3089_v18  ;;  %v3398_v59 = vpop.f32.mrf.mxu0  ;;  %v3506_v24 = vpop.f32.mrf.mxu1 }
 0x290   : > { %v3349_v13 = vld [vmem:[#allocation2 + $0x20] sm:$0xff] }
 0x291   : > { %vm3618_vm12 = vcmp.ge.f32.partialorder %v3602_v19, 0.0  ;;  %v3634_v54 = vmul.f32 0.01, %v3602_v19  ;;  %3334 = vst.msk [vmem:[#allocation2 + $0x28] sm:$0xff] %vm546_vm8, %v3318_v2  ;;  %v3425_v14 = vadd.f32 %v5974_v11, %v3349_v13  ;;  %v3017_v13 = vld [vmem:[#allocation2 + $0x50] sm:$0xff] }
 0x292   : > { %v3456_v0 = vld [vmem:[#allocation2 + $0x18] sm:$0xff] }
 0x293   : > { %v3650_v22 = vsel %vm3618_vm12, %v3602_v19, %v3634_v54  ;;  %3441 = vst.msk [vmem:[#allocation2 + $0x20] sm:$0xff] %vm546_vm8, %v3425_v14  ;;  %v3532_v39 = vadd.f32 %v5976_v29, %v3456_v0 }
 0x294   : > { %v3666_v25 = vpack.c.bf16 %v3650_v22, %v3650_v22  ;;  %v3563_v36 = vld [vmem:[#allocation2 + $0x10] sm:$0xff]  ;;  %v3060_v31 = vpop.f32.mrf.mxu2  ;;  %v3290_v7 = vpop.f32.mrf.mxu3 }
 0x295   : > { %v3583_v16 = vmul.f32 %v5987_v37, %v3563_v36  ;;  %3548 = vst.msk [vmem:[#allocation2 + $0x18] sm:$0xff] %vm546_vm8, %v3532_v39  ;;  %v3090_v33 = vadd.f32 %v3060_v31, %v3014_v1 }
 0x296   : > { %3683 = vst.msk [vmem:[%s6010_s14 + $0x4] sm:$0xf] %vm3681_vm11, %v3666_v25  ;;  %v3201_v60 = vld [vmem:[#allocation2 + $0x30] sm:$0xff] }
 0x297   : > { %v3603_v27 = vadd.f32 %v5994_v50, %v3583_v16  ;;  %v3319_v32 = vadd.f32 %v3288_v6, %v3201_v60  ;;  %3106 = vst.msk [vmem:[#allocation2 + $0x38] sm:$0xff] %vm546_vm8, %v3090_v33  ;;  %v3401_v26 = vpop.f32.mrf.mxu0  ;;  %v3509_v10 = vpop.f32.mrf.mxu1 }
 0x298   : > { %v3350_v49 = vld [vmem:[#allocation2 + $0x28] sm:$0xff] }
 0x299   : > { %vm3619_vm13 = vcmp.ge.f32.partialorder %v3603_v27, 0.0  ;;  %v3635_v11 = vmul.f32 0.01, %v3603_v27  ;;  %3335 = vst.msk [vmem:[#allocation2 + $0x30] sm:$0xff] %vm546_vm8, %v3319_v32  ;;  %v3426_v29 = vadd.f32 %v5997_v17, %v3350_v49 }
 0x29a   : > { %v3457_v52 = vld [vmem:[#allocation2 + $0x20] sm:$0xff] }
 0x29b   : > { %v3651_v63 = vsel %vm3619_vm13, %v3603_v27, %v3635_v11  ;;  %3442 = vst.msk [vmem:[#allocation2 + $0x28] sm:$0xff] %vm546_vm8, %v3426_v29  ;;  %v3533_v57 = vadd.f32 %v5999_v56, %v3457_v52 }
 0x29c   : > { %v3667_v38 = vpack.c.bf16 %v3651_v63, %v3651_v63  ;;  %v3564_v43 = vld [vmem:[#allocation2 + $0x18] sm:$0xff]  ;;  %v3063_v8 = vpop.f32.mrf.mxu2  ;;  %v3293_v48 = vpop.f32.mrf.mxu3 }
 0x29d   : > { %v3584_v41 = vmul.f32 %v5987_v37, %v3564_v43  ;;  %3549 = vst.msk [vmem:[#allocation2 + $0x20] sm:$0xff] %vm546_vm8, %v3533_v57  ;;  %v3091_v40 = vadd.f32 %v3063_v8, %v3015_v15 }
 0x29e   : > { %3684 = vst.msk [vmem:[%s6010_s14 + $0x8] sm:$0xf] %vm3681_vm11, %v3667_v38  ;;  %v3202_v28 = vld [vmem:[#allocation2 + $0x38] sm:$0xff] }
 0x29f   : > { %v3604_v42 = vadd.f32 %v5994_v50, %v3584_v41  ;;  %v3320_v17 = vadd.f32 %v3290_v7, %v3202_v28  ;;  %3107 = vst.msk [vmem:[#allocation2 + $0x40] sm:$0xff] %vm546_vm8, %v3091_v40  ;;  %v3511_v52 = vpop.f32.mrf.mxu1 }
 0x2a0   : > { %v3351_v45 = vld [vmem:[#allocation2 + $0x30] sm:$0xff] }
 0x2a1   : > { %vm3620_vm14 = vcmp.ge.f32.partialorder %v3604_v42, 0.0  ;;  %v3636_v56 = vmul.f32 0.01, %v3604_v42  ;;  %3336 = vst.msk [vmem:[#allocation2 + $0x38] sm:$0xff] %vm546_vm8, %v3320_v17  ;;  %v3427_v62 = vadd.f32 %v3396_v20, %v3351_v45  ;;  %v3019_v45 = vld [vmem:[#allocation2 + $0x60] sm:$0xff] }
 0x2a2   : > { %v3458_v9 = vld [vmem:[#allocation2 + $0x28] sm:$0xff] }
 0x2a3   : > { %v3652_v23 = vsel %vm3620_vm14, %v3604_v42, %v3636_v56  ;;  %3443 = vst.msk [vmem:[#allocation2 + $0x30] sm:$0xff] %vm546_vm8, %v3427_v62  ;;  %v3534_v3 = vadd.f32 %v3501_v55, %v3458_v9  ;;  %v3403_v55 = vpop.f32.mrf.mxu0 }
 0x2a4   : > { %v3668_v53 = vpack.c.bf16 %v3652_v23, %v3652_v23  ;;  %v3565_v58 = vld [vmem:[#allocation2 + $0x20] sm:$0xff]  ;;  %v3065_v5 = vpop.f32.mrf.mxu2  ;;  %v3295_v46 = vpop.f32.mrf.mxu3 }
 0x2a5   : > { %v3585_v12 = vmul.f32 %v5987_v37, %v3565_v58  ;;  %3550 = vst.msk [vmem:[#allocation2 + $0x28] sm:$0xff] %vm546_vm8, %v3534_v3  ;;  %v3092_v34 = vadd.f32 %v3065_v5, %v3016_v35 }
 0x2a6   : > { %3685 = vst.msk [vmem:[%s6010_s14 + $0xc] sm:$0xf] %vm3681_vm11, %v3668_v53  ;;  %v3203_v51 = vld [vmem:[#allocation2 + $0x40] sm:$0xff] }
 0x2a7   : > { %v3605_v21 = vadd.f32 %v5994_v50, %v3585_v12  ;;  %v3321_v4 = vadd.f32 %v3293_v48, %v3203_v51  ;;  %3108 = vst.msk [vmem:[#allocation2 + $0x48] sm:$0xff] %vm546_vm8, %v3092_v34  ;;  %v3514_v53 = vpop.f32.mrf.mxu1 }
 0x2a8   : > { %v3352_v47 = vld [vmem:[#allocation2 + $0x38] sm:$0xff] }
 0x2a9   : > { %vm3621_vm15 = vcmp.ge.f32.partialorder %v3605_v21, 0.0  ;;  %v3637_v44 = vmul.f32 0.01, %v3605_v21  ;;  %3337 = vst.msk [vmem:[#allocation2 + $0x40] sm:$0xff] %vm546_vm8, %v3321_v4  ;;  %v3428_v6 = vadd.f32 %v3398_v59, %v3352_v47  ;;  %v3018_v59 = vld [vmem:[#allocation2 + $0x58] sm:$0xff]  ;;  %v3020_v47 = vld [vmem:[#allocation2 + $0x68] sm:$0xff] }
 0x2aa   : > { %v3459_v61 = vld [vmem:[#allocation2 + $0x30] sm:$0xff] }
 0x2ab   : > { %v3653_v18 = vsel %vm3621_vm15, %v3605_v21, %v3637_v44  ;;  %3444 = vst.msk [vmem:[#allocation2 + $0x38] sm:$0xff] %vm546_vm8, %v3428_v6  ;;  %v3535_v20 = vadd.f32 %v3504_v30, %v3459_v61  ;;  %v3406_v29 = vpop.f32.mrf.mxu0 }
 0x2ac   : > { %v3669_v19 = vpack.c.bf16 %v3653_v18, %v3653_v18  ;;  %v3566_v2 = vld [vmem:[#allocation2 + $0x28] sm:$0xff]  ;;  %v3068_v54 = vpop.f32.mrf.mxu2  ;;  %v3298_v14 = vpop.f32.mrf.mxu3 }
 0x2ad   : > { %v3586_v0 = vmul.f32 %v5987_v37, %v3566_v2  ;;  %3551 = vst.msk [vmem:[#allocation2 + $0x30] sm:$0xff] %vm546_vm8, %v3535_v20  ;;  %v3093_v22 = vadd.f32 %v3068_v54, %v3017_v13 }
 0x2ae   : > { %3686 = vst.msk [vmem:[%s6010_s14 + $0x10] sm:$0xf] %vm3681_vm11, %v3669_v19  ;;  %v3204_v39 = vld [vmem:[#allocation2 + $0x48] sm:$0xff] }
 0x2af   : > { %v3606_v25 = vadd.f32 %v5994_v50, %v3586_v0  ;;  %v3322_v36 = vadd.f32 %v3295_v46, %v3204_v39  ;;  %3109 = vst.msk [vmem:[#allocation2 + $0x50] sm:$0xff] %vm546_vm8, %v3093_v22  ;;  %v3516_v54 = vpop.f32.mrf.mxu1 }
 0x2b0   : > { %v3353_v1 = vld [vmem:[#allocation2 + $0x40] sm:$0xff] }
 0x2b1   : > { %vm3622_vm0 = vcmp.ge.f32.partialorder %v3606_v25, 0.0  ;;  %v3638_v31 = vmul.f32 0.01, %v3606_v25  ;;  %3338 = vst.msk [vmem:[#allocation2 + $0x48] sm:$0xff] %vm546_vm8, %v3322_v36  ;;  %v3429_v7 = vadd.f32 %v3401_v26, %v3353_v1  ;;  %v3021_v1 = vld [vmem:[#allocation2 + $0x70] sm:$0xff] }
 0x2b2   : > { %v3460_v16 = vld [vmem:[#allocation2 + $0x38] sm:$0xff] }
 0x2b3   : > { %v3654_v33 = vsel %vm3622_vm0, %v3606_v25, %v3638_v31  ;;  %3445 = vst.msk [vmem:[#allocation2 + $0x40] sm:$0xff] %vm546_vm8, %v3429_v7  ;;  %v3536_v60 = vadd.f32 %v3506_v24, %v3460_v16  ;;  %v3408_v3 = vpop.f32.mrf.mxu0 }
 0x2b4   : > { %v3670_v27 = vpack.c.bf16 %v3654_v33, %v3654_v33  ;;  %v3567_v32 = vld [vmem:[#allocation2 + $0x30] sm:$0xff]  ;;  %v3070_v30 = vpop.f32.mrf.mxu2  ;;  %v3300_v57 = vpop.f32.mrf.mxu3 }
 0x2b5   : > { %v3587_v49 = vmul.f32 %v5987_v37, %v3567_v32  ;;  %3552 = vst.msk [vmem:[#allocation2 + $0x38] sm:$0xff] %vm546_vm8, %v3536_v60  ;;  %v3094_v11 = vadd.f32 %v3070_v30, %v3018_v59 }
 0x2b6   : > { %3687 = vst.msk [vmem:[%s6010_s14 + $0x14] sm:$0xf] %vm3681_vm11, %v3670_v27  ;;  %v3205_v63 = vld [vmem:[#allocation2 + $0x50] sm:$0xff] }
 0x2b7   : > { %v3607_v38 = vadd.f32 %v5994_v50, %v3587_v49  ;;  %v3323_v43 = vadd.f32 %v3298_v14, %v3205_v63  ;;  %3110 = vst.msk [vmem:[#allocation2 + $0x58] sm:$0xff] %vm546_vm8, %v3094_v11  ;;  %v3519_v63 = vpop.f32.mrf.mxu1 }
 0x2b8   : > { %v3354_v15 = vld [vmem:[#allocation2 + $0x48] sm:$0xff] }
 0x2b9   : > { %vm3623_vm1 = vcmp.ge.f32.partialorder %v3607_v38, 0.0  ;;  %v3639_v8 = vmul.f32 0.01, %v3607_v38  ;;  %3339 = vst.msk [vmem:[#allocation2 + $0x50] sm:$0xff] %vm546_vm8, %v3323_v43  ;;  %v3430_v48 = vadd.f32 %v3403_v55, %v3354_v15  ;;  %v3022_v15 = vld [vmem:[#allocation2 + $0x78] sm:$0xff] }
 0x2ba   : > { %v3461_v41 = vld [vmem:[#allocation2 + $0x40] sm:$0xff] }
 0x2bb   : > { %v3655_v40 = vsel %vm3623_vm1, %v3607_v38, %v3639_v8  ;;  %3446 = vst.msk [vmem:[#allocation2 + $0x48] sm:$0xff] %vm546_vm8, %v3430_v48  ;;  %v3537_v28 = vadd.f32 %v3509_v10, %v3461_v41  ;;  %v3411_v13 = vpop.f32.mrf.mxu0 }
 0x2bc   : > { %v3671_v42 = vpack.c.bf16 %v3655_v40, %v3655_v40  ;;  %v3568_v17 = vld [vmem:[#allocation2 + $0x38] sm:$0xff]  ;;  %v3073_v56 = vpop.f32.mrf.mxu2  ;;  %v3303_v35 = vpop.f32.mrf.mxu3 }
 0x2bd   : > { %v3588_v62 = vmul.f32 %v5987_v37, %v3568_v17  ;;  %3553 = vst.msk [vmem:[#allocation2 + $0x40] sm:$0xff] %vm546_vm8, %v3537_v28  ;;  %v3095_v26 = vadd.f32 %v3073_v56, %v3019_v45 }
 0x2be   : > { %3688 = vst.msk [vmem:[%s6010_s14 + $0x18] sm:$0xf] %vm3681_vm11, %v3671_v42  ;;  %v3206_v24 = vld [vmem:[#allocation2 + $0x58] sm:$0xff] }
 0x2bf   : > { %v3608_v9 = vadd.f32 %v5994_v50, %v3588_v62  ;;  %v3324_v23 = vadd.f32 %v3300_v57, %v3206_v24  ;;  %3111 = vst.msk [vmem:[#allocation2 + $0x60] sm:$0xff] %vm546_vm8, %v3095_v26 }
 0x2c0   : > { %v3355_v58 = vld [vmem:[#allocation2 + $0x50] sm:$0xff] }
 0x2c1   : > { %vm3624_vm2 = vcmp.ge.f32.partialorder %v3608_v9, 0.0  ;;  %v3640_v5 = vmul.f32 0.01, %v3608_v9  ;;  %3340 = vst.msk [vmem:[#allocation2 + $0x58] sm:$0xff] %vm546_vm8, %v3324_v23  ;;  %v3431_v46 = vadd.f32 %v3406_v29, %v3355_v58 }
 0x2c2   : > { %v3462_v12 = vld [vmem:[#allocation2 + $0x48] sm:$0xff] }
 0x2c3   : > { %v3656_v34 = vsel %vm3624_vm2, %v3608_v9, %v3640_v5  ;;  %3447 = vst.msk [vmem:[#allocation2 + $0x50] sm:$0xff] %vm546_vm8, %v3431_v46  ;;  %v3538_v51 = vadd.f32 %v3511_v52, %v3462_v12  ;;  %v3413_v52 = vpop.f32.mrf.mxu0 }
 0x2c4   : > { %v3672_v21 = vpack.c.bf16 %v3656_v34, %v3656_v34  ;;  %v3569_v4 = vld [vmem:[#allocation2 + $0x40] sm:$0xff]  ;;  %v3075_v44 = vpop.f32.mrf.mxu2  ;;  %v3305_v0 = vpop.f32.mrf.mxu3 }
 0x2c5   : > { %v3589_v6 = vmul.f32 %v5987_v37, %v3569_v4  ;;  %3554 = vst.msk [vmem:[#allocation2 + $0x48] sm:$0xff] %vm546_vm8, %v3538_v51  ;;  %v3096_v61 = vadd.f32 %v3075_v44, %v3020_v47 }
 0x2c6   : > { %3689 = vst.msk [vmem:[%s6010_s14 + $0x1c] sm:$0xf] %vm3681_vm11, %v3672_v21  ;;  %v3207_v18 = vld [vmem:[#allocation2 + $0x60] sm:$0xff] }
 0x2c7   : > { %v3609_v20 = vadd.f32 %v5994_v50, %v3589_v6  ;;  %v3325_v55 = vadd.f32 %v3303_v35, %v3207_v18  ;;  %3112 = vst.msk [vmem:[#allocation2 + $0x68] sm:$0xff] %vm546_vm8, %v3096_v61 }
 0x2c8   : > { %v3356_v10 = vld [vmem:[#allocation2 + $0x58] sm:$0xff] }
 0x2c9   : > { %vm3625_vm3 = vcmp.ge.f32.partialorder %v3609_v20, 0.0  ;;  %v3641_v19 = vmul.f32 0.01, %v3609_v20  ;;  %3341 = vst.msk [vmem:[#allocation2 + $0x60] sm:$0xff] %vm546_vm8, %v3325_v55  ;;  %v3432_v2 = vadd.f32 %v3408_v3, %v3356_v10 }
 0x2ca   : > { %v3463_v14 = vld [vmem:[#allocation2 + $0x50] sm:$0xff] }
 0x2cb   : > { %v3657_v22 = vsel %vm3625_vm3, %v3609_v20, %v3641_v19  ;;  %3448 = vst.msk [vmem:[#allocation2 + $0x58] sm:$0xff] %vm546_vm8, %v3432_v2  ;;  %v3539_v39 = vadd.f32 %v3514_v53, %v3463_v14  ;;  %v3521_v53 = vpop.f32.mrf.mxu1  ;;  %v3416_v5 = vpop.f32.mrf.mxu0 }
 0x2cc   : > { %v3673_v25 = vpack.c.bf16 %v3657_v22, %v3657_v22  ;;  %v3570_v36 = vld [vmem:[#allocation2 + $0x48] sm:$0xff]  ;;  %v3078_v31 = vpop.f32.mrf.mxu2  ;;  %v3308_v43 = vpop.f32.mrf.mxu3 }
 0x2cd   : > { %v3590_v7 = vmul.f32 %v5987_v37, %v3570_v36  ;;  %3555 = vst.msk [vmem:[#allocation2 + $0x50] sm:$0xff] %vm546_vm8, %v3539_v39  ;;  %v3097_v16 = vadd.f32 %v3078_v31, %v3021_v1 }
 0x2ce   : > { %3690 = vst.msk [vmem:[%s6010_s14 + $0x20] sm:$0xf] %vm3681_vm11, %v3673_v25  ;;  %v3208_v33 = vld [vmem:[#allocation2 + $0x68] sm:$0xff] }
 0x2cf   : > { %v3610_v60 = vadd.f32 %v5994_v50, %v3590_v7  ;;  %v3326_v27 = vadd.f32 %v3305_v0, %v3208_v33  ;;  %3113 = vst.msk [vmem:[#allocation2 + $0x70] sm:$0xff] %vm546_vm8, %v3097_v16 }
 0x2d0   : > { %v3357_v32 = vld [vmem:[#allocation2 + $0x60] sm:$0xff] }
 0x2d1   : > { %vm3626_vm4 = vcmp.ge.f32.partialorder %v3610_v60, 0.0  ;;  %v3642_v59 = vmul.f32 0.01, %v3610_v60  ;;  %3342 = vst.msk [vmem:[#allocation2 + $0x68] sm:$0xff] %vm546_vm8, %v3326_v27  ;;  %v3433_v30 = vadd.f32 %v3411_v13, %v3357_v32 }
 0x2d2   : > { %v3464_v49 = vld [vmem:[#allocation2 + $0x58] sm:$0xff] }
 0x2d3   : > { %v3658_v11 = vsel %vm3626_vm4, %v3610_v60, %v3642_v59  ;;  %3449 = vst.msk [vmem:[#allocation2 + $0x60] sm:$0xff] %vm546_vm8, %v3433_v30  ;;  %v3540_v29 = vadd.f32 %v3516_v54, %v3464_v49  ;;  %v3418_v10 = vpop.f32.mrf.mxu0  ;;  %v3524_v19 = vpop.f32.mrf.mxu1 }
 0x2d4   : > { %v3674_v57 = vpack.c.bf16 %v3658_v11, %v3658_v11  ;;  %v3571_v38 = vld [vmem:[#allocation2 + $0x50] sm:$0xff]  ;;  %v3080_v8 = vpop.f32.mrf.mxu2  ;;  %v3310_v35 = vpop.f32.mrf.mxu3 }
 0x2d5   : > { %v3591_v48 = vmul.f32 %v5987_v37, %v3571_v38  ;;  %3556 = vst.msk [vmem:[#allocation2 + $0x58] sm:$0xff] %vm546_vm8, %v3540_v29  ;;  %v3098_v41 = vadd.f32 %v3080_v8, %v3022_v15 }
 0x2d6   : > { %3691 = vst.msk [vmem:[%s6010_s14 + $0x24] sm:$0xf] %vm3681_vm11, %v3674_v57  ;;  %v3209_v40 = vld [vmem:[#allocation2 + $0x70] sm:$0xff] }
 0x2d7   : > { %v3611_v28 = vadd.f32 %v5994_v50, %v3591_v48  ;;  %v3327_v42 = vadd.f32 %v3308_v43, %v3209_v40  ;;  %3114 = vst.msk [vmem:[#allocation2 + $0x78] sm:$0xff] %vm546_vm8, %v3098_v41 }
 0x2d8   : > { %v3358_v17 = vld [vmem:[#allocation2 + $0x68] sm:$0xff] }
 0x2d9   : > { %vm3627_vm5 = vcmp.ge.f32.partialorder %v3611_v28, 0.0  ;;  %v3643_v45 = vmul.f32 0.01, %v3611_v28  ;;  %3343 = vst.msk [vmem:[#allocation2 + $0x70] sm:$0xff] %vm546_vm8, %v3327_v42  ;;  %v3434_v56 = vadd.f32 %v3413_v52, %v3358_v17 }
 0x2da   : > { %v3465_v62 = vld [vmem:[#allocation2 + $0x60] sm:$0xff] }
 0x2db   : > { %v3659_v26 = vsel %vm3627_vm5, %v3611_v28, %v3643_v45  ;;  %3450 = vst.msk [vmem:[#allocation2 + $0x68] sm:$0xff] %vm546_vm8, %v3434_v56  ;;  %v3541_v24 = vadd.f32 %v3519_v63, %v3465_v62  ;;  %v3526_v7 = vpop.f32.mrf.mxu1 }
 0x2dc   : > { %v3675_v9 = vpack.c.bf16 %v3659_v26, %v3659_v26  ;;  %v3572_v23 = vld [vmem:[#allocation2 + $0x58] sm:$0xff] }
 0x2dd   : > { %v3592_v3 = vmul.f32 %v5987_v37, %v3572_v23  ;;  %3557 = vst.msk [vmem:[#allocation2 + $0x60] sm:$0xff] %vm546_vm8, %v3541_v24 }
 0x2de   : > { %3692 = vst.msk [vmem:[%s6010_s14 + $0x28] sm:$0xf] %vm3681_vm11, %v3675_v9  ;;  %v3210_v58 = vld [vmem:[#allocation2 + $0x78] sm:$0xff] }
 0x2df   : > { %v3612_v46 = vadd.f32 %v5994_v50, %v3592_v3  ;;  %v3328_v12 = vadd.f32 %v3310_v35, %v3210_v58 }
 0x2e0   : > { %v3359_v34 = vld [vmem:[#allocation2 + $0x70] sm:$0xff] }
 0x2e1   : > { %vm3628_vm6 = vcmp.ge.f32.partialorder %v3612_v46, 0.0  ;;  %v3644_v51 = vmul.f32 0.01, %v3612_v46  ;;  %3344 = vst.msk [vmem:[#allocation2 + $0x78] sm:$0xff] %vm546_vm8, %v3328_v12  ;;  %v3435_v21 = vadd.f32 %v3416_v5, %v3359_v34 }
 0x2e2   : > { %v3466_v4 = vld [vmem:[#allocation2 + $0x68] sm:$0xff] }
 0x2e3   : > { %v3660_v47 = vsel %vm3628_vm6, %v3612_v46, %v3644_v51  ;;  %3451 = vst.msk [vmem:[#allocation2 + $0x70] sm:$0xff] %vm546_vm8, %v3435_v21  ;;  %v3542_v44 = vadd.f32 %v3521_v53, %v3466_v4 }
 0x2e4   : > { %v3676_v6 = vpack.c.bf16 %v3660_v47, %v3660_v47  ;;  %v3573_v61 = vld [vmem:[#allocation2 + $0x60] sm:$0xff] }
 0x2e5   : > { %v3593_v18 = vmul.f32 %v5987_v37, %v3573_v61  ;;  %3558 = vst.msk [vmem:[#allocation2 + $0x68] sm:$0xff] %vm546_vm8, %v3542_v44 }
 0x2e6   : > { %3693 = vst.msk [vmem:[%s6010_s14 + $0x2c] sm:$0xf] %vm3681_vm11, %v3676_v6 }
 0x2e7   : > { %v3613_v20 = vadd.f32 %v5994_v50, %v3593_v18 }
 0x2e8   : > { %v3360_v55 = vld [vmem:[#allocation2 + $0x78] sm:$0xff] }
 0x2e9   : > { %vm3629_vm7 = vcmp.ge.f32.partialorder %v3613_v20, 0.0  ;;  %v3645_v2 = vmul.f32 0.01, %v3613_v20  ;;  %v3436_v13 = vadd.f32 %v3418_v10, %v3360_v55 }
 0x2ea   : > { %v3467_v54 = vld [vmem:[#allocation2 + $0x70] sm:$0xff] }
 0x2eb   : > { %v3661_v14 = vsel %vm3629_vm7, %v3613_v20, %v3645_v2  ;;  %3452 = vst.msk [vmem:[#allocation2 + $0x78] sm:$0xff] %vm546_vm8, %v3436_v13  ;;  %v3543_v0 = vadd.f32 %v3524_v19, %v3467_v54 }
 0x2ec   : > { %v3677_v22 = vpack.c.bf16 %v3661_v14, %v3661_v14  ;;  %v3574_v39 = vld [vmem:[#allocation2 + $0x68] sm:$0xff] }
 0x2ed   : > { %v3594_v25 = vmul.f32 %v5987_v37, %v3574_v39  ;;  %3559 = vst.msk [vmem:[#allocation2 + $0x70] sm:$0xff] %vm546_vm8, %v3543_v0 }
 0x2ee   : > { %3694 = vst.msk [vmem:[%s6010_s14 + $0x30] sm:$0xf] %vm3681_vm11, %v3677_v22 }
 0x2ef   : > { %v3614_v36 = vadd.f32 %v5994_v50, %v3594_v25 }
 0x2f1   : > { %vm3630_vm9 = vcmp.ge.f32.partialorder %v3614_v36, 0.0  ;;  %v3646_v1 = vmul.f32 0.01, %v3614_v36 }
 0x2f2   : > { %v3468_v31 = vld [vmem:[#allocation2 + $0x78] sm:$0xff] }
 0x2f3   : > { %v3662_v16 = vsel %vm3630_vm9, %v3614_v36, %v3646_v1  ;;  %v3544_v33 = vadd.f32 %v3526_v7, %v3468_v31 }
 0x2f4   : > { %v3678_v60 = vpack.c.bf16 %v3662_v16, %v3662_v16  ;;  %v3575_v27 = vld [vmem:[#allocation2 + $0x70] sm:$0xff] }
 0x2f5   : > { %v3595_v32 = vmul.f32 %v5987_v37, %v3575_v27  ;;  %3560 = vst.msk [vmem:[#allocation2 + $0x78] sm:$0xff] %vm546_vm8, %v3544_v33 }
 0x2f6   : > { %3695 = vst.msk [vmem:[%s6010_s14 + $0x34] sm:$0xf] %vm3681_vm11, %v3678_v60 }
 0x2f7   : > { %v3615_v59 = vadd.f32 %v5994_v50, %v3595_v32 }
 0x2f9   : > { %vm3631_vm10 = vcmp.ge.f32.partialorder %v3615_v59, 0.0  ;;  %v3647_v30 = vmul.f32 0.01, %v3615_v59 }
 0x2fb   : > { %v3663_v49 = vsel %vm3631_vm10, %v3615_v59, %v3647_v30 }
 0x2fc   : > { %v3679_v11 = vpack.c.bf16 %v3663_v49, %v3663_v49  ;;  %v3576_v29 = vld [vmem:[#allocation2 + $0x78] sm:$0xff] }
 0x2fd   : > { %v3596_v52 = vmul.f32 %v5987_v37, %v3576_v29 }
 0x2fe   : > { %3696 = vst.msk [vmem:[%s6010_s14 + $0x38] sm:$0xf] %vm3681_vm11, %v3679_v11 }
 0x2ff   : > { %v3616_v63 = vadd.f32 %v5994_v50, %v3596_v52 }
 0x301   : > { %vm3632_vm12 = vcmp.ge.f32.partialorder %v3616_v63, 0.0  ;;  %v3648_v57 = vmul.f32 0.01, %v3616_v63 }
 0x303   : > { %v3664_v38 = vsel %vm3632_vm12, %v3616_v63, %v3648_v57 }
 0x304   : > { %v3680_v43 = vpack.c.bf16 %v3664_v38, %v3664_v38 }
 0x306   : > { %3697 = vst.msk [vmem:[%s6010_s14 + $0x3c] sm:$0xf] %vm3681_vm11, %v3680_v43 }
 0x307 PF: > { %s18_s9 = sadd.s32 1, %s4324_s9   ;;  %s6155_s27 = smov %s4316_s29 }
 0x308   : > { %p15_p9 = scmp.ge.s32.totalorder %s18_s9, 6   ;;  %s6156_s28 = smov %s4320_s30 }
 0x309   : > { %s6157_s29 = smov %s6160_s10  ;;  %s6158_s30 = smov %s6164_s11 }
 0x30a   :  { %17 = sbr.rel (!%p15_p9) target bundleno = 3 (0x3), region = 107 }

</bundles_post_ra>
